<compile_context>
chip_gen: v5e
topology: v5e:2x2
jax: 0.10.0
libtpu: 0.0.40
codegen_flags: <defaults>
</compile_context>

<pallas_src>
import numpy as np
import jax
import jax.numpy as jnp
from jax.experimental import pallas as pl
from jax.experimental.pallas import tpu as pltpu

# ---- module hyper-params (nfft / win are hard-coded in the torch module) ----
SAMPLING_RATE = 16000
HOP = 256
N_MELS = 32                    # `input_size` in the torch module
NFFT = 2048
WIN = 512
N_FREQ = NFFT // 2 + 1         # 1025 onesided bins (torch / reference)
N_FREQ_K = NFFT // 2           # 1024 bins kept by the kernel (Nyquist mel weight ~ 0)
WIN_OFF = (NFFT - WIN) // 2    # 768: torch.stft zero-pads the window to nfft, centered

FREQ_CHUNKS = 4                # kernel inner loop over frequency chunks
FCHUNK = N_FREQ_K // FREQ_CHUNKS        # 256 frequencies per chunk
CHUNK_COLS = 2 * FCHUNK                 # 512 basis cols per chunk: [cos_c | -sin_c]


# ---------------- deterministic parameter construction ----------------
# TODO(synk): the torch module uses librosa.filters.mel (Slaney scale + norm).
# librosa is not available in this sandbox, so a deterministic HTK-style
# triangular filterbank is built as a stand-in; pass the real librosa matrix as
# `mel_fb` for exact parity with the torch buffer (kernel is agnostic to it).
def _hz_to_mel(f):
    return 2595.0 * np.log10(1.0 + np.asarray(f, dtype=np.float64) / 700.0)


def _mel_to_hz(m):
    return 700.0 * (10.0 ** (np.asarray(m, dtype=np.float64) / 2595.0) - 1.0)


def mel_filterbank(sr, nfft, n_mels, fmin=80.0, fmax=None):
    """Deterministic triangular (HTK-scale) mel filterbank, shape (n_mels, nfft//2+1)."""
    if fmax is None:
        fmax = sr / 2.0
    mel_pts = np.linspace(_hz_to_mel(fmin), _hz_to_mel(fmax), n_mels + 2)
    hz_pts = _mel_to_hz(mel_pts)
    hz_pts[-1] = float(fmax)               # snap endpoint so the Nyquist weight is exactly 0
    fft_freqs = np.linspace(0.0, sr / 2.0, nfft // 2 + 1)
    fb = np.zeros((n_mels, nfft // 2 + 1), dtype=np.float32)
    for i in range(n_mels):
        lo, ctr, hi = hz_pts[i], hz_pts[i + 1], hz_pts[i + 2]
        up = (fft_freqs - lo) / max(ctr - lo, 1e-8)
        down = (hi - fft_freqs) / max(hi - ctr, 1e-8)
        fb[i] = np.maximum(0.0, np.minimum(up, down)).astype(np.float32)
    return fb


def dft_basis_chunked(n_chunks=FREQ_CHUNKS):
    """DFT basis restricted to the 512 window samples, Nyquist bin dropped,
    columns grouped per frequency chunk: chunk c occupies columns
    [c*2*Fc, (c+1)*2*Fc) = [cos(freqs_c) | -sin(freqs_c)].  Shape (WIN, 2*N_FREQ_K).
    X[k] = sum_n x[n+768] * exp(-2*pi*i*k*(n+768)/2048)."""
    pos = np.arange(WIN, dtype=np.float64) + WIN_OFF
    fc = N_FREQ_K // n_chunks
    cols = []
    for c in range(n_chunks):
        k = np.arange(c * fc, (c + 1) * fc, dtype=np.float64)
        ang = 2.0 * np.pi * np.outer(pos, k) / NFFT       # (WIN, fc)
        cols.append(np.cos(ang))
        cols.append(-np.sin(ang))
    return np.concatenate(cols, axis=1).astype(np.float32)


# ----------------------------- Pallas kernel -----------------------------
def mel_encoder_kernel(frames_ref, basis_ref, melT_ref, out_ref):
    # frames: (TR, 512) bf16
    # basis : (512, 2048) bf16, chunk c = cols [c*512,(c+1)*512) = [cos_c | -sin_c]
    # melT  : (1024, 32) bf16, natural frequency order, 2/512 scale folded in
    frames = frames_ref[...]
    acc = jnp.zeros((frames.shape[0], N_MELS), dtype=jnp.float32)
    # Statically-unrolled frequency-chunk loop: each iteration is one
    # (TR,512)@(512,512) MXU pass, a VPU/EUP magnitude epilogue on a 4x-smaller
    # intermediate, and a small (TR,256)@(256,32) mel accumulation.  This avoids
    # materializing a (TR,2048) f32 intermediate in VMEM and lets chunk c+1's
    # MXU work overlap chunk c's epilogue.
    for c in range(FREQ_CHUNKS):
        col0 = c * CHUNK_COLS
        reim = jnp.dot(frames, basis_ref[:, col0:col0 + CHUNK_COLS],
                       preferred_element_type=jnp.float32)          # (TR, 512) f32
        re = reim[:, :FCHUNK]                                        # 128-aligned slices
        im = reim[:, FCHUNK:]
        mag = jnp.sqrt(re * re + im * im)                            # (TR, 256) f32
        row0 = c * FCHUNK
        acc = acc + jnp.dot(mag.astype(jnp.bfloat16),
                            melT_ref[row0:row0 + FCHUNK, :],
                            preferred_element_type=jnp.float32)      # (TR, 32) f32
    acc = jnp.maximum(acc, 1e-5)                                     # clamp(min=1e-5)
    out_ref[...] = jnp.log10(acc) * 0.2 + 1.0                        # == (log10(.)+5)/5


# ----------------------------- glue -----------------------------
def _round_up(x, m):
    return ((x + m - 1) // m) * m


def _pick_tile_rows(n_rows):
    """Adaptive row tile.  Small inputs: one right-sized tile (multiple of 8 for
    the sublane constraint) so a 16-row utterance is not padded to 256 rows of
    zero MXU work.  Large inputs: 256/512-row tiles (MXU-aligned, >=2 'parallel'
    grid steps so both v7x TensorCores are used; 512 amortizes the ~0.35us
    per-step pipeline overhead for long audio)."""
    if n_rows <= 256:
        return _round_up(n_rows, 8)
    if n_rows <= 2048:
        return 256
    return 512


def _frame_signal(x_pad, n_frames):
    """(B, Tpad) -> (B*n_frames, WIN) via strided HOP-chunk views + concat
    (avoids an expensive overlapping-window gather HLO)."""
    B = x_pad.shape[0]
    if WIN % HOP == 0:
        k = WIN // HOP
        chunks = x_pad[:, WIN_OFF:WIN_OFF + (n_frames + k - 1) * HOP]
        chunks = chunks.reshape(B, n_frames + k - 1, HOP)
        frames = jnp.concatenate([chunks[:, j:j + n_frames] for j in range(k)], axis=-1)
    else:  # fallback: generic gather
        starts = np.arange(n_frames) * HOP + WIN_OFF
        idx = starts[:, None] + np.arange(WIN)[None, :]
        frames = x_pad[:, idx]
    return frames.reshape(B * n_frames, WIN)


def _build_pallas_call(tile_rows, r_pad, single_buffer_consts):
    # Constant operands (same block every step) stay resident in VMEM; with
    # pl.Buffered(1) they are single-buffered (saves ~2.3 MiB vs the default
    # double buffer).
    const_kw = {"pipeline_mode": pl.Buffered(1)} if single_buffer_consts else {}
    return pl.pallas_call(
        mel_encoder_kernel,
        out_shape=jax.ShapeDtypeStruct((r_pad, N_MELS), jnp.float32),
        grid_spec=pltpu.PrefetchScalarGridSpec(
            num_scalar_prefetch=0,
            grid=(r_pad // tile_rows,),
            in_specs=[
                pl.BlockSpec((tile_rows, WIN), lambda i: (i, 0)),
                pl.BlockSpec((WIN, 2 * N_FREQ_K), lambda i: (0, 0), **const_kw),
                pl.BlockSpec((N_FREQ_K, N_MELS), lambda i: (0, 0), **const_kw),
            ],
            out_specs=pl.BlockSpec((tile_rows, N_MELS), lambda i: (i, 0)),
        ),
        compiler_params=pltpu.CompilerParams(
            # Independent row tiles -> megacore / v7x two-TC sharding when grid >= 2.
            dimension_semantics=("parallel",),
            # ~8 MiB working set; 32 MiB is safe on every generation, incl. v7x (64 MiB).
            vmem_limit_bytes=32 << 20,
        ),
    )


def mel_encoder(x, mel_fb, basis):
    """x: (B, T) or (B, 1, T) float32. mel_fb: (n_mels, 1025). basis: (512, 2048)
    chunk-ordered (dft_basis_chunked). Returns (B, n_mels, n_frames)."""
    if x.ndim == 3:
        x = jnp.squeeze(x, axis=1)
    B, T = x.shape
    # right pad by nfft - hop (config.USE_CACHED_PADDING == False path)
    x_pad = jnp.pad(x, ((0, 0), (0, NFFT - HOP)))
    n_frames = 1 + (x_pad.shape[-1] - NFFT) // HOP

    frames = _frame_signal(x_pad, n_frames).astype(jnp.bfloat16)    # (R, 512) bf16
    R = B * n_frames
    tile_rows = _pick_tile_rows(R)
    r_pad = _round_up(R, tile_rows)
    if r_pad != R:
        frames = jnp.pad(frames, ((0, r_pad - R), (0, 0)))

    # The kernel drops frequency bins >= N_FREQ_K (just the Nyquist bin here);
    # guard that this never silently drops real mel energy.
    mel_np = np.asarray(mel_fb, dtype=np.float32)
    assert mel_np.shape == (N_MELS, N_FREQ), "unexpected mel filterbank shape"
    assert float(np.abs(mel_np[:, N_FREQ_K:]).max()) <= 1e-6, (
        "mel filterbank has non-negligible weight on the dropped Nyquist bin")

    # Fold the 2/512 magnitude scale into the mel weights; drop the Nyquist column.
    melT = jnp.asarray((mel_np[:, :N_FREQ_K] * (2.0 / 512.0)).T, dtype=jnp.bfloat16)
    basis_bf16 = jnp.asarray(basis, dtype=jnp.bfloat16)              # (512, 2048)

    try:
        out = _build_pallas_call(tile_rows, r_pad, True)(frames, basis_bf16, melT)
    except Exception:
        # pipeline_mode=pl.Buffered(1) is a VMEM-only optimization; fall back to
        # default double-buffering if this jax/Mosaic version rejects it.
        out = _build_pallas_call(tile_rows, r_pad, False)(frames, basis_bf16, melT)

    # (r_pad, n_mels) -> drop row padding -> (B, n_mels, n_frames)  (torch layout)
    return out[:R].reshape(B, n_frames, N_MELS).transpose(0, 2, 1)


# ----------------------------- pure-JAX reference -----------------------------
def mel_encoder_ref(x, mel_fb):
    if x.ndim == 3:
        x = jnp.squeeze(x, axis=1)
    B, T = x.shape
    x_pad = jnp.pad(x, ((0, 0), (0, NFFT - HOP)))
    n_frames = 1 + (x_pad.shape[-1] - NFFT) // HOP
    idx = np.arange(n_frames)[:, None] * HOP + np.arange(NFFT)[None, :]
    frames = x_pad[:, idx]                                           # (B, n_frames, 2048)
    window = np.zeros(NFFT, np.float32)
    window[WIN_OFF:WIN_OFF + WIN] = 1.0
    spec = jnp.fft.rfft(frames * window, axis=-1)                    # (B, n_frames, 1025)
    mag = 2.0 * jnp.abs(spec) / 512.0
    smel = jnp.einsum("mf,btf->bmt", jnp.asarray(mel_fb), mag)       # (B, n_mels, n_frames)
    return (jnp.log10(jnp.clip(smel, 1e-5)) + 5.0) / 5.0


if __name__ == "__main__":
    key = jax.random.PRNGKey(0)
    B, T = 2, 2048                                                   # -> 8 frames per item
    x = jax.random.normal(key, (B, 1, T), dtype=jnp.float32)         # (B, C=1, T) like torch

    mel_fb = mel_filterbank(SAMPLING_RATE, NFFT, N_MELS, fmin=80.0)
    basis = dft_basis_chunked()

    out = jax.block_until_ready(mel_encoder(x, mel_fb, basis))
    ref = jax.block_until_ready(mel_encoder_ref(x, mel_fb))

    assert out.shape == ref.shape == (B, N_MELS, T // HOP)
    # bf16 operands with f32 MXU accumulation + log compression: ~1e-3-level agreement.
    np.testing.assert_allclose(np.asarray(out), np.asarray(ref), rtol=5e-3, atol=5e-3)

    print("KERNEL_OK")
</pallas_src>

<mosaic_0001>
module attributes {stable_mosaic.version = 11 : i64} {
  func.func @mel_encoder_kernel(%arg0: i32, %arg1: memref<16x512xbf16, #tpu.memory_space<vmem>>, %arg2: memref<512x2048xbf16, #tpu.memory_space<vmem>>, %arg3: memref<1024x32xbf16, #tpu.memory_space<vmem>>, %arg4: memref<16x32xf32, #tpu.memory_space<vmem>>) attributes {dimension_semantics = [#tpu.dimension_semantics<parallel>], iteration_bounds = array<i64: 1>, scalar_prefetch = 0 : i64, scratch_operands = 0 : i64, tpu.core_type = #tpu.core_type<tc>, window_params = [{transform_indices = @transform_0, window_bounds = array<i64: 16, 512>}, {pipeline_mode = #tpu.pipeline_mode<synchronous>, transform_indices = @transform_1, window_bounds = array<i64: 512, 2048>}, {pipeline_mode = #tpu.pipeline_mode<synchronous>, transform_indices = @transform_2, window_bounds = array<i64: 1024, 32>}, {transform_indices = @transform_3, window_bounds = array<i64: 16, 32>}]} {
    %c0 = arith.constant 0 : index
    %c0_0 = arith.constant 0 : index
    %0 = vector.load %arg1[%c0, %c0_0] : memref<16x512xbf16, #tpu.memory_space<vmem>>, vector<16x512xbf16>
    %cst = arith.constant 0.000000e+00 : f32
    %1 = vector.broadcast %cst : f32 to vector<16x32xf32>
    %c0_1 = arith.constant 0 : index
    %c0_2 = arith.constant 0 : index
    %2 = vector.load %arg2[%c0_1, %c0_2] : memref<512x2048xbf16, #tpu.memory_space<vmem>>, vector<512x512xbf16>
    %cst_3 = arith.constant dense<0.000000e+00> : vector<16x512xf32>
    %3 = tpu.matmul %0, %2, %cst_3 {dimension_numbers = #tpu.dot_dimension_numbers<[1], [0], [0], [1], [0, 0, 1, 1], [], []>} : vector<16x512xbf16>, vector<512x512xbf16>, vector<16x512xf32> -> vector<16x512xf32>
    %4 = vector.extract_strided_slice %3 {offsets = [0, 0], sizes = [16, 256], strides = [1, 1]} : vector<16x512xf32> to vector<16x256xf32>
    %5 = vector.extract_strided_slice %3 {offsets = [0, 256], sizes = [16, 256], strides = [1, 1]} : vector<16x512xf32> to vector<16x256xf32>
    %6 = arith.mulf %4, %4 : vector<16x256xf32>
    %7 = arith.mulf %5, %5 : vector<16x256xf32>
    %8 = arith.addf %6, %7 : vector<16x256xf32>
    %9 = math.sqrt %8 : vector<16x256xf32>
    %10 = arith.truncf %9 : vector<16x256xf32> to vector<16x256xbf16>
    %c0_4 = arith.constant 0 : index
    %c0_5 = arith.constant 0 : index
    %11 = vector.load %arg3[%c0_4, %c0_5] : memref<1024x32xbf16, #tpu.memory_space<vmem>>, vector<256x32xbf16>
    %cst_6 = arith.constant dense<0.000000e+00> : vector<16x32xf32>
    %12 = tpu.matmul %10, %11, %cst_6 {dimension_numbers = #tpu.dot_dimension_numbers<[1], [0], [0], [1], [0, 0, 1, 1], [], []>} : vector<16x256xbf16>, vector<256x32xbf16>, vector<16x32xf32> -> vector<16x32xf32>
    %13 = arith.addf %1, %12 : vector<16x32xf32>
    %c0_7 = arith.constant 0 : index
    %c512 = arith.constant 512 : index
    %14 = vector.load %arg2[%c0_7, %c512] : memref<512x2048xbf16, #tpu.memory_space<vmem>>, vector<512x512xbf16>
    %cst_8 = arith.constant dense<0.000000e+00> : vector<16x512xf32>
    %15 = tpu.matmul %0, %14, %cst_8 {dimension_numbers = #tpu.dot_dimension_numbers<[1], [0], [0], [1], [0, 0, 1, 1], [], []>} : vector<16x512xbf16>, vector<512x512xbf16>, vector<16x512xf32> -> vector<16x512xf32>
    %16 = vector.extract_strided_slice %15 {offsets = [0, 0], sizes = [16, 256], strides = [1, 1]} : vector<16x512xf32> to vector<16x256xf32>
    %17 = vector.extract_strided_slice %15 {offsets = [0, 256], sizes = [16, 256], strides = [1, 1]} : vector<16x512xf32> to vector<16x256xf32>
    %18 = arith.mulf %16, %16 : vector<16x256xf32>
    %19 = arith.mulf %17, %17 : vector<16x256xf32>
    %20 = arith.addf %18, %19 : vector<16x256xf32>
    %21 = math.sqrt %20 : vector<16x256xf32>
    %22 = arith.truncf %21 : vector<16x256xf32> to vector<16x256xbf16>
    %c256 = arith.constant 256 : index
    %c0_9 = arith.constant 0 : index
    %23 = vector.load %arg3[%c256, %c0_9] : memref<1024x32xbf16, #tpu.memory_space<vmem>>, vector<256x32xbf16>
    %cst_10 = arith.constant dense<0.000000e+00> : vector<16x32xf32>
    %24 = tpu.matmul %22, %23, %cst_10 {dimension_numbers = #tpu.dot_dimension_numbers<[1], [0], [0], [1], [0, 0, 1, 1], [], []>} : vector<16x256xbf16>, vector<256x32xbf16>, vector<16x32xf32> -> vector<16x32xf32>
    %25 = arith.addf %13, %24 : vector<16x32xf32>
    %c0_11 = arith.constant 0 : index
    %c1024 = arith.constant 1024 : index
    %26 = vector.load %arg2[%c0_11, %c1024] : memref<512x2048xbf16, #tpu.memory_space<vmem>>, vector<512x512xbf16>
    %cst_12 = arith.constant dense<0.000000e+00> : vector<16x512xf32>
    %27 = tpu.matmul %0, %26, %cst_12 {dimension_numbers = #tpu.dot_dimension_numbers<[1], [0], [0], [1], [0, 0, 1, 1], [], []>} : vector<16x512xbf16>, vector<512x512xbf16>, vector<16x512xf32> -> vector<16x512xf32>
    %28 = vector.extract_strided_slice %27 {offsets = [0, 0], sizes = [16, 256], strides = [1, 1]} : vector<16x512xf32> to vector<16x256xf32>
    %29 = vector.extract_strided_slice %27 {offsets = [0, 256], sizes = [16, 256], strides = [1, 1]} : vector<16x512xf32> to vector<16x256xf32>
    %30 = arith.mulf %28, %28 : vector<16x256xf32>
    %31 = arith.mulf %29, %29 : vector<16x256xf32>
    %32 = arith.addf %30, %31 : vector<16x256xf32>
    %33 = math.sqrt %32 : vector<16x256xf32>
    %34 = arith.truncf %33 : vector<16x256xf32> to vector<16x256xbf16>
    %c512_13 = arith.constant 512 : index
    %c0_14 = arith.constant 0 : index
    %35 = vector.load %arg3[%c512_13, %c0_14] : memref<1024x32xbf16, #tpu.memory_space<vmem>>, vector<256x32xbf16>
    %cst_15 = arith.constant dense<0.000000e+00> : vector<16x32xf32>
    %36 = tpu.matmul %34, %35, %cst_15 {dimension_numbers = #tpu.dot_dimension_numbers<[1], [0], [0], [1], [0, 0, 1, 1], [], []>} : vector<16x256xbf16>, vector<256x32xbf16>, vector<16x32xf32> -> vector<16x32xf32>
    %37 = arith.addf %25, %36 : vector<16x32xf32>
    %c0_16 = arith.constant 0 : index
    %c1536 = arith.constant 1536 : index
    %38 = vector.load %arg2[%c0_16, %c1536] : memref<512x2048xbf16, #tpu.memory_space<vmem>>, vector<512x512xbf16>
    %cst_17 = arith.constant dense<0.000000e+00> : vector<16x512xf32>
    %39 = tpu.matmul %0, %38, %cst_17 {dimension_numbers = #tpu.dot_dimension_numbers<[1], [0], [0], [1], [0, 0, 1, 1], [], []>} : vector<16x512xbf16>, vector<512x512xbf16>, vector<16x512xf32> -> vector<16x512xf32>
    %40 = vector.extract_strided_slice %39 {offsets = [0, 0], sizes = [16, 256], strides = [1, 1]} : vector<16x512xf32> to vector<16x256xf32>
    %41 = vector.extract_strided_slice %39 {offsets = [0, 256], sizes = [16, 256], strides = [1, 1]} : vector<16x512xf32> to vector<16x256xf32>
    %42 = arith.mulf %40, %40 : vector<16x256xf32>
    %43 = arith.mulf %41, %41 : vector<16x256xf32>
    %44 = arith.addf %42, %43 : vector<16x256xf32>
    %45 = math.sqrt %44 : vector<16x256xf32>
    %46 = arith.truncf %45 : vector<16x256xf32> to vector<16x256xbf16>
    %c768 = arith.constant 768 : index
    %c0_18 = arith.constant 0 : index
    %47 = vector.load %arg3[%c768, %c0_18] : memref<1024x32xbf16, #tpu.memory_space<vmem>>, vector<256x32xbf16>
    %cst_19 = arith.constant dense<0.000000e+00> : vector<16x32xf32>
    %48 = tpu.matmul %46, %47, %cst_19 {dimension_numbers = #tpu.dot_dimension_numbers<[1], [0], [0], [1], [0, 0, 1, 1], [], []>} : vector<16x256xbf16>, vector<256x32xbf16>, vector<16x32xf32> -> vector<16x32xf32>
    %49 = arith.addf %37, %48 : vector<16x32xf32>
    %cst_20 = arith.constant 9.99999974E-6 : f32
    %50 = vector.broadcast %cst_20 : f32 to vector<16x32xf32>
    %51 = arith.maximumf %49, %50 : vector<16x32xf32>
    %52 = math.log %51 : vector<16x32xf32>
    %cst_21 = arith.constant 0.434294492 : f32
    %53 = vector.broadcast %cst_21 : f32 to vector<16x32xf32>
    %54 = arith.mulf %52, %53 : vector<16x32xf32>
    %cst_22 = arith.constant 2.000000e-01 : f32
    %55 = vector.broadcast %cst_22 : f32 to vector<16x32xf32>
    %56 = arith.mulf %54, %55 : vector<16x32xf32>
    %cst_23 = arith.constant 1.000000e+00 : f32
    %57 = vector.broadcast %cst_23 : f32 to vector<16x32xf32>
    %58 = arith.addf %56, %57 : vector<16x32xf32>
    %c0_24 = arith.constant 0 : index
    %c0_25 = arith.constant 0 : index
    %59 = vector.load %arg4[%c0_24, %c0_25] : memref<16x32xf32, #tpu.memory_space<vmem>>, vector<16x32xf32>
    tpu.vector_store %arg4[%c0_24, %c0_25], %58 {strides = array<i32>} : memref<16x32xf32, #tpu.memory_space<vmem>>, vector<16x32xf32>,
    return
  }
  func.func @transform_0(%arg0: i32) -> (i32, i32) {
    %c0_i32 = arith.constant 0 : i32
    %c0_i32_0 = arith.constant 0 : i32
    return %arg0, %c0_i32 : i32, i32
  }
  func.func @transform_1(%arg0: i32) -> (i32, i32) {
    %c0_i32 = arith.constant 0 : i32
    %c0_i32_0 = arith.constant 0 : i32
    %c0_i32_1 = arith.constant 0 : i32
    return %c0_i32, %c0_i32_0 : i32, i32
  }
  func.func @transform_2(%arg0: i32) -> (i32, i32) {
    %c0_i32 = arith.constant 0 : i32
    %c0_i32_0 = arith.constant 0 : i32
    %c0_i32_1 = arith.constant 0 : i32
    return %c0_i32, %c0_i32_0 : i32, i32
  }
  func.func @transform_3(%arg0: i32) -> (i32, i32) {
    %c0_i32 = arith.constant 0 : i32
    %c0_i32_0 = arith.constant 0 : i32
    return %arg0, %c0_i32 : i32, i32
  }
}

module attributes {stable_mosaic.version = 11 : i64} {
  func.func @mel_encoder_kernel(%arg0: i32, %arg1: memref<16x512xbf16, #tpu.memory_space<vmem>>, %arg2: memref<512x2048xbf16, #tpu.memory_space<vmem>>, %arg3: memref<1024x32xbf16, #tpu.memory_space<vmem>>, %arg4: memref<16x32xf32, #tpu.memory_space<vmem>>) attributes {dimension_semantics = [#tpu.dimension_semantics<parallel>], iteration_bounds = array<i64: 1>, scalar_prefetch = 0 : i64, scratch_operands = 0 : i64, tpu.core_type = #tpu.core_type<tc>, window_params = [{transform_indices = @transform_0, window_bounds = array<i64: 16, 512>}, {pipeline_mode = #tpu.pipeline_mode<synchronous>, transform_indices = @transform_1, window_bounds = array<i64: 512, 2048>}, {pipeline_mode = #tpu.pipeline_mode<synchronous>, transform_indices = @transform_2, window_bounds = array<i64: 1024, 32>}, {transform_indices = @transform_3, window_bounds = array<i64: 16, 32>}]} {
    %c0 = arith.constant 0 : index
    %c0_0 = arith.constant 0 : index
    %0 = vector.load %arg1[%c0, %c0_0] : memref<16x512xbf16, #tpu.memory_space<vmem>>, vector<16x512xbf16>
    %cst = arith.constant 0.000000e+00 : f32
    %1 = vector.broadcast %cst : f32 to vector<16x32xf32>
    %c0_1 = arith.constant 0 : index
    %c0_2 = arith.constant 0 : index
    %2 = vector.load %arg2[%c0_1, %c0_2] : memref<512x2048xbf16, #tpu.memory_space<vmem>>, vector<512x512xbf16>
    %cst_3 = arith.constant dense<0.000000e+00> : vector<16x512xf32>
    %3 = tpu.matmul %0, %2, %cst_3 {dimension_numbers = #tpu.dot_dimension_numbers<[1], [0], [0], [1], [0, 0, 1, 1], [], []>} : vector<16x512xbf16>, vector<512x512xbf16>, vector<16x512xf32> -> vector<16x512xf32>
    %4 = vector.extract_strided_slice %3 {offsets = [0, 0], sizes = [16, 256], strides = [1, 1]} : vector<16x512xf32> to vector<16x256xf32>
    %5 = vector.extract_strided_slice %3 {offsets = [0, 256], sizes = [16, 256], strides = [1, 1]} : vector<16x512xf32> to vector<16x256xf32>
    %6 = arith.mulf %4, %4 : vector<16x256xf32>
    %7 = arith.mulf %5, %5 : vector<16x256xf32>
    %8 = arith.addf %6, %7 : vector<16x256xf32>
    %9 = math.sqrt %8 : vector<16x256xf32>
    %10 = arith.truncf %9 : vector<16x256xf32> to vector<16x256xbf16>
    %c0_4 = arith.constant 0 : index
    %c0_5 = arith.constant 0 : index
    %11 = vector.load %arg3[%c0_4, %c0_5] : memref<1024x32xbf16, #tpu.memory_space<vmem>>, vector<256x32xbf16>
    %cst_6 = arith.constant dense<0.000000e+00> : vector<16x32xf32>
    %12 = tpu.matmul %10, %11, %cst_6 {dimension_numbers = #tpu.dot_dimension_numbers<[1], [0], [0], [1], [0, 0, 1, 1], [], []>} : vector<16x256xbf16>, vector<256x32xbf16>, vector<16x32xf32> -> vector<16x32xf32>
    %13 = arith.addf %1, %12 : vector<16x32xf32>
    %c0_7 = arith.constant 0 : index
    %c512 = arith.constant 512 : index
    %14 = vector.load %arg2[%c0_7, %c512] : memref<512x2048xbf16, #tpu.memory_space<vmem>>, vector<512x512xbf16>
    %cst_8 = arith.constant dense<0.000000e+00> : vector<16x512xf32>
    %15 = tpu.matmul %0, %14, %cst_8 {dimension_numbers = #tpu.dot_dimension_numbers<[1], [0], [0], [1], [0, 0, 1, 1], [], []>} : vector<16x512xbf16>, vector<512x512xbf16>, vector<16x512xf32> -> vector<16x512xf32>
    %16 = vector.extract_strided_slice %15 {offsets = [0, 0], sizes = [16, 256], strides = [1, 1]} : vector<16x512xf32> to vector<16x256xf32>
    %17 = vector.extract_strided_slice %15 {offsets = [0, 256], sizes = [16, 256], strides = [1, 1]} : vector<16x512xf32> to vector<16x256xf32>
    %18 = arith.mulf %16, %16 : vector<16x256xf32>
    %19 = arith.mulf %17, %17 : vector<16x256xf32>
    %20 = arith.addf %18, %19 : vector<16x256xf32>
    %21 = math.sqrt %20 : vector<16x256xf32>
    %22 = arith.truncf %21 : vector<16x256xf32> to vector<16x256xbf16>
    %c256 = arith.constant 256 : index
    %c0_9 = arith.constant 0 : index
    %23 = vector.load %arg3[%c256, %c0_9] : memref<1024x32xbf16, #tpu.memory_space<vmem>>, vector<256x32xbf16>
    %cst_10 = arith.constant dense<0.000000e+00> : vector<16x32xf32>
    %24 = tpu.matmul %22, %23, %cst_10 {dimension_numbers = #tpu.dot_dimension_numbers<[1], [0], [0], [1], [0, 0, 1, 1], [], []>} : vector<16x256xbf16>, vector<256x32xbf16>, vector<16x32xf32> -> vector<16x32xf32>
    %25 = arith.addf %13, %24 : vector<16x32xf32>
    %c0_11 = arith.constant 0 : index
    %c1024 = arith.constant 1024 : index
    %26 = vector.load %arg2[%c0_11, %c1024] : memref<512x2048xbf16, #tpu.memory_space<vmem>>, vector<512x512xbf16>
    %cst_12 = arith.constant dense<0.000000e+00> : vector<16x512xf32>
    %27 = tpu.matmul %0, %26, %cst_12 {dimension_numbers = #tpu.dot_dimension_numbers<[1], [0], [0], [1], [0, 0, 1, 1], [], []>} : vector<16x512xbf16>, vector<512x512xbf16>, vector<16x512xf32> -> vector<16x512xf32>
    %28 = vector.extract_strided_slice %27 {offsets = [0, 0], sizes = [16, 256], strides = [1, 1]} : vector<16x512xf32> to vector<16x256xf32>
    %29 = vector.extract_strided_slice %27 {offsets = [0, 256], sizes = [16, 256], strides = [1, 1]} : vector<16x512xf32> to vector<16x256xf32>
    %30 = arith.mulf %28, %28 : vector<16x256xf32>
    %31 = arith.mulf %29, %29 : vector<16x256xf32>
    %32 = arith.addf %30, %31 : vector<16x256xf32>
    %33 = math.sqrt %32 : vector<16x256xf32>
    %34 = arith.truncf %33 : vector<16x256xf32> to vector<16x256xbf16>
    %c512_13 = arith.constant 512 : index
    %c0_14 = arith.constant 0 : index
    %35 = vector.load %arg3[%c512_13, %c0_14] : memref<1024x32xbf16, #tpu.memory_space<vmem>>, vector<256x32xbf16>
    %cst_15 = arith.constant dense<0.000000e+00> : vector<16x32xf32>
    %36 = tpu.matmul %34, %35, %cst_15 {dimension_numbers = #tpu.dot_dimension_numbers<[1], [0], [0], [1], [0, 0, 1, 1], [], []>} : vector<16x256xbf16>, vector<256x32xbf16>, vector<16x32xf32> -> vector<16x32xf32>
    %37 = arith.addf %25, %36 : vector<16x32xf32>
    %c0_16 = arith.constant 0 : index
    %c1536 = arith.constant 1536 : index
    %38 = vector.load %arg2[%c0_16, %c1536] : memref<512x2048xbf16, #tpu.memory_space<vmem>>, vector<512x512xbf16>
    %cst_17 = arith.constant dense<0.000000e+00> : vector<16x512xf32>
    %39 = tpu.matmul %0, %38, %cst_17 {dimension_numbers = #tpu.dot_dimension_numbers<[1], [0], [0], [1], [0, 0, 1, 1], [], []>} : vector<16x512xbf16>, vector<512x512xbf16>, vector<16x512xf32> -> vector<16x512xf32>
    %40 = vector.extract_strided_slice %39 {offsets = [0, 0], sizes = [16, 256], strides = [1, 1]} : vector<16x512xf32> to vector<16x256xf32>
    %41 = vector.extract_strided_slice %39 {offsets = [0, 256], sizes = [16, 256], strides = [1, 1]} : vector<16x512xf32> to vector<16x256xf32>
    %42 = arith.mulf %40, %40 : vector<16x256xf32>
    %43 = arith.mulf %41, %41 : vector<16x256xf32>
    %44 = arith.addf %42, %43 : vector<16x256xf32>
    %45 = math.sqrt %44 : vector<16x256xf32>
    %46 = arith.truncf %45 : vector<16x256xf32> to vector<16x256xbf16>
    %c768 = arith.constant 768 : index
    %c0_18 = arith.constant 0 : index
    %47 = vector.load %arg3[%c768, %c0_18] : memref<1024x32xbf16, #tpu.memory_space<vmem>>, vector<256x32xbf16>
    %cst_19 = arith.constant dense<0.000000e+00> : vector<16x32xf32>
    %48 = tpu.matmul %46, %47, %cst_19 {dimension_numbers = #tpu.dot_dimension_numbers<[1], [0], [0], [1], [0, 0, 1, 1], [], []>} : vector<16x256xbf16>, vector<256x32xbf16>, vector<16x32xf32> -> vector<16x32xf32>
    %49 = arith.addf %37, %48 : vector<16x32xf32>
    %cst_20 = arith.constant 9.99999974E-6 : f32
    %50 = vector.broadcast %cst_20 : f32 to vector<16x32xf32>
    %51 = arith.maximumf %49, %50 : vector<16x32xf32>
    %52 = math.log %51 : vector<16x32xf32>
    %cst_21 = arith.constant 0.434294492 : f32
    %53 = vector.broadcast %cst_21 : f32 to vector<16x32xf32>
    %54 = arith.mulf %52, %53 : vector<16x32xf32>
    %cst_22 = arith.constant 2.000000e-01 : f32
    %55 = vector.broadcast %cst_22 : f32 to vector<16x32xf32>
    %56 = arith.mulf %54, %55 : vector<16x32xf32>
    %cst_23 = arith.constant 1.000000e+00 : f32
    %57 = vector.broadcast %cst_23 : f32 to vector<16x32xf32>
    %58 = arith.addf %56, %57 : vector<16x32xf32>
    %c0_24 = arith.constant 0 : index
    %c0_25 = arith.constant 0 : index
    %59 = vector.load %arg4[%c0_24, %c0_25] : memref<16x32xf32, #tpu.memory_space<vmem>>, vector<16x32xf32>
    tpu.vector_store %arg4[%c0_24, %c0_25], %58 {strides = array<i32>} : memref<16x32xf32, #tpu.memory_space<vmem>>, vector<16x32xf32>,
    return
  }
  func.func @transform_0(%arg0: i32) -> (i32, i32) {
    %c0_i32 = arith.constant 0 : i32
    %c0_i32_0 = arith.constant 0 : i32
    return %arg0, %c0_i32 : i32, i32
  }
  func.func @transform_1(%arg0: i32) -> (i32, i32) {
    %c0_i32 = arith.constant 0 : i32
    %c0_i32_0 = arith.constant 0 : i32
    %c0_i32_1 = arith.constant 0 : i32
    return %c0_i32, %c0_i32_0 : i32, i32
  }
  func.func @transform_2(%arg0: i32) -> (i32, i32) {
    %c0_i32 = arith.constant 0 : i32
    %c0_i32_0 = arith.constant 0 : i32
    %c0_i32_1 = arith.constant 0 : i32
    return %c0_i32, %c0_i32_0 : i32, i32
  }
  func.func @transform_3(%arg0: i32) -> (i32, i32) {
    %c0_i32 = arith.constant 0 : i32
    %c0_i32_0 = arith.constant 0 : i32
    return %arg0, %c0_i32 : i32, i32
  }
}

</mosaic_0001>

<bundles_post_ra>
// kernel: tpu_custom_call.1
= control target key start
LH: loop header
LB: loop body
LE: loop exit
PB: predicated region body
PF: predicated region fallthrough
CT: control target
= control target key end

     0   :  { %8 = vsyncpa [#allocation3], 0  ;;  %s8539_s0 = inlined_call_operand.hbm [shape: bf16[16,512], index: 0, kind: input, shape index: {}]   ;;  %s8540_s1 = inlined_call_operand.hbm [shape: bf16[512,2048], index: 1, kind: input, shape index: {}]   ;;  %s8541_s2 = inlined_call_operand.vmem [shape: bf16[1024,32], index: 2, kind: input, shape index: {}]   ;;  %s8542_s3 = inlined_call_operand.hbm [shape: f32[16,32], index: 3, kind: output, shape index: {}]  }
   0x1   :  { %9 = vsyncpa [#allocation6], 0 }
   0x2   :  { %10 = vsyncpa [#allocation4], 0  ;;  %s15_s14 = sshll.u32 %s8539_s0, 4  ;;  %s7973_s15 = smov [#allocation2]   ;;  %s16_s14 = int_to_ptr.hbm [resolvable:$true] %s15_s14 }
   0x3   :  { %s17_s16 = sshll.u32 %s7973_s15, 4  ;;  %s28_s19 = sshll.u32 %s8540_s1, 4  ;;  %s18_s16 = int_to_ptr.vmem [resolvable:$true] %s17_s16  ;;  %s29_s19 = int_to_ptr.hbm [resolvable:$true] %s28_s19 }
   0x4   :  { %s7974_s20 = smov 256   ;;  %s7975_s21 = smov 16  }
   0x5   :  { %23 = dma.hbm_to_vmem [thread:$0]  %s16_s14, 512, %s18_s16, [#allocation3], %s7974_s20, %s7974_s20, %s7975_s21  }
   0x6   :  { %s7976_s22 = smov [#allocation5]   ;;  %s7977_s24 = smov 1024  }
   0x7   :  { %s30_s23 = sshll.u32 %s7976_s22, 4  ;;  %s7978_s25 = smov 64   ;;  %s31_s23 = int_to_ptr.vmem [resolvable:$true] %s30_s23 }
   0x8   :  { %36 = dma.hbm_to_vmem [thread:$0]  %s29_s19, 65536, %s31_s23, [#allocation6], %s7977_s24, %s7977_s24, %s7978_s25  }
   0x9   :  { %7967 = dma.done.wait [#allocation3], 512  }
   0xa   :  { %7968 = vsyncadd [#allocation3], 4294966784 }
   0xb   :  { %7969 = dma.done.wait [#allocation6], 65536  }
   0xc   :  { %7970 = vsyncadd [#allocation6], 4294901760  ;;  %v5080_v0 = vld [vmem:[#allocation5 + $0x380] sm:$0xf]  ;;  %s4936_s12 = sshll.u32 %s8542_s3, 4  ;;  %s7980_s13 = smov 128   ;;  %s4937_s12 = int_to_ptr.hbm [resolvable:$true] %s4936_s12 }
   0xd   :  { %v7304_v1 = vld [vmem:[#allocation5 + $0x3bc] sm:$0xf0]  ;;  %s7981_s14 = smov 8  }
   0xe   :  { %v5208_v2 = vld [vmem:[#allocation5 + $0x780] sm:$0xf]  ;;  %v5081_v3 = vor.u32 %v7304_v1, %v5080_v0 }
   0xf   :  { %v7336_v4 = vld [vmem:[#allocation5 + $0x7bc] sm:$0xf0] }
  0x10   :  { %v5336_v5 = vld [vmem:[#allocation5 + $0xb80] sm:$0xf]  ;;  %v5209_v7 = vor.u32 %v7336_v4, %v5208_v2  ;;  %839 = vmatpush.bf16.msra.mxu0 %v5081_v3 }
  0x11   :  { %v7368_v6 = vld [vmem:[#allocation5 + $0xbbc] sm:$0xf0] }
  0x12   :  { %v5337_v8 = vor.u32 %v7368_v6, %v5336_v5  ;;  %v5464_v9 = vld [vmem:[#allocation5 + $0xf80] sm:$0xf]  ;;  %853 = vmatpush.bf16.msra.mxu1 %v5209_v7 }
  0x13   :  { %v7400_v10 = vld [vmem:[#allocation5 + $0xfbc] sm:$0xf0] }
  0x14   :  { %v5064_v11 = vld [vmem:[#allocation5 + $0x300] sm:$0xf]  ;;  %v5465_v12 = vor.u32 %v7400_v10, %v5464_v9  ;;  %867 = vmatpush.bf16.msra.mxu2 %v5337_v8 }
  0x15   :  { %v7300_v13 = vld [vmem:[#allocation5 + $0x33c] sm:$0xf0] }
  0x16   :  { %v5192_v14 = vld [vmem:[#allocation5 + $0x700] sm:$0xf]  ;;  %v5065_v16 = vor.u32 %v7300_v13, %v5064_v11  ;;  %881 = vmatpush.bf16.msra.mxu3 %v5465_v12 }
  0x17   :  { %v7332_v15 = vld [vmem:[#allocation5 + $0x73c] sm:$0xf0] }
  0x18   :  { %v5193_v17 = vor.u32 %v7332_v15, %v5192_v14  ;;  %v5320_v18 = vld [vmem:[#allocation5 + $0xb00] sm:$0xf]  ;;  %840 = vmatpush.bf16.msra.mxu0 %v5065_v16 }
  0x19   :  { %v7364_v19 = vld [vmem:[#allocation5 + $0xb3c] sm:$0xf0] }
  0x1a   :  { %v5448_v20 = vld [vmem:[#allocation5 + $0xf00] sm:$0xf]  ;;  %v5321_v21 = vor.u32 %v7364_v19, %v5320_v18  ;;  %854 = vmatpush.bf16.msra.mxu1 %v5193_v17 }
  0x1b   :  { %v7396_v22 = vld [vmem:[#allocation5 + $0xf3c] sm:$0xf0] }
  0x1c   :  { %v5048_v23 = vld [vmem:[#allocation5 + $0x280] sm:$0xf]  ;;  %v5449_v25 = vor.u32 %v7396_v22, %v5448_v20  ;;  %868 = vmatpush.bf16.msra.mxu2 %v5321_v21 }
  0x1d   :  { %v7296_v24 = vld [vmem:[#allocation5 + $0x2bc] sm:$0xf0] }
  0x1e   :  { %v5176_v26 = vld [vmem:[#allocation5 + $0x680] sm:$0xf]  ;;  %v5049_v29 = vor.u32 %v7296_v24, %v5048_v23  ;;  %882 = vmatpush.bf16.msra.mxu3 %v5449_v25 }
  0x1f   :  { %v7328_v27 = vld [vmem:[#allocation5 + $0x6bc] sm:$0xf0] }
  0x20   :  { %v5304_v28 = vld [vmem:[#allocation5 + $0xa80] sm:$0xf]  ;;  %v5177_v33 = vor.u32 %v7328_v27, %v5176_v26  ;;  %841 = vmatpush.bf16.msra.mxu0 %v5049_v29  ;;  %v5082_v29 = vld [vmem:[#allocation5 + $0x3c0] sm:$0xf0] }
  0x21   :  { %v7360_v30 = vld [vmem:[#allocation5 + $0xabc] sm:$0xf0] }
  0x22   :  { %v5432_v31 = vld [vmem:[#allocation5 + $0xe80] sm:$0xf]  ;;  %v5305_v34 = vor.u32 %v7360_v30, %v5304_v28  ;;  %855 = vmatpush.bf16.msra.mxu1 %v5177_v33  ;;  %v7302_v28 = vld [vmem:[#allocation5 + $0x384] sm:$0xf] }
  0x23   :  { %v7392_v32 = vld [vmem:[#allocation5 + $0xebc] sm:$0xf0]  ;;  %v7334_v30 = vld [vmem:[#allocation5 + $0x784] sm:$0xf] }
  0x24   :  { %v5032_v35 = vld [vmem:[#allocation5 + $0x200] sm:$0xf]  ;;  %v5433_v38 = vor.u32 %v7392_v32, %v5432_v31  ;;  %869 = vmatpush.bf16.msra.mxu2 %v5305_v34  ;;  %v5210_v32 = vld [vmem:[#allocation5 + $0x7c0] sm:$0xf0] }
  0x25   :  { %v7292_v36 = vld [vmem:[#allocation5 + $0x23c] sm:$0xf0]  ;;  %v7366_v33 = vld [vmem:[#allocation5 + $0xb84] sm:$0xf] }
  0x26   :  { %v5160_v37 = vld [vmem:[#allocation5 + $0x600] sm:$0xf]  ;;  %v5033_v44 = vor.u32 %v7292_v36, %v5032_v35  ;;  %883 = vmatpush.bf16.msra.mxu3 %v5433_v38  ;;  %v5338_v34 = vld [vmem:[#allocation5 + $0xbc0] sm:$0xf0] }
  0x27   :  { %v7324_v39 = vld [vmem:[#allocation5 + $0x63c] sm:$0xf0]  ;;  %v5466_v38 = vld [vmem:[#allocation5 + $0xfc0] sm:$0xf0] }
  0x28   :  { %v5288_v40 = vld [vmem:[#allocation5 + $0xa00] sm:$0xf]  ;;  %v5161_v45 = vor.u32 %v7324_v39, %v5160_v37  ;;  %842 = vmatpush.bf16.msra.mxu0 %v5033_v44  ;;  %v7398_v37 = vld [vmem:[#allocation5 + $0xf84] sm:$0xf] }
  0x29   :  { %v7356_v41 = vld [vmem:[#allocation5 + $0xa3c] sm:$0xf0]  ;;  %v5066_v44 = vld [vmem:[#allocation5 + $0x340] sm:$0xf0] }
  0x2a   :  { %v5416_v42 = vld [vmem:[#allocation5 + $0xe00] sm:$0xf]  ;;  %v5289_v46 = vor.u32 %v7356_v41, %v5288_v40  ;;  %856 = vmatpush.bf16.msra.mxu1 %v5161_v45  ;;  %v5085_v40 = vor.u32 %v7302_v28, %v5082_v29  ;;  %v5213_v41 = vor.u32 %v7334_v30, %v5210_v32  ;;  %v7330_v45 = vld [vmem:[#allocation5 + $0x704] sm:$0xf]  ;;  %v4954_v28 = vld [vmem:[#allocation2 + $0x10] sm:$0xf0] }
  0x2b   :  { %v7388_v43 = vld [vmem:[#allocation5 + $0xe3c] sm:$0xf0]  ;;  %v5146_v30 = vld [vmem:[#allocation5 + $0x5c0] sm:$0xf0] }
  0x2c   :  { %v5016_v47 = vld [vmem:[#allocation5 + $0x180] sm:$0xf]  ;;  %v5417_v50 = vor.u32 %v7388_v43, %v5416_v42  ;;  %870 = vmatpush.bf16.msra.mxu2 %v5289_v46  ;;  %v5341_v42 = vor.u32 %v7366_v33, %v5338_v34  ;;  %v7298_v43 = vld [vmem:[#allocation5 + $0x304] sm:$0xf]  ;;  %v5469_v46 = vor.u32 %v7398_v37, %v5466_v38 }
  0x2d   :  { %v7288_v48 = vld [vmem:[#allocation5 + $0x1bc] sm:$0xf0]  ;;  %v5274_v32 = vld [vmem:[#allocation5 + $0x9c0] sm:$0xf0] }
  0x2e   :  { %v5144_v49 = vld [vmem:[#allocation5 + $0x580] sm:$0xf]  ;;  %v5017_v56 = vor.u32 %v7288_v48, %v5016_v47  ;;  %884 = vmatpush.bf16.msra.mxu3 %v5417_v50  ;;  %v5194_v47 = vld [vmem:[#allocation5 + $0x740] sm:$0xf0] }
  0x2f   :  { %v7320_v51 = vld [vmem:[#allocation5 + $0x5bc] sm:$0xf0]  ;;  %v7362_v48 = vld [vmem:[#allocation5 + $0xb04] sm:$0xf] }
  0x30   :  { %v5272_v52 = vld [vmem:[#allocation5 + $0x980] sm:$0xf]  ;;  %v5145_v57 = vor.u32 %v7320_v51, %v5144_v49  ;;  %843 = vmatpush.bf16.msra.mxu0 %v5017_v56  ;;  %v5322_v49 = vld [vmem:[#allocation5 + $0xb40] sm:$0xf0] }
  0x31   :  { %v7352_v53 = vld [vmem:[#allocation5 + $0x9bc] sm:$0xf0]  ;;  %v7394_v50 = vld [vmem:[#allocation5 + $0xf04] sm:$0xf] }
  0x32   :  { %v5400_v54 = vld [vmem:[#allocation5 + $0xd80] sm:$0xf]  ;;  %v5273_v58 = vor.u32 %v7352_v53, %v5272_v52  ;;  %857 = vmatpush.bf16.msra.mxu1 %v5145_v57  ;;  %v5450_v51 = vld [vmem:[#allocation5 + $0xf40] sm:$0xf0]  ;;  %v5069_v52 = vor.u32 %v7298_v43, %v5066_v44  ;;  %v5197_v53 = vor.u32 %v7330_v45, %v5194_v47 }
  0x33   :  { %v7384_v55 = vld [vmem:[#allocation5 + $0xdbc] sm:$0xf0]  ;;  %v5050_v56 = vld [vmem:[#allocation5 + $0x2c0] sm:$0xf0] }
  0x34   :  { %v5000_v59 = vld [vmem:[#allocation5 + $0x100] sm:$0xf]  ;;  %v5401_v62 = vor.u32 %v7384_v55, %v5400_v54  ;;  %871 = vmatpush.bf16.msra.mxu2 %v5273_v58  ;;  %v5325_v54 = vor.u32 %v7362_v48, %v5322_v49  ;;  %v7294_v55 = vld [vmem:[#allocation5 + $0x284] sm:$0xf]  ;;  %v5453_v58 = vor.u32 %v7394_v50, %v5450_v51 }
  0x35   :  { %v7284_v60 = vld [vmem:[#allocation5 + $0x13c] sm:$0xf0]  ;;  %v7326_v57 = vld [vmem:[#allocation5 + $0x684] sm:$0xf] }
  0x36   :  { %v5128_v61 = vld [vmem:[#allocation5 + $0x500] sm:$0xf]  ;;  %v5001_v4 = vor.u32 %v7284_v60, %v5000_v59  ;;  %885 = vmatpush.bf16.msra.mxu3 %v5401_v62  ;;  %v5178_v59 = vld [vmem:[#allocation5 + $0x6c0] sm:$0xf0] }
  0x37   :  { %v7316_v63 = vld [vmem:[#allocation5 + $0x53c] sm:$0xf0]  ;;  %v7358_v60 = vld [vmem:[#allocation5 + $0xa84] sm:$0xf] }
  0x38   :  { %v5256_v0 = vld [vmem:[#allocation5 + $0x900] sm:$0xf]  ;;  %v5129_v5 = vor.u32 %v7316_v63, %v5128_v61  ;;  %844 = vmatpush.bf16.msra.mxu0 %v5001_v4  ;;  %v5306_v61 = vld [vmem:[#allocation5 + $0xac0] sm:$0xf0]  ;;  %v7273_v4 = vld [vmem:[#allocation2 + $0x14] sm:$0xf0] }
  0x39   :  { %v7348_v1 = vld [vmem:[#allocation5 + $0x93c] sm:$0xf0]  ;;  %v7390_v62 = vld [vmem:[#allocation5 + $0xe84] sm:$0xf] }
  0x3a   :  { %v5384_v2 = vld [vmem:[#allocation5 + $0xd00] sm:$0xf]  ;;  %v5257_v6 = vor.u32 %v7348_v1, %v5256_v0  ;;  %858 = vmatpush.bf16.msra.mxu1 %v5129_v5  ;;  %v5434_v63 = vld [vmem:[#allocation5 + $0xec0] sm:$0xf0]  ;;  %v5053_v1 = vor.u32 %v7294_v55, %v5050_v56  ;;  %v5181_v5 = vor.u32 %v7326_v57, %v5178_v59 }
  0x3b   :  { %v7380_v3 = vld [vmem:[#allocation5 + $0xd3c] sm:$0xf0]  ;;  %v7290_v0 = vld [vmem:[#allocation5 + $0x204] sm:$0xf] }
  0x3c   :  { %v4984_v7 = vld [vmem:[#allocation5 + $0x80] sm:$0xf]  ;;  %v5385_v10 = vor.u32 %v7380_v3, %v5384_v2  ;;  %872 = vmatpush.bf16.msra.mxu2 %v5257_v6  ;;  %v5034_v2 = vld [vmem:[#allocation5 + $0x240] sm:$0xf0]  ;;  %v4960_v3 = vld [vmem:[#allocation2 + $0x8] sm:$0xf]  ;;  %v5309_v6 = vor.u32 %v7358_v60, %v5306_v61 }
  0x3d   :  { %v7280_v8 = vld [vmem:[#allocation5 + $0xbc] sm:$0xf0]  ;;  %v7382_v34 = vld [vmem:[#allocation5 + $0xd84] sm:$0xf] }
  0x3e   :  { %v5112_v9 = vld [vmem:[#allocation5 + $0x480] sm:$0xf]  ;;  %v4985_v16 = vor.u32 %v7280_v8, %v4984_v7  ;;  %886 = vmatpush.bf16.msra.mxu3 %v5385_v10  ;;  %v7322_v7 = vld [vmem:[#allocation5 + $0x604] sm:$0xf]  ;;  %v8008_v8 = vor.u32 %v7273_v4, %v4960_v3  ;;  %v4962_v10 = vld [vmem:[#allocation2 + $0x18] sm:$0xf0] }
  0x3f   :  { %v7312_v11 = vld [vmem:[#allocation5 + $0x4bc] sm:$0xf0]  ;;  %v5130_v43 = vld [vmem:[#allocation5 + $0x540] sm:$0xf0] }
  0x40   :  { %v5240_v12 = vld [vmem:[#allocation5 + $0x880] sm:$0xf]  ;;  %v5113_v19 = vor.u32 %v7312_v11, %v5112_v9  ;;  %845 = vmatpush.bf16.msra.mxu0 %v4985_v16  ;;  %v7271_v9 = vld [vmem:[#allocation2 + $0xc] sm:$0xf]  ;;  %v5437_v11 = vor.u32 %v7390_v62, %v5434_v63  ;;  %v7386_v16 = vld [vmem:[#allocation5 + $0xe04] sm:$0xf] }
  0x41   :  { %v7344_v13 = vld [vmem:[#allocation5 + $0x8bc] sm:$0xf0]  ;;  %v7346_v44 = vld [vmem:[#allocation5 + $0x904] sm:$0xf] }
  0x42   :  { %v5368_v14 = vld [vmem:[#allocation5 + $0xc80] sm:$0xf]  ;;  %v5241_v20 = vor.u32 %v7344_v13, %v5240_v12  ;;  %859 = vmatpush.bf16.msra.mxu1 %v5113_v19  ;;  %v5162_v12 = vld [vmem:[#allocation5 + $0x640] sm:$0xf0]  ;;  %v5037_v19 = vor.u32 %v7290_v0, %v5034_v2 }
  0x43   :  { %v7376_v15 = vld [vmem:[#allocation5 + $0xcbc] sm:$0xf0]  ;;  %v7354_v13 = vld [vmem:[#allocation5 + $0xa04] sm:$0xf] }
  0x44   :  { %v4968_v17 = vld [vmem:[#allocation5] sm:$0xf]  ;;  %v5369_v24 = vor.u32 %v7376_v15, %v5368_v14  ;;  %873 = vmatpush.bf16.msra.mxu2 %v5241_v20  ;;  %v5290_v14 = vld [vmem:[#allocation5 + $0xa40] sm:$0xf0]  ;;  %v8010_v15 = vor.u32 %v7271_v9, %v4962_v10  ;;  %v5088_v9 = vld [vmem:[#allocation5 + $0x388] sm:$0xf] }
  0x45   :  { %v7276_v18 = vld [vmem:[#allocation5 + $0x3c] sm:$0xf0]  ;;  %v5018_v20 = vld [vmem:[#allocation5 + $0x1c0] sm:$0xf0]  ;;  %v7305_v10 = vld [vmem:[#allocation5 + $0x3c4] sm:$0xf0] }
  0x46   :  { %v5096_v21 = vld [vmem:[#allocation5 + $0x400] sm:$0xf]  ;;  %v4969_v31 = vor.u32 %v7276_v18, %v4968_v17  ;;  %887 = vmatpush.bf16.msra.mxu3 %v5369_v24  ;;  %v5418_v17 = vld [vmem:[#allocation5 + $0xe40] sm:$0xf0]  ;;  %v5293_v24 = vor.u32 %v7354_v13, %v5290_v14  ;;  %v7337_v13 = vld [vmem:[#allocation5 + $0x7c4] sm:$0xf0] }
  0x47   :  { %v7308_v22 = vld [vmem:[#allocation5 + $0x43c] sm:$0xf0]  ;;  %v7286_v18 = vld [vmem:[#allocation5 + $0x184] sm:$0xf]  ;;  %v5421_v29 = vor.u32 %v7386_v16, %v5418_v17  ;;  %v5344_v14 = vld [vmem:[#allocation5 + $0xb88] sm:$0xf] }
  0x48   :  { %v5224_v23 = vld [vmem:[#allocation5 + $0x800] sm:$0xf]  ;;  %v5097_v35 = vor.u32 %v7308_v22, %v5096_v21  ;;  %846 = vmatpush.bf16.msra.mxu0 %v4969_v31  ;;  %v7272_v22 = vld [vmem:[#allocation2 + $0xc] sm:$0xf0]  ;;  %v7350_v31 = vld [vmem:[#allocation5 + $0x984] sm:$0xf] }
  0x49   :  { %v7340_v25 = vld [vmem:[#allocation5 + $0x83c] sm:$0xf0]  ;;  %v5277_v38 = vor.u32 %v7350_v31, %v5274_v32  ;;  %v5258_v45 = vld [vmem:[#allocation5 + $0x940] sm:$0xf0]  ;;  %v7369_v16 = vld [vmem:[#allocation5 + $0xbc4] sm:$0xf0] }
  0x4a   :  { %v5352_v26 = vld [vmem:[#allocation5 + $0xc00] sm:$0xf]  ;;  %v5225_v36 = vor.u32 %v7340_v25, %v5224_v23  ;;  %860 = vmatpush.bf16.msra.mxu1 %v5097_v35  ;;  %v5165_v23 = vor.u32 %v7322_v7, %v5162_v12  ;;  %v7318_v25 = vld [vmem:[#allocation5 + $0x584] sm:$0xf]  ;;  %v5261_v50 = vor.u32 %v7346_v44, %v5258_v45  ;;  %v5328_v31 = vld [vmem:[#allocation5 + $0xb08] sm:$0xf] }
  0x4b   :  { %v7372_v27 = vld [vmem:[#allocation5 + $0xc3c] sm:$0xf0]  ;;  %v5402_v35 = vld [vmem:[#allocation5 + $0xdc0] sm:$0xf0]  ;;  %v5149_v37 = vor.u32 %v7318_v25, %v5146_v30  ;;  %v5072_v25 = vld [vmem:[#allocation5 + $0x308] sm:$0xf] }
  0x4c   :  { %v5353_v39 = vor.u32 %v7372_v27, %v5352_v26  ;;  %874 = vmatpush.bf16.msra.mxu2 %v5225_v36  ;;  %895 = vmatpush.bf16.msrb.mxu0 %v5085_v40  ;;  %v4952_v21 = vld [vmem:[#allocation2] sm:$0xf]  ;;  %v7270_v27 = vld [vmem:[#allocation2 + $0x4] sm:$0xf]  ;;  %v5021_v36 = vor.u32 %v7286_v18, %v5018_v20  ;;  %v7401_v20 = vld [vmem:[#allocation5 + $0xfc4] sm:$0xf0] }
  0x4d   :  { %v8014_v26 = vor.u32 %v7272_v22, %v4952_v21  ;;  %v8016_v33 = vor.u32 %v7270_v27, %v4954_v28  ;;  %v5002_v40 = vld [vmem:[#allocation5 + $0x140] sm:$0xf0]  ;;  %v5089_v22 = vor.u32 %v7305_v10, %v5088_v9  ;;  %v7301_v27 = vld [vmem:[#allocation5 + $0x344] sm:$0xf0] }
  0x4e   :  { %888 = vmatpush.bf16.msra.mxu3 %v5353_v39  ;;  %909 = vmatpush.bf16.msrb.mxu1 %v5213_v41  ;;  %v7282_v39 = vld [vmem:[#allocation5 + $0x104] sm:$0xf]  ;;  %v5200_v28 = vld [vmem:[#allocation5 + $0x708] sm:$0xf] }
  0x4f   :  { %875 = vmatmul.bf16.vlgmr.msra.gmra.mxu2 %v8008_v8  ;;  %847 = vmatmul.bf16.vlgmr.msra.gmra.mxu0 %v8014_v26  ;;  %v7314_v41 = vld [vmem:[#allocation5 + $0x504] sm:$0xf]  ;;  %v5005_v48 = vor.u32 %v7282_v39, %v5002_v40  ;;  %v7333_v30 = vld [vmem:[#allocation5 + $0x744] sm:$0xf0] }
  0x50   :  { %923 = vmatpush.bf16.msrb.mxu2 %v5341_v42  ;;  %896 = vmatpush.bf16.msrb.mxu0 %v5069_v52  ;;  %v5405_v42 = vor.u32 %v7382_v34, %v5402_v35  ;;  %v5386_v47 = vld [vmem:[#allocation5 + $0xd40] sm:$0xf0]  ;;  %v5133_v49 = vor.u32 %v7314_v41, %v5130_v43  ;;  %v7365_v32 = vld [vmem:[#allocation5 + $0xb44] sm:$0xf0] }
  0x51   :  { %889 = vmatmul.bf16.vlgmr.msra.gmra.mxu3 %v8010_v15  ;;  %861 = vmatmul.bf16.vlgmr.msra.gmra.mxu1 %v8016_v33  ;;  %v7278_v51 = vld [vmem:[#allocation5 + $0x84] sm:$0xf]  ;;  %v5456_v34 = vld [vmem:[#allocation5 + $0xf08] sm:$0xf] }
  0x52   :  { %937 = vmatpush.bf16.msrb.mxu3 %v5469_v46  ;;  %910 = vmatpush.bf16.msrb.mxu1 %v5197_v53  ;;  %v7378_v46 = vld [vmem:[#allocation5 + $0xd04] sm:$0xf]  ;;  %v7397_v35 = vld [vmem:[#allocation5 + $0xf44] sm:$0xf0] }
  0x53   :  { %v4986_v52 = vld [vmem:[#allocation5 + $0xc0] sm:$0xf0]  ;;  %v5056_v39 = vld [vmem:[#allocation5 + $0x288] sm:$0xf] }
  0x54   :  { %924 = vmatpush.bf16.msrb.mxu2 %v5325_v54  ;;  %897 = vmatpush.bf16.msrb.mxu0 %v5053_v1  ;;  %v7310_v53 = vld [vmem:[#allocation5 + $0x484] sm:$0xf]  ;;  %v5389_v54 = vor.u32 %v7378_v46, %v5386_v47  ;;  %v4989_v60 = vor.u32 %v7278_v51, %v4986_v52  ;;  %v7297_v40 = vld [vmem:[#allocation5 + $0x2c4] sm:$0xf0] }
  0x55   :  { %v5114_v55 = vld [vmem:[#allocation5 + $0x4c0] sm:$0xf0]  ;;  %v5184_v41 = vld [vmem:[#allocation5 + $0x688] sm:$0xf] }
  0x56   :  { %938 = vmatpush.bf16.msrb.mxu3 %v5453_v58  ;;  %911 = vmatpush.bf16.msrb.mxu1 %v5181_v5  ;;  %v7342_v56 = vld [vmem:[#allocation5 + $0x884] sm:$0xf]  ;;  %v5117_v63 = vor.u32 %v7310_v53, %v5114_v55  ;;  %v7329_v43 = vld [vmem:[#allocation5 + $0x6c4] sm:$0xf0] }
  0x57   :  { %v5242_v57 = vld [vmem:[#allocation5 + $0x8c0] sm:$0xf0]  ;;  %v5312_v44 = vld [vmem:[#allocation5 + $0xa88] sm:$0xf] }
  0x58   :  { %925 = vmatpush.bf16.msrb.mxu2 %v5309_v6  ;;  %898 = vmatpush.bf16.msrb.mxu0 %v5037_v19  ;;  %v7374_v58 = vld [vmem:[#allocation5 + $0xc84] sm:$0xf]  ;;  %v5245_v0 = vor.u32 %v7342_v56, %v5242_v57  ;;  %v5472_v19 = vld [vmem:[#allocation5 + $0xf88] sm:$0xf] }
  0x59   :  { %v5370_v59 = vld [vmem:[#allocation5 + $0xcc0] sm:$0xf0]  ;;  %v7361_v45 = vld [vmem:[#allocation5 + $0xac4] sm:$0xf0] }
  0x5a   :  { %939 = vmatpush.bf16.msrb.mxu3 %v5437_v11  ;;  %912 = vmatpush.bf16.msrb.mxu1 %v5165_v23  ;;  %v7274_v61 = vld [vmem:[#allocation5 + $0x4] sm:$0xf]  ;;  %v5373_v4 = vor.u32 %v7374_v58, %v5370_v59  ;;  %v5216_v11 = vld [vmem:[#allocation5 + $0x788] sm:$0xf] }
  0x5b   :  { %v4970_v62 = vld [vmem:[#allocation5 + $0x40] sm:$0xf0]  ;;  %v5217_v23 = vor.u32 %v7337_v13, %v5216_v11  ;;  %v5440_v46 = vld [vmem:[#allocation5 + $0xe88] sm:$0xf] }
  0x5c   :  { %926 = vmatpush.bf16.msrb.mxu2 %v5293_v24  ;;  %899 = vmatpush.bf16.msrb.mxu0 %v5021_v36  ;;  %v7306_v1 = vld [vmem:[#allocation5 + $0x404] sm:$0xf]  ;;  %v4973_v12 = vor.u32 %v7274_v61, %v4970_v62  ;;  %v5345_v24 = vor.u32 %v7369_v16, %v5344_v14  ;;  %v5073_v36 = vor.u32 %v7301_v27, %v5072_v25  ;;  %v7393_v47 = vld [vmem:[#allocation5 + $0xec4] sm:$0xf0] }
  0x5d   :  { %v5098_v2 = vld [vmem:[#allocation5 + $0x440] sm:$0xf0]  ;;  %v5040_v51 = vld [vmem:[#allocation5 + $0x208] sm:$0xf] }
  0x5e   :  { %940 = vmatpush.bf16.msrb.mxu3 %v5421_v29  ;;  %913 = vmatpush.bf16.msrb.mxu1 %v5149_v37  ;;  %v7338_v3 = vld [vmem:[#allocation5 + $0x804] sm:$0xf]  ;;  %v5101_v17 = vor.u32 %v7306_v1, %v5098_v2  ;;  %v5473_v29 = vor.u32 %v7401_v20, %v5472_v19  ;;  %v5201_v37 = vor.u32 %v7333_v30, %v5200_v28  ;;  %v7293_v52 = vld [vmem:[#allocation5 + $0x244] sm:$0xf0] }
  0x5f   :  { %v5226_v5 = vld [vmem:[#allocation5 + $0x840] sm:$0xf0]  ;;  %v5168_v53 = vld [vmem:[#allocation5 + $0x608] sm:$0xf] }
  0x60   :  { %927 = vmatpush.bf16.msrb.mxu2 %v5277_v38  ;;  %900 = vmatpush.bf16.msrb.mxu0 %v5005_v48  ;;  %v7370_v6 = vld [vmem:[#allocation5 + $0xc04] sm:$0xf]  ;;  %v5229_v18 = vor.u32 %v7338_v3, %v5226_v5  ;;  %v5329_v38 = vor.u32 %v7365_v32, %v5328_v31  ;;  %v5057_v48 = vor.u32 %v7297_v40, %v5056_v39  ;;  %v7325_v55 = vld [vmem:[#allocation5 + $0x644] sm:$0xf0] }
  0x61   :  { %v5354_v7 = vld [vmem:[#allocation5 + $0xc40] sm:$0xf0]  ;;  %v5296_v56 = vld [vmem:[#allocation5 + $0xa08] sm:$0xf]  ;;  %v5169_v61 = vor.u32 %v7325_v55, %v5168_v53  ;;  %v7367_v53 = vld [vmem:[#allocation5 + $0xb8c] sm:$0xf] }
  0x62   :  { %941 = vmatpush.bf16.msrb.mxu3 %v5405_v42  ;;  %914 = vmatpush.bf16.msrb.mxu1 %v5133_v49  ;;  %v5357_v21 = vor.u32 %v7370_v6, %v5354_v7  ;;  %v5457_v42 = vor.u32 %v7397_v35, %v5456_v34  ;;  %v5185_v49 = vor.u32 %v7329_v43, %v5184_v41  ;;  %v7357_v57 = vld [vmem:[#allocation5 + $0xa44] sm:$0xf0] }
  0x63   :  { %v5424_v58 = vld [vmem:[#allocation5 + $0xe08] sm:$0xf]  ;;  %v5297_v62 = vor.u32 %v7357_v57, %v5296_v56  ;;  %v7399_v57 = vld [vmem:[#allocation5 + $0xf8c] sm:$0xf] }
  0x64   :  { %928 = vmatpush.bf16.msrb.mxu2 %v5261_v50  ;;  %901 = vmatpush.bf16.msrb.mxu0 %v4989_v60  ;;  %v5313_v50 = vor.u32 %v7361_v45, %v5312_v44  ;;  %v7389_v59 = vld [vmem:[#allocation5 + $0xe44] sm:$0xf0]  ;;  %v5041_v60 = vor.u32 %v7293_v52, %v5040_v51  ;;  %v5218_v52 = vld [vmem:[#allocation5 + $0x7c8] sm:$0xf0] }
  0x65   :  { %v5152_v1 = vld [vmem:[#allocation5 + $0x588] sm:$0xf]  ;;  %v5425_v2 = vor.u32 %v7389_v59, %v5424_v58  ;;  %v5474_v58 = vld [vmem:[#allocation5 + $0xfc8] sm:$0xf0] }
  0x66   :  { %942 = vmatpush.bf16.msrb.mxu3 %v5389_v54  ;;  %915 = vmatpush.bf16.msrb.mxu1 %v5117_v63  ;;  %v5441_v54 = vor.u32 %v7393_v47, %v5440_v46  ;;  %v5024_v63 = vld [vmem:[#allocation5 + $0x188] sm:$0xf] }
  0x67   :  { %v7321_v3 = vld [vmem:[#allocation5 + $0x5c4] sm:$0xf0] }
  0x68   :  { %929 = vmatpush.bf16.msrb.mxu2 %v5245_v0  ;;  %902 = vmatpush.bf16.msrb.mxu0 %v4973_v12  ;;  %v7289_v0 = vld [vmem:[#allocation5 + $0x1c4] sm:$0xf0]  ;;  %v5153_v10 = vor.u32 %v7321_v3, %v5152_v1  ;;  %v7331_v1 = vld [vmem:[#allocation5 + $0x70c] sm:$0xf] }
  0x69   :  { %v7353_v5 = vld [vmem:[#allocation5 + $0x9c4] sm:$0xf0]  ;;  %v5025_v9 = vor.u32 %v7289_v0, %v5024_v63  ;;  %v7299_v63 = vld [vmem:[#allocation5 + $0x30c] sm:$0xf] }
  0x6a   :  { %943 = vmatpush.bf16.msrb.mxu3 %v5373_v4  ;;  %916 = vmatpush.bf16.msrb.mxu1 %v5101_v17  ;;  %v5280_v4 = vld [vmem:[#allocation5 + $0x988] sm:$0xf]  ;;  %v5074_v0 = vld [vmem:[#allocation5 + $0x348] sm:$0xf0] }
  0x6b   :  { %903 = vmatmul.bf16.vlgmr.msrb.gmra.mxu0 %v8014_v26  ;;  %v5408_v6 = vld [vmem:[#allocation5 + $0xd88] sm:$0xf]  ;;  %v5281_v11 = vor.u32 %v7353_v5, %v5280_v4  ;;  %v5202_v3 = vld [vmem:[#allocation5 + $0x748] sm:$0xf0] }
  0x6c   :  { %930 = vmatpush.bf16.msrb.mxu2 %v5229_v18  ;;  %951 = vmatpush.bf16.msra.mxu0 %v5089_v22  ;;  %v7385_v7 = vld [vmem:[#allocation5 + $0xdc4] sm:$0xf0]  ;;  %v7363_v4 = vld [vmem:[#allocation5 + $0xb0c] sm:$0xf] }
  0x6d   :  { %917 = vmatmul.bf16.vlgmr.msrb.gmra.mxu1 %v8016_v33  ;;  %v5008_v12 = vld [vmem:[#allocation5 + $0x108] sm:$0xf]  ;;  %v5409_v16 = vor.u32 %v7385_v7, %v5408_v6  ;;  %v5330_v5 = vld [vmem:[#allocation5 + $0xb48] sm:$0xf0] }
  0x6e   :  { %944 = vmatpush.bf16.msrb.mxu3 %v5357_v21  ;;  %965 = vmatpush.bf16.msra.mxu1 %v5217_v23  ;;  %v7285_v13 = vld [vmem:[#allocation5 + $0x144] sm:$0xf0]  ;;  %v7395_v6 = vld [vmem:[#allocation5 + $0xf0c] sm:$0xf] }
  0x6f   :  { %931 = vmatmul.bf16.vlgmr.msrb.gmra.mxu2 %v8008_v8  ;;  %v5136_v14 = vld [vmem:[#allocation5 + $0x508] sm:$0xf]  ;;  %v5009_v22 = vor.u32 %v7285_v13, %v5008_v12  ;;  %v5458_v7 = vld [vmem:[#allocation5 + $0xf48] sm:$0xf0] }
  0x70   :  { %979 = vmatpush.bf16.msra.mxu2 %v5345_v24  ;;  %952 = vmatpush.bf16.msra.mxu0 %v5073_v36  ;;  %v7317_v17 = vld [vmem:[#allocation5 + $0x544] sm:$0xf0]  ;;  %v7295_v12 = vld [vmem:[#allocation5 + $0x28c] sm:$0xf] }
  0x71   :  { %945 = vmatmul.bf16.vlgmr.msrb.gmra.mxu3 %v8010_v15  ;;  %v5264_v18 = vld [vmem:[#allocation5 + $0x908] sm:$0xf]  ;;  %v5137_v23 = vor.u32 %v7317_v17, %v5136_v14  ;;  %v5058_v13 = vld [vmem:[#allocation5 + $0x2c8] sm:$0xf0] }
  0x72   :  { %993 = vmatpush.bf16.msra.mxu3 %v5473_v29  ;;  %966 = vmatpush.bf16.msra.mxu1 %v5201_v37  ;;  %v7349_v19 = vld [vmem:[#allocation5 + $0x944] sm:$0xf0]  ;;  %v7327_v14 = vld [vmem:[#allocation5 + $0x68c] sm:$0xf] }
  0x73   :  { %v5392_v20 = vld [vmem:[#allocation5 + $0xd08] sm:$0xf]  ;;  %v5265_v24 = vor.u32 %v7349_v19, %v5264_v18  ;;  %v5186_v17 = vld [vmem:[#allocation5 + $0x6c8] sm:$0xf0] }
  0x74   :  { %980 = vmatpush.bf16.msra.mxu2 %v5329_v38  ;;  %953 = vmatpush.bf16.msra.mxu0 %v5057_v48  ;;  %v7381_v21 = vld [vmem:[#allocation5 + $0xd44] sm:$0xf0]  ;;  %v7303_v48 = vld [vmem:[#allocation5 + $0x38c] sm:$0xf] }
  0x75   :  { %v4992_v25 = vld [vmem:[#allocation5 + $0x88] sm:$0xf]  ;;  %v5393_v29 = vor.u32 %v7381_v21, %v5392_v20  ;;  %v7359_v18 = vld [vmem:[#allocation5 + $0xa8c] sm:$0xf] }
  0x76   :  { %994 = vmatpush.bf16.msra.mxu3 %v5457_v42  ;;  %967 = vmatpush.bf16.msra.mxu1 %v5185_v49  ;;  %v7281_v27 = vld [vmem:[#allocation5 + $0xc4] sm:$0xf0]  ;;  %v5090_v49 = vld [vmem:[#allocation5 + $0x3c8] sm:$0xf0] }
  0x77   :  { %v5120_v28 = vld [vmem:[#allocation5 + $0x488] sm:$0xf]  ;;  %v4993_v36 = vor.u32 %v7281_v27, %v4992_v25  ;;  %v5314_v19 = vld [vmem:[#allocation5 + $0xac8] sm:$0xf0] }
  0x78   :  { %981 = vmatpush.bf16.msra.mxu2 %v5313_v50  ;;  %954 = vmatpush.bf16.msra.mxu0 %v5041_v60  ;;  %v7313_v30 = vld [vmem:[#allocation5 + $0x4c4] sm:$0xf0]  ;;  %v7335_v50 = vld [vmem:[#allocation5 + $0x78c] sm:$0xf]  ;;  %v5093_v60 = vor.u32 %v7303_v48, %v5090_v49 }
  0x79   :  { %v5248_v31 = vld [vmem:[#allocation5 + $0x888] sm:$0xf]  ;;  %v5121_v39 = vor.u32 %v7313_v30, %v5120_v28  ;;  %v7391_v20 = vld [vmem:[#allocation5 + $0xe8c] sm:$0xf] }
  0x7a   :  { %995 = vmatpush.bf16.msra.mxu3 %v5441_v54  ;;  %968 = vmatpush.bf16.msra.mxu1 %v5169_v61  ;;  %v7345_v32 = vld [vmem:[#allocation5 + $0x8c4] sm:$0xf0]  ;;  %v5346_v54 = vld [vmem:[#allocation5 + $0xbc8] sm:$0xf0]  ;;  %v5221_v61 = vor.u32 %v7335_v50, %v5218_v52 }
  0x7b   :  { %v5376_v34 = vld [vmem:[#allocation5 + $0xc88] sm:$0xf]  ;;  %v5249_v40 = vor.u32 %v7345_v32, %v5248_v31  ;;  %v5442_v21 = vld [vmem:[#allocation5 + $0xec8] sm:$0xf0] }
  0x7c   :  { %982 = vmatpush.bf16.msra.mxu2 %v5297_v62  ;;  %955 = vmatpush.bf16.msra.mxu0 %v5025_v9  ;;  %v7377_v35 = vld [vmem:[#allocation5 + $0xcc4] sm:$0xf0]  ;;  %v5349_v62 = vor.u32 %v7367_v53, %v5346_v54  ;;  %v5077_v9 = vor.u32 %v7299_v63, %v5074_v0  ;;  %v7291_v25 = vld [vmem:[#allocation5 + $0x20c] sm:$0xf] }
  0x7d   :  { %v4976_v37 = vld [vmem:[#allocation5 + $0x8] sm:$0xf]  ;;  %v5377_v44 = vor.u32 %v7377_v35, %v5376_v34  ;;  %v5042_v27 = vld [vmem:[#allocation5 + $0x248] sm:$0xf0] }
  0x7e   :  { %996 = vmatpush.bf16.msra.mxu3 %v5425_v2  ;;  %969 = vmatpush.bf16.msra.mxu1 %v5153_v10  ;;  %v7277_v38 = vld [vmem:[#allocation5 + $0x44] sm:$0xf0]  ;;  %v5477_v2 = vor.u32 %v7399_v57, %v5474_v58  ;;  %v5205_v10 = vor.u32 %v7331_v1, %v5202_v3  ;;  %v7323_v28 = vld [vmem:[#allocation5 + $0x60c] sm:$0xf] }
  0x7f   :  { %v5104_v41 = vld [vmem:[#allocation5 + $0x408] sm:$0xf]  ;;  %v4977_v51 = vor.u32 %v7277_v38, %v4976_v37  ;;  %v5170_v30 = vld [vmem:[#allocation5 + $0x648] sm:$0xf0] }
  0x80   :  { %983 = vmatpush.bf16.msra.mxu2 %v5281_v11  ;;  %956 = vmatpush.bf16.msra.mxu0 %v5009_v22  ;;  %v7309_v42 = vld [vmem:[#allocation5 + $0x444] sm:$0xf0]  ;;  %v5333_v11 = vor.u32 %v7363_v4, %v5330_v5  ;;  %v5061_v22 = vor.u32 %v7295_v12, %v5058_v13  ;;  %v7355_v31 = vld [vmem:[#allocation5 + $0xa0c] sm:$0xf]  ;;  %v5173_v37 = vor.u32 %v7323_v28, %v5170_v30  ;;  %v5848_v28 = vld [vmem:[#allocation5 + $0xb90] sm:$0xf] }
  0x81   :  { %v5232_v43 = vld [vmem:[#allocation5 + $0x808] sm:$0xf]  ;;  %v5105_v55 = vor.u32 %v7309_v42, %v5104_v41  ;;  %v5298_v32 = vld [vmem:[#allocation5 + $0xa48] sm:$0xf0] }
  0x82   :  { %997 = vmatpush.bf16.msra.mxu3 %v5409_v16  ;;  %970 = vmatpush.bf16.msra.mxu1 %v5137_v23  ;;  %v7341_v45 = vld [vmem:[#allocation5 + $0x844] sm:$0xf0]  ;;  %v5461_v16 = vor.u32 %v7395_v6, %v5458_v7  ;;  %v5189_v23 = vor.u32 %v7327_v14, %v5186_v17  ;;  %v7387_v34 = vld [vmem:[#allocation5 + $0xe0c] sm:$0xf]  ;;  %v5301_v38 = vor.u32 %v7355_v31, %v5298_v32  ;;  %v5976_v32 = vld [vmem:[#allocation5 + $0xf90] sm:$0xf] }
  0x83   :  { %v5360_v46 = vld [vmem:[#allocation5 + $0xc08] sm:$0xf]  ;;  %v5233_v56 = vor.u32 %v7341_v45, %v5232_v43  ;;  %v5426_v35 = vld [vmem:[#allocation5 + $0xe48] sm:$0xf0] }
  0x84   :  { %984 = vmatpush.bf16.msra.mxu2 %v5265_v24  ;;  %v7373_v47 = vld [vmem:[#allocation5 + $0xc44] sm:$0xf0]  ;;  %957 = vmatpush.bf16.msra.mxu0 %v4993_v36  ;;  %v5317_v24 = vor.u32 %v7359_v18, %v5314_v19  ;;  %v5045_v36 = vor.u32 %v7291_v25, %v5042_v27  ;;  %v7319_v41 = vld [vmem:[#allocation5 + $0x58c] sm:$0xf]  ;;  %v5429_v42 = vor.u32 %v7387_v34, %v5426_v35  ;;  %v7480_v27 = vld [vmem:[#allocation5 + $0x7cc] sm:$0xf0] }
  0x85   :  { %v5361_v59 = vor.u32 %v7373_v47, %v5360_v46  ;;  %v5154_v43 = vld [vmem:[#allocation5 + $0x5c8] sm:$0xf0]  ;;  %v7544_v34 = vld [vmem:[#allocation5 + $0xfcc] sm:$0xf0] }
  0x86   :  { %998 = vmatpush.bf16.msra.mxu3 %v5393_v29  ;;  %971 = vmatpush.bf16.msra.mxu1 %v5121_v39  ;;  %v5445_v29 = vor.u32 %v7391_v20, %v5442_v21  ;;  %v7287_v39 = vld [vmem:[#allocation5 + $0x18c] sm:$0xf]  ;;  %v5157_v49 = vor.u32 %v7319_v41, %v5154_v43  ;;  %v5704_v41 = vld [vmem:[#allocation5 + $0x710] sm:$0xf] }
  0x87   :  { %v5282_v45 = vld [vmem:[#allocation5 + $0x9c8] sm:$0xf0]  ;;  %v7476_v43 = vld [vmem:[#allocation5 + $0x74c] sm:$0xf0] }
  0x88   :  { %985 = vmatpush.bf16.msra.mxu2 %v5249_v40  ;;  %958 = vmatpush.bf16.msra.mxu0 %v4977_v51  ;;  %v5026_v40 = vld [vmem:[#allocation5 + $0x1c8] sm:$0xf0] }
  0x89   :  { %v7383_v46 = vld [vmem:[#allocation5 + $0xd8c] sm:$0xf]  ;;  %v5029_v48 = vor.u32 %v7287_v39, %v5026_v40  ;;  %v5576_v39 = vld [vmem:[#allocation5 + $0x310] sm:$0xf] }
  0x8a   :  { %999 = vmatpush.bf16.msra.mxu3 %v5377_v44  ;;  %972 = vmatpush.bf16.msra.mxu1 %v5105_v55  ;;  %v7351_v44 = vld [vmem:[#allocation5 + $0x98c] sm:$0xf]  ;;  %v7444_v40 = vld [vmem:[#allocation5 + $0x34c] sm:$0xf0] }
  0x8b   :  { %959 = vmatmul.bf16.vlgmr.msra.gmra.mxu0 %v8014_v26  ;;  %v5410_v47 = vld [vmem:[#allocation5 + $0xdc8] sm:$0xf0]  ;;  %v5285_v50 = vor.u32 %v7351_v44, %v5282_v45  ;;  %v5832_v44 = vld [vmem:[#allocation5 + $0xb10] sm:$0xf] }
  0x8c   :  { %986 = vmatpush.bf16.msra.mxu2 %v5233_v56  ;;  %1007 = vmatpush.bf16.msrb.mxu0 %v5093_v60  ;;  %v7283_v51 = vld [vmem:[#allocation5 + $0x10c] sm:$0xf]  ;;  %v5413_v54 = vor.u32 %v7383_v46, %v5410_v47  ;;  %v7508_v45 = vld [vmem:[#allocation5 + $0xb4c] sm:$0xf0] }
  0x8d   :  { %973 = vmatmul.bf16.vlgmr.msra.gmra.mxu1 %v8016_v33  ;;  %v5010_v52 = vld [vmem:[#allocation5 + $0x148] sm:$0xf0]  ;;  %v5960_v46 = vld [vmem:[#allocation5 + $0xf10] sm:$0xf] }
  0x8e   :  { %1000 = vmatpush.bf16.msra.mxu3 %v5361_v59  ;;  %1021 = vmatpush.bf16.msrb.mxu1 %v5221_v61  ;;  %v7315_v53 = vld [vmem:[#allocation5 + $0x50c] sm:$0xf]  ;;  %v5013_v60 = vor.u32 %v7283_v51, %v5010_v52  ;;  %v7540_v47 = vld [vmem:[#allocation5 + $0xf4c] sm:$0xf0] }
  0x8f   :  { %987 = vmatmul.bf16.vlgmr.msra.gmra.mxu2 %v8008_v8  ;;  %v5138_v55 = vld [vmem:[#allocation5 + $0x548] sm:$0xf0]  ;;  %v5560_v51 = vld [vmem:[#allocation5 + $0x290] sm:$0xf] }
  0x90   :  { %1035 = vmatpush.bf16.msrb.mxu2 %v5349_v62  ;;  %1008 = vmatpush.bf16.msrb.mxu0 %v5077_v9  ;;  %v7347_v56 = vld [vmem:[#allocation5 + $0x90c] sm:$0xf]  ;;  %v5141_v61 = vor.u32 %v7315_v53, %v5138_v55  ;;  %v7440_v52 = vld [vmem:[#allocation5 + $0x2cc] sm:$0xf0] }
  0x91   :  { %1001 = vmatmul.bf16.vlgmr.msra.gmra.mxu3 %v8010_v15  ;;  %v5266_v57 = vld [vmem:[#allocation5 + $0x948] sm:$0xf0]  ;;  %v5688_v53 = vld [vmem:[#allocation5 + $0x690] sm:$0xf] }
  0x92   :  { %1049 = vmatpush.bf16.msrb.mxu3 %v5477_v2  ;;  %1022 = vmatpush.bf16.msrb.mxu1 %v5205_v10  ;;  %v7379_v58 = vld [vmem:[#allocation5 + $0xd0c] sm:$0xf]  ;;  %v5269_v62 = vor.u32 %v7347_v56, %v5266_v57  ;;  %v7472_v55 = vld [vmem:[#allocation5 + $0x6cc] sm:$0xf0] }
  0x93   :  { %v5394_v59 = vld [vmem:[#allocation5 + $0xd48] sm:$0xf0]  ;;  %v5816_v56 = vld [vmem:[#allocation5 + $0xa90] sm:$0xf] }
  0x94   :  { %1036 = vmatpush.bf16.msrb.mxu2 %v5333_v11  ;;  %1009 = vmatpush.bf16.msrb.mxu0 %v5061_v22  ;;  %v7279_v63 = vld [vmem:[#allocation5 + $0x8c] sm:$0xf]  ;;  %v5397_v2 = vor.u32 %v7379_v58, %v5394_v59  ;;  %v5592_v22 = vld [vmem:[#allocation5 + $0x390] sm:$0xf] }
  0x95   :  { %v4994_v0 = vld [vmem:[#allocation5 + $0xc8] sm:$0xf0]  ;;  %v7504_v57 = vld [vmem:[#allocation5 + $0xacc] sm:$0xf0] }
  0x96   :  { %1050 = vmatpush.bf16.msrb.mxu3 %v5461_v16  ;;  %1023 = vmatpush.bf16.msrb.mxu1 %v5189_v23  ;;  %v7311_v1 = vld [vmem:[#allocation5 + $0x48c] sm:$0xf]  ;;  %v4997_v9 = vor.u32 %v7279_v63, %v4994_v0  ;;  %v7448_v23 = vld [vmem:[#allocation5 + $0x3cc] sm:$0xf0] }
  0x97   :  { %v5122_v3 = vld [vmem:[#allocation5 + $0x4c8] sm:$0xf0]  ;;  %v5944_v58 = vld [vmem:[#allocation5 + $0xe90] sm:$0xf] }
  0x98   :  { %1037 = vmatpush.bf16.msrb.mxu2 %v5317_v24  ;;  %1010 = vmatpush.bf16.msrb.mxu0 %v5045_v36  ;;  %v7343_v4 = vld [vmem:[#allocation5 + $0x88c] sm:$0xf]  ;;  %v5125_v12 = vor.u32 %v7311_v1, %v5122_v3  ;;  %v5720_v24 = vld [vmem:[#allocation5 + $0x790] sm:$0xf]  ;;  %v5593_v36 = vor.u32 %v7448_v23, %v5592_v22 }
  0x99   :  { %v5250_v5 = vld [vmem:[#allocation5 + $0x8c8] sm:$0xf0]  ;;  %v7536_v59 = vld [vmem:[#allocation5 + $0xecc] sm:$0xf0] }
  0x9a   :  { %1051 = vmatpush.bf16.msrb.mxu3 %v5445_v29  ;;  %1024 = vmatpush.bf16.msrb.mxu1 %v5173_v37  ;;  %v7375_v6 = vld [vmem:[#allocation5 + $0xc8c] sm:$0xf]  ;;  %v5253_v13 = vor.u32 %v7343_v4, %v5250_v5  ;;  %v7512_v29 = vld [vmem:[#allocation5 + $0xbcc] sm:$0xf0]  ;;  %v5721_v37 = vor.u32 %v7480_v27, %v5720_v24 }
  0x9b   :  { %v5378_v7 = vld [vmem:[#allocation5 + $0xcc8] sm:$0xf0]  ;;  %v5544_v63 = vld [vmem:[#allocation5 + $0x210] sm:$0xf] }
  0x9c   :  { %1038 = vmatpush.bf16.msrb.mxu2 %v5301_v38  ;;  %1011 = vmatpush.bf16.msrb.mxu0 %v5029_v48  ;;  %v7275_v10 = vld [vmem:[#allocation5 + $0xc] sm:$0xf]  ;;  %v5381_v18 = vor.u32 %v7375_v6, %v5378_v7  ;;  %v5849_v38 = vor.u32 %v7512_v29, %v5848_v28  ;;  %v5577_v48 = vor.u32 %v7444_v40, %v5576_v39  ;;  %v7436_v0 = vld [vmem:[#allocation5 + $0x24c] sm:$0xf0] }
  0x9d   :  { %v4978_v11 = vld [vmem:[#allocation5 + $0x48] sm:$0xf0]  ;;  %v5672_v1 = vld [vmem:[#allocation5 + $0x610] sm:$0xf] }
  0x9e   :  { %1052 = vmatpush.bf16.msrb.mxu3 %v5429_v42  ;;  %1025 = vmatpush.bf16.msrb.mxu1 %v5157_v49  ;;  %v7307_v14 = vld [vmem:[#allocation5 + $0x40c] sm:$0xf]  ;;  %v4981_v25 = vor.u32 %v7275_v10, %v4978_v11  ;;  %v5977_v42 = vor.u32 %v7544_v34, %v5976_v32  ;;  %v5705_v49 = vor.u32 %v7476_v43, %v5704_v41  ;;  %v7468_v3 = vld [vmem:[#allocation5 + $0x64c] sm:$0xf0] }
  0x9f   :  { %v5106_v16 = vld [vmem:[#allocation5 + $0x448] sm:$0xf0]  ;;  %v5800_v4 = vld [vmem:[#allocation5 + $0xa10] sm:$0xf]  ;;  %v5673_v10 = vor.u32 %v7468_v3, %v5672_v1  ;;  %v7510_v1 = vld [vmem:[#allocation5 + $0xb94] sm:$0xf] }
  0xa0   :  { %1039 = vmatpush.bf16.msrb.mxu2 %v5285_v50  ;;  %1012 = vmatpush.bf16.msrb.mxu0 %v5013_v60  ;;  %v7339_v17 = vld [vmem:[#allocation5 + $0x80c] sm:$0xf]  ;;  %v5109_v30 = vor.u32 %v7307_v14, %v5106_v16  ;;  %v5833_v50 = vor.u32 %v7508_v45, %v5832_v44  ;;  %v5561_v60 = vor.u32 %v7440_v52, %v5560_v51  ;;  %v7500_v5 = vld [vmem:[#allocation5 + $0xa4c] sm:$0xf0] }
  0xa1   :  { %v5234_v19 = vld [vmem:[#allocation5 + $0x848] sm:$0xf0]  ;;  %v5928_v6 = vld [vmem:[#allocation5 + $0xe10] sm:$0xf]  ;;  %v5801_v11 = vor.u32 %v7500_v5, %v5800_v4  ;;  %v7542_v5 = vld [vmem:[#allocation5 + $0xf94] sm:$0xf] }
  0xa2   :  { %1053 = vmatpush.bf16.msrb.mxu3 %v5413_v54  ;;  %1026 = vmatpush.bf16.msrb.mxu1 %v5141_v61  ;;  %v7371_v20 = vld [vmem:[#allocation5 + $0xc0c] sm:$0xf]  ;;  %v5237_v31 = vor.u32 %v7339_v17, %v5234_v19  ;;  %v5961_v54 = vor.u32 %v7540_v47, %v5960_v46  ;;  %v5689_v61 = vor.u32 %v7472_v55, %v5688_v53  ;;  %v7532_v7 = vld [vmem:[#allocation5 + $0xe4c] sm:$0xf0] }
  0xa3   :  { %v5362_v21 = vld [vmem:[#allocation5 + $0xc48] sm:$0xf0]  ;;  %v5656_v14 = vld [vmem:[#allocation5 + $0x590] sm:$0xf]  ;;  %v5929_v16 = vor.u32 %v7532_v7, %v5928_v6  ;;  %v5978_v6 = vld [vmem:[#allocation5 + $0xfd0] sm:$0xf0] }
  0xa4   :  { %1040 = vmatpush.bf16.msrb.mxu2 %v5269_v62  ;;  %1013 = vmatpush.bf16.msrb.mxu0 %v4997_v9  ;;  %v5365_v35 = vor.u32 %v7371_v20, %v5362_v21  ;;  %v5817_v62 = vor.u32 %v7504_v57, %v5816_v56  ;;  %v5545_v9 = vor.u32 %v7436_v0, %v5544_v63  ;;  %v7464_v17 = vld [vmem:[#allocation5 + $0x5cc] sm:$0xf0]  ;;  %v5722_v0 = vld [vmem:[#allocation5 + $0x7d0] sm:$0xf0] }
  0xa5   :  { %v7496_v19 = vld [vmem:[#allocation5 + $0x9cc] sm:$0xf0]  ;;  %v5657_v23 = vor.u32 %v7464_v17, %v5656_v14  ;;  %v7474_v14 = vld [vmem:[#allocation5 + $0x714] sm:$0xf] }
  0xa6   :  { %1054 = vmatpush.bf16.msrb.mxu3 %v5397_v2  ;;  %1027 = vmatpush.bf16.msrb.mxu1 %v5125_v12  ;;  %v5945_v2 = vor.u32 %v7536_v59, %v5944_v58  ;;  %v5528_v12 = vld [vmem:[#allocation5 + $0x190] sm:$0xf]  ;;  %v5706_v17 = vld [vmem:[#allocation5 + $0x750] sm:$0xf0] }
  0xa7   :  { %v5912_v20 = vld [vmem:[#allocation5 + $0xd90] sm:$0xf] }
  0xa8   :  { %1041 = vmatpush.bf16.msrb.mxu2 %v5253_v13  ;;  %1014 = vmatpush.bf16.msrb.mxu0 %v4981_v25  ;;  %v7432_v13 = vld [vmem:[#allocation5 + $0x1cc] sm:$0xf0] }
  0xa9   :  { %v7528_v21 = vld [vmem:[#allocation5 + $0xdcc] sm:$0xf0]  ;;  %v5529_v22 = vor.u32 %v7432_v13, %v5528_v12  ;;  %v7442_v12 = vld [vmem:[#allocation5 + $0x314] sm:$0xf] }
  0xaa   :  { %1055 = vmatpush.bf16.msrb.mxu3 %v5381_v18  ;;  %1028 = vmatpush.bf16.msrb.mxu1 %v5109_v30  ;;  %v5784_v18 = vld [vmem:[#allocation5 + $0x990] sm:$0xf]  ;;  %v5913_v29 = vor.u32 %v7528_v21, %v5912_v20  ;;  %v5578_v13 = vld [vmem:[#allocation5 + $0x350] sm:$0xf0] }
  0xab   :  { %1015 = vmatmul.bf16.vlgmr.msrb.gmra.mxu0 %v8014_v26  ;;  %v5785_v24 = vor.u32 %v7496_v19, %v5784_v18  ;;  %v5512_v25 = vld [vmem:[#allocation5 + $0x110] sm:$0xf]  ;;  %v7506_v18 = vld [vmem:[#allocation5 + $0xb14] sm:$0xf] }
  0xac   :  { %1042 = vmatpush.bf16.msrb.mxu2 %v5237_v31  ;;  %1925 = vmatpush.bf16.msra.mxu0 %v5593_v36  ;;  %v7428_v27 = vld [vmem:[#allocation5 + $0x14c] sm:$0xf0]  ;;  %v5834_v19 = vld [vmem:[#allocation5 + $0xb50] sm:$0xf0] }
  0xad   :  { %1029 = vmatmul.bf16.vlgmr.msrb.gmra.mxu1 %v8016_v33  ;;  %v5640_v28 = vld [vmem:[#allocation5 + $0x510] sm:$0xf]  ;;  %v5513_v36 = vor.u32 %v7428_v27, %v5512_v25  ;;  %v7538_v20 = vld [vmem:[#allocation5 + $0xf14] sm:$0xf] }
  0xae   :  { %1056 = vmatpush.bf16.msrb.mxu3 %v5365_v35  ;;  %1939 = vmatpush.bf16.msra.mxu1 %v5721_v37  ;;  %v7460_v30 = vld [vmem:[#allocation5 + $0x54c] sm:$0xf0]  ;;  %v5962_v21 = vld [vmem:[#allocation5 + $0xf50] sm:$0xf0] }
  0xaf   :  { %1043 = vmatmul.bf16.vlgmr.msrb.gmra.mxu2 %v8008_v8  ;;  %v5768_v31 = vld [vmem:[#allocation5 + $0x910] sm:$0xf]  ;;  %v5641_v37 = vor.u32 %v7460_v30, %v5640_v28  ;;  %v7438_v25 = vld [vmem:[#allocation5 + $0x294] sm:$0xf] }
  0xb0   :  { %1953 = vmatpush.bf16.msra.mxu2 %v5849_v38  ;;  %1926 = vmatpush.bf16.msra.mxu0 %v5577_v48  ;;  %v7492_v32 = vld [vmem:[#allocation5 + $0x94c] sm:$0xf0]  ;;  %v5562_v27 = vld [vmem:[#allocation5 + $0x2d0] sm:$0xf0] }
  0xb1   :  { %1057 = vmatmul.bf16.vlgmr.msrb.gmra.mxu3 %v8010_v15  ;;  %v5896_v34 = vld [vmem:[#allocation5 + $0xd10] sm:$0xf]  ;;  %v5769_v38 = vor.u32 %v7492_v32, %v5768_v31  ;;  %v7470_v28 = vld [vmem:[#allocation5 + $0x694] sm:$0xf] }
  0xb2   :  { %1967 = vmatpush.bf16.msra.mxu3 %v5977_v42  ;;  %1940 = vmatpush.bf16.msra.mxu1 %v5705_v49  ;;  %v7524_v35 = vld [vmem:[#allocation5 + $0xd4c] sm:$0xf0]  ;;  %v5690_v30 = vld [vmem:[#allocation5 + $0x6d0] sm:$0xf0] }
  0xb3   :  { %v5496_v39 = vld [vmem:[#allocation5 + $0x90] sm:$0xf]  ;;  %v5897_v42 = vor.u32 %v7524_v35, %v5896_v34  ;;  %v7502_v31 = vld [vmem:[#allocation5 + $0xa94] sm:$0xf] }
  0xb4   :  { %1954 = vmatpush.bf16.msra.mxu2 %v5833_v50  ;;  %1927 = vmatpush.bf16.msra.mxu0 %v5561_v60  ;;  %v7424_v40 = vld [vmem:[#allocation5 + $0xcc] sm:$0xf0]  ;;  %v7446_v60 = vld [vmem:[#allocation5 + $0x394] sm:$0xf] }
  0xb5   :  { %v5624_v41 = vld [vmem:[#allocation5 + $0x490] sm:$0xf]  ;;  %v5497_v48 = vor.u32 %v7424_v40, %v5496_v39  ;;  %v5818_v32 = vld [vmem:[#allocation5 + $0xad0] sm:$0xf0] }
  0xb6   :  { %1968 = vmatpush.bf16.msra.mxu3 %v5961_v54  ;;  %1941 = vmatpush.bf16.msra.mxu1 %v5689_v61  ;;  %v7456_v43 = vld [vmem:[#allocation5 + $0x4cc] sm:$0xf0]  ;;  %v5594_v61 = vld [vmem:[#allocation5 + $0x3d0] sm:$0xf0] }
  0xb7   :  { %v5752_v44 = vld [vmem:[#allocation5 + $0x890] sm:$0xf]  ;;  %v5625_v51 = vor.u32 %v7456_v43, %v5624_v41  ;;  %v7534_v34 = vld [vmem:[#allocation5 + $0xe94] sm:$0xf] }
  0xb8   :  { %1955 = vmatpush.bf16.msra.mxu2 %v5817_v62  ;;  %1928 = vmatpush.bf16.msra.mxu0 %v5545_v9  ;;  %v7488_v45 = vld [vmem:[#allocation5 + $0x8cc] sm:$0xf0]  ;;  %v7478_v62 = vld [vmem:[#allocation5 + $0x794] sm:$0xf]  ;;  %v5597_v9 = vor.u32 %v7446_v60, %v5594_v61 }
  0xb9   :  { %v5880_v46 = vld [vmem:[#allocation5 + $0xc90] sm:$0xf]  ;;  %v5753_v52 = vor.u32 %v7488_v45, %v5752_v44  ;;  %v5946_v35 = vld [vmem:[#allocation5 + $0xed0] sm:$0xf0] }
  0xba   :  { %1969 = vmatpush.bf16.msra.mxu3 %v5945_v2  ;;  %1942 = vmatpush.bf16.msra.mxu1 %v5673_v10  ;;  %v7520_v47 = vld [vmem:[#allocation5 + $0xccc] sm:$0xf0]  ;;  %v5850_v2 = vld [vmem:[#allocation5 + $0xbd0] sm:$0xf0]  ;;  %v5725_v10 = vor.u32 %v7478_v62, %v5722_v0 }
  0xbb   :  { %v5480_v49 = vld [vmem:[#allocation5 + $0x10] sm:$0xf]  ;;  %v5881_v56 = vor.u32 %v7520_v47, %v5880_v46  ;;  %v7434_v39 = vld [vmem:[#allocation5 + $0x214] sm:$0xf] }
  0xbc   :  { %1956 = vmatpush.bf16.msra.mxu2 %v5801_v11  ;;  %1929 = vmatpush.bf16.msra.mxu0 %v5529_v22  ;;  %v7420_v50 = vld [vmem:[#allocation5 + $0x4c] sm:$0xf0]  ;;  %v5853_v11 = vor.u32 %v7510_v1, %v5850_v2  ;;  %v5581_v22 = vor.u32 %v7442_v12, %v5578_v13  ;;  %v5546_v40 = vld [vmem:[#allocation5 + $0x250] sm:$0xf0] }
  0xbd   :  { %v5608_v53 = vld [vmem:[#allocation5 + $0x410] sm:$0xf]  ;;  %v5481_v63 = vor.u32 %v7420_v50, %v5480_v49  ;;  %v7466_v41 = vld [vmem:[#allocation5 + $0x614] sm:$0xf] }
  0xbe   :  { %1970 = vmatpush.bf16.msra.mxu3 %v5929_v16  ;;  %1943 = vmatpush.bf16.msra.mxu1 %v5657_v23  ;;  %v7452_v54 = vld [vmem:[#allocation5 + $0x44c] sm:$0xf0]  ;;  %v5981_v16 = vor.u32 %v7542_v5, %v5978_v6  ;;  %v5709_v23 = vor.u32 %v7474_v14, %v5706_v17  ;;  %v5674_v43 = vld [vmem:[#allocation5 + $0x650] sm:$0xf0] }
  0xbf   :  { %v5736_v55 = vld [vmem:[#allocation5 + $0x810] sm:$0xf]  ;;  %v5609_v3 = vor.u32 %v7452_v54, %v5608_v53  ;;  %v7498_v44 = vld [vmem:[#allocation5 + $0xa14] sm:$0xf]  ;;  %v5677_v49 = vor.u32 %v7466_v41, %v5674_v43  ;;  %v5856_v41 = vld [vmem:[#allocation5 + $0xb98] sm:$0xf] }
  0xc0   :  { %1957 = vmatpush.bf16.msra.mxu2 %v5785_v24  ;;  %1930 = vmatpush.bf16.msra.mxu0 %v5513_v36  ;;  %v7484_v57 = vld [vmem:[#allocation5 + $0x84c] sm:$0xf0]  ;;  %v5837_v24 = vor.u32 %v7506_v18, %v5834_v19  ;;  %v5565_v36 = vor.u32 %v7438_v25, %v5562_v27  ;;  %v5802_v45 = vld [vmem:[#allocation5 + $0xa50] sm:$0xf0] }
  0xc1   :  { %v5864_v58 = vld [vmem:[#allocation5 + $0xc10] sm:$0xf]  ;;  %v5737_v4 = vor.u32 %v7484_v57, %v5736_v55  ;;  %v7530_v46 = vld [vmem:[#allocation5 + $0xe14] sm:$0xf]  ;;  %v5805_v50 = vor.u32 %v7498_v44, %v5802_v45  ;;  %v5984_v45 = vld [vmem:[#allocation5 + $0xf98] sm:$0xf] }
  0xc2   :  { %1971 = vmatpush.bf16.msra.mxu3 %v5913_v29  ;;  %1944 = vmatpush.bf16.msra.mxu1 %v5641_v37  ;;  %v7516_v59 = vld [vmem:[#allocation5 + $0xc4c] sm:$0xf0]  ;;  %v5965_v29 = vor.u32 %v7538_v20, %v5962_v21  ;;  %v5693_v37 = vor.u32 %v7470_v28, %v5690_v30  ;;  %v5930_v47 = vld [vmem:[#allocation5 + $0xe50] sm:$0xf0] }
  0xc3   :  { %v5865_v7 = vor.u32 %v7516_v59, %v5864_v58  ;;  %v7462_v53 = vld [vmem:[#allocation5 + $0x594] sm:$0xf]  ;;  %v5933_v54 = vor.u32 %v7530_v46, %v5930_v47  ;;  %v7545_v46 = vld [vmem:[#allocation5 + $0xfd4] sm:$0xf0] }
  0xc4   :  { %1958 = vmatpush.bf16.msra.mxu2 %v5769_v38  ;;  %1931 = vmatpush.bf16.msra.mxu0 %v5497_v48  ;;  %v5821_v38 = vor.u32 %v7502_v31, %v5818_v32  ;;  %v5549_v48 = vor.u32 %v7434_v39, %v5546_v40  ;;  %v5658_v55 = vld [vmem:[#allocation5 + $0x5d0] sm:$0xf0]  ;;  %v7481_v40 = vld [vmem:[#allocation5 + $0x7d4] sm:$0xf0] }
  0xc5   :  { %v5786_v57 = vld [vmem:[#allocation5 + $0x9d0] sm:$0xf0]  ;;  %v5661_v61 = vor.u32 %v7462_v53, %v5658_v55  ;;  %v5712_v53 = vld [vmem:[#allocation5 + $0x718] sm:$0xf] }
  0xc6   :  { %1972 = vmatpush.bf16.msra.mxu3 %v5897_v42  ;;  %1945 = vmatpush.bf16.msra.mxu1 %v5625_v51  ;;  %v5949_v42 = vor.u32 %v7534_v34, %v5946_v35  ;;  %v7430_v51 = vld [vmem:[#allocation5 + $0x194] sm:$0xf]  ;;  %v7477_v55 = vld [vmem:[#allocation5 + $0x754] sm:$0xf0] }
  0xc7   :  { %v7526_v58 = vld [vmem:[#allocation5 + $0xd94] sm:$0xf] }
  0xc8   :  { %1959 = vmatpush.bf16.msra.mxu2 %v5753_v52  ;;  %1932 = vmatpush.bf16.msra.mxu0 %v5481_v63  ;;  %v5530_v52 = vld [vmem:[#allocation5 + $0x1d0] sm:$0xf0] }
  0xc9   :  { %v5914_v59 = vld [vmem:[#allocation5 + $0xdd0] sm:$0xf0]  ;;  %v5533_v60 = vor.u32 %v7430_v51, %v5530_v52  ;;  %v5584_v51 = vld [vmem:[#allocation5 + $0x318] sm:$0xf] }
  0xca   :  { %1973 = vmatpush.bf16.msra.mxu3 %v5881_v56  ;;  %1946 = vmatpush.bf16.msra.mxu1 %v5609_v3  ;;  %v7494_v56 = vld [vmem:[#allocation5 + $0x994] sm:$0xf]  ;;  %v5917_v2 = vor.u32 %v7526_v58, %v5914_v59  ;;  %v7445_v52 = vld [vmem:[#allocation5 + $0x354] sm:$0xf0] }
  0xcb   :  { %1933 = vmatmul.bf16.vlgmr.msra.gmra.mxu0 %v8014_v26  ;;  %v5789_v62 = vor.u32 %v7494_v56, %v5786_v57  ;;  %v7426_v63 = vld [vmem:[#allocation5 + $0x114] sm:$0xf]  ;;  %v5840_v56 = vld [vmem:[#allocation5 + $0xb18] sm:$0xf] }
  0xcc   :  { %1960 = vmatpush.bf16.msra.mxu2 %v5737_v4  ;;  %1981 = vmatpush.bf16.msrb.mxu0 %v5597_v9  ;;  %v5514_v0 = vld [vmem:[#allocation5 + $0x150] sm:$0xf0]  ;;  %v7509_v57 = vld [vmem:[#allocation5 + $0xb54] sm:$0xf0] }
  0xcd   :  { %1947 = vmatmul.bf16.vlgmr.msra.gmra.mxu1 %v8016_v33  ;;  %v7458_v1 = vld [vmem:[#allocation5 + $0x514] sm:$0xf]  ;;  %v5517_v9 = vor.u32 %v7426_v63, %v5514_v0  ;;  %v5968_v58 = vld [vmem:[#allocation5 + $0xf18] sm:$0xf]  ;;  %v5841_v63 = vor.u32 %v7509_v57, %v5840_v56 }
  0xce   :  { %1974 = vmatpush.bf16.msra.mxu3 %v5865_v7  ;;  %1995 = vmatpush.bf16.msrb.mxu1 %v5725_v10  ;;  %v5642_v3 = vld [vmem:[#allocation5 + $0x550] sm:$0xf0]  ;;  %v7541_v59 = vld [vmem:[#allocation5 + $0xf54] sm:$0xf0]  ;;  %v8038_v0 = vpop.f32.mrf.mxu1 }
  0xcf   :  { %1961 = vmatmul.bf16.vlgmr.msra.gmra.mxu2 %v8008_v8  ;;  %v7490_v4 = vld [vmem:[#allocation5 + $0x914] sm:$0xf]  ;;  %v5645_v10 = vor.u32 %v7458_v1, %v5642_v3  ;;  %v5568_v1 = vld [vmem:[#allocation5 + $0x298] sm:$0xf] }
  0xd0   :  { %2009 = vmatpush.bf16.msrb.mxu2 %v5853_v11  ;;  %1982 = vmatpush.bf16.msrb.mxu0 %v5581_v22  ;;  %v5770_v5 = vld [vmem:[#allocation5 + $0x950] sm:$0xf0]  ;;  %v5696_v3 = vld [vmem:[#allocation5 + $0x698] sm:$0xf] }
  0xd1   :  { %1975 = vmatmul.bf16.vlgmr.msra.gmra.mxu3 %v8010_v15  ;;  %v7522_v6 = vld [vmem:[#allocation5 + $0xd14] sm:$0xf]  ;;  %v5773_v11 = vor.u32 %v7490_v4, %v5770_v5  ;;  %v5969_v4 = vor.u32 %v7541_v59, %v5968_v58  ;;  %v7473_v5 = vld [vmem:[#allocation5 + $0x6d4] sm:$0xf0] }
  0xd2   :  { %2023 = vmatpush.bf16.msrb.mxu3 %v5981_v16  ;;  %1996 = vmatpush.bf16.msrb.mxu1 %v5709_v23  ;;  %v5898_v7 = vld [vmem:[#allocation5 + $0xd50] sm:$0xf0]  ;;  %v5504_v59 = vld [vmem:[#allocation5 + $0x98] sm:$0xf] }
  0xd3   :  { %v7422_v12 = vld [vmem:[#allocation5 + $0x94] sm:$0xf]  ;;  %v5901_v16 = vor.u32 %v7522_v6, %v5898_v7  ;;  %v5824_v6 = vld [vmem:[#allocation5 + $0xa98] sm:$0xf] }
  0xd4   :  { %2010 = vmatpush.bf16.msrb.mxu2 %v5837_v24  ;;  %1983 = vmatpush.bf16.msrb.mxu0 %v5565_v36  ;;  %v5498_v13 = vld [vmem:[#allocation5 + $0xd0] sm:$0xf0]  ;;  %v5600_v36 = vld [vmem:[#allocation5 + $0x398] sm:$0xf] }
  0xd5   :  { %v7454_v14 = vld [vmem:[#allocation5 + $0x494] sm:$0xf]  ;;  %v5501_v22 = vor.u32 %v7422_v12, %v5498_v13  ;;  %v7505_v7 = vld [vmem:[#allocation5 + $0xad4] sm:$0xf0]  ;;  %v8044_v12 = vpop.f32.mrf.mxu2  ;;  %v5697_v13 = vor.u32 %v7473_v5, %v5696_v3 }
  0xd6   :  { %2024 = vmatpush.bf16.msrb.mxu3 %v5965_v29  ;;  %1997 = vmatpush.bf16.msrb.mxu1 %v5693_v37  ;;  %v5626_v17 = vld [vmem:[#allocation5 + $0x4d0] sm:$0xf0]  ;;  %v7449_v37 = vld [vmem:[#allocation5 + $0x3d4] sm:$0xf0] }
  0xd7   :  { %v7486_v18 = vld [vmem:[#allocation5 + $0x894] sm:$0xf]  ;;  %v5629_v25 = vor.u32 %v7454_v14, %v5626_v17  ;;  %v5825_v14 = vor.u32 %v7505_v7, %v5824_v6  ;;  %v7437_v17 = vld [vmem:[#allocation5 + $0x254] sm:$0xf0] }
  0xd8   :  { %2011 = vmatpush.bf16.msrb.mxu2 %v5821_v38  ;;  %1984 = vmatpush.bf16.msrb.mxu0 %v5549_v48  ;;  %v5754_v19 = vld [vmem:[#allocation5 + $0x8d0] sm:$0xf0]  ;;  %v5728_v38 = vld [vmem:[#allocation5 + $0x798] sm:$0xf]  ;;  %v5601_v48 = vor.u32 %v7449_v37, %v5600_v36 }
  0xd9   :  { %v7518_v20 = vld [vmem:[#allocation5 + $0xc94] sm:$0xf]  ;;  %v5757_v27 = vor.u32 %v7486_v18, %v5754_v19  ;;  %v5680_v18 = vld [vmem:[#allocation5 + $0x618] sm:$0xf] }
  0xda   :  { %2025 = vmatpush.bf16.msrb.mxu3 %v5949_v42  ;;  %1998 = vmatpush.bf16.msrb.mxu1 %v5677_v49  ;;  %v5882_v21 = vld [vmem:[#allocation5 + $0xcd0] sm:$0xf0]  ;;  %v7513_v42 = vld [vmem:[#allocation5 + $0xbd4] sm:$0xf0]  ;;  %v5729_v49 = vor.u32 %v7481_v40, %v5728_v38 }
  0xdb   :  { %v7418_v23 = vld [vmem:[#allocation5 + $0x14] sm:$0xf]  ;;  %v5885_v31 = vor.u32 %v7518_v20, %v5882_v21  ;;  %v8046_v20 = vpop.f32.mrf.mxu3  ;;  %v7469_v21 = vld [vmem:[#allocation5 + $0x654] sm:$0xf0] }
  0xdc   :  { %2012 = vmatpush.bf16.msrb.mxu2 %v5805_v50  ;;  %1985 = vmatpush.bf16.msrb.mxu0 %v5533_v60  ;;  %v5482_v24 = vld [vmem:[#allocation5 + $0x50] sm:$0xf0]  ;;  %v5857_v50 = vor.u32 %v7513_v42, %v5856_v41  ;;  %v5585_v60 = vor.u32 %v7445_v52, %v5584_v51  ;;  %v7465_v36 = vld [vmem:[#allocation5 + $0x5d4] sm:$0xf0] }
  0xdd   :  { %v7450_v28 = vld [vmem:[#allocation5 + $0x414] sm:$0xf]  ;;  %v5485_v39 = vor.u32 %v7418_v23, %v5482_v24  ;;  %v7501_v23 = vld [vmem:[#allocation5 + $0xa54] sm:$0xf0]  ;;  %v8052_v52 = vpop.f32.mrf.mxu2 }
  0xde   :  { %2026 = vmatpush.bf16.msrb.mxu3 %v5933_v54  ;;  %1999 = vmatpush.bf16.msrb.mxu1 %v5661_v61  ;;  %v5610_v29 = vld [vmem:[#allocation5 + $0x450] sm:$0xf0]  ;;  %v5985_v54 = vor.u32 %v7545_v46, %v5984_v45  ;;  %v8036_v61 = vpop.f32.mrf.mxu0  ;;  %v5936_v24 = vld [vmem:[#allocation5 + $0xe18] sm:$0xf] }
  0xdf   :  { %v7482_v30 = vld [vmem:[#allocation5 + $0x814] sm:$0xf]  ;;  %v5613_v43 = vor.u32 %v7450_v28, %v5610_v29  ;;  %v5681_v28 = vor.u32 %v7469_v21, %v5680_v18  ;;  %v5792_v37 = vld [vmem:[#allocation5 + $0x998] sm:$0xf] }
  0xe0   :  { %2013 = vmatpush.bf16.msrb.mxu2 %v5789_v62  ;;  %1986 = vmatpush.bf16.msrb.mxu0 %v5517_v9  ;;  %v5738_v32 = vld [vmem:[#allocation5 + $0x850] sm:$0xf0]  ;;  %v5713_v62 = vor.u32 %v7477_v55, %v5712_v53  ;;  %v5952_v9 = vld [vmem:[#allocation5 + $0xe98] sm:$0xf] }
  0xe1   :  { %v7514_v34 = vld [vmem:[#allocation5 + $0xc14] sm:$0xf]  ;;  %v5741_v44 = vor.u32 %v7482_v30, %v5738_v32  ;;  %v5536_v30 = vld [vmem:[#allocation5 + $0x198] sm:$0xf] }
  0xe2   :  { %2027 = vmatpush.bf16.msrb.mxu3 %v5917_v2  ;;  %2000 = vmatpush.bf16.msrb.mxu1 %v5645_v10  ;;  %v5866_v35 = vld [vmem:[#allocation5 + $0xc50] sm:$0xf0]  ;;  %v7441_v2 = vld [vmem:[#allocation5 + $0x2d4] sm:$0xf0] }
  0xe3   :  { %v5869_v47 = vor.u32 %v7514_v34, %v5866_v35  ;;  %v7537_v10 = vld [vmem:[#allocation5 + $0xed4] sm:$0xf0]  ;;  %v8054_v55 = vpop.f32.mrf.mxu3 }
  0xe4   :  { %2014 = vmatpush.bf16.msrb.mxu2 %v5773_v11  ;;  %1987 = vmatpush.bf16.msrb.mxu0 %v5501_v22  ;;  %v5569_v11 = vor.u32 %v7441_v2, %v5568_v1  ;;  %v5953_v19 = vor.u32 %v7537_v10, %v5952_v9  ;;  %v5808_v22 = vld [vmem:[#allocation5 + $0xa18] sm:$0xf] }
  0xe5   :  { %v5809_v29 = vor.u32 %v7501_v23, %v5808_v22  ;;  %v5664_v32 = vld [vmem:[#allocation5 + $0x598] sm:$0xf] }
  0xe6   :  { %2028 = vmatpush.bf16.msrb.mxu3 %v5901_v16  ;;  %2001 = vmatpush.bf16.msrb.mxu1 %v5629_v25  ;;  %v5552_v16 = vld [vmem:[#allocation5 + $0x218] sm:$0xf]  ;;  %v8048_v35 = vpop.f32.mrf.mxu0 }
  0xe7   :  { %v7533_v25 = vld [vmem:[#allocation5 + $0xe54] sm:$0xf0] }
  0xe8   :  { %2015 = vmatpush.bf16.msrb.mxu2 %v5757_v27  ;;  %1988 = vmatpush.bf16.msrb.mxu0 %v5485_v39  ;;  %v5553_v27 = vor.u32 %v7437_v17, %v5552_v16  ;;  %v5937_v34 = vor.u32 %v7533_v25, %v5936_v24  ;;  %v7497_v38 = vld [vmem:[#allocation5 + $0x9d4] sm:$0xf0]  ;;  %v8050_v39 = vpop.f32.mrf.mxu1  ;;  %v7447_v24 = vld [vmem:[#allocation5 + $0x39c] sm:$0xf] }
  0xe9   :  { %v5920_v40 = vld [vmem:[#allocation5 + $0xd98] sm:$0xf]  ;;  %v5602_v25 = vld [vmem:[#allocation5 + $0x3d8] sm:$0xf0] }
  0xea   :  { %2029 = vmatpush.bf16.msrb.mxu3 %v5885_v31  ;;  %2002 = vmatpush.bf16.msrb.mxu1 %v5613_v43  ;;  %v7433_v31 = vld [vmem:[#allocation5 + $0x1d4] sm:$0xf0]  ;;  %v5665_v43 = vor.u32 %v7465_v36, %v5664_v32  ;;  %v5858_v32 = vld [vmem:[#allocation5 + $0xbd8] sm:$0xf0] }
  0xeb   :  { %1989 = vmatmul.bf16.vlgmr.msrb.gmra.mxu0 %v8014_v26  ;;  %v7529_v41 = vld [vmem:[#allocation5 + $0xdd4] sm:$0xf0]  ;;  %v5537_v42 = vor.u32 %v7433_v31, %v5536_v30  ;;  %v5730_v30 = vld [vmem:[#allocation5 + $0x7d8] sm:$0xf0] }
  0xec   :  { %2016 = vmatpush.bf16.msrb.mxu2 %v5741_v44  ;;  %2037 = vmatpush.bf16.msra.mxu0 %v5601_v48  ;;  %v5793_v44 = vor.u32 %v7497_v38, %v5792_v37  ;;  %v5520_v45 = vld [vmem:[#allocation5 + $0x118] sm:$0xf]  ;;  %v5921_v48 = vor.u32 %v7529_v41, %v5920_v40  ;;  %v7511_v31 = vld [vmem:[#allocation5 + $0xb9c] sm:$0xf] }
  0xed   :  { %2003 = vmatmul.bf16.vlgmr.msrb.gmra.mxu1 %v8016_v33  ;;  %v7429_v46 = vld [vmem:[#allocation5 + $0x154] sm:$0xf0]  ;;  %v7543_v38 = vld [vmem:[#allocation5 + $0xf9c] sm:$0xf] }
  0xee   :  { %2030 = vmatpush.bf16.msrb.mxu3 %v5869_v47  ;;  %2051 = vmatpush.bf16.msra.mxu1 %v5729_v49  ;;  %v5648_v47 = vld [vmem:[#allocation5 + $0x518] sm:$0xf]  ;;  %v5521_v56 = vor.u32 %v7429_v46, %v5520_v45  ;;  %v5986_v40 = vld [vmem:[#allocation5 + $0xfd8] sm:$0xf0] }
  0xef   :  { %2017 = vmatmul.bf16.vlgmr.msrb.gmra.mxu2 %v8008_v8  ;;  %v7461_v49 = vld [vmem:[#allocation5 + $0x554] sm:$0xf0]  ;;  %v7443_v45 = vld [vmem:[#allocation5 + $0x31c] sm:$0xf] }
  0xf0   :  { %2065 = vmatpush.bf16.msra.mxu2 %v5857_v50  ;;  %2038 = vmatpush.bf16.msra.mxu0 %v5585_v60  ;;  %v5776_v50 = vld [vmem:[#allocation5 + $0x918] sm:$0xf]  ;;  %v5649_v57 = vor.u32 %v7461_v49, %v5648_v47  ;;  %v8058_v7 = vpop.f32.mrf.mxu1  ;;  %v5586_v46 = vld [vmem:[#allocation5 + $0x358] sm:$0xf0] }
  0xf1   :  { %2031 = vmatmul.bf16.vlgmr.msrb.gmra.mxu3 %v8010_v15  ;;  %v7493_v51 = vld [vmem:[#allocation5 + $0x954] sm:$0xf0]  ;;  %v7475_v47 = vld [vmem:[#allocation5 + $0x71c] sm:$0xf] }
  0xf2   :  { %2079 = vmatpush.bf16.msra.mxu3 %v5985_v54  ;;  %2052 = vmatpush.bf16.msra.mxu1 %v5713_v62  ;;  %v5904_v53 = vld [vmem:[#allocation5 + $0xd18] sm:$0xf]  ;;  %v5777_v58 = vor.u32 %v7493_v51, %v5776_v50  ;;  %v5714_v49 = vld [vmem:[#allocation5 + $0x758] sm:$0xf0] }
  0xf3   :  { %v7525_v54 = vld [vmem:[#allocation5 + $0xd54] sm:$0xf0]  ;;  %v7507_v50 = vld [vmem:[#allocation5 + $0xb1c] sm:$0xf] }
  0xf4   :  { %2066 = vmatpush.bf16.msra.mxu2 %v5841_v63  ;;  %2039 = vmatpush.bf16.msra.mxu0 %v5569_v11  ;;  %v7425_v60 = vld [vmem:[#allocation5 + $0xd4] sm:$0xf0]  ;;  %v5905_v63 = vor.u32 %v7525_v54, %v5904_v53  ;;  %v5842_v51 = vld [vmem:[#allocation5 + $0xb58] sm:$0xf0] }
  0xf5   :  { %v5632_v62 = vld [vmem:[#allocation5 + $0x498] sm:$0xf]  ;;  %v5505_v9 = vor.u32 %v7425_v60, %v5504_v59  ;;  %v7539_v54 = vld [vmem:[#allocation5 + $0xf1c] sm:$0xf]  ;;  %v5717_v59 = vor.u32 %v7475_v47, %v5714_v49  ;;  %v5845_v60 = vor.u32 %v7507_v50, %v5842_v51 }
  0xf6   :  { %2080 = vmatpush.bf16.msra.mxu3 %v5969_v4  ;;  %2053 = vmatpush.bf16.msra.mxu1 %v5697_v13  ;;  %v7457_v1 = vld [vmem:[#allocation5 + $0x4d4] sm:$0xf0]  ;;  %v8056_v4 = vpop.f32.mrf.mxu0  ;;  %v7527_v47 = vld [vmem:[#allocation5 + $0xd9c] sm:$0xf] }
  0xf7   :  { %v5760_v2 = vld [vmem:[#allocation5 + $0x898] sm:$0xf]  ;;  %v5633_v13 = vor.u32 %v7457_v1, %v5632_v62  ;;  %v7439_v62 = vld [vmem:[#allocation5 + $0x29c] sm:$0xf] }
  0xf8   :  { %2067 = vmatpush.bf16.msra.mxu2 %v5825_v14  ;;  %2040 = vmatpush.bf16.msra.mxu0 %v5553_v27  ;;  %v7489_v3 = vld [vmem:[#allocation5 + $0x8d4] sm:$0xf0]  ;;  %v7479_v27 = vld [vmem:[#allocation5 + $0x79c] sm:$0xf] }
  0xf9   :  { %v5888_v5 = vld [vmem:[#allocation5 + $0xc98] sm:$0xf]  ;;  %v5761_v14 = vor.u32 %v7489_v3, %v5760_v2  ;;  %v7471_v1 = vld [vmem:[#allocation5 + $0x69c] sm:$0xf] }
  0xfa   :  { %2081 = vmatpush.bf16.msra.mxu3 %v5953_v19  ;;  %2054 = vmatpush.bf16.msra.mxu1 %v5681_v28  ;;  %v7521_v6 = vld [vmem:[#allocation5 + $0xcd4] sm:$0xf0]  ;;  %v8060_v28 = vpop.f32.mrf.mxu2  ;;  %v5698_v3 = vld [vmem:[#allocation5 + $0x6d8] sm:$0xf0] }
  0xfb   :  { %v5488_v10 = vld [vmem:[#allocation5 + $0x18] sm:$0xf]  ;;  %v5889_v19 = vor.u32 %v7521_v6, %v5888_v5  ;;  %v7503_v5 = vld [vmem:[#allocation5 + $0xa9c] sm:$0xf] }
  0xfc   :  { %2068 = vmatpush.bf16.msra.mxu2 %v5809_v29  ;;  %2041 = vmatpush.bf16.msra.mxu0 %v5537_v42  ;;  %v7421_v11 = vld [vmem:[#allocation5 + $0x54] sm:$0xf0]  ;;  %v5605_v42 = vor.u32 %v7447_v24, %v5602_v25  ;;  %v5826_v6 = vld [vmem:[#allocation5 + $0xad8] sm:$0xf0] }
  0xfd   :  { %v5616_v16 = vld [vmem:[#allocation5 + $0x418] sm:$0xf]  ;;  %v5489_v29 = vor.u32 %v7421_v11, %v5488_v10  ;;  %v5954_v10 = vld [vmem:[#allocation5 + $0xed8] sm:$0xf0] }
  0xfe   :  { %2082 = vmatpush.bf16.msra.mxu3 %v5937_v34  ;;  %2055 = vmatpush.bf16.msra.mxu1 %v5665_v43  ;;  %v7453_v17 = vld [vmem:[#allocation5 + $0x454] sm:$0xf0]  ;;  %v8062_v34 = vpop.f32.mrf.mxu3  ;;  %v5733_v43 = vor.u32 %v7479_v27, %v5730_v30  ;;  %v8064_v53 = vpop.f32.mrf.mxu0  ;;  %v5682_v24 = vld [vmem:[#allocation5 + $0x658] sm:$0xf0] }
  0xff   :  { %v5744_v18 = vld [vmem:[#allocation5 + $0x818] sm:$0xf]  ;;  %v5617_v36 = vor.u32 %v7453_v17, %v5616_v16  ;;  %v863_v16 = vadd.f32 %v8038_v0, %v8036_v61  ;;  %v5701_v17 = vor.u32 %v7471_v1, %v5698_v3  ;;  %v7499_v25 = vld [vmem:[#allocation5 + $0xa1c] sm:$0xf] }
 0x100   :  { %2069 = vmatpush.bf16.msra.mxu2 %v5793_v44  ;;  %2042 = vmatpush.bf16.msra.mxu0 %v5521_v56  ;;  %v7485_v21 = vld [vmem:[#allocation5 + $0x854] sm:$0xf0]  ;;  %v5861_v44 = vor.u32 %v7511_v31, %v5858_v32  ;;  %v5970_v56 = vld [vmem:[#allocation5 + $0xf58] sm:$0xf0] }
 0x101   :  { %v5872_v22 = vld [vmem:[#allocation5 + $0xc18] sm:$0xf]  ;;  %v5745_v37 = vor.u32 %v7485_v21, %v5744_v18  ;;  %v5973_v2 = vor.u32 %v7539_v54, %v5970_v56  ;;  %v5829_v18 = vor.u32 %v7503_v5, %v5826_v6  ;;  %v5554_v21 = vld [vmem:[#allocation5 + $0x258] sm:$0xf0] }
 0x102   :  { %2083 = vmatpush.bf16.msra.mxu3 %v5921_v48  ;;  %2056 = vmatpush.bf16.msra.mxu1 %v5649_v57  ;;  %v7517_v23 = vld [vmem:[#allocation5 + $0xc54] sm:$0xf0]  ;;  %v5989_v48 = vor.u32 %v7543_v38, %v5986_v40  ;;  %v8066_v57 = vpop.f32.mrf.mxu1  ;;  %v8071_v11 = vpop.f32.mrf.mxu2  ;;  %v5810_v27 = vld [vmem:[#allocation5 + $0xa58] sm:$0xf0] }
 0x103   :  { %v5873_v41 = vor.u32 %v7517_v23, %v5872_v22  ;;  %v7467_v22 = vld [vmem:[#allocation5 + $0x61c] sm:$0xf]  ;;  %v5813_v0 = vor.u32 %v7499_v25, %v5810_v27 }
 0x104   :  { %2070 = vmatpush.bf16.msra.mxu2 %v5777_v58  ;;  %2043 = vmatpush.bf16.msra.mxu0 %v5505_v9  ;;  %v5589_v58 = vor.u32 %v7443_v45, %v5586_v46  ;;  %v7535_v9 = vld [vmem:[#allocation5 + $0xe9c] sm:$0xf]  ;;  %v5685_v61 = vor.u32 %v7467_v22, %v5682_v24 }
 0x105   :  { %v5957_v23 = vor.u32 %v7535_v9, %v5954_v10  ;;  %v5938_v30 = vld [vmem:[#allocation5 + $0xe58] sm:$0xf0] }
 0x106   :  { %2084 = vmatpush.bf16.msra.mxu3 %v5905_v63  ;;  %2057 = vmatpush.bf16.msra.mxu1 %v5633_v13  ;;  %v5570_v63 = vld [vmem:[#allocation5 + $0x2d8] sm:$0xf0] }
 0x107   :  { %v5573_v13 = vor.u32 %v7439_v62, %v5570_v63  ;;  %v7431_v38 = vld [vmem:[#allocation5 + $0x19c] sm:$0xf] }
 0x108   :  { %2071 = vmatpush.bf16.msra.mxu2 %v5761_v14  ;;  %2044 = vmatpush.bf16.msra.mxu0 %v5489_v29  ;;  %v8074_v14 = vpop.f32.mrf.mxu3  ;;  %v7531_v29 = vld [vmem:[#allocation5 + $0xe1c] sm:$0xf]  ;;  %v960_v32 = vpop.f32.mrf.mxu0 }
 0x109   :  { %v5538_v40 = vld [vmem:[#allocation5 + $0x1d8] sm:$0xf0] }
 0x10a   :  { %2085 = vmatpush.bf16.msra.mxu3 %v5889_v19  ;;  %2058 = vmatpush.bf16.msra.mxu1 %v5617_v36  ;;  %v7435_v19 = vld [vmem:[#allocation5 + $0x21c] sm:$0xf]  ;;  %v877_v36 = vadd.f32 %v8044_v12, %v863_v16  ;;  %v5541_v49 = vor.u32 %v7431_v38, %v5538_v40 }
 0x10b   :  { %2045 = vmatmul.bf16.vlgmr.msra.gmra.mxu0 %v8014_v26  ;;  %v5557_v31 = vor.u32 %v7435_v19, %v5554_v21  ;;  %v7495_v45 = vld [vmem:[#allocation5 + $0x99c] sm:$0xf] }
 0x10c   :  { %2072 = vmatpush.bf16.msra.mxu2 %v5745_v37  ;;  %2093 = vmatpush.bf16.msrb.mxu0 %v5605_v42  ;;  %v974_v37 = vpop.f32.mrf.mxu1  ;;  %v5941_v42 = vor.u32 %v7531_v29, %v5938_v30  ;;  %v5794_v46 = vld [vmem:[#allocation5 + $0x9d8] sm:$0xf0]  ;;  %v891_v12 = vadd.f32 %v8046_v20, %v877_v36 }
 0x10d   :  { %2059 = vmatmul.bf16.vlgmr.msra.gmra.mxu1 %v8016_v33  ;;  %v5797_v51 = vor.u32 %v7495_v45, %v5794_v46  ;;  %v7427_v56 = vld [vmem:[#allocation5 + $0x11c] sm:$0xf] }
 0x10e   :  { %2086 = vmatpush.bf16.msra.mxu3 %v5873_v41  ;;  %2107 = vmatpush.bf16.msrb.mxu1 %v5733_v43  ;;  %v7463_v41 = vld [vmem:[#allocation5 + $0x59c] sm:$0xf]  ;;  %v975_v43 = vadd.f32 %v974_v37, %v960_v32  ;;  %v1063_v16 = vmul.f32 %v891_v12, %v891_v12 }
 0x10f   :  { %2073 = vmatmul.bf16.vlgmr.msra.gmra.mxu2 %v8008_v8  ;;  %v7491_v3 = vld [vmem:[#allocation5 + $0x91c] sm:$0xf] }
 0x110   :  { %2121 = vmatpush.bf16.msrb.mxu2 %v5861_v44  ;;  %2094 = vmatpush.bf16.msrb.mxu0 %v5589_v58  ;;  %v5666_v44 = vld [vmem:[#allocation5 + $0x5d8] sm:$0xf0] }
 0x111   :  { %2087 = vmatmul.bf16.vlgmr.msra.gmra.mxu3 %v8010_v15  ;;  %v5669_v50 = vor.u32 %v7463_v41, %v5666_v44  ;;  %v5522_v58 = vld [vmem:[#allocation5 + $0x158] sm:$0xf0] }
 0x112   :  { %2135 = vmatpush.bf16.msrb.mxu3 %v5989_v48  ;;  %2108 = vmatpush.bf16.msrb.mxu1 %v5717_v59  ;;  %v5922_v48 = vld [vmem:[#allocation5 + $0xdd8] sm:$0xf0]  ;;  %v988_v54 = vpop.f32.mrf.mxu2  ;;  %v5525_v10 = vor.u32 %v7427_v56, %v5522_v58 }
 0x113   :  { %v7459_v59 = vld [vmem:[#allocation5 + $0x51c] sm:$0xf]  ;;  %v5925_v62 = vor.u32 %v7527_v47, %v5922_v48  ;;  %v989_v63 = vadd.f32 %v988_v54, %v975_v43 }
 0x114   :  { %2122 = vmatpush.bf16.msrb.mxu2 %v5845_v60  ;;  %2095 = vmatpush.bf16.msrb.mxu0 %v5573_v13  ;;  %v865_v60 = vadd.f32 %v8050_v39, %v8048_v35  ;;  %v1002_v1 = vpop.f32.mrf.mxu3  ;;  %v5778_v5 = vld [vmem:[#allocation5 + $0x958] sm:$0xf0]  ;;  %v962_v13 = vpop.f32.mrf.mxu0 }
 0x115   :  { %v7523_v6 = vld [vmem:[#allocation5 + $0xd1c] sm:$0xf]  ;;  %v1003_v9 = vadd.f32 %v1002_v1, %v989_v63  ;;  %v976_v19 = vpop.f32.mrf.mxu1 }
 0x116   :  { %2136 = vmatpush.bf16.msrb.mxu3 %v5973_v2  ;;  %2109 = vmatpush.bf16.msrb.mxu1 %v5701_v17  ;;  %v5650_v2 = vld [vmem:[#allocation5 + $0x558] sm:$0xf0]  ;;  %v879_v22 = vadd.f32 %v8052_v52, %v865_v60  ;;  %v977_v25 = vadd.f32 %v976_v19, %v962_v13  ;;  %v919_v13 = vadd.f32 %v8058_v7, %v8056_v4 }
 0x117   :  { %v5906_v20 = vld [vmem:[#allocation5 + $0xd58] sm:$0xf0]  ;;  %v5653_v17 = vor.u32 %v7459_v59, %v5650_v2  ;;  %v7408_v2 = vld [vmem:[%s8541_s2 + $0x30] sm:$0xff] }
 0x118   :  { %2123 = vmatpush.bf16.msrb.mxu2 %v5829_v18  ;;  %2096 = vmatpush.bf16.msrb.mxu0 %v5557_v31  ;;  %v5781_v18 = vor.u32 %v7491_v3, %v5778_v5  ;;  %v7423_v35 = vld [vmem:[#allocation5 + $0x9c] sm:$0xf]  ;;  %v5909_v24 = vor.u32 %v7523_v6, %v5906_v20  ;;  %v7416_v3 = vld [vmem:[%s8541_s2 + $0x70] sm:$0xff]  ;;  %v7407_v6 = vld [vmem:[%s8541_s2 + $0x28] sm:$0xff] }
 0x119   :  { %v5506_v39 = vld [vmem:[#allocation5 + $0xd8] sm:$0xf0] }
 0x11a   :  { %2137 = vmatpush.bf16.msrb.mxu3 %v5957_v23  ;;  %2110 = vmatpush.bf16.msrb.mxu1 %v5685_v61  ;;  %v7455_v21 = vld [vmem:[#allocation5 + $0x49c] sm:$0xf]  ;;  %v1067_v23 = vmul.f32 %v1003_v9, %v1003_v9  ;;  %v5509_v61 = vor.u32 %v7423_v35, %v5506_v39  ;;  %v990_v38 = vpop.f32.mrf.mxu2  ;;  %v7415_v9 = vld [vmem:[%s8541_s2 + $0x68] sm:$0xff] }
 0x11b   :  { %v5634_v27 = vld [vmem:[#allocation5 + $0x4d8] sm:$0xf0]  ;;  %v991_v44 = vadd.f32 %v990_v38, %v977_v25 }
 0x11c   :  { %2124 = vmatpush.bf16.msrb.mxu2 %v5813_v0  ;;  %2097 = vmatpush.bf16.msrb.mxu0 %v5541_v49  ;;  %v7487_v29 = vld [vmem:[#allocation5 + $0x89c] sm:$0xf]  ;;  %v8083_v36 = vadd.f32 %v1067_v23, %v1063_v16  ;;  %v5637_v0 = vor.u32 %v7455_v21, %v5634_v27  ;;  %v1004_v45 = vpop.f32.mrf.mxu3  ;;  %v7414_v21 = vld [vmem:[%s8541_s2 + $0x60] sm:$0xff] }
 0x11d   :  { %v5762_v30 = vld [vmem:[#allocation5 + $0x8d8] sm:$0xf0] }
 0x11e   :  { %2138 = vmatpush.bf16.msrb.mxu3 %v5941_v42  ;;  %2111 = vmatpush.bf16.msrb.mxu1 %v5669_v50  ;;  %v7519_v31 = vld [vmem:[#allocation5 + $0xc9c] sm:$0xf]  ;;  %v5765_v37 = vor.u32 %v7487_v29, %v5762_v30  ;;  %v893_v42 = vadd.f32 %v8054_v55, %v879_v22  ;;  %7859 = vrsqrt.f32 %v8083_v36  ;;  %v1005_v50 = vadd.f32 %v1004_v45, %v991_v44  ;;  %v7403_v45 = vld [vmem:[%s8541_s2 + $0x8] sm:$0xff] }
 0x11f   :  { %v5890_v32 = vld [vmem:[#allocation5 + $0xcd8] sm:$0xf0]  ;;  %v933_v22 = vadd.f32 %v8060_v28, %v919_v13  ;;  %v921_v28 = vadd.f32 %v8066_v57, %v8064_v53  ;;  %vm1082_vm1 = vcmp.eq.f32.partialorder %v8083_v36, inf  ;;  %vm1084_vm3 = vcmp.eq.f32.partialorder %v8083_v36, 0.0 }
 0x120   :  { %2125 = vmatpush.bf16.msrb.mxu2 %v5797_v51  ;;  %2098 = vmatpush.bf16.msrb.mxu0 %v5525_v10  ;;  %v7419_v40 = vld [vmem:[#allocation5 + $0x1c] sm:$0xf]  ;;  %v5893_v43 = vor.u32 %v7519_v31, %v5890_v32  ;;  %v1065_v58 = vmul.f32 %v893_v42, %v893_v42  ;;  %v1069_v55 = vmul.f32 %v1005_v50, %v1005_v50 }
 0x121   :  { %v5490_v52 = vld [vmem:[#allocation5 + $0x58] sm:$0xf0]  ;;  %v947_v30 = vadd.f32 %v8062_v34, %v933_v22  ;;  %v7412_v34 = vld [vmem:[%s8541_s2 + $0x50] sm:$0xff]  ;;  %v935_v53 = vadd.f32 %v8071_v11, %v921_v28 }
 0x122   :  { %2139 = vmatpush.bf16.msrb.mxu3 %v5925_v62  ;;  %2112 = vmatpush.bf16.msrb.mxu1 %v5653_v17  ;;  %v7451_v41 = vld [vmem:[#allocation5 + $0x41c] sm:$0xf]  ;;  %v5493_v51 = vor.u32 %v7419_v40, %v5490_v52  ;;  %v8093_v1 = vadd.f32 %v1069_v55, %v1065_v58  ;;  %v7406_v17 = vld [vmem:[%s8541_s2 + $0x20] sm:$0xff] }
 0x123   :  { %v5618_v46 = vld [vmem:[#allocation5 + $0x458] sm:$0xf0]  ;;  %v949_v11 = vadd.f32 %v8074_v14, %v935_v53  ;;  %v7410_v14 = vld [vmem:[%s8541_s2 + $0x40] sm:$0xff] }
 0x124   :  { %2126 = vmatpush.bf16.msrb.mxu2 %v5781_v18  ;;  %v7483_v47 = vld [vmem:[#allocation5 + $0x81c] sm:$0xf]  ;;  %2099 = vmatpush.bf16.msrb.mxu0 %v5509_v61  ;;  %v5621_v54 = vor.u32 %v7451_v41, %v5618_v46  ;;  %v7860_v63 = vpop.eup %7859  ;;  %7861 = vrsqrt.f32 %v8093_v1  ;;  %v1064_v41 = vmul.f32 %v947_v30, %v947_v30  ;;  %vm1106_vm0 = vcmp.eq.f32.partialorder %v8093_v1, inf }
 0x125   :  { %v5746_v48 = vld [vmem:[#allocation5 + $0x858] sm:$0xf0]  ;;  %v1076_v5 = vmul.f32 %v7860_v63, %v8083_v36  ;;  %vm1108_vm2 = vcmp.eq.f32.partialorder %v8093_v1, 0.0  ;;  %v1066_v55 = vmul.f32 %v949_v11, %v949_v11 }
 0x126   :  { %2140 = vmatpush.bf16.msrb.mxu3 %v5909_v24  ;;  %v7515_v49 = vld [vmem:[#allocation5 + $0xc1c] sm:$0xf]  ;;  %2113 = vmatpush.bf16.msrb.mxu1 %v5637_v0  ;;  %v5749_v56 = vor.u32 %v7483_v47, %v5746_v48  ;;  %v7411_v48 = vld [vmem:[%s8541_s2 + $0x48] sm:$0xff] }
 0x127   :  { %v5874_v12 = vld [vmem:[#allocation5 + $0xc58] sm:$0xf0]  ;;  %v1077_v20 = vmul.f32 %v7860_v63, %v1076_v5 }
 0x128   :  { %2127 = vmatpush.bf16.msrb.mxu2 %v5765_v37  ;;  %v5877_v59 = vor.u32 %v7515_v49, %v5874_v12  ;;  %v7409_v60 = vld [vmem:[%s8541_s2 + $0x38] sm:$0xff]  ;;  %2100 = vmatpush.bf16.msrb.mxu0 %v5493_v51  ;;  %v1016_v18 = vpop.f32.mrf.mxu0  ;;  %v7404_v37 = vld [vmem:[%s8541_s2 + $0x10] sm:$0xff] }
 0x129   :  { %v7417_v62 = vld [vmem:[%s8541_s2 + $0x78] sm:$0xff]  ;;  %v1078_v35 = vmul.f32 0.5, %v1077_v20 }
 0x12a   :  { %2141 = vmatpush.bf16.msrb.mxu3 %v5893_v43  ;;  %2114 = vmatpush.bf16.msrb.mxu1 %v5621_v54  ;;  %v7862_v10 = vpop.eup %7861  ;;  %v1030_v19 = vpop.f32.mrf.mxu1  ;;  %v7405_v7 = vld [vmem:[%s8541_s2 + $0x18] sm:$0xff]  ;;  %v7402_v54 = vld [vmem:[%s8541_s2] sm:$0xff] }
 0x12b   :  { %2101 = vmatmul.bf16.vlgmr.msrb.gmra.mxu0 %v8014_v26  ;;  %v1100_v16 = vmul.f32 %v7862_v10, %v8093_v1  ;;  %v1031_v23 = vadd.f32 %v1030_v19, %v1016_v18  ;;  %v1079_v25 = vsub.f32 1.5, %v1078_v35  ;;  %v7413_v29 = vld [vmem:[%s8541_s2 + $0x58] sm:$0xff] }
 0x12c   :  { %2128 = vmatpush.bf16.msrb.mxu2 %v5749_v56  ;;  %v1109_v56 = vand.u32 2147483648, %v8093_v1 }
 0x12d   :  { %2115 = vmatmul.bf16.vlgmr.msrb.gmra.mxu1 %v8016_v33  ;;  %v1101_v39 = vmul.f32 %v7862_v10, %v1100_v16  ;;  %v1080_v52 = vmul.f32 %v7860_v63, %v1079_v25 }
 0x12e   :  { %2142 = vmatpush.bf16.msrb.mxu3 %v5877_v59 }
 0x12f   :  { %2129 = vmatmul.bf16.vlgmr.msrb.gmra.mxu2 %v8008_v8  ;;  %v1102_v4 = vmul.f32 0.5, %v1101_v39  ;;  %v1081_v47 = vmul.f32 %v1080_v52, %v8083_v36 }
 0x130   :  { %2463 = vmatpush.bf16.msra.mxu2 %v7409_v60  ;;  %v1018_v38 = vpop.f32.mrf.mxu0  ;;  %v1085_v60 = vand.u32 2147483648, %v8083_v36 }
 0x131   :  { %2143 = vmatmul.bf16.vlgmr.msrb.gmra.mxu3 %v8010_v15  ;;  %v1103_v27 = vsub.f32 1.5, %v1102_v4  ;;  %v1083_v58 = vsel %vm1082_vm1, %v8083_v36, %v1081_v47 }
 0x132   :  { %2477 = vmatpush.bf16.msra.mxu3 %v7417_v62  ;;  %v1044_v24 = vpop.f32.mrf.mxu2  ;;  %v1032_v40 = vpop.f32.mrf.mxu1 }
 0x133   :  { %v1045_v31 = vadd.f32 %v1044_v24, %v1031_v23  ;;  %v1104_v61 = vmul.f32 %v7862_v10, %v1103_v27  ;;  %v1033_v42 = vadd.f32 %v1032_v40, %v1018_v38  ;;  %v7552_v40 = vld [vmem:[%s8541_s2 + $0xb0] sm:$0xff] }
 0x134   :  { %2464 = vmatpush.bf16.msra.mxu2 %v7408_v2  ;;  %v1058_v32 = vpop.f32.mrf.mxu3 }
 0x135   :  { %v1059_v0 = vadd.f32 %v1058_v32, %v1045_v31  ;;  %v1105_v43 = vmul.f32 %v1104_v61, %v8093_v1  ;;  %v7553_v61 = vld [vmem:[%s8541_s2 + $0xb8] sm:$0xff] }
 0x136   :  { %2478 = vmatpush.bf16.msra.mxu3 %v7416_v3  ;;  %v1086_v3 = vsel %vm1084_vm3, %v1085_v60, %v1083_v58  ;;  %2339 = vmatpush.bf16.msra.mxu0 %v7553_v61  ;;  %v7656_v58 = vld [vmem:[#allocation5 + $0xbdc] sm:$0xf0] }
 0x137   :  { %v1068_v57 = vmul.f32 %v1059_v0, %v1059_v0  ;;  %v1107_v50 = vsel %vm1106_vm0, %v8093_v1, %v1105_v43  ;;  %v7560_v43 = vld [vmem:[%s8541_s2 + $0xf0] sm:$0xff] }
 0x138   :  { %2465 = vmatpush.bf16.msra.mxu2 %v7407_v6  ;;  %v1110_v62 = vsel %vm1108_vm2, %v1109_v56, %v1107_v50  ;;  %v6488_v56 = vld [vmem:[#allocation5 + $0xba0] sm:$0xf] }
 0x139   :  { %v1072_v44 = vadd.f32 %v1068_v57, %v1064_v41  ;;  %v1123_v5 = vpack.c.bf16 %v1110_v62, %v1086_v3  ;;  %v7561_v41 = vld [vmem:[%s8541_s2 + $0xf8] sm:$0xff] }
 0x13a   :  { %2479 = vmatpush.bf16.msra.mxu3 %v7415_v9  ;;  %v1046_v46 = vpop.f32.mrf.mxu2  ;;  %2340 = vmatpush.bf16.msra.mxu0 %v7552_v40 }
 0x13b   :  { %7863 = vrsqrt.f32 %v1072_v44  ;;  %v1047_v49 = vadd.f32 %v1046_v46, %v1033_v42  ;;  %vm1094_vm4 = vcmp.eq.f32.partialorder %v1072_v44, inf  ;;  %v1097_v22 = vand.u32 2147483648, %v1072_v44  ;;  %2353 = vmatpush.bf16.msra.mxu1 %v7561_v41  ;;  %v7550_v42 = vld [vmem:[%s8541_s2 + $0xa0] sm:$0xff]  ;;  %v7559_v46 = vld [vmem:[%s8541_s2 + $0xe8] sm:$0xff] }
 0x13c   :  { %2466 = vmatpush.bf16.msra.mxu2 %v7406_v17  ;;  %v1060_v12 = vpop.f32.mrf.mxu3  ;;  %vm1096_vm6 = vcmp.eq.f32.partialorder %v1072_v44, 0.0  ;;  %v6584_v41 = vld [vmem:[#allocation5 + $0xea0] sm:$0xf] }
 0x13d   :  { %v1061_v51 = vadd.f32 %v1060_v12, %v1047_v49  ;;  %v7548_v49 = vld [vmem:[%s8541_s2 + $0x90] sm:$0xff]  ;;  %v7558_v12 = vld [vmem:[%s8541_s2 + $0xe0] sm:$0xff] }
 0x13e   :  { %2480 = vmatpush.bf16.msra.mxu3 %v7414_v21 }
 0x13f   :  { %v1070_v59 = vmul.f32 %v1061_v51, %v1061_v51  ;;  %2354 = vmatpush.bf16.msra.mxu1 %v7560_v43  ;;  %v7547_v51 = vld [vmem:[%s8541_s2 + $0x88] sm:$0xff] }
 0x140   :  { %2467 = vmatpush.bf16.msra.mxu2 %v7405_v7 }
 0x141   :  { %v7864_v63 = vpop.eup %7863  ;;  %v1074_v2 = vadd.f32 %v1070_v59, %v1066_v55  ;;  %v6489_v55 = vor.u32 %v7656_v58, %v6488_v56  ;;  %v6440_v56 = vld [vmem:[#allocation5 + $0xa20] sm:$0xf] }
 0x142   :  { %2481 = vmatpush.bf16.msra.mxu3 %v7413_v29  ;;  %v1088_v6 = vmul.f32 %v7864_v63, %v1072_v44 }
 0x143   :  { %7865 = vrsqrt.f32 %v1074_v2  ;;  %vm1118_vm5 = vcmp.eq.f32.partialorder %v1074_v2, inf  ;;  %v1121_v23 = vand.u32 2147483648, %v1074_v2  ;;  %vm1120_vm7 = vcmp.eq.f32.partialorder %v1074_v2, 0.0  ;;  %2355 = vmatpush.bf16.msra.mxu1 %v7559_v46  ;;  %v7554_v46 = vld [vmem:[%s8541_s2 + $0xc0] sm:$0xff] }
 0x144   :  { %2468 = vmatpush.bf16.msra.mxu2 %v7404_v37  ;;  %v1089_v1 = vmul.f32 %v7864_v63, %v1088_v6  ;;  %v7556_v6 = vld [vmem:[%s8541_s2 + $0xd0] sm:$0xff] }
 0x146   :  { %2482 = vmatpush.bf16.msra.mxu3 %v7412_v34  ;;  %v1090_v20 = vmul.f32 0.5, %v1089_v1  ;;  %v7551_v34 = vld [vmem:[%s8541_s2 + $0xa8] sm:$0xff]  ;;  %v6232_v1 = vld [vmem:[#allocation5 + $0x3a0] sm:$0xf] }
 0x147   :  { %2341 = vmatpush.bf16.msra.mxu0 %v7551_v34  ;;  %2356 = vmatpush.bf16.msra.mxu1 %v7558_v12  ;;  %v7584_v12 = vld [vmem:[#allocation5 + $0x2dc] sm:$0xf0] }
 0x148   :  { %2469 = vmatpush.bf16.msra.mxu2 %v7403_v45  ;;  %v1091_v9 = vsub.f32 1.5, %v1090_v20  ;;  %v1934_v27 = vpop.f32.mrf.mxu0  ;;  %v7549_v45 = vld [vmem:[%s8541_s2 + $0x98] sm:$0xff] }
 0x149   :  { %v7866_v10 = vpop.eup %7865 }
 0x14a   :  { %2483 = vmatpush.bf16.msra.mxu3 %v7411_v48  ;;  %v1112_v13 = vmul.f32 %v7866_v10, %v1074_v2  ;;  %v1092_v16 = vmul.f32 %v7864_v63, %v1091_v9  ;;  %v1948_v29 = vpop.f32.mrf.mxu1  ;;  %v6616_v63 = vld [vmem:[#allocation5 + $0xfa0] sm:$0xf] }
 0x14b   :  { %2342 = vmatpush.bf16.msra.mxu0 %v7550_v42  ;;  %v1949_v50 = vadd.f32 %v1948_v29, %v1934_v27  ;;  %v7680_v42 = vld [vmem:[#allocation5 + $0xedc] sm:$0xf0] }
 0x14c   :  { %2470 = vmatpush.bf16.msra.mxu2 %v7402_v54  ;;  %v1113_v17 = vmul.f32 %v7866_v10, %v1112_v13  ;;  %v1093_v19 = vmul.f32 %v1092_v16, %v1072_v44  ;;  %v7557_v54 = vld [vmem:[%s8541_s2 + $0xd8] sm:$0xff]  ;;  %v7592_v13 = vld [vmem:[#allocation5 + $0x3dc] sm:$0xf0]  ;;  %v6585_v43 = vor.u32 %v7680_v42, %v6584_v41 }
 0x14d   :  { %2357 = vmatpush.bf16.msra.mxu1 %v7557_v54  ;;  %v6472_v16 = vld [vmem:[#allocation5 + $0xb20] sm:$0xf] }
 0x14e   :  { %2484 = vmatpush.bf16.msra.mxu3 %v7410_v14  ;;  %v1114_v18 = vmul.f32 0.5, %v1113_v17  ;;  %v1095_v39 = vsel %vm1094_vm4, %v1072_v44, %v1093_v19  ;;  %v7652_v17 = vld [vmem:[#allocation5 + $0xb5c] sm:$0xf0] }
 0x14f   :  { %2471 = vmatmul.bf16.vlgmr.msra.gmra.mxu2 %v1123_v5  ;;  %v1098_v7 = vsel %vm1096_vm6, %v1097_v22, %v1095_v39  ;;  %2343 = vmatpush.bf16.msra.mxu0 %v7549_v45  ;;  %v7546_v5 = vld [vmem:[%s8541_s2 + $0x80] sm:$0xff] }
 0x150   :  { %v1115_v35 = vsub.f32 1.5, %v1114_v18  ;;  %v1936_v31 = vpop.f32.mrf.mxu0  ;;  %3287 = vmatpush.bf16.msrb.mxu2 %v6489_v55  ;;  %v6600_v39 = vld [vmem:[#allocation5 + $0xf20] sm:$0xf] }
 0x151   :  { %2358 = vmatpush.bf16.msra.mxu1 %v7556_v6  ;;  %v7624_v54 = vld [vmem:[#allocation5 + $0x7dc] sm:$0xf0] }
 0x152   :  { %v1116_v36 = vmul.f32 %v7866_v10, %v1115_v35  ;;  %v1962_v30 = vpop.f32.mrf.mxu2  ;;  %v1950_v32 = vpop.f32.mrf.mxu1  ;;  %v6233_v35 = vor.u32 %v7592_v13, %v6232_v1  ;;  %v6184_v6 = vld [vmem:[#allocation5 + $0x220] sm:$0xf] }
 0x153   :  { %2344 = vmatpush.bf16.msra.mxu0 %v7548_v49  ;;  %v1963_v59 = vadd.f32 %v1962_v30, %v1949_v50  ;;  %v1951_v9 = vadd.f32 %v1950_v32, %v1936_v31  ;;  %v7648_v31 = vld [vmem:[#allocation5 + $0xadc] sm:$0xf0] }
 0x154   :  { %v1117_v21 = vmul.f32 %v1116_v36, %v1074_v2  ;;  %v1976_v28 = vpop.f32.mrf.mxu3  ;;  %v6473_v36 = vor.u32 %v7652_v17, %v6472_v16  ;;  %v6200_v49 = vld [vmem:[#allocation5 + $0x2a0] sm:$0xf] }
 0x155   :  { %v1977_v20 = vadd.f32 %v1976_v28, %v1963_v59  ;;  %v6456_v28 = vld [vmem:[#allocation5 + $0xaa0] sm:$0xf] }
 0x156   :  { %v1119_v4 = vsel %vm1118_vm5, %v1074_v2, %v1117_v21  ;;  %v7688_v2 = vld [vmem:[#allocation5 + $0xfdc] sm:$0xf0]  ;;  %3288 = vmatpush.bf16.msrb.mxu2 %v6473_v36  ;;  %v6457_v34 = vor.u32 %v7648_v31, %v6456_v28 }
 0x157   :  { %v1122_v24 = vsel %vm1120_vm7, %v1121_v23, %v1119_v4  ;;  %2345 = vmatpush.bf16.msra.mxu0 %v7547_v51  ;;  %v6617_v3 = vor.u32 %v7688_v2, %v6616_v63  ;;  %v7684_v21 = vld [vmem:[#allocation5 + $0xf5c] sm:$0xf0]  ;;  %v2149_v27 = vmul.f32 %v1977_v20, %v1977_v20 }
 0x158   :  { %v1124_v25 = vpack.c.bf16 %v1122_v24, %v1098_v7  ;;  %v6601_v22 = vor.u32 %v7684_v21, %v6600_v39  ;;  %v7555_v7 = vld [vmem:[%s8541_s2 + $0xc8] sm:$0xff]  ;;  %v6216_v24 = vld [vmem:[#allocation5 + $0x320] sm:$0xf] }
 0x159   :  { %3301 = vmatpush.bf16.msrb.mxu3 %v6617_v3  ;;  %2359 = vmatpush.bf16.msra.mxu1 %v7555_v7  ;;  %v6360_v51 = vld [vmem:[#allocation5 + $0x7a0] sm:$0xf] }
 0x15a   :  { %2485 = vmatmul.bf16.vlgmr.msra.gmra.mxu3 %v1124_v25  ;;  %v8165_v0 = vpop.f32.mrf.mxu2  ;;  %v7588_v25 = vld [vmem:[#allocation5 + $0x35c] sm:$0xf0]  ;;  %3289 = vmatpush.bf16.msrb.mxu2 %v6457_v34 }
 0x15b   :  { %2346 = vmatpush.bf16.msra.mxu0 %v7546_v5  ;;  %v6217_v30 = vor.u32 %v7588_v25, %v6216_v24  ;;  %v1965_v32 = vadd.f32 %v8165_v0, %v1951_v9  ;;  %v6201_v0 = vor.u32 %v7584_v12, %v6200_v49  ;;  %v7644_v59 = vld [vmem:[#allocation5 + $0xa5c] sm:$0xf0] }
 0x15c   :  { %v8167_v37 = vpop.f32.mrf.mxu3  ;;  %v6441_v63 = vor.u32 %v7644_v59, %v6440_v56  ;;  %v7676_v2 = vld [vmem:[#allocation5 + $0xe5c] sm:$0xf0] }
 0x15d   :  { %3302 = vmatpush.bf16.msrb.mxu3 %v6601_v22  ;;  %v1979_v58 = vadd.f32 %v8167_v37, %v1965_v32  ;;  %2360 = vmatpush.bf16.msra.mxu1 %v7554_v46  ;;  %v7580_v1 = vld [vmem:[#allocation5 + $0x25c] sm:$0xf0] }
 0x15e   :  { %v6344_v20 = vld [vmem:[#allocation5 + $0x720] sm:$0xf]  ;;  %3290 = vmatpush.bf16.msrb.mxu2 %v6441_v63  ;;  %v6185_v9 = vor.u32 %v7580_v1, %v6184_v6 }
 0x15f   :  { %3259 = vmatpush.bf16.msrb.mxu0 %v6233_v35  ;;  %v7620_v37 = vld [vmem:[#allocation5 + $0x75c] sm:$0xf0]  ;;  %v2151_v16 = vmul.f32 %v1979_v58, %v1979_v58 }
 0x160   :  { %v7640_v13 = vld [vmem:[#allocation5 + $0x9dc] sm:$0xf0] }
 0x161   :  { %3303 = vmatpush.bf16.msrb.mxu3 %v6585_v43  ;;  %v6552_v35 = vld [vmem:[#allocation5 + $0xda0] sm:$0xf] }
 0x162   :  { %v7672_v36 = vld [vmem:[#allocation5 + $0xddc] sm:$0xf0] }
 0x163   :  { %3260 = vmatpush.bf16.msrb.mxu0 %v6217_v30  ;;  %v6553_v39 = vor.u32 %v7672_v36, %v6552_v35  ;;  %v6328_v7 = vld [vmem:[#allocation5 + $0x6a0] sm:$0xf] }
 0x164   :  { %v7636_v30 = vld [vmem:[#allocation5 + $0x95c] sm:$0xf0] }
 0x165   :  { %v6536_v28 = vld [vmem:[#allocation5 + $0xd20] sm:$0xf] }
 0x166   :  { %v6152_v34 = vld [vmem:[#allocation5 + $0x120] sm:$0xf] }
 0x167   :  { %3261 = vmatpush.bf16.msrb.mxu0 %v6201_v0  ;;  %v7572_v41 = vld [vmem:[#allocation5 + $0x15c] sm:$0xf0] }
 0x168   :  { %v8169_v38 = vpop.f32.mrf.mxu0  ;;  %v6153_v43 = vor.u32 %v7572_v41, %v6152_v34  ;;  %v6312_v46 = vld [vmem:[#allocation5 + $0x620] sm:$0xf] }
 0x169   :  { %v7612_v49 = vld [vmem:[#allocation5 + $0x65c] sm:$0xf0] }
 0x16a   :  { %v8174_v52 = vpop.f32.mrf.mxu1  ;;  %v6392_v12 = vld [vmem:[#allocation5 + $0x8a0] sm:$0xf]  ;;  %v6313_v0 = vor.u32 %v7612_v49, %v6312_v46  ;;  %v7682_v46 = vld [vmem:[#allocation5 + $0xf24] sm:$0xf] }
 0x16b   :  { %3262 = vmatpush.bf16.msrb.mxu0 %v6185_v9  ;;  %v7664_v58 = vld [vmem:[#allocation5 + $0xcdc] sm:$0xf0]  ;;  %v2005_v59 = vadd.f32 %v8174_v52, %v8169_v38  ;;  %v6602_v49 = vld [vmem:[#allocation5 + $0xf60] sm:$0xf0] }
 0x16c   :  { %v6296_v63 = vld [vmem:[#allocation5 + $0x5a0] sm:$0xf] }
 0x16d   :  { %v6376_v6 = vld [vmem:[#allocation5 + $0x820] sm:$0xf] }
 0x16e   :  { %v7628_v1 = vld [vmem:[#allocation5 + $0x85c] sm:$0xf0] }
 0x170   :  { %v8192_v44 = vpop.f32.mrf.mxu0 }
 0x172   :  { %v8182_v53 = vpop.f32.mrf.mxu2  ;;  %v8200_v47 = vpop.f32.mrf.mxu1 }
 0x173   :  { %v2019_v35 = vadd.f32 %v8182_v53, %v2005_v59  ;;  %v2007_v34 = vadd.f32 %v8200_v47, %v8192_v44  ;;  %v7646_v47 = vld [vmem:[#allocation5 + $0xaa4] sm:$0xf] }
 0x174   :  { %v8184_v57 = vpop.f32.mrf.mxu3  ;;  %v7590_v59 = vld [vmem:[#allocation5 + $0x3a4] sm:$0xf] }
 0x17a   :  { %v8202_v48 = vpop.f32.mrf.mxu2 }
 0x17c   :  { %v8204_v11 = vpop.f32.mrf.mxu3 }
 0x188   :  { %v2046_v14 = vpop.f32.mrf.mxu0 }
 0x18a   :  { %v2060_v60 = vpop.f32.mrf.mxu1 }
 0x18b   :  { %v2061_v62 = vadd.f32 %v2060_v60, %v2046_v14  ;;  %v6568_v60 = vld [vmem:[#allocation5 + $0xe20] sm:$0xf] }
 0x18c   :  { %v6569_v5 = vor.u32 %v7676_v2, %v6568_v60  ;;  %v7608_v2 = vld [vmem:[#allocation5 + $0x5dc] sm:$0xf0] }
 0x18e   :  { %3304 = vmatpush.bf16.msrb.mxu3 %v6569_v5 }
 0x190   :  { %v2048_v4 = vpop.f32.mrf.mxu0 }
 0x192   :  { %v2074_v10 = vpop.f32.mrf.mxu2  ;;  %v2062_v29 = vpop.f32.mrf.mxu1  ;;  %3305 = vmatpush.bf16.msrb.mxu3 %v6553_v39 }
 0x193   :  { %v2075_v18 = vadd.f32 %v2074_v10, %v2061_v62  ;;  %v2063_v40 = vadd.f32 %v2062_v29, %v2048_v4  ;;  %v6361_v62 = vor.u32 %v7624_v54, %v6360_v51  ;;  %v6424_v10 = vld [vmem:[#allocation5 + $0x9a0] sm:$0xf] }
 0x194   :  { %v2088_v19 = vpop.f32.mrf.mxu3  ;;  %v7576_v4 = vld [vmem:[#allocation5 + $0x1dc] sm:$0xf0] }
 0x195   :  { %v2089_v23 = vadd.f32 %v2088_v19, %v2075_v18  ;;  %3273 = vmatpush.bf16.msrb.mxu1 %v6361_v62  ;;  %v6345_v18 = vor.u32 %v7620_v37, %v6344_v20  ;;  %v6425_v19 = vor.u32 %v7640_v13, %v6424_v10  ;;  %v6408_v29 = vld [vmem:[#allocation5 + $0x920] sm:$0xf]  ;;  %v7654_v20 = vld [vmem:[#allocation5 + $0xba4] sm:$0xf]  ;;  %v6297_v13 = vor.u32 %v7608_v2, %v6296_v63 }
 0x196   :  { %v7632_v51 = vld [vmem:[#allocation5 + $0x8dc] sm:$0xf0]  ;;  %v2021_v63 = vadd.f32 %v8202_v48, %v2007_v34 }
 0x197   :  { %v2153_v61 = vmul.f32 %v2089_v23, %v2089_v23  ;;  %v6168_v23 = vld [vmem:[#allocation5 + $0x1a0] sm:$0xf]  ;;  %3291 = vmatpush.bf16.msrb.mxu2 %v6425_v19  ;;  %v6393_v56 = vor.u32 %v7632_v51, %v6392_v12 }
 0x198   :  { %v6169_v25 = vor.u32 %v7576_v4, %v6168_v23  ;;  %v6520_v54 = vld [vmem:[#allocation5 + $0xca0] sm:$0xf]  ;;  %v7686_v23 = vld [vmem:[#allocation5 + $0xfa4] sm:$0xf] }
 0x199   :  { %v8228_v45 = vadd.f32 %v2153_v61, %v2149_v27  ;;  %3274 = vmatpush.bf16.msrb.mxu1 %v6345_v18  ;;  %v7616_v27 = vld [vmem:[#allocation5 + $0x6dc] sm:$0xf0]  ;;  %v6409_v61 = vor.u32 %v7636_v30, %v6408_v29  ;;  %v6521_v62 = vor.u32 %v7664_v58, %v6520_v54  ;;  %v6618_v4 = vld [vmem:[#allocation5 + $0xfe0] sm:$0xf0] }
 0x19a   :  { %v2076_v50 = vpop.f32.mrf.mxu2  ;;  %v6329_v32 = vor.u32 %v7616_v27, %v6328_v7  ;;  %3263 = vmatpush.bf16.msrb.mxu0 %v6169_v25  ;;  %v6504_v18 = vld [vmem:[#allocation5 + $0xc20] sm:$0xf] }
 0x19b   :  { %7867 = vrsqrt.f32 %v8228_v45  ;;  %v2077_v14 = vadd.f32 %v2076_v50, %v2063_v40  ;;  %v7668_v40 = vld [vmem:[#allocation5 + $0xd5c] sm:$0xf0]  ;;  %3292 = vmatpush.bf16.msrb.mxu2 %v6409_v61  ;;  %v6474_v61 = vld [vmem:[#allocation5 + $0xb60] sm:$0xf0]  ;;  %vm2168_vm8 = vcmp.eq.f32.partialorder %v8228_v45, inf  ;;  %vm2170_vm9 = vcmp.eq.f32.partialorder %v8228_v45, 0.0 }
 0x19c   :  { %v2090_v55 = vpop.f32.mrf.mxu3  ;;  %v6537_v42 = vor.u32 %v7668_v40, %v6536_v28  ;;  %v7660_v19 = vld [vmem:[#allocation5 + $0xc5c] sm:$0xf0]  ;;  %v2033_v40 = vadd.f32 %v8184_v57, %v2019_v35 }
 0x19d   :  { %v2091_v3 = vadd.f32 %v2090_v55, %v2077_v14  ;;  %3275 = vmatpush.bf16.msrb.mxu1 %v6329_v32  ;;  %v6136_v14 = vld [vmem:[#allocation5 + $0xa0] sm:$0xf]  ;;  %v6505_v39 = vor.u32 %v7660_v19, %v6504_v18  ;;  %v7650_v32 = vld [vmem:[#allocation5 + $0xb24] sm:$0xf] }
 0x19e   :  { %3306 = vmatpush.bf16.msrb.mxu3 %v6537_v42  ;;  %v7568_v55 = vld [vmem:[#allocation5 + $0xdc] sm:$0xf0]  ;;  %3264 = vmatpush.bf16.msrb.mxu0 %v6153_v43  ;;  %v6477_v43 = vor.u32 %v7650_v32, %v6474_v61  ;;  %v7638_v32 = vld [vmem:[#allocation5 + $0x9a4] sm:$0xf] }
 0x19f   :  { %v2155_v17 = vmul.f32 %v2091_v3, %v2091_v3  ;;  %v6137_v5 = vor.u32 %v7568_v55, %v6136_v14  ;;  %3293 = vmatpush.bf16.msrb.mxu2 %v6393_v56  ;;  %v6120_v25 = vld [vmem:[#allocation5 + $0x20] sm:$0xf]  ;;  %v6458_v56 = vld [vmem:[#allocation5 + $0xae0] sm:$0xf0]  ;;  %v2171_v55 = vand.u32 2147483648, %v8228_v45 }
 0x1a0   :  { %v7564_v27 = vld [vmem:[#allocation5 + $0x5c] sm:$0xf0]  ;;  %v6426_v61 = vld [vmem:[#allocation5 + $0x9e0] sm:$0xf0] }
 0x1a1   :  { %v7868_v21 = vpop.eup %7867  ;;  %v8235_v22 = vadd.f32 %v2155_v17, %v2151_v16  ;;  %3276 = vmatpush.bf16.msrb.mxu1 %v6313_v0  ;;  %v6377_v16 = vor.u32 %v7628_v1, %v6376_v6  ;;  %v6490_v17 = vld [vmem:[#allocation5 + $0xbe0] sm:$0xf0]  ;;  %v6280_v29 = vld [vmem:[#allocation5 + $0x520] sm:$0xf]  ;;  %v6605_v0 = vor.u32 %v7682_v46, %v6602_v49  ;;  %v6429_v34 = vor.u32 %v7638_v32, %v6426_v61  ;;  %v6608_v32 = vld [vmem:[#allocation5 + $0xf28] sm:$0xf] }
 0x1a2   :  { %v2162_v24 = vmul.f32 %v7868_v21, %v8228_v45  ;;  %3307 = vmatpush.bf16.msrb.mxu3 %v6521_v62  ;;  %v6493_v52 = vor.u32 %v7654_v20, %v6490_v17  ;;  %3265 = vmatpush.bf16.msrb.mxu0 %v6137_v5  ;;  %v7604_v28 = vld [vmem:[#allocation5 + $0x55c] sm:$0xf0]  ;;  %v2150_v62 = vmul.f32 %v2033_v40, %v2033_v40  ;;  %v6234_v6 = vld [vmem:[#allocation5 + $0x3e0] sm:$0xf0]  ;;  %v7685_v61 = vld [vmem:[#allocation5 + $0xf64] sm:$0xf0] }
 0x1a3   :  { %7869 = vrsqrt.f32 %v8235_v22  ;;  %3294 = vmatpush.bf16.msrb.mxu2 %v6377_v16  ;;  %v6281_v53 = vor.u32 %v7604_v28, %v6280_v29  ;;  %v6264_v51 = vld [vmem:[#allocation5 + $0x4a0] sm:$0xf]  ;;  %v7678_v1 = vld [vmem:[#allocation5 + $0xea4] sm:$0xf]  ;;  %vm2192_vm10 = vcmp.eq.f32.partialorder %v8235_v22, inf  ;;  %vm2194_vm11 = vcmp.eq.f32.partialorder %v8235_v22, 0.0 }
 0x1a4   :  { %v2163_v31 = vmul.f32 %v7868_v21, %v2162_v24  ;;  %v6621_v24 = vor.u32 %v7686_v23, %v6618_v4  ;;  %v7600_v54 = vld [vmem:[#allocation5 + $0x4dc] sm:$0xf0]  ;;  %v6586_v20 = vld [vmem:[#allocation5 + $0xee0] sm:$0xf0]  ;;  %v6237_v35 = vor.u32 %v7590_v59, %v6234_v6 }
 0x1a5   :  { %3277 = vmatpush.bf16.msrb.mxu1 %v6297_v13  ;;  %v6265_v44 = vor.u32 %v7600_v54, %v6264_v51  ;;  %v6248_v13 = vld [vmem:[#allocation5 + $0x420] sm:$0xf]  ;;  %v6442_v23 = vld [vmem:[#allocation5 + $0xa60] sm:$0xf0] }
 0x1a6   :  { %v2164_v50 = vmul.f32 0.5, %v2163_v31  ;;  %3308 = vmatpush.bf16.msrb.mxu3 %v6505_v39  ;;  %3295 = vmatmul.bf16.vlgmr.msrb.gmra.mxu2 %v8008_v8  ;;  %v7596_v16 = vld [vmem:[#allocation5 + $0x45c] sm:$0xf0]  ;;  %v7642_v39 = vld [vmem:[#allocation5 + $0xa24] sm:$0xf] }
 0x1a7   :  { %3343 = vmatpush.bf16.msra.mxu2 %v6493_v52  ;;  %v6202_v40 = vld [vmem:[#allocation5 + $0x2e0] sm:$0xf0] }
 0x1a8   :  { %v2165_v60 = vsub.f32 1.5, %v2164_v50  ;;  %v2102_v9 = vpop.f32.mrf.mxu0  ;;  %v7634_v49 = vld [vmem:[#allocation5 + $0x924] sm:$0xf] }
 0x1a9   :  { %v7870_v3 = vpop.eup %7869  ;;  %3278 = vmatpush.bf16.msrb.mxu1 %v6281_v53  ;;  %3309 = vmatmul.bf16.vlgmr.msrb.gmra.mxu3 %v8010_v15  ;;  %v7582_v53 = vld [vmem:[#allocation5 + $0x2a4] sm:$0xf] }
 0x1aa   :  { %v2116_v37 = vpop.f32.mrf.mxu1  ;;  %v2186_v10 = vmul.f32 %v7870_v3, %v8235_v22  ;;  %v2166_v38 = vmul.f32 %v7868_v21, %v2165_v60  ;;  %v6121_v21 = vor.u32 %v7564_v27, %v6120_v25  ;;  %3357 = vmatpush.bf16.msra.mxu3 %v6621_v24  ;;  %v6461_v60 = vor.u32 %v7646_v47, %v6458_v56  ;;  %v6218_v24 = vld [vmem:[#allocation5 + $0x360] sm:$0xf0] }
 0x1ab   :  { %v2117_v7 = vadd.f32 %v2116_v37, %v2102_v9  ;;  %3344 = vmatpush.bf16.msra.mxu2 %v6477_v43  ;;  %v2195_v37 = vand.u32 2147483648, %v8235_v22  ;;  %v7674_v25 = vld [vmem:[#allocation5 + $0xe24] sm:$0xf]  ;;  %v6205_v51 = vor.u32 %v7582_v53, %v6202_v40 }
 0x1ac   :  { %v2187_v36 = vmul.f32 %v7870_v3, %v2186_v10  ;;  %v2167_v31 = vmul.f32 %v2166_v38, %v8228_v45  ;;  %3266 = vmatpush.bf16.msrb.mxu0 %v6121_v21  ;;  %v6589_v10 = vor.u32 %v7678_v1, %v6586_v20  ;;  %v6249_v38 = vor.u32 %v7596_v16, %v6248_v13  ;;  %v6570_v27 = vld [vmem:[#allocation5 + $0xe60] sm:$0xf0] }
 0x1ad   :  { %3279 = vmatpush.bf16.msrb.mxu1 %v6265_v44  ;;  %v6573_v21 = vor.u32 %v7674_v25, %v6570_v27  ;;  %v7578_v54 = vld [vmem:[#allocation5 + $0x224] sm:$0xf] }
 0x1ae   :  { %v2188_v30 = vmul.f32 0.5, %v2187_v36  ;;  %v2169_v14 = vsel %vm2168_vm8, %v8228_v45, %v2167_v31  ;;  %3358 = vmatpush.bf16.msra.mxu3 %v6605_v0  ;;  %v7586_v36 = vld [vmem:[#allocation5 + $0x324] sm:$0xf]  ;;  %v6445_v45 = vor.u32 %v7642_v39, %v6442_v23 }
 0x1af   :  { %v2172_v17 = vsel %vm2170_vm9, %v2171_v55, %v2169_v14  ;;  %3345 = vmatpush.bf16.msra.mxu2 %v6461_v60  ;;  %v6221_v31 = vor.u32 %v7586_v36, %v6218_v24  ;;  %v6186_v47 = vld [vmem:[#allocation5 + $0x260] sm:$0xf0]  ;;  %v7689_v24 = vld [vmem:[#allocation5 + $0xfe4] sm:$0xf0] }
 0x1b0   :  { %v2189_v42 = vsub.f32 1.5, %v2188_v30  ;;  %v2104_v2 = vpop.f32.mrf.mxu0  ;;  %v7666_v56 = vld [vmem:[#allocation5 + $0xd24] sm:$0xf]  ;;  %v6189_v60 = vor.u32 %v7578_v54, %v6186_v47 }
 0x1b1   :  { %3280 = vmatpush.bf16.msrb.mxu1 %v6249_v38  ;;  %v7574_v55 = vld [vmem:[#allocation5 + $0x1a4] sm:$0xf]  ;;  %v7657_v38 = vld [vmem:[#allocation5 + $0xbe4] sm:$0xf0] }
 0x1b2   :  { %v2130_v41 = vpop.f32.mrf.mxu2  ;;  %v2190_v57 = vmul.f32 %v7870_v3, %v2189_v42  ;;  %v2118_v5 = vpop.f32.mrf.mxu1  ;;  %3359 = vmatpush.bf16.msra.mxu3 %v6589_v10  ;;  %v6554_v42 = vld [vmem:[#allocation5 + $0xde0] sm:$0xf0] }
 0x1b3   :  { %v2131_v12 = vadd.f32 %v2130_v41, %v2117_v7  ;;  %v2119_v18 = vadd.f32 %v2118_v5, %v2104_v2  ;;  %3346 = vmatpush.bf16.msra.mxu2 %v6445_v45  ;;  %v7670_v41 = vld [vmem:[#allocation5 + $0xda4] sm:$0xf] }
 0x1b4   :  { %v2144_v50 = vpop.f32.mrf.mxu3  ;;  %v2191_v3 = vmul.f32 %v2190_v57, %v8235_v22  ;;  %v6557_v46 = vor.u32 %v7670_v41, %v6554_v42  ;;  %v6394_v2 = vld [vmem:[#allocation5 + $0x8e0] sm:$0xf0]  ;;  %v6609_v41 = vor.u32 %v7685_v61, %v6608_v32  ;;  %v7669_v32 = vld [vmem:[#allocation5 + $0xd64] sm:$0xf0] }
 0x1b5   :  { %v2145_v58 = vadd.f32 %v2144_v50, %v2131_v12  ;;  %v6410_v12 = vld [vmem:[#allocation5 + $0x960] sm:$0xf0] }
 0x1b6   :  { %v2193_v48 = vsel %vm2192_vm10, %v8235_v22, %v2191_v3  ;;  %v2035_v22 = vadd.f32 %v8204_v11, %v2021_v63  ;;  %3360 = vmatpush.bf16.msra.mxu3 %v6573_v21  ;;  %v6413_v57 = vor.u32 %v7634_v49, %v6410_v12  ;;  %v7630_v63 = vld [vmem:[#allocation5 + $0x8a4] sm:$0xf]  ;;  %v6240_v12 = vld [vmem:[#allocation5 + $0x3a8] sm:$0xf] }
 0x1b7   :  { %v2154_v9 = vmul.f32 %v2145_v58, %v2145_v58  ;;  %v2196_v19 = vsel %vm2194_vm11, %v2195_v37, %v2193_v48  ;;  %3347 = vmatpush.bf16.msra.mxu2 %v6429_v34  ;;  %v6538_v58 = vld [vmem:[#allocation5 + $0xd60] sm:$0xf0]  ;;  %v6397_v3 = vor.u32 %v7630_v63, %v6394_v2  ;;  %v6496_v48 = vld [vmem:[#allocation5 + $0xba8] sm:$0xf] }
 0x1b8   :  { %v2209_v7 = vpack.c.bf16 %v2196_v19, %v2172_v17  ;;  %v2152_v11 = vmul.f32 %v2035_v22, %v2035_v22  ;;  %v6541_v59 = vor.u32 %v7666_v56, %v6538_v58  ;;  %v7662_v6 = vld [vmem:[#allocation5 + $0xca4] sm:$0xf]  ;;  %v6497_v36 = vor.u32 %v7657_v38, %v6496_v48 }
 0x1b9   :  { %v8261_v52 = vadd.f32 %v2154_v9, %v2150_v62  ;;  %v6170_v62 = vld [vmem:[#allocation5 + $0x1e0] sm:$0xf0] }
 0x1ba   :  { %v2132_v4 = vpop.f32.mrf.mxu2  ;;  %2347 = vmatmul.bf16.vlgmr.msra.gmra.mxu0 %v2209_v7  ;;  %3361 = vmatpush.bf16.msra.mxu3 %v6557_v46  ;;  %v6522_v1 = vld [vmem:[#allocation5 + $0xce0] sm:$0xf0]  ;;  %v6173_v16 = vor.u32 %v7574_v55, %v6170_v62  ;;  %v6624_v7 = vld [vmem:[#allocation5 + $0xfa8] sm:$0xf] }
 0x1bb   :  { %7871 = vrsqrt.f32 %v8261_v52  ;;  %v2133_v29 = vadd.f32 %v2132_v4, %v2119_v18  ;;  %3315 = vmatpush.bf16.msra.mxu0 %v6237_v35  ;;  %3348 = vmatpush.bf16.msra.mxu2 %v6413_v57  ;;  %v6525_v20 = vor.u32 %v7662_v6, %v6522_v1  ;;  %v7570_v37 = vld [vmem:[#allocation5 + $0x124] sm:$0xf]  ;;  %v6625_v27 = vor.u32 %v7689_v24, %v6624_v7  ;;  %v6592_v57 = vld [vmem:[#allocation5 + $0xea8] sm:$0xf] }
 0x1bc   :  { %v2146_v30 = vpop.f32.mrf.mxu3  ;;  %v7626_v10 = vld [vmem:[#allocation5 + $0x824] sm:$0xf]  ;;  %vm2180_vm12 = vcmp.eq.f32.partialorder %v8261_v52, inf  ;;  %vm2182_vm13 = vcmp.eq.f32.partialorder %v8261_v52, 0.0  ;;  %v2183_v56 = vand.u32 2147483648, %v8261_v52 }
 0x1bd   :  { %v2147_v28 = vadd.f32 %v2146_v30, %v2133_v29  ;;  %v6378_v17 = vld [vmem:[#allocation5 + $0x860] sm:$0xf0]  ;;  %v6480_v30 = vld [vmem:[#allocation5 + $0xb28] sm:$0xf] }
 0x1be   :  { %3362 = vmatpush.bf16.msra.mxu3 %v6541_v59  ;;  %v6154_v19 = vld [vmem:[#allocation5 + $0x160] sm:$0xf0]  ;;  %v6381_v35 = vor.u32 %v7626_v10, %v6378_v17  ;;  %v7645_v6 = vld [vmem:[#allocation5 + $0xa64] sm:$0xf0] }
 0x1bf   :  { %v2156_v43 = vmul.f32 %v2147_v28, %v2147_v28  ;;  %3316 = vmatpush.bf16.msra.mxu0 %v6221_v31  ;;  %3349 = vmatpush.bf16.msra.mxu2 %v6397_v3  ;;  %v7658_v39 = vld [vmem:[#allocation5 + $0xc24] sm:$0xf]  ;;  %v6157_v22 = vor.u32 %v7570_v37, %v6154_v19  ;;  %v7653_v31 = vld [vmem:[#allocation5 + $0xb64] sm:$0xf0] }
 0x1c0   :  { %v6506_v23 = vld [vmem:[#allocation5 + $0xc60] sm:$0xf0]  ;;  %v6481_v53 = vor.u32 %v7653_v31, %v6480_v30  ;;  %v6448_v3 = vld [vmem:[#allocation5 + $0xa28] sm:$0xf] }
 0x1c1   :  { %v7872_v50 = vpop.eup %7871  ;;  %v8265_v0 = vadd.f32 %v2156_v43, %v2152_v11  ;;  %v6509_v4 = vor.u32 %v7658_v39, %v6506_v23  ;;  %v7566_v29 = vld [vmem:[#allocation5 + $0xa4] sm:$0xf]  ;;  %v6464_v43 = vld [vmem:[#allocation5 + $0xaa8] sm:$0xf]  ;;  %v6449_v10 = vor.u32 %v7645_v6, %v6448_v3 }
 0x1c2   :  { %v2174_v44 = vmul.f32 %v7872_v50, %v8261_v52  ;;  %3363 = vmatpush.bf16.msra.mxu3 %v6525_v20  ;;  %v6138_v28 = vld [vmem:[#allocation5 + $0xe0] sm:$0xf0]  ;;  %v7589_v37 = vld [vmem:[#allocation5 + $0x364] sm:$0xf0] }
 0x1c3   :  { %7873 = vrsqrt.f32 %v8265_v0  ;;  %3317 = vmatpush.bf16.msra.mxu0 %v6205_v51  ;;  %3350 = vmatpush.bf16.msra.mxu2 %v6381_v35  ;;  %v6141_v42 = vor.u32 %v7566_v29, %v6138_v28  ;;  %v7562_v11 = vld [vmem:[#allocation5 + $0x24] sm:$0xf]  ;;  %v7593_v51 = vld [vmem:[#allocation5 + $0x3e4] sm:$0xf0]  ;;  %vm2204_vm14 = vcmp.eq.f32.partialorder %v8265_v0, inf  ;;  %vm2206_vm15 = vcmp.eq.f32.partialorder %v8265_v0, 0.0 }
 0x1c4   :  { %v2175_v14 = vmul.f32 %v7872_v50, %v2174_v44  ;;  %v6122_v49 = vld [vmem:[#allocation5 + $0x60] sm:$0xf0]  ;;  %v7681_v44 = vld [vmem:[#allocation5 + $0xee4] sm:$0xf0]  ;;  %v6241_v2 = vor.u32 %v7593_v51, %v6240_v12 }
 0x1c5   :  { %v6362_v55 = vld [vmem:[#allocation5 + $0x7e0] sm:$0xf0]  ;;  %v6593_v59 = vor.u32 %v7681_v44, %v6592_v57  ;;  %v6125_v62 = vor.u32 %v7562_v11, %v6122_v49  ;;  %v7641_v19 = vld [vmem:[#allocation5 + $0x9e4] sm:$0xf0] }
 0x1c6   :  { %v2176_v5 = vmul.f32 0.5, %v2175_v14  ;;  %3364 = vmatpush.bf16.msra.mxu3 %v6509_v4  ;;  %3351 = vmatmul.bf16.vlgmr.msra.gmra.mxu2 %v8008_v8  ;;  %v7622_v14 = vld [vmem:[#allocation5 + $0x7a4] sm:$0xf]  ;;  %v7585_v39 = vld [vmem:[#allocation5 + $0x2e4] sm:$0xf0] }
 0x1c7   :  { %3318 = vmatpush.bf16.msra.mxu0 %v6189_v60  ;;  %3399 = vmatpush.bf16.msrb.mxu2 %v6497_v36  ;;  %v2207_v60 = vand.u32 2147483648, %v8265_v0  ;;  %v7618_v48 = vld [vmem:[#allocation5 + $0x724] sm:$0xf]  ;;  %v6208_v36 = vld [vmem:[#allocation5 + $0x2a8] sm:$0xf] }
 0x1c8   :  { %v2177_v9 = vsub.f32 1.5, %v2176_v5  ;;  %v6224_v5 = vld [vmem:[#allocation5 + $0x328] sm:$0xf]  ;;  %v6346_v38 = vld [vmem:[#allocation5 + $0x760] sm:$0xf0]  ;;  %v6209_v29 = vor.u32 %v7585_v39, %v6208_v36 }
 0x1c9   :  { %v7874_v13 = vpop.eup %7873  ;;  %3365 = vmatmul.bf16.vlgmr.msra.gmra.mxu3 %v8010_v15  ;;  %v6225_v35 = vor.u32 %v7589_v37, %v6224_v5  ;;  %v6560_v4 = vld [vmem:[#allocation5 + $0xda8] sm:$0xf]  ;;  %v7614_v24 = vld [vmem:[#allocation5 + $0x6a4] sm:$0xf]  ;;  %v6626_v37 = vld [vmem:[#allocation5 + $0xfe8] sm:$0xf0] }
 0x1ca   :  { %v2198_v18 = vmul.f32 %v7874_v13, %v8265_v0  ;;  %v2178_v45 = vmul.f32 %v7872_v50, %v2177_v9  ;;  %3267 = vmatmul.bf16.vlgmr.msrb.gmra.mxu0 %v8014_v26  ;;  %3413 = vmatpush.bf16.msrb.mxu3 %v6625_v27  ;;  %v7649_v50 = vld [vmem:[#allocation5 + $0xae4] sm:$0xf0]  ;;  %v6365_v9 = vor.u32 %v7622_v14, %v6362_v55  ;;  %v7610_v61 = vld [vmem:[#allocation5 + $0x624] sm:$0xf]  ;;  %v7683_v36 = vld [vmem:[#allocation5 + $0xf2c] sm:$0xf] }
 0x1cb   :  { %3319 = vmatpush.bf16.msra.mxu0 %v6173_v16  ;;  %3400 = vmatpush.bf16.msrb.mxu2 %v6481_v53  ;;  %v6465_v54 = vor.u32 %v7649_v50, %v6464_v43  ;;  %v7677_v16 = vld [vmem:[#allocation5 + $0xe64] sm:$0xf0]  ;;  %v6298_v57 = vld [vmem:[#allocation5 + $0x5e0] sm:$0xf0] }
 0x1cc   :  { %v2199_v25 = vmul.f32 %v7874_v13, %v2198_v18  ;;  %v2179_v40 = vmul.f32 %v2178_v45, %v8261_v52  ;;  %v7673_v7 = vld [vmem:[#allocation5 + $0xde4] sm:$0xf0]  ;;  %v6330_v45 = vld [vmem:[#allocation5 + $0x6e0] sm:$0xf0] }
 0x1cd   :  { %v6416_v27 = vld [vmem:[#allocation5 + $0x928] sm:$0xf]  ;;  %v6282_v6 = vld [vmem:[#allocation5 + $0x560] sm:$0xf0] }
 0x1ce   :  { %v2200_v21 = vmul.f32 0.5, %v2199_v25  ;;  %3414 = vmatpush.bf16.msrb.mxu3 %v6609_v41  ;;  %v2181_v47 = vsel %vm2180_vm12, %v8261_v52, %v2179_v40  ;;  %v6349_v52 = vor.u32 %v7618_v48, %v6346_v38  ;;  %v6561_v25 = vor.u32 %v7673_v7, %v6560_v4  ;;  %v6192_v30 = vld [vmem:[#allocation5 + $0x228] sm:$0xf]  ;;  %v6314_v40 = vld [vmem:[#allocation5 + $0x660] sm:$0xf0] }
 0x1cf   :  { %3320 = vmatpush.bf16.msra.mxu0 %v6157_v22  ;;  %3401 = vmatpush.bf16.msrb.mxu2 %v6465_v54  ;;  %v2184_v1 = vsel %vm2182_vm13, %v2183_v56, %v2181_v47  ;;  %v7637_v22 = vld [vmem:[#allocation5 + $0x964] sm:$0xf0]  ;;  %v7606_v54 = vld [vmem:[#allocation5 + $0x5a4] sm:$0xf] }
 0x1d0   :  { %v2201_v34 = vsub.f32 1.5, %v2200_v21  ;;  %v6333_v21 = vor.u32 %v7614_v24, %v6330_v45  ;;  %v7581_v28 = vld [vmem:[#allocation5 + $0x264] sm:$0xf0]  ;;  %v6417_v31 = vor.u32 %v7637_v22, %v6416_v27  ;;  %v6250_v4 = vld [vmem:[#allocation5 + $0x460] sm:$0xf0] }
 0x1d1   :  { %v6544_v53 = vld [vmem:[#allocation5 + $0xd28] sm:$0xf]  ;;  %v6193_v11 = vor.u32 %v7581_v28, %v6192_v30  ;;  %v7647_v45 = vld [vmem:[#allocation5 + $0xaac] sm:$0xf] }
 0x1d2   :  { %v2202_v46 = vmul.f32 %v7874_v13, %v2201_v34  ;;  %3415 = vmatpush.bf16.msrb.mxu3 %v6593_v59  ;;  %v6576_v13 = vld [vmem:[#allocation5 + $0xe28] sm:$0xf]  ;;  %v6545_v34 = vor.u32 %v7669_v32, %v6544_v53  ;;  %v7655_v59 = vld [vmem:[#allocation5 + $0xbac] sm:$0xf] }
 0x1d3   :  { %3321 = vmatpush.bf16.msra.mxu0 %v6141_v42  ;;  %v6577_v18 = vor.u32 %v7677_v16, %v6576_v13  ;;  %3402 = vmatpush.bf16.msrb.mxu2 %v6449_v10  ;;  %v6400_v41 = vld [vmem:[#allocation5 + $0x8a8] sm:$0xf]  ;;  %v7598_v13 = vld [vmem:[#allocation5 + $0x4a4] sm:$0xf]  ;;  %v7591_v22 = vld [vmem:[#allocation5 + $0x3ac] sm:$0xf] }
 0x1d4   :  { %v2203_v58 = vmul.f32 %v2202_v46, %v8265_v0  ;;  %v7633_v42 = vld [vmem:[#allocation5 + $0x8e4] sm:$0xf0]  ;;  %v6317_v46 = vor.u32 %v7610_v61, %v6314_v40  ;;  %v6242_v30 = vld [vmem:[#allocation5 + $0x3e8] sm:$0xf0] }
 0x1d5   :  { %v6176_v43 = vld [vmem:[#allocation5 + $0x1a8] sm:$0xf]  ;;  %v6401_v12 = vor.u32 %v7633_v42, %v6400_v41  ;;  %v7679_v28 = vld [vmem:[#allocation5 + $0xeac] sm:$0xf]  ;;  %v6245_v41 = vor.u32 %v7591_v22, %v6242_v30 }
 0x1d6   :  { %v2205_v63 = vsel %vm2204_vm14, %v8265_v0, %v2203_v58  ;;  %v6432_v0 = vld [vmem:[#allocation5 + $0x9a8] sm:$0xf]  ;;  %3416 = vmatpush.bf16.msrb.mxu3 %v6577_v18  ;;  %v7602_v58 = vld [vmem:[#allocation5 + $0x524] sm:$0xf]  ;;  %v7587_v42 = vld [vmem:[#allocation5 + $0x32c] sm:$0xf] }
 0x1d7   :  { %v2208_v20 = vsel %vm2206_vm15, %v2207_v60, %v2205_v63  ;;  %3322 = vmatpush.bf16.msra.mxu0 %v6125_v62  ;;  %v6433_v23 = vor.u32 %v7641_v19, %v6432_v0  ;;  %v7577_v49 = vld [vmem:[#allocation5 + $0x1e4] sm:$0xf0]  ;;  %v6498_v60 = vld [vmem:[#allocation5 + $0xbe8] sm:$0xf0]  ;;  %v6301_v62 = vor.u32 %v7606_v54, %v6298_v57  ;;  %v6285_v48 = vor.u32 %v7602_v58, %v6282_v6  ;;  %v6266_v19 = vld [vmem:[#allocation5 + $0x4e0] sm:$0xf0] }
 0x1d8   :  { %v2210_v17 = vpack.c.bf16 %v2208_v20, %v2184_v1  ;;  %v6528_v50 = vld [vmem:[#allocation5 + $0xca8] sm:$0xf]  ;;  %v6177_v14 = vor.u32 %v7577_v49, %v6176_v43  ;;  %v6501_v1 = vor.u32 %v7655_v59, %v6498_v60  ;;  %v6482_v0 = vld [vmem:[#allocation5 + $0xb68] sm:$0xf0] }
 0x1d9   :  { %3403 = vmatpush.bf16.msrb.mxu2 %v6433_v23  ;;  %v7665_v51 = vld [vmem:[#allocation5 + $0xce4] sm:$0xf0]  ;;  %v7594_v23 = vld [vmem:[#allocation5 + $0x424] sm:$0xf]  ;;  %v6450_v43 = vld [vmem:[#allocation5 + $0xa68] sm:$0xf0] }
 0x1da   :  { %2361 = vmatmul.bf16.vlgmr.msra.gmra.mxu1 %v2210_v17  ;;  %3323 = vmatmul.bf16.vlgmr.msra.gmra.mxu0 %v8014_v26  ;;  %v6529_v44 = vor.u32 %v7665_v51, %v6528_v50  ;;  %v6384_v47 = vld [vmem:[#allocation5 + $0x828] sm:$0xf]  ;;  %v7651_v17 = vld [vmem:[#allocation5 + $0xb2c] sm:$0xf] }
 0x1db   :  { %3371 = vmatpush.bf16.msrb.mxu0 %v6241_v2  ;;  %3329 = vmatpush.bf16.msra.mxu1 %v6365_v9  ;;  %v7629_v56 = vld [vmem:[#allocation5 + $0x864] sm:$0xf0]  ;;  %v7687_v9 = vld [vmem:[#allocation5 + $0xfac] sm:$0xf] }
 0x1dc   :  { %3417 = vmatpush.bf16.msrb.mxu3 %v6561_v25  ;;  %v6160_v55 = vld [vmem:[#allocation5 + $0x128] sm:$0xf]  ;;  %v6385_v2 = vor.u32 %v7629_v56, %v6384_v47  ;;  %v6629_v10 = vor.u32 %v7687_v9, %v6626_v37  ;;  %v6269_v25 = vor.u32 %v7598_v13, %v6266_v19  ;;  %v6226_v49 = vld [vmem:[#allocation5 + $0x368] sm:$0xf0] }
 0x1dd   :  { %3404 = vmatpush.bf16.msrb.mxu2 %v6417_v31  ;;  %v7573_v63 = vld [vmem:[#allocation5 + $0x164] sm:$0xf0]  ;;  %v6594_v31 = vld [vmem:[#allocation5 + $0xee8] sm:$0xf0]  ;;  %v6229_v47 = vor.u32 %v7587_v42, %v6226_v49 }
 0x1de   :  { %v6512_v5 = vld [vmem:[#allocation5 + $0xc28] sm:$0xf]  ;;  %v6161_v16 = vor.u32 %v7573_v63, %v6160_v55  ;;  %v6597_v61 = vor.u32 %v7679_v28, %v6594_v31  ;;  %v7675_v50 = vld [vmem:[#allocation5 + $0xe2c] sm:$0xf] }
 0x1df   :  { %3372 = vmatpush.bf16.msrb.mxu0 %v6225_v35  ;;  %3330 = vmatpush.bf16.msra.mxu1 %v6349_v52  ;;  %v7661_v3 = vld [vmem:[#allocation5 + $0xc64] sm:$0xf0]  ;;  %v6485_v35 = vor.u32 %v7651_v17, %v6482_v0  ;;  %v6610_v52 = vld [vmem:[#allocation5 + $0xf68] sm:$0xf0] }
 0x1e0   :  { %3418 = vmatpush.bf16.msrb.mxu3 %v6545_v34  ;;  %v6513_v20 = vor.u32 %v7661_v3, %v6512_v5  ;;  %v6144_v38 = vld [vmem:[#allocation5 + $0xa8] sm:$0xf]  ;;  %v6613_v39 = vor.u32 %v7683_v36, %v6610_v52  ;;  %v6253_v34 = vor.u32 %v7594_v23, %v6250_v4  ;;  %v6578_v51 = vld [vmem:[#allocation5 + $0xe68] sm:$0xf0] }
 0x1e1   :  { %3405 = vmatpush.bf16.msrb.mxu2 %v6401_v12  ;;  %v7569_v18 = vld [vmem:[#allocation5 + $0xe4] sm:$0xf0]  ;;  %v7583_v56 = vld [vmem:[#allocation5 + $0x2ac] sm:$0xf] }
 0x1e2   :  { %v6145_v7 = vor.u32 %v7569_v18, %v6144_v38  ;;  %v6128_v24 = vld [vmem:[#allocation5 + $0x28] sm:$0xf]  ;;  %v7639_v58 = vld [vmem:[#allocation5 + $0x9ac] sm:$0xf] }
 0x1e3   :  { %3373 = vmatpush.bf16.msrb.mxu0 %v6209_v29  ;;  %3331 = vmatpush.bf16.msra.mxu1 %v6333_v21  ;;  %v7565_v27 = vld [vmem:[#allocation5 + $0x64] sm:$0xf0]  ;;  %v6466_v29 = vld [vmem:[#allocation5 + $0xae8] sm:$0xf0] }
 0x1e4   :  { %3419 = vmatpush.bf16.msrb.mxu3 %v6529_v44  ;;  %v6469_v21 = vor.u32 %v7647_v45, %v6466_v29  ;;  %v6368_v53 = vld [vmem:[#allocation5 + $0x7a8] sm:$0xf]  ;;  %v6129_v40 = vor.u32 %v7565_v27, %v6128_v24  ;;  %v6581_v44 = vor.u32 %v7675_v50, %v6578_v51  ;;  %v6210_v59 = vld [vmem:[#allocation5 + $0x2e8] sm:$0xf0] }
 0x1e5   :  { %3406 = vmatpush.bf16.msrb.mxu2 %v6385_v2  ;;  %v7625_v32 = vld [vmem:[#allocation5 + $0x7e4] sm:$0xf0]  ;;  %v6562_v63 = vld [vmem:[#allocation5 + $0xde8] sm:$0xf0] }
 0x1e6   :  { %v6352_v54 = vld [vmem:[#allocation5 + $0x728] sm:$0xf]  ;;  %v7635_v6 = vld [vmem:[#allocation5 + $0x92c] sm:$0xf] }
 0x1e7   :  { %3374 = vmatpush.bf16.msrb.mxu0 %v6193_v11  ;;  %3332 = vmatpush.bf16.msra.mxu1 %v6317_v46  ;;  %v7643_v11 = vld [vmem:[#allocation5 + $0xa2c] sm:$0xf]  ;;  %v6369_v46 = vor.u32 %v7625_v32, %v6368_v53  ;;  %v7621_v57 = vld [vmem:[#allocation5 + $0x764] sm:$0xf0] }
 0x1e8   :  { %3420 = vmatpush.bf16.msrb.mxu3 %v6513_v20  ;;  %3407 = vmatmul.bf16.vlgmr.msrb.gmra.mxu2 %v8008_v8  ;;  %v6453_v12 = vor.u32 %v7643_v11, %v6450_v43  ;;  %v6353_v55 = vor.u32 %v7621_v57, %v6352_v54  ;;  %v6336_v2 = vld [vmem:[#allocation5 + $0x6a8] sm:$0xf]  ;;  %v6213_v20 = vor.u32 %v7583_v56, %v6210_v59  ;;  %v7579_v9 = vld [vmem:[#allocation5 + $0x22c] sm:$0xf] }
 0x1e9   :  { %3455 = vmatpush.bf16.msra.mxu2 %v6501_v1  ;;  %v7617_v5 = vld [vmem:[#allocation5 + $0x6e4] sm:$0xf0]  ;;  %v6418_v1 = vld [vmem:[#allocation5 + $0x968] sm:$0xf0] }
 0x1ea   :  { %3281 = vmatmul.bf16.vlgmr.msrb.gmra.mxu1 %v8016_v33  ;;  %v6337_v37 = vor.u32 %v7617_v5, %v6336_v2  ;;  %v6421_v13 = vor.u32 %v7635_v6, %v6418_v1  ;;  %v6546_v17 = vld [vmem:[#allocation5 + $0xd68] sm:$0xf0]  ;;  %v7613_v38 = vld [vmem:[#allocation5 + $0x664] sm:$0xf0] }
 0x1eb   :  { %3375 = vmatpush.bf16.msrb.mxu0 %v6177_v14  ;;  %3333 = vmatpush.bf16.msra.mxu1 %v6301_v62  ;;  %v6434_v14 = vld [vmem:[#allocation5 + $0x9e8] sm:$0xf0]  ;;  %v6304_v24 = vld [vmem:[#allocation5 + $0x5a8] sm:$0xf] }
 0x1ec   :  { %3469 = vmatpush.bf16.msra.mxu3 %v6629_v10  ;;  %v6437_v60 = vor.u32 %v7639_v58, %v6434_v14  ;;  %v7671_v62 = vld [vmem:[#allocation5 + $0xdac] sm:$0xf]  ;;  %v7609_v45 = vld [vmem:[#allocation5 + $0x5e4] sm:$0xf0] }
 0x1ed   :  { %3421 = vmatmul.bf16.vlgmr.msrb.gmra.mxu3 %v8010_v15  ;;  %3456 = vmatpush.bf16.msra.mxu2 %v6485_v35  ;;  %v6565_v3 = vor.u32 %v7671_v62, %v6562_v63  ;;  %v6194_v10 = vld [vmem:[#allocation5 + $0x268] sm:$0xf0]  ;;  %v7601_v49 = vld [vmem:[#allocation5 + $0x4e4] sm:$0xf0] }
 0x1ee   :  { %v7631_v0 = vld [vmem:[#allocation5 + $0x8ac] sm:$0xf]  ;;  %v6197_v35 = vor.u32 %v7579_v9, %v6194_v10  ;;  %v6256_v57 = vld [vmem:[#allocation5 + $0x428] sm:$0xf] }
 0x1ef   :  { %3376 = vmatpush.bf16.msrb.mxu0 %v6161_v16  ;;  %3334 = vmatpush.bf16.msra.mxu1 %v6285_v48  ;;  %v7667_v16 = vld [vmem:[#allocation5 + $0xd2c] sm:$0xf]  ;;  %v6320_v48 = vld [vmem:[#allocation5 + $0x628] sm:$0xf] }
 0x1f0   :  { %3470 = vmatpush.bf16.msra.mxu3 %v6613_v39  ;;  %v6549_v18 = vor.u32 %v7667_v16, %v6546_v17  ;;  %v6402_v19 = vld [vmem:[#allocation5 + $0x8e8] sm:$0xf0]  ;;  %v6321_v52 = vor.u32 %v7613_v38, %v6320_v48 }
 0x1f1   :  { %3457 = vmatpush.bf16.msra.mxu2 %v6469_v21  ;;  %v7575_v36 = vld [vmem:[#allocation5 + $0x1ac] sm:$0xf]  ;;  %v6405_v23 = vor.u32 %v7631_v0, %v6402_v19  ;;  %v6305_v21 = vor.u32 %v7609_v45, %v6304_v24 }
 0x1f2   :  { %v6178_v39 = vld [vmem:[#allocation5 + $0x1e8] sm:$0xf0] }
 0x1f3   :  { %3377 = vmatpush.bf16.msrb.mxu0 %v6145_v7  ;;  %3335 = vmatpush.bf16.msra.mxu1 %v6269_v25  ;;  %v7663_v4 = vld [vmem:[#allocation5 + $0xcac] sm:$0xf]  ;;  %v6181_v29 = vor.u32 %v7575_v36, %v6178_v39  ;;  %v8298_v36 = vpop.f32.mrf.mxu2 }
 0x1f4   :  { %3471 = vmatpush.bf16.msra.mxu3 %v6597_v61  ;;  %v6530_v7 = vld [vmem:[#allocation5 + $0xce8] sm:$0xf0]  ;;  %v6288_v61 = vld [vmem:[#allocation5 + $0x528] sm:$0xf] }
 0x1f5   :  { %3458 = vmatpush.bf16.msra.mxu2 %v6453_v12  ;;  %v6533_v25 = vor.u32 %v7663_v4, %v6530_v7  ;;  %v7627_v27 = vld [vmem:[#allocation5 + $0x82c] sm:$0xf] }
 0x1f6   :  { %v6386_v22 = vld [vmem:[#allocation5 + $0x868] sm:$0xf0] }
 0x1f7   :  { %3378 = vmatpush.bf16.msrb.mxu0 %v6129_v40  ;;  %3336 = vmatpush.bf16.msra.mxu1 %v6253_v34  ;;  %v7571_v30 = vld [vmem:[#allocation5 + $0x12c] sm:$0xf]  ;;  %v6389_v31 = vor.u32 %v7627_v27, %v6386_v22  ;;  %v7605_v40 = vld [vmem:[#allocation5 + $0x564] sm:$0xf0] }
 0x1f8   :  { %3472 = vmatpush.bf16.msra.mxu3 %v6581_v44  ;;  %v6162_v28 = vld [vmem:[#allocation5 + $0x168] sm:$0xf0]  ;;  %v6289_v42 = vor.u32 %v7605_v40, %v6288_v61  ;;  %v7597_v44 = vld [vmem:[#allocation5 + $0x464] sm:$0xf0] }
 0x1f9   :  { %3459 = vmatpush.bf16.msra.mxu2 %v6437_v60  ;;  %v7659_v53 = vld [vmem:[#allocation5 + $0xc2c] sm:$0xf]  ;;  %v6257_v14 = vor.u32 %v7597_v44, %v6256_v57  ;;  %v7692_v44 = vld [vmem:[%s8541_s2 + $0x110] sm:$0xff] }
 0x1fa   :  { %3379 = vmatmul.bf16.vlgmr.msrb.gmra.mxu0 %v8014_v26  ;;  %3337 = vmatmul.bf16.vlgmr.msra.gmra.mxu1 %v8016_v33  ;;  %v6514_v32 = vld [vmem:[#allocation5 + $0xc68] sm:$0xf0] }
 0x1fb   :  { %3427 = vmatpush.bf16.msra.mxu0 %v6245_v41  ;;  %3385 = vmatpush.bf16.msrb.mxu1 %v6369_v46  ;;  %v6517_v34 = vor.u32 %v7659_v53, %v6514_v32  ;;  %v6165_v41 = vor.u32 %v7571_v30, %v6162_v28  ;;  %v7567_v11 = vld [vmem:[#allocation5 + $0xac] sm:$0xf]  ;;  %v6272_v46 = vld [vmem:[#allocation5 + $0x4a8] sm:$0xf]  ;;  %v2474_v45 = vpop.f32.mrf.mxu2  ;;  %v7697_v53 = vld [vmem:[%s8541_s2 + $0x138] sm:$0xff] }
 0x1fc   :  { %3473 = vmatpush.bf16.msra.mxu3 %v6565_v3  ;;  %v6146_v43 = vld [vmem:[#allocation5 + $0xe8] sm:$0xf0]  ;;  %v6273_v50 = vor.u32 %v7601_v49, %v6272_v46 }
 0x1fd   :  { %3460 = vmatpush.bf16.msra.mxu2 %v6421_v13  ;;  %v6149_v12 = vor.u32 %v7567_v11, %v6146_v43  ;;  %v7563_v51 = vld [vmem:[#allocation5 + $0x2c] sm:$0xf]  ;;  %v7705_v43 = vld [vmem:[%s8541_s2 + $0x178] sm:$0xff] }
 0x1fe   :  { %v6130_v54 = vld [vmem:[#allocation5 + $0x68] sm:$0xf0] }
 0x1ff   :  { %3428 = vmatpush.bf16.msra.mxu0 %v6229_v47  ;;  %3386 = vmatpush.bf16.msrb.mxu1 %v6353_v55  ;;  %v7623_v47 = vld [vmem:[#allocation5 + $0x7ac] sm:$0xf]  ;;  %v6133_v58 = vor.u32 %v7563_v51, %v6130_v54  ;;  %v7693_v51 = vld [vmem:[%s8541_s2 + $0x118] sm:$0xff] }
 0x200   :  { %3474 = vmatpush.bf16.msra.mxu3 %v6549_v18  ;;  %v6370_v56 = vld [vmem:[#allocation5 + $0x7e8] sm:$0xf0] }
 0x201   :  { %3461 = vmatpush.bf16.msra.mxu2 %v6405_v23  ;;  %v6373_v55 = vor.u32 %v7623_v47, %v6370_v56  ;;  %v7619_v59 = vld [vmem:[#allocation5 + $0x72c] sm:$0xf]  ;;  %v8302_v23 = vpop.f32.mrf.mxu3  ;;  %v6808_v47 = vld [vmem:[#allocation5 + $0x3b0] sm:$0xf] }
 0x202   :  { %v6354_v60 = vld [vmem:[#allocation5 + $0x768] sm:$0xf0] }
 0x203   :  { %3429 = vmatpush.bf16.msra.mxu0 %v6213_v20  ;;  %3387 = vmatpush.bf16.msrb.mxu1 %v6337_v37  ;;  %v6357_v62 = vor.u32 %v7619_v59, %v6354_v60  ;;  %v7615_v63 = vld [vmem:[#allocation5 + $0x6ac] sm:$0xf] }
 0x204   :  { %3475 = vmatpush.bf16.msra.mxu3 %v6533_v25  ;;  %v6338_v2 = vld [vmem:[#allocation5 + $0x6e8] sm:$0xf0] }
 0x205   :  { %3462 = vmatpush.bf16.msra.mxu2 %v6389_v31  ;;  %v6341_v5 = vor.u32 %v7615_v63, %v6338_v2  ;;  %v7611_v3 = vld [vmem:[#allocation5 + $0x62c] sm:$0xf]  ;;  %v6792_v63 = vld [vmem:[#allocation5 + $0x330] sm:$0xf] }
 0x206   :  { %v6322_v6 = vld [vmem:[#allocation5 + $0x668] sm:$0xf0] }
 0x207   :  { %3430 = vmatpush.bf16.msra.mxu0 %v6197_v35  ;;  %3388 = vmatpush.bf16.msrb.mxu1 %v6321_v52  ;;  %v6325_v1 = vor.u32 %v7611_v3, %v6322_v6  ;;  %v7607_v20 = vld [vmem:[#allocation5 + $0x5ac] sm:$0xf]  ;;  %v7732_v3 = vld [vmem:[#allocation5 + $0x36c] sm:$0xf0] }
 0x208   :  { %3476 = vmatpush.bf16.msra.mxu3 %v6517_v34  ;;  %3463 = vmatmul.bf16.vlgmr.msra.gmra.mxu2 %v8008_v8  ;;  %v6306_v9 = vld [vmem:[#allocation5 + $0x5e8] sm:$0xf0]  ;;  %v7696_v34 = vld [vmem:[%s8541_s2 + $0x130] sm:$0xff] }
 0x209   :  { %v6309_v37 = vor.u32 %v7607_v20, %v6306_v9  ;;  %v7603_v10 = vld [vmem:[#allocation5 + $0x52c] sm:$0xf]  ;;  %v2488_v27 = vpop.f32.mrf.mxu3  ;;  %v6920_v6 = vld [vmem:[#allocation5 + $0x730] sm:$0xf]  ;;  %v6793_v9 = vor.u32 %v7732_v3, %v6792_v63 }
 0x20a   :  { %v6290_v13 = vld [vmem:[#allocation5 + $0x568] sm:$0xf0] }
 0x20b   :  { %3431 = vmatpush.bf16.msra.mxu0 %v6181_v29  ;;  %3389 = vmatpush.bf16.msrb.mxu1 %v6305_v21  ;;  %v6293_v16 = vor.u32 %v7603_v10, %v6290_v13  ;;  %v7599_v17 = vld [vmem:[#allocation5 + $0x4ac] sm:$0xf]  ;;  %v7701_v13 = vld [vmem:[%s8541_s2 + $0x158] sm:$0xff] }
 0x20c   :  { %3477 = vmatmul.bf16.vlgmr.msra.gmra.mxu3 %v8010_v15  ;;  %v6274_v48 = vld [vmem:[#allocation5 + $0x4e8] sm:$0xf0] }
 0x20d   :  { %v6277_v38 = vor.u32 %v7599_v17, %v6274_v48  ;;  %v7595_v18 = vld [vmem:[#allocation5 + $0x42c] sm:$0xf]  ;;  %v7690_v17 = vld [vmem:[%s8541_s2 + $0x100] sm:$0xff]  ;;  %v6776_v48 = vld [vmem:[#allocation5 + $0x2b0] sm:$0xf] }
 0x20e   :  { %v6258_v0 = vld [vmem:[#allocation5 + $0x468] sm:$0xf0] }
 0x20f   :  { %3432 = vmatpush.bf16.msra.mxu0 %v6165_v41  ;;  %3390 = vmatpush.bf16.msrb.mxu1 %v6289_v42  ;;  %v6261_v19 = vor.u32 %v7595_v18, %v6258_v0  ;;  %v7695_v42 = vld [vmem:[%s8541_s2 + $0x128] sm:$0xff] }
 0x210   :  { %v7703_v57 = vld [vmem:[%s8541_s2 + $0x168] sm:$0xff] }
 0x211   :  { %v7691_v20 = vld [vmem:[%s8541_s2 + $0x108] sm:$0xff] }
 0x213   :  { %3433 = vmatpush.bf16.msra.mxu0 %v6149_v12  ;;  %3391 = vmatpush.bf16.msrb.mxu1 %v6273_v50  ;;  %v7694_v12 = vld [vmem:[%s8541_s2 + $0x120] sm:$0xff]  ;;  %v7704_v50 = vld [vmem:[%s8541_s2 + $0x170] sm:$0xff] }
 0x217   :  { %3434 = vmatpush.bf16.msra.mxu0 %v6133_v58  ;;  %3392 = vmatpush.bf16.msrb.mxu1 %v6257_v14  ;;  %v7736_v58 = vld [vmem:[#allocation5 + $0x3ec] sm:$0xf0] }
 0x218   :  { %v6936_v14 = vld [vmem:[#allocation5 + $0x7b0] sm:$0xf]  ;;  %v6809_v59 = vor.u32 %v7736_v58, %v6808_v47 }
 0x21a   :  { %3435 = vmatmul.bf16.vlgmr.msra.gmra.mxu0 %v8014_v26  ;;  %3393 = vmatmul.bf16.vlgmr.msrb.gmra.mxu1 %v8016_v33 }
 0x21b   :  { %3441 = vmatpush.bf16.msra.mxu1 %v6373_v55  ;;  %3673 = vmatpush.bf16.msrb.mxu0 %v7697_v53  ;;  %v7768_v55 = vld [vmem:[#allocation5 + $0x7ec] sm:$0xf0] }
 0x21c   :  { %v6937_v60 = vor.u32 %v7768_v55, %v6936_v14  ;;  %4471 = vmatpush.bf16.msrb.mxu2 %v6809_v59  ;;  %v7724_v53 = vld [vmem:[#allocation5 + $0x26c] sm:$0xf0]  ;;  %v7699_v14 = vld [vmem:[%s8541_s2 + $0x148] sm:$0xff] }
 0x21d   :  { %v7720_v59 = vld [vmem:[#allocation5 + $0x1ec] sm:$0xf0] }
 0x21e   :  { %4485 = vmatpush.bf16.msrb.mxu3 %v6937_v60  ;;  %v6872_v60 = vld [vmem:[#allocation5 + $0x5b0] sm:$0xf] }
 0x21f   :  { %3442 = vmatpush.bf16.msra.mxu1 %v6357_v62  ;;  %3674 = vmatpush.bf16.msrb.mxu0 %v7696_v34  ;;  %v7702_v62 = vld [vmem:[%s8541_s2 + $0x160] sm:$0xff]  ;;  %v6888_v34 = vld [vmem:[#allocation5 + $0x630] sm:$0xf] }
 0x220   :  { %4472 = vmatpush.bf16.msrb.mxu2 %v6793_v9 }
 0x223   :  { %3443 = vmatpush.bf16.msra.mxu1 %v6341_v5  ;;  %3675 = vmatpush.bf16.msrb.mxu0 %v7695_v42 }
 0x227   :  { %3444 = vmatpush.bf16.msra.mxu1 %v6325_v1  ;;  %3676 = vmatpush.bf16.msrb.mxu0 %v7694_v12  ;;  %v7764_v1 = vld [vmem:[#allocation5 + $0x76c] sm:$0xf0] }
 0x228   :  { %v7756_v12 = vld [vmem:[#allocation5 + $0x66c] sm:$0xf0] }
 0x229   :  { %v3296_v30 = vpop.f32.mrf.mxu2  ;;  %v6889_v47 = vor.u32 %v7756_v12, %v6888_v34  ;;  %v7828_v34 = vld [vmem:[#allocation5 + $0xf6c] sm:$0xf0] }
 0x22a   :  { %v7712_v12 = vld [vmem:[#allocation5 + $0xec] sm:$0xf0] }
 0x22b   :  { %3445 = vmatpush.bf16.msra.mxu1 %v6309_v37  ;;  %3677 = vmatpush.bf16.msrb.mxu0 %v7693_v51  ;;  %v6921_v37 = vor.u32 %v7764_v1, %v6920_v6  ;;  %v7796_v51 = vld [vmem:[#allocation5 + $0xb6c] sm:$0xf0] }
 0x22c   :  { %v8306_v28 = vpop.f32.mrf.mxu3  ;;  %v7752_v6 = vld [vmem:[#allocation5 + $0x5ec] sm:$0xf0] }
 0x22d   :  { %4486 = vmatpush.bf16.msrb.mxu3 %v6921_v37  ;;  %v6873_v9 = vor.u32 %v7752_v6, %v6872_v60  ;;  %v6696_v60 = vld [vmem:[#allocation5 + $0x30] sm:$0xf] }
 0x22e   :  { %v7708_v6 = vld [vmem:[#allocation5 + $0x6c] sm:$0xf0] }
 0x22f   :  { %3446 = vmatpush.bf16.msra.mxu1 %v6293_v16  ;;  %3678 = vmatpush.bf16.msrb.mxu0 %v7692_v44 }
 0x231   :  { %v8313_v32 = vpop.f32.mrf.mxu2 }
 0x233   :  { %3447 = vmatpush.bf16.msra.mxu1 %v6277_v38  ;;  %3679 = vmatpush.bf16.msrb.mxu0 %v7691_v20  ;;  %v7728_v38 = vld [vmem:[#allocation5 + $0x2ec] sm:$0xf0] }
 0x234   :  { %v8317_v40 = vpop.f32.mrf.mxu3 }
 0x237   :  { %3448 = vmatpush.bf16.msra.mxu1 %v6261_v19  ;;  %v2348_v35 = vpop.f32.mrf.mxu0  ;;  %v6777_v19 = vor.u32 %v7728_v38, %v6776_v48  ;;  %3680 = vmatpush.bf16.msrb.mxu0 %v7690_v17  ;;  %v7192_v17 = vld [vmem:[#allocation5 + $0xfb0] sm:$0xf] }
 0x238   :  { %v7832_v48 = vld [vmem:[#allocation5 + $0xfec] sm:$0xf0] }
 0x239   :  { %4473 = vmatpush.bf16.msrb.mxu2 %v6777_v19 }
 0x23a   :  { %3449 = vmatmul.bf16.vlgmr.msra.gmra.mxu1 %v8016_v33 }
 0x23b   :  { %3687 = vmatpush.bf16.msrb.mxu1 %v7705_v43 }
 0x23f   :  { %v2350_v4 = vpop.f32.mrf.mxu0  ;;  %3688 = vmatpush.bf16.msrb.mxu1 %v7704_v50  ;;  %v7048_v50 = vld [vmem:[#allocation5 + $0xb30] sm:$0xf] }
 0x240   :  { %v7049_v58 = vor.u32 %v7796_v51, %v7048_v50  ;;  %v6840_v50 = vld [vmem:[#allocation5 + $0x4b0] sm:$0xf] }
 0x243   :  { %3689 = vmatpush.bf16.msrb.mxu1 %v7703_v57 }
 0x247   :  { %v3268_v29 = vpop.f32.mrf.mxu0  ;;  %3690 = vmatpush.bf16.msrb.mxu1 %v7702_v62 }
 0x249   :  { %v8327_v11 = vpop.f32.mrf.mxu2 }
 0x24b   :  { %3691 = vmatpush.bf16.msrb.mxu1 %v7701_v13 }
 0x24c   :  { %v8334_v49 = vpop.f32.mrf.mxu3 }
 0x24f   :  { %v8308_v31 = vpop.f32.mrf.mxu0 }
 0x251   :  { %v8353_v56 = vpop.f32.mrf.mxu2 }
 0x254   :  { %v8360_v5 = vpop.f32.mrf.mxu3 }
 0x257   :  { %v2362_v52 = vpop.f32.mrf.mxu1  ;;  %v8322_v41 = vpop.f32.mrf.mxu0 }
 0x258   :  { %v8300_v39 = vadd.f32 %v2362_v52, %v2348_v35  ;;  %v6904_v35 = vld [vmem:[#allocation5 + $0x6b0] sm:$0xf] }
 0x259   :  { %v7760_v52 = vld [vmem:[#allocation5 + $0x6ec] sm:$0xf0] }
 0x25f   :  { %v2364_v7 = vpop.f32.mrf.mxu1  ;;  %v8345_v54 = vpop.f32.mrf.mxu0 }
 0x260   :  { %v2365_v24 = vadd.f32 %v2364_v7, %v2350_v4  ;;  %v7064_v4 = vld [vmem:[#allocation5 + $0xbb0] sm:$0xf]  ;;  %v6905_v7 = vor.u32 %v7760_v52, %v6904_v35 }
 0x261   :  { %v7716_v35 = vld [vmem:[#allocation5 + $0x16c] sm:$0xf0] }
 0x262   :  { %v2475_v25 = vadd.f32 %v2474_v45, %v2365_v24  ;;  %v7800_v24 = vld [vmem:[#allocation5 + $0xbec] sm:$0xf0]  ;;  %4487 = vmatpush.bf16.msrb.mxu3 %v6905_v7 }
 0x263   :  { %v7700_v45 = vld [vmem:[%s8541_s2 + $0x150] sm:$0xff] }
 0x264   :  { %v8304_v22 = vadd.f32 %v2488_v27, %v2475_v25  ;;  %3692 = vmatpush.bf16.msrb.mxu1 %v7700_v45  ;;  %v6856_v52 = vld [vmem:[#allocation5 + $0x530] sm:$0xf] }
 0x265   :  { %v7016_v45 = vld [vmem:[#allocation5 + $0xa30] sm:$0xf] }
 0x266   :  { %4488 = vmatpush.bf16.msrb.mxu3 %v6889_v47  ;;  %v7000_v47 = vld [vmem:[#allocation5 + $0x9b0] sm:$0xf] }
 0x267   :  { %v3282_v21 = vpop.f32.mrf.mxu1 }
 0x268   :  { %v3283_v10 = vadd.f32 %v3282_v21, %v3268_v29  ;;  %v7065_v29 = vor.u32 %v7800_v24, %v7064_v4  ;;  %3693 = vmatpush.bf16.msrb.mxu1 %v7699_v14  ;;  %v7748_v24 = vld [vmem:[#allocation5 + $0x56c] sm:$0xf0] }
 0x26a   :  { %v3297_v18 = vadd.f32 %v3296_v30, %v3283_v10  ;;  %v6760_v30 = vld [vmem:[#allocation5 + $0x230] sm:$0xf]  ;;  %4499 = vmatpush.bf16.msra.mxu0 %v7065_v29  ;;  %v7698_v10 = vld [vmem:[%s8541_s2 + $0x140] sm:$0xff]  ;;  %4489 = vmatpush.bf16.msrb.mxu3 %v6873_v9 }
 0x26b   :  { %v3408_v0 = vpop.f32.mrf.mxu2  ;;  %v6761_v43 = vor.u32 %v7724_v53, %v6760_v30  ;;  %v7788_v29 = vld [vmem:[#allocation5 + $0xa6c] sm:$0xf0] }
 0x26c   :  { %v3311_v42 = vadd.f32 %v8306_v28, %v3297_v18  ;;  %v6744_v28 = vld [vmem:[#allocation5 + $0x1b0] sm:$0xf]  ;;  %3694 = vmatpush.bf16.msrb.mxu1 %v7698_v10  ;;  %v7017_v53 = vor.u32 %v7788_v29, %v7016_v45  ;;  %v6794_v29 = vld [vmem:[#allocation5 + $0x370] sm:$0xf0] }
 0x26d   :  { %4474 = vmatpush.bf16.msrb.mxu2 %v6761_v43  ;;  %v6745_v3 = vor.u32 %v7720_v59, %v6744_v28  ;;  %v6712_v43 = vld [vmem:[#allocation5 + $0xb0] sm:$0xf] }
 0x26e   :  { %v3483_v62 = vmul.f32 %v3311_v42, %v3311_v42  ;;  %4500 = vmatpush.bf16.msra.mxu0 %v7049_v58  ;;  %v7784_v58 = vld [vmem:[#allocation5 + $0x9ec] sm:$0xf0] }
 0x26f   :  { %v8315_v61 = vpop.f32.mrf.mxu1  ;;  %v7160_v28 = vld [vmem:[#allocation5 + $0xeb0] sm:$0xf] }
 0x270   :  { %v3422_v27 = vpop.f32.mrf.mxu3  ;;  %v3285_v57 = vadd.f32 %v8315_v61, %v8308_v31  ;;  %v7032_v31 = vld [vmem:[#allocation5 + $0xab0] sm:$0xf] }
 0x271   :  { %v7792_v61 = vld [vmem:[#allocation5 + $0xaec] sm:$0xf0]  ;;  %4475 = vmatpush.bf16.msrb.mxu2 %v6745_v3 }
 0x272   :  { %v3299_v1 = vadd.f32 %v8313_v32, %v3285_v57  ;;  %v7033_v37 = vor.u32 %v7792_v61, %v7032_v31  ;;  %v6728_v32 = vld [vmem:[#allocation5 + $0x130] sm:$0xf]  ;;  %v6713_v57 = vor.u32 %v7712_v12, %v6712_v43 }
 0x273   :  { %v7824_v59 = vld [vmem:[#allocation5 + $0xeec] sm:$0xf0] }
 0x274   :  { %4501 = vmatpush.bf16.msra.mxu0 %v7033_v37  ;;  %v3313_v4 = vadd.f32 %v8317_v40, %v3299_v1  ;;  %v7161_v3 = vor.u32 %v7824_v59, %v7160_v28  ;;  %v6824_v31 = vld [vmem:[#allocation5 + $0x430] sm:$0xf] }
 0x275   :  { %v7740_v61 = vld [vmem:[#allocation5 + $0x46c] sm:$0xf0] }
 0x276   :  { %v3485_v40 = vmul.f32 %v3313_v4, %v3313_v4  ;;  %v6825_v9 = vor.u32 %v7740_v61, %v6824_v31  ;;  %v6984_v37 = vld [vmem:[#allocation5 + $0x930] sm:$0xf] }
 0x277   :  { %v8332_v46 = vpop.f32.mrf.mxu1  ;;  %v3380_v16 = vpop.f32.mrf.mxu0  ;;  %v7780_v10 = vld [vmem:[#allocation5 + $0x96c] sm:$0xf0] }
 0x278   :  { %v3424_v19 = vpop.f32.mrf.mxu3  ;;  %4502 = vmatpush.bf16.msra.mxu0 %v7017_v53  ;;  %v6968_v4 = vld [vmem:[#allocation5 + $0x8b0] sm:$0xf]  ;;  %v7762_v53 = vld [vmem:[#allocation5 + $0x734] sm:$0xf] }
 0x279   :  { %v7812_v31 = vld [vmem:[#allocation5 + $0xd6c] sm:$0xf0] }
 0x27f   :  { %v8358_v2 = vpop.f32.mrf.mxu1  ;;  %v3382_v63 = vpop.f32.mrf.mxu0 }
 0x297   :  { %v3394_v25 = vpop.f32.mrf.mxu1  ;;  %v3436_v28 = vpop.f32.mrf.mxu0 }
 0x298   :  { %v3395_v21 = vadd.f32 %v3394_v25, %v3380_v16  ;;  %v3410_v16 = vpop.f32.mrf.mxu2  ;;  %v6729_v25 = vor.u32 %v7716_v35, %v6728_v32  ;;  %v7144_v32 = vld [vmem:[#allocation5 + $0xe30] sm:$0xf] }
 0x29a   :  { %v3409_v44 = vadd.f32 %v3408_v0, %v3395_v21  ;;  %v7193_v0 = vor.u32 %v7832_v48, %v7192_v17  ;;  %v7176_v21 = vld [vmem:[#allocation5 + $0xf30] sm:$0xf]  ;;  %4476 = vmatpush.bf16.msrb.mxu2 %v6729_v25  ;;  %v6985_v48 = vor.u32 %v7780_v10, %v6984_v37 }
 0x29b   :  { %v7177_v42 = vor.u32 %v7828_v34, %v7176_v21  ;;  %v6922_v34 = vld [vmem:[#allocation5 + $0x770] sm:$0xf0] }
 0x29c   :  { %v3423_v55 = vadd.f32 %v3422_v27, %v3409_v44  ;;  %4513 = vmatpush.bf16.msra.mxu1 %v7193_v0  ;;  %v6857_v27 = vor.u32 %v7748_v24, %v6856_v52  ;;  %v7744_v44 = vld [vmem:[#allocation5 + $0x4ec] sm:$0xf0]  ;;  %v7766_v0 = vld [vmem:[#allocation5 + $0x7b4] sm:$0xf]  ;;  %v3339_v24 = vadd.f32 %v8332_v46, %v8322_v41  ;;  %v6925_v12 = vor.u32 %v7762_v53, %v6922_v34 }
 0x29d   :  { %v6841_v14 = vor.u32 %v7744_v44, %v6840_v50  ;;  %v7820_v52 = vld [vmem:[#allocation5 + $0xe6c] sm:$0xf0]  ;;  %v6778_v44 = vld [vmem:[#allocation5 + $0x2f0] sm:$0xf0] }
 0x29e   :  { %v3487_v20 = vmul.f32 %v3423_v55, %v3423_v55  ;;  %4490 = vmatpush.bf16.msrb.mxu3 %v6857_v27  ;;  %v7001_v55 = vor.u32 %v7784_v58, %v7000_v47  ;;  %4477 = vmatpush.bf16.msrb.mxu2 %v6713_v57  ;;  %v7145_v25 = vor.u32 %v7820_v52, %v7144_v32  ;;  %v7730_v27 = vld [vmem:[#allocation5 + $0x334] sm:$0xf]  ;;  %v7816_v50 = vld [vmem:[#allocation5 + $0xdec] sm:$0xf0]  ;;  %v3478_v32 = vpop.f32.mrf.mxu3 }
 0x29f   :  { %v3396_v13 = vpop.f32.mrf.mxu1  ;;  %v7726_v57 = vld [vmem:[#allocation5 + $0x2b4] sm:$0xf]  ;;  %v3353_v47 = vadd.f32 %v8327_v11, %v3339_v24 }
 0x2a0   :  { %v8384_v38 = vadd.f32 %v3487_v20, %v3483_v62  ;;  %v3397_v18 = vadd.f32 %v3396_v13, %v3382_v63  ;;  %4514 = vmatpush.bf16.msra.mxu1 %v7177_v42  ;;  %v6697_v20 = vor.u32 %v7708_v6, %v6696_v60  ;;  %v7734_v13 = vld [vmem:[#allocation5 + $0x3b4] sm:$0xf]  ;;  %4503 = vmatpush.bf16.msra.mxu0 %v7001_v55  ;;  %v7128_v42 = vld [vmem:[#allocation5 + $0xdb0] sm:$0xf]  ;;  %v3464_v37 = vpop.f32.mrf.mxu2 }
 0x2a1   :  { %v7129_v46 = vor.u32 %v7816_v50, %v7128_v42  ;;  %v6906_v55 = vld [vmem:[#allocation5 + $0x6f0] sm:$0xf0]  ;;  %v7112_v6 = vld [vmem:[#allocation5 + $0xd30] sm:$0xf] }
 0x2a2   :  { %7875 = vrsqrt.f32 %v8384_v38  ;;  %v3411_v7 = vadd.f32 %v3410_v16, %v3397_v18  ;;  %4491 = vmatpush.bf16.msrb.mxu3 %v6841_v14  ;;  %v6810_v16 = vld [vmem:[#allocation5 + $0x3f0] sm:$0xf0]  ;;  %4478 = vmatpush.bf16.msrb.mxu2 %v6697_v20  ;;  %v7113_v10 = vor.u32 %v7812_v31, %v7112_v6  ;;  %vm3502_vm0 = vcmp.eq.f32.partialorder %v8384_v38, inf }
 0x2a3   :  { %v6813_v18 = vor.u32 %v7734_v13, %v6810_v16  ;;  %v7758_v14 = vld [vmem:[#allocation5 + $0x6b4] sm:$0xf]  ;;  %vm3504_vm1 = vcmp.eq.f32.partialorder %v8384_v38, 0.0 }
 0x2a4   :  { %v3425_v30 = vadd.f32 %v3424_v19, %v3411_v7  ;;  %4515 = vmatpush.bf16.msra.mxu1 %v7161_v3  ;;  %v6938_v19 = vld [vmem:[#allocation5 + $0x7f0] sm:$0xf0]  ;;  %v7776_v7 = vld [vmem:[#allocation5 + $0x8ec] sm:$0xf0]  ;;  %4504 = vmatpush.bf16.msra.mxu0 %v6985_v48  ;;  %v6781_v3 = vor.u32 %v7726_v57, %v6778_v44  ;;  %v3438_v44 = vpop.f32.mrf.mxu0 }
 0x2a5   :  { %v6941_v35 = vor.u32 %v7766_v0, %v6938_v19  ;;  %v6969_v21 = vor.u32 %v7776_v7, %v6968_v4  ;;  %4479 = vmatmul.bf16.vlgmr.msrb.gmra.mxu2 %v8014_v26  ;;  %v7722_v20 = vld [vmem:[#allocation5 + $0x234] sm:$0xf]  ;;  %v7808_v0 = vld [vmem:[#allocation5 + $0xcec] sm:$0xf0]  ;;  %v3341_v19 = vadd.f32 %v8358_v2, %v8345_v54 }
 0x2a6   :  { %v3489_v51 = vmul.f32 %v3425_v30, %v3425_v30  ;;  %4492 = vmatpush.bf16.msrb.mxu3 %v6825_v9  ;;  %4527 = vmatpush.bf16.msra.mxu2 %v6813_v18  ;;  %v6797_v30 = vor.u32 %v7730_v27, %v6794_v29  ;;  %v6762_v9 = vld [vmem:[#allocation5 + $0x270] sm:$0xf0]  ;;  %v7096_v18 = vld [vmem:[#allocation5 + $0xcb0] sm:$0xf] }
 0x2a7   :  { %v7754_v13 = vld [vmem:[#allocation5 + $0x634] sm:$0xf]  ;;  %v6765_v52 = vor.u32 %v7722_v20, %v6762_v9  ;;  %v3355_v34 = vadd.f32 %v8353_v56, %v3341_v19 }
 0x2a8   :  { %v7876_v62 = vpop.eup %7875  ;;  %v8388_v63 = vadd.f32 %v3489_v51, %v3485_v40  ;;  %4516 = vmatpush.bf16.msra.mxu1 %v7145_v25  ;;  %v6952_v40 = vld [vmem:[#allocation5 + $0x830] sm:$0xf]  ;;  %4505 = vmatpush.bf16.msra.mxu0 %v6969_v21  ;;  %v6890_v16 = vld [vmem:[#allocation5 + $0x670] sm:$0xf0]  ;;  %v7097_v25 = vor.u32 %v7808_v0, %v7096_v18 }
 0x2a9   :  { %v3496_v1 = vmul.f32 %v7876_v62, %v8384_v38  ;;  %v7772_v51 = vld [vmem:[#allocation5 + $0x86c] sm:$0xf0]  ;;  %4493 = vmatmul.bf16.vlgmr.msrb.gmra.mxu3 %v8016_v33  ;;  %v7718_v4 = vld [vmem:[#allocation5 + $0x1b4] sm:$0xf] }
 0x2aa   :  { %7877 = vrsqrt.f32 %v8388_v63  ;;  %4541 = vmatpush.bf16.msra.mxu3 %v6941_v35  ;;  %4528 = vmatpush.bf16.msra.mxu2 %v6797_v30  ;;  %v6953_v60 = vor.u32 %v7772_v51, %v6952_v40  ;;  %v6746_v7 = vld [vmem:[#allocation5 + $0x1f0] sm:$0xf0]  ;;  %v7080_v21 = vld [vmem:[#allocation5 + $0xc30] sm:$0xf]  ;;  %vm3526_vm2 = vcmp.eq.f32.partialorder %v8388_v63, inf  ;;  %v3529_v56 = vand.u32 2147483648, %v8388_v63 }
 0x2ab   :  { %v3497_v17 = vmul.f32 %v7876_v62, %v3496_v1  ;;  %v6909_v1 = vor.u32 %v7758_v14, %v6906_v55  ;;  %v7750_v27 = vld [vmem:[#allocation5 + $0x5b4] sm:$0xf]  ;;  %v7804_v30 = vld [vmem:[#allocation5 + $0xc6c] sm:$0xf0]  ;;  %vm3528_vm3 = vcmp.eq.f32.partialorder %v8388_v63, 0.0 }
 0x2ac   :  { %4517 = vmatpush.bf16.msra.mxu1 %v7129_v46  ;;  %4506 = vmatpush.bf16.msra.mxu0 %v6953_v60  ;;  %v6874_v29 = vld [vmem:[#allocation5 + $0x5f0] sm:$0xf0]  ;;  %v7081_v57 = vor.u32 %v7804_v30, %v7080_v21 }
 0x2ad   :  { %v3498_v45 = vmul.f32 0.5, %v3497_v17  ;;  %v3367_v17 = vadd.f32 %v8334_v49, %v3353_v47  ;;  %v6893_v49 = vor.u32 %v7754_v13, %v6890_v16  ;;  %v7798_v46 = vld [vmem:[#allocation5 + $0xbb4] sm:$0xf] }
 0x2ae   :  { %4542 = vmatpush.bf16.msra.mxu3 %v6925_v12  ;;  %4529 = vmatpush.bf16.msra.mxu2 %v6781_v3  ;;  %v6877_v12 = vor.u32 %v7750_v27, %v6874_v29  ;;  %v7066_v51 = vld [vmem:[#allocation5 + $0xbf0] sm:$0xf0] }
 0x2af   :  { %v3499_v43 = vsub.f32 1.5, %v3498_v45  ;;  %v3484_v53 = vmul.f32 %v3367_v17, %v3367_v17  ;;  %v7069_v3 = vor.u32 %v7798_v46, %v7066_v51  ;;  %v7714_v6 = vld [vmem:[#allocation5 + $0x134] sm:$0xf] }
 0x2b0   :  { %v7878_v41 = vpop.eup %7877  ;;  %4518 = vmatpush.bf16.msra.mxu1 %v7113_v10  ;;  %v6730_v31 = vld [vmem:[#allocation5 + $0x170] sm:$0xf0] }
 0x2b1   :  { %v3520_v58 = vmul.f32 %v7878_v41, %v8388_v63  ;;  %v3500_v59 = vmul.f32 %v7876_v62, %v3499_v43  ;;  %v6749_v43 = vor.u32 %v7718_v4, %v6746_v7  ;;  %v7794_v9 = vld [vmem:[#allocation5 + $0xb34] sm:$0xf]  ;;  %v6733_v10 = vor.u32 %v7714_v6, %v6730_v31 }
 0x2b2   :  { %4543 = vmatpush.bf16.msra.mxu3 %v6909_v1  ;;  %4530 = vmatpush.bf16.msra.mxu2 %v6765_v52  ;;  %v7790_v19 = vld [vmem:[#allocation5 + $0xab4] sm:$0xf] }
 0x2b3   :  { %v3521_v61 = vmul.f32 %v7878_v41, %v3520_v58  ;;  %v3501_v35 = vmul.f32 %v3500_v59, %v8384_v38  ;;  %v6842_v52 = vld [vmem:[#allocation5 + $0x4f0] sm:$0xf0] }
 0x2b4   :  { %4519 = vmatpush.bf16.msra.mxu1 %v7097_v25  ;;  %v7706_v25 = vld [vmem:[#allocation5 + $0x34] sm:$0xf] }
 0x2b5   :  { %v3522_v48 = vmul.f32 0.5, %v3521_v61  ;;  %v3503_v42 = vsel %vm3502_vm0, %v8384_v38, %v3501_v35  ;;  %v7746_v61 = vld [vmem:[#allocation5 + $0x534] sm:$0xf]  ;;  %vm4927_vm0 = vcmask 261120  }
 0x2b6   :  { %4544 = vmatpush.bf16.msra.mxu3 %v6893_v49  ;;  %4531 = vmatpush.bf16.msra.mxu2 %v6749_v43  ;;  %v6698_v27 = vld [vmem:[#allocation5 + $0x70] sm:$0xf0]  ;;  %v7737_v43 = vld [vmem:[#allocation5 + $0x3f4] sm:$0xf0] }
 0x2b7   :  { %v3450_v11 = vpop.f32.mrf.mxu1  ;;  %v3523_v45 = vsub.f32 1.5, %v3522_v48  ;;  %v6714_v48 = vld [vmem:[#allocation5 + $0xf0] sm:$0xf0] }
 0x2b8   :  { %v3451_v62 = vadd.f32 %v3450_v11, %v3436_v28  ;;  %v3466_v28 = vpop.f32.mrf.mxu2  ;;  %4520 = vmatpush.bf16.msra.mxu1 %v7081_v57  ;;  %v6858_v11 = vld [vmem:[#allocation5 + $0x570] sm:$0xf0] }
 0x2b9   :  { %v3524_v2 = vmul.f32 %v7878_v41, %v3523_v45  ;;  %v3505_v41 = vand.u32 2147483648, %v8384_v38  ;;  %v3369_v38 = vadd.f32 %v8360_v5, %v3355_v34  ;;  %v6861_v13 = vor.u32 %v7746_v61, %v6858_v11  ;;  %v7742_v5 = vld [vmem:[#allocation5 + $0x4b4] sm:$0xf] }
 0x2ba   :  { %v3465_v24 = vadd.f32 %v3464_v37, %v3451_v62  ;;  %v7050_v37 = vld [vmem:[#allocation5 + $0xb70] sm:$0xf0]  ;;  %4545 = vmatpush.bf16.msra.mxu3 %v6877_v12  ;;  %4532 = vmatpush.bf16.msra.mxu2 %v6733_v10  ;;  %v6845_v4 = vor.u32 %v7742_v5, %v6842_v52  ;;  %v6944_v12 = vld [vmem:[#allocation5 + $0x7b8] sm:$0xf] }
 0x2bb   :  { %v3525_v40 = vmul.f32 %v3524_v2, %v8388_v63  ;;  %v3506_v59 = vsel %vm3504_vm1, %v3505_v41, %v3503_v42  ;;  %v7053_v17 = vor.u32 %v7794_v9, %v7050_v37  ;;  %v7710_v62 = vld [vmem:[#allocation5 + $0xb4] sm:$0xf]  ;;  %v3486_v18 = vmul.f32 %v3369_v38, %v3369_v38  ;;  %v6816_v42 = vld [vmem:[#allocation5 + $0x3b8] sm:$0xf] }
 0x2bc   :  { %v3479_v54 = vadd.f32 %v3478_v32, %v3465_v24  ;;  %v7034_v32 = vld [vmem:[#allocation5 + $0xaf0] sm:$0xf0]  ;;  %v6717_v35 = vor.u32 %v7710_v62, %v6714_v48  ;;  %v6701_v2 = vor.u32 %v7706_v25, %v6698_v27  ;;  %v6817_v51 = vor.u32 %v7737_v43, %v6816_v42  ;;  %v6800_v41 = vld [vmem:[#allocation5 + $0x338] sm:$0xf] }
 0x2bd   :  { %v3527_v55 = vsel %vm3526_vm2, %v8388_v63, %v3525_v40  ;;  %v3480_v63 = vpop.f32.mrf.mxu3  ;;  %v7037_v45 = vor.u32 %v7790_v19, %v7034_v32  ;;  %v7738_v29 = vld [vmem:[#allocation5 + $0x434] sm:$0xf]  ;;  %v6912_v9 = vld [vmem:[#allocation5 + $0x6b8] sm:$0xf] }
 0x2be   :  { %v3488_v50 = vmul.f32 %v3479_v54, %v3479_v54  ;;  %v3530_v60 = vsel %vm3528_vm3, %v3529_v56, %v3527_v55  ;;  %4546 = vmatpush.bf16.msra.mxu3 %v6861_v13  ;;  %4533 = vmatpush.bf16.msra.mxu2 %v6717_v35  ;;  %v7786_v21 = vld [vmem:[#allocation5 + $0xa34] sm:$0xf]  ;;  %v6928_v55 = vld [vmem:[#allocation5 + $0x738] sm:$0xf] }
 0x2bf   :  { %v3452_v47 = vpop.f32.mrf.mxu1  ;;  %v3543_v20 = vpack.c.bf16 %v3530_v60, %v3506_v59  ;;  %v7018_v30 = vld [vmem:[#allocation5 + $0xa70] sm:$0xf0]  ;;  %v7765_v60 = vld [vmem:[#allocation5 + $0x774] sm:$0xf0] }
 0x2c0   :  { %v8410_v58 = vadd.f32 %v3488_v50, %v3484_v53  ;;  %v3453_v14 = vadd.f32 %v3452_v47, %v3438_v44  ;;  %v6826_v53 = vld [vmem:[#allocation5 + $0x470] sm:$0xf0]  ;;  %v7769_v50 = vld [vmem:[#allocation5 + $0x7f4] sm:$0xf0]  ;;  %v7021_v46 = vor.u32 %v7786_v21, %v7018_v30  ;;  %v6929_v38 = vor.u32 %v7765_v60, %v6928_v55 }
 0x2c1   :  { %3681 = vmatmul.bf16.vlgmr.msrb.gmra.mxu0 %v3543_v20  ;;  %v6829_v34 = vor.u32 %v7738_v29, %v6826_v53  ;;  %v6945_v57 = vor.u32 %v7769_v50, %v6944_v12  ;;  %v7782_v44 = vld [vmem:[#allocation5 + $0x9b4] sm:$0xf]  ;;  %v7729_v20 = vld [vmem:[#allocation5 + $0x2f4] sm:$0xf0] }
 0x2c2   :  { %7879 = vrsqrt.f32 %v8410_v58  ;;  %v3467_v1 = vadd.f32 %v3466_v28, %v3453_v14  ;;  %4555 = vmatpush.bf16.msrb.mxu0 %v7069_v3  ;;  %4547 = vmatpush.bf16.msra.mxu3 %v6845_v4  ;;  %v7002_v47 = vld [vmem:[#allocation5 + $0x9f0] sm:$0xf0]  ;;  %v7733_v14 = vld [vmem:[#allocation5 + $0x374] sm:$0xf0]  ;;  %vm3514_vm4 = vcmp.eq.f32.partialorder %v8410_v58, inf  ;;  %v3517_v50 = vand.u32 2147483648, %v8410_v58 }
 0x2c3   :  { %4534 = vmatpush.bf16.msra.mxu2 %v6701_v2  ;;  %v6801_v59 = vor.u32 %v7733_v14, %v6800_v41  ;;  %v7005_v6 = vor.u32 %v7782_v44, %v7002_v47  ;;  %v7778_v31 = vld [vmem:[#allocation5 + $0x934] sm:$0xf]  ;;  %v7761_v10 = vld [vmem:[#allocation5 + $0x6f4] sm:$0xf0]  ;;  %vm3516_vm6 = vcmp.eq.f32.partialorder %v8410_v58, 0.0 }
 0x2c4   :  { %v3481_v16 = vadd.f32 %v3480_v63, %v3467_v1  ;;  %v6986_v61 = vld [vmem:[#allocation5 + $0x970] sm:$0xf0]  ;;  %v6784_v1 = vld [vmem:[#allocation5 + $0x2b8] sm:$0xf]  ;;  %v6913_v13 = vor.u32 %v7761_v10, %v6912_v9 }
 0x2c5   :  { %v6785_v63 = vor.u32 %v7729_v20, %v6784_v1  ;;  %v7774_v62 = vld [vmem:[#allocation5 + $0x8b4] sm:$0xf]  ;;  %v6768_v5 = vld [vmem:[#allocation5 + $0x238] sm:$0xf] }
 0x2c6   :  { %v3490_v0 = vmul.f32 %v3481_v16, %v3481_v16  ;;  %4556 = vmatpush.bf16.msrb.mxu0 %v7053_v17  ;;  %4548 = vmatpush.bf16.msra.mxu3 %v6829_v34  ;;  %v6989_v17 = vor.u32 %v7778_v31, %v6986_v61  ;;  %v6970_v48 = vld [vmem:[#allocation5 + $0x8f0] sm:$0xf0]  ;;  %v7757_v52 = vld [vmem:[#allocation5 + $0x674] sm:$0xf0] }
 0x2c7   :  { %4583 = vmatpush.bf16.msrb.mxu2 %v6817_v51  ;;  %v6973_v25 = vor.u32 %v7774_v62, %v6970_v48  ;;  %v7770_v27 = vld [vmem:[#allocation5 + $0x834] sm:$0xf]  ;;  %v6752_v21 = vld [vmem:[#allocation5 + $0x1b8] sm:$0xf] }
 0x2c8   :  { %v7880_v7 = vpop.eup %7879  ;;  %v8416_v24 = vadd.f32 %v3490_v0, %v3486_v18  ;;  %4535 = vmatmul.bf16.vlgmr.msra.gmra.mxu2 %v8014_v26  ;;  %v7725_v18 = vld [vmem:[#allocation5 + $0x274] sm:$0xf0]  ;;  %v6954_v29 = vld [vmem:[#allocation5 + $0x870] sm:$0xf0] }
 0x2c9   :  { %v3508_v49 = vmul.f32 %v7880_v7, %v8410_v58  ;;  %4549 = vmatmul.bf16.vlgmr.msra.gmra.mxu3 %v8016_v33  ;;  %v6896_v0 = vld [vmem:[#allocation5 + $0x638] sm:$0xf]  ;;  %v6769_v35 = vor.u32 %v7725_v18, %v6768_v5  ;;  %v7178_v44 = vld [vmem:[#allocation5 + $0xf70] sm:$0xf0]  ;;  %v6957_v47 = vor.u32 %v7770_v27, %v6954_v29  ;;  %v6818_v27 = vld [vmem:[#allocation5 + $0x3f8] sm:$0xf0] }
 0x2ca   :  { %7881 = vrsqrt.f32 %v8416_v24  ;;  %4557 = vmatpush.bf16.msrb.mxu0 %v7037_v45  ;;  %4597 = vmatpush.bf16.msrb.mxu3 %v6945_v57  ;;  %v6897_v4 = vor.u32 %v7757_v52, %v6896_v0  ;;  %v7830_v45 = vld [vmem:[#allocation5 + $0xfb4] sm:$0xf]  ;;  %v7721_v30 = vld [vmem:[#allocation5 + $0x1f4] sm:$0xf0]  ;;  %vm3538_vm5 = vcmp.eq.f32.partialorder %v8416_v24, inf  ;;  %vm3540_vm7 = vcmp.eq.f32.partialorder %v8416_v24, 0.0 }
 0x2cb   :  { %v3509_v54 = vmul.f32 %v7880_v7, %v3508_v49  ;;  %4584 = vmatpush.bf16.msrb.mxu2 %v6801_v59  ;;  %v7194_v49 = vld [vmem:[#allocation5 + $0xff0] sm:$0xf0]  ;;  %v6880_v53 = vld [vmem:[#allocation5 + $0x5b8] sm:$0xf]  ;;  %v6753_v43 = vor.u32 %v7721_v30, %v6752_v21  ;;  %v7767_v29 = vld [vmem:[#allocation5 + $0x7bc] sm:$0xf] }
 0x2cc   :  { %v7072_v34 = vld [vmem:[#allocation5 + $0xbb8] sm:$0xf]  ;;  %v7826_v57 = vld [vmem:[#allocation5 + $0xf34] sm:$0xf]  ;;  %v7197_v14 = vor.u32 %v7830_v45, %v7194_v49 }
 0x2cd   :  { %v3510_v40 = vmul.f32 0.5, %v3509_v54  ;;  %v7801_v42 = vld [vmem:[#allocation5 + $0xbf4] sm:$0xf0]  ;;  %v7162_v1 = vld [vmem:[#allocation5 + $0xef0] sm:$0xf0]  ;;  %v7181_v20 = vor.u32 %v7826_v57, %v7178_v44 }
 0x2ce   :  { %4558 = vmatpush.bf16.msrb.mxu0 %v7021_v46  ;;  %4598 = vmatpush.bf16.msrb.mxu3 %v6929_v38  ;;  %v7753_v12 = vld [vmem:[#allocation5 + $0x5f4] sm:$0xf0]  ;;  %v7073_v55 = vor.u32 %v7801_v42, %v7072_v34  ;;  %v7818_v48 = vld [vmem:[#allocation5 + $0xe34] sm:$0xf]  ;;  %v6930_v57 = vld [vmem:[#allocation5 + $0x778] sm:$0xf0] }
 0x2cf   :  { %v3511_v56 = vsub.f32 1.5, %v3510_v40  ;;  %4585 = vmatpush.bf16.msrb.mxu2 %v6785_v63  ;;  %v3541_v40 = vand.u32 2147483648, %v8416_v24  ;;  %v6881_v46 = vor.u32 %v7753_v12, %v6880_v53  ;;  %v7717_v59 = vld [vmem:[#allocation5 + $0x174] sm:$0xf0]  ;;  %v7146_v5 = vld [vmem:[#allocation5 + $0xe70] sm:$0xf0] }
 0x2d0   :  { %v7882_v28 = vpop.eup %7881  ;;  %v6864_v60 = vld [vmem:[#allocation5 + $0x538] sm:$0xf]  ;;  %v7814_v21 = vld [vmem:[#allocation5 + $0xdb4] sm:$0xf]  ;;  %v6946_v53 = vld [vmem:[#allocation5 + $0x7f8] sm:$0xf0] }
 0x2d1   :  { %v3532_v3 = vmul.f32 %v7882_v28, %v8416_v24  ;;  %v3512_v37 = vmul.f32 %v7880_v7, %v3511_v56  ;;  %4507 = vmatmul.bf16.vlgmr.msra.gmra.mxu0 %v8008_v8  ;;  %v7797_v31 = vld [vmem:[#allocation5 + $0xb74] sm:$0xf0]  ;;  %v6949_v12 = vor.u32 %v7767_v29, %v6946_v53  ;;  %v7810_v44 = vld [vmem:[#allocation5 + $0xd34] sm:$0xf] }
 0x2d2   :  { %4559 = vmatpush.bf16.msrb.mxu0 %v7005_v6  ;;  %4599 = vmatpush.bf16.msrb.mxu3 %v6913_v13  ;;  %v7056_v6 = vld [vmem:[#allocation5 + $0xb38] sm:$0xf] }
 0x2d3   :  { %v3533_v11 = vmul.f32 %v7882_v28, %v3532_v3  ;;  %v3513_v19 = vmul.f32 %v3512_v37, %v8410_v58  ;;  %4586 = vmatpush.bf16.msrb.mxu2 %v6769_v35  ;;  %v7749_v61 = vld [vmem:[#allocation5 + $0x574] sm:$0xf0]  ;;  %v7057_v9 = vor.u32 %v7797_v31, %v7056_v6  ;;  %v6914_v31 = vld [vmem:[#allocation5 + $0x6f8] sm:$0xf0] }
 0x2d4   :  { %v6865_v38 = vor.u32 %v7749_v61, %v6864_v60  ;;  %v6720_v37 = vld [vmem:[#allocation5 + $0xb8] sm:$0xf]  ;;  %v6786_v60 = vld [vmem:[#allocation5 + $0x2f8] sm:$0xf0] }
 0x2d5   :  { %v3534_v16 = vmul.f32 0.5, %v3533_v11  ;;  %v3515_v54 = vsel %vm3514_vm4, %v8410_v58, %v3513_v19  ;;  %v7713_v11 = vld [vmem:[#allocation5 + $0xf4] sm:$0xf0] }
 0x2d6   :  { %4560 = vmatpush.bf16.msrb.mxu0 %v6989_v17  ;;  %4600 = vmatpush.bf16.msrb.mxu3 %v6897_v4  ;;  %v3518_v41 = vsel %vm3516_vm6, %v3517_v50, %v3515_v54  ;;  %v6848_v63 = vld [vmem:[#allocation5 + $0x4b8] sm:$0xf]  ;;  %v7149_v54 = vor.u32 %v7818_v48, %v7146_v5  ;;  %v7731_v50 = vld [vmem:[#allocation5 + $0x33c] sm:$0xf] }
 0x2d7   :  { %v3535_v32 = vsub.f32 1.5, %v3534_v16  ;;  %4587 = vmatpush.bf16.msrb.mxu2 %v6753_v43  ;;  %v7040_v10 = vld [vmem:[#allocation5 + $0xab8] sm:$0xf]  ;;  %v6721_v16 = vor.u32 %v7713_v11, %v6720_v37  ;;  %v7723_v37 = vld [vmem:[#allocation5 + $0x23c] sm:$0xf] }
 0x2d8   :  { %v7793_v13 = vld [vmem:[#allocation5 + $0xaf4] sm:$0xf0]  ;;  %v6770_v11 = vld [vmem:[#allocation5 + $0x278] sm:$0xf0] }
 0x2d9   :  { %v3536_v7 = vmul.f32 %v7882_v28, %v3535_v32  ;;  %v6736_v28 = vld [vmem:[#allocation5 + $0x138] sm:$0xf]  ;;  %v7041_v0 = vor.u32 %v7793_v13, %v7040_v10  ;;  %v6773_v10 = vor.u32 %v7723_v37, %v6770_v11  ;;  %v6898_v13 = vld [vmem:[#allocation5 + $0x678] sm:$0xf0] }
 0x2da   :  { %4561 = vmatpush.bf16.msrb.mxu0 %v6973_v25  ;;  %4601 = vmatpush.bf16.msrb.mxu3 %v6881_v46  ;;  %v6737_v58 = vor.u32 %v7717_v59, %v6736_v28  ;;  %v7745_v17 = vld [vmem:[#allocation5 + $0x4f4] sm:$0xf0]  ;;  %v7735_v25 = vld [vmem:[#allocation5 + $0x3bc] sm:$0xf] }
 0x2db   :  { %v3537_v2 = vmul.f32 %v3536_v7, %v8416_v24  ;;  %v6849_v62 = vor.u32 %v7745_v17, %v6848_v63  ;;  %v6704_v19 = vld [vmem:[#allocation5 + $0x38] sm:$0xf]  ;;  %v6821_v30 = vor.u32 %v7735_v25, %v6818_v27  ;;  %v7763_v46 = vld [vmem:[#allocation5 + $0x73c] sm:$0xf]  ;;  %v7082_v17 = vld [vmem:[#allocation5 + $0xc70] sm:$0xf0] }
 0x2dc   :  { %4588 = vmatpush.bf16.msrb.mxu2 %v6737_v58  ;;  %v7709_v32 = vld [vmem:[#allocation5 + $0x74] sm:$0xf0]  ;;  %v7727_v59 = vld [vmem:[#allocation5 + $0x2bc] sm:$0xf]  ;;  %v7806_v58 = vld [vmem:[#allocation5 + $0xcb4] sm:$0xf] }
 0x2dd   :  { %v3539_v51 = vsel %vm3538_vm5, %v8416_v24, %v3537_v2  ;;  %v7822_v24 = vld [vmem:[#allocation5 + $0xeb4] sm:$0xf]  ;;  %v6832_v35 = vld [vmem:[#allocation5 + $0x438] sm:$0xf]  ;;  %v6705_v7 = vor.u32 %v7709_v32, %v6704_v19  ;;  %v6789_v6 = vor.u32 %v7727_v59, %v6786_v60  ;;  %v7755_v63 = vld [vmem:[#allocation5 + $0x63c] sm:$0xf] }
 0x2de   :  { %v3542_v56 = vsel %vm3540_vm7, %v3541_v40, %v3539_v51  ;;  %4562 = vmatpush.bf16.msrb.mxu0 %v6957_v47  ;;  %4602 = vmatpush.bf16.msrb.mxu3 %v6865_v38  ;;  %v7165_v18 = vor.u32 %v7822_v24, %v7162_v1  ;;  %v7024_v52 = vld [vmem:[#allocation5 + $0xa38] sm:$0xf]  ;;  %v7130_v2 = vld [vmem:[#allocation5 + $0xdf0] sm:$0xf0]  ;;  %v6802_v40 = vld [vmem:[#allocation5 + $0x378] sm:$0xf0]  ;;  %v6933_v47 = vor.u32 %v7763_v46, %v6930_v57 }
 0x2df   :  { %v3544_v3 = vpack.c.bf16 %v3542_v56, %v3518_v41  ;;  %v7789_v4 = vld [vmem:[#allocation5 + $0xa74] sm:$0xf0]  ;;  %v6805_v51 = vor.u32 %v7731_v50, %v6802_v40  ;;  %v7133_v41 = vor.u32 %v7814_v21, %v7130_v2  ;;  %v7114_v56 = vld [vmem:[#allocation5 + $0xd70] sm:$0xf0]  ;;  %v6882_v25 = vld [vmem:[#allocation5 + $0x5f8] sm:$0xf0] }
 0x2e0   :  { %4589 = vmatpush.bf16.msrb.mxu2 %v6721_v16  ;;  %v7741_v45 = vld [vmem:[#allocation5 + $0x474] sm:$0xf0]  ;;  %v7025_v34 = vor.u32 %v7789_v4, %v7024_v52  ;;  %v7117_v38 = vor.u32 %v7810_v44, %v7114_v56  ;;  %v7098_v24 = vld [vmem:[#allocation5 + $0xcf0] sm:$0xf0]  ;;  %v6754_v52 = vld [vmem:[#allocation5 + $0x1f8] sm:$0xf0] }
 0x2e1   :  { %3695 = vmatmul.bf16.vlgmr.msrb.gmra.mxu1 %v3544_v3  ;;  %4563 = vmatmul.bf16.vlgmr.msrb.gmra.mxu0 %v8008_v8  ;;  %v6833_v49 = vor.u32 %v7741_v45, %v6832_v35  ;;  %v7008_v42 = vld [vmem:[#allocation5 + $0x9b8] sm:$0xf]  ;;  %v7759_v3 = vld [vmem:[#allocation5 + $0x6bc] sm:$0xf]  ;;  %v7802_v16 = vld [vmem:[#allocation5 + $0xc34] sm:$0xf]  ;;  %v7101_v48 = vor.u32 %v7806_v58, %v7098_v24 }
 0x2e2   :  { %4569 = vmatpush.bf16.msrb.mxu1 %v7197_v14  ;;  %4611 = vmatpush.bf16.msra.mxu0 %v7073_v55  ;;  %v7785_v43 = vld [vmem:[#allocation5 + $0x9f4] sm:$0xf0]  ;;  %v6917_v61 = vor.u32 %v7759_v3, %v6914_v31  ;;  %v7719_v35 = vld [vmem:[#allocation5 + $0x1bc] sm:$0xf]  ;;  %v7085_v29 = vor.u32 %v7802_v16, %v7082_v17 }
 0x2e3   :  { %4603 = vmatpush.bf16.msrb.mxu3 %v6849_v62  ;;  %v7009_v14 = vor.u32 %v7785_v43, %v7008_v42  ;;  %v6992_v55 = vld [vmem:[#allocation5 + $0x938] sm:$0xf]  ;;  %v6901_v62 = vor.u32 %v7755_v63, %v6898_v13  ;;  %v7751_v4 = vld [vmem:[#allocation5 + $0x5bc] sm:$0xf] }
 0x2e4   :  { %4590 = vmatpush.bf16.msrb.mxu2 %v6705_v7  ;;  %v7781_v28 = vld [vmem:[#allocation5 + $0x974] sm:$0xf0]  ;;  %v7799_v7 = vld [vmem:[#allocation5 + $0xbbc] sm:$0xf]  ;;  %v6885_v27 = vor.u32 %v7751_v4, %v6882_v25 }
 0x2e5   :  { %v6993_v1 = vor.u32 %v7781_v28, %v6992_v55  ;;  %v7200_v5 = vld [vmem:[#allocation5 + $0xfb8] sm:$0xf]  ;;  %v7074_v45 = vld [vmem:[#allocation5 + $0xbf8] sm:$0xf0] }
 0x2e6   :  { %4570 = vmatpush.bf16.msrb.mxu1 %v7181_v20  ;;  %4612 = vmatpush.bf16.msra.mxu0 %v7057_v9  ;;  %v6976_v20 = vld [vmem:[#allocation5 + $0x8b8] sm:$0xf]  ;;  %v7077_v2 = vor.u32 %v7799_v7, %v7074_v45  ;;  %v6738_v42 = vld [vmem:[#allocation5 + $0x178] sm:$0xf0] }
 0x2e7   :  { %4604 = vmatpush.bf16.msrb.mxu3 %v6833_v49  ;;  %4591 = vmatmul.bf16.vlgmr.msrb.gmra.mxu2 %v8014_v26  ;;  %v7777_v9 = vld [vmem:[#allocation5 + $0x8f4] sm:$0xf0]  ;;  %v6757_v49 = vor.u32 %v7719_v35, %v6754_v52  ;;  %v7747_v43 = vld [vmem:[#allocation5 + $0x53c] sm:$0xf] }
 0x2e8   :  { %4639 = vmatpush.bf16.msra.mxu2 %v6821_v30  ;;  %v6960_v19 = vld [vmem:[#allocation5 + $0x838] sm:$0xf]  ;;  %v7058_v50 = vld [vmem:[#allocation5 + $0xb78] sm:$0xf0] }
 0x2e9   :  { %v7773_v32 = vld [vmem:[#allocation5 + $0x874] sm:$0xf0]  ;;  %v6866_v46 = vld [vmem:[#allocation5 + $0x578] sm:$0xf0] }
 0x2ea   :  { %4571 = vmatpush.bf16.msrb.mxu1 %v7165_v18  ;;  %4613 = vmatpush.bf16.msra.mxu0 %v7041_v0  ;;  %v7833_v18 = vld [vmem:[#allocation5 + $0xff4] sm:$0xf0]  ;;  %v6977_v0 = vor.u32 %v7777_v9, %v6976_v20  ;;  %v6961_v53 = vor.u32 %v7773_v32, %v6960_v19  ;;  %v7711_v56 = vld [vmem:[#allocation5 + $0xbc] sm:$0xf] }
 0x2eb   :  { %4653 = vmatpush.bf16.msra.mxu3 %v6949_v12  ;;  %v7184_v21 = vld [vmem:[#allocation5 + $0xf38] sm:$0xf]  ;;  %v7795_v12 = vld [vmem:[#allocation5 + $0xb3c] sm:$0xf] }
 0x2ec   :  { %4605 = vmatmul.bf16.vlgmr.msrb.gmra.mxu3 %v8016_v33  ;;  %4640 = vmatpush.bf16.msra.mxu2 %v6805_v51  ;;  %v7829_v30 = vld [vmem:[#allocation5 + $0xf74] sm:$0xf0]  ;;  %v6869_v51 = vor.u32 %v7747_v43, %v6866_v46  ;;  %v7743_v55 = vld [vmem:[#allocation5 + $0x4bc] sm:$0xf] }
 0x2ed   :  { %v7168_v57 = vld [vmem:[#allocation5 + $0xeb8] sm:$0xf]  ;;  %v7791_v28 = vld [vmem:[#allocation5 + $0xabc] sm:$0xf] }
 0x2ee   :  { %4572 = vmatpush.bf16.msrb.mxu1 %v7149_v54  ;;  %4614 = vmatpush.bf16.msra.mxu0 %v7025_v34  ;;  %v7201_v54 = vor.u32 %v7833_v18, %v7200_v5  ;;  %v7715_v34 = vld [vmem:[#allocation5 + $0x13c] sm:$0xf]  ;;  %v7825_v44 = vld [vmem:[#allocation5 + $0xef4] sm:$0xf0] }
 0x2ef   :  { %4654 = vmatpush.bf16.msra.mxu3 %v6933_v47  ;;  %v6741_v40 = vor.u32 %v7715_v34, %v6738_v42  ;;  %v7185_v47 = vor.u32 %v7829_v30, %v7184_v21  ;;  %v7042_v59 = vld [vmem:[#allocation5 + $0xaf8] sm:$0xf0]  ;;  %v7152_v31 = vld [vmem:[#allocation5 + $0xe38] sm:$0xf] }
 0x2f0   :  { %4641 = vmatpush.bf16.msra.mxu2 %v6789_v6  ;;  %v6850_v3 = vld [vmem:[#allocation5 + $0x4f8] sm:$0xf0]  ;;  %v7821_v58 = vld [vmem:[#allocation5 + $0xe74] sm:$0xf0] }
 0x2f1   :  { %4521 = vmatmul.bf16.vlgmr.msra.gmra.mxu1 %v8010_v15  ;;  %v6853_v6 = vor.u32 %v7743_v55, %v6850_v3  ;;  %v7707_v24 = vld [vmem:[#allocation5 + $0x3c] sm:$0xf]  ;;  %v7153_v13 = vor.u32 %v7821_v58, %v7152_v31  ;;  %v7136_v16 = vld [vmem:[#allocation5 + $0xdb8] sm:$0xf] }
 0x2f2   :  { %4573 = vmatpush.bf16.msrb.mxu1 %v7133_v41  ;;  %4615 = vmatpush.bf16.msra.mxu0 %v7009_v14  ;;  %v7061_v41 = vor.u32 %v7795_v12, %v7058_v50  ;;  %v6722_v14 = vld [vmem:[#allocation5 + $0xf8] sm:$0xf0]  ;;  %v7813_v32 = vld [vmem:[#allocation5 + $0xd74] sm:$0xf0] }
 0x2f3   :  { %4655 = vmatpush.bf16.msra.mxu3 %v6917_v61  ;;  %v6725_v60 = vor.u32 %v7711_v56, %v6722_v14  ;;  %v7169_v61 = vor.u32 %v7825_v44, %v7168_v57  ;;  %v7739_v20 = vld [vmem:[#allocation5 + $0x43c] sm:$0xf]  ;;  %v7104_v7 = vld [vmem:[#allocation5 + $0xcb8] sm:$0xf] }
 0x2f4   :  { %4642 = vmatpush.bf16.msra.mxu2 %v6773_v10  ;;  %v7787_v9 = vld [vmem:[#allocation5 + $0xa3c] sm:$0xf]  ;;  %v7088_v21 = vld [vmem:[#allocation5 + $0xc38] sm:$0xf] }
 0x2f5   :  { %v7026_v37 = vld [vmem:[#allocation5 + $0xa78] sm:$0xf0] }
 0x2f6   :  { %4574 = vmatpush.bf16.msrb.mxu1 %v7117_v38  ;;  %4616 = vmatpush.bf16.msra.mxu0 %v6993_v1  ;;  %v7045_v38 = vor.u32 %v7791_v28, %v7042_v59  ;;  %v6706_v1 = vld [vmem:[#allocation5 + $0x78] sm:$0xf0]  ;;  %v7029_v17 = vor.u32 %v7787_v9, %v7026_v37 }
 0x2f7   :  { %4656 = vmatpush.bf16.msra.mxu3 %v6901_v62  ;;  %v6709_v11 = vor.u32 %v7707_v24, %v6706_v1  ;;  %v6834_v63 = vld [vmem:[#allocation5 + $0x478] sm:$0xf0]  ;;  %v7817_v62 = vld [vmem:[#allocation5 + $0xdf4] sm:$0xf0] }
 0x2f8   :  { %4643 = vmatpush.bf16.msra.mxu2 %v6757_v49  ;;  %v6837_v10 = vor.u32 %v7739_v20, %v6834_v63  ;;  %v7010_v5 = vld [vmem:[#allocation5 + $0x9f8] sm:$0xf0]  ;;  %v7137_v18 = vor.u32 %v7817_v62, %v7136_v16  ;;  %v7809_v49 = vld [vmem:[#allocation5 + $0xcf4] sm:$0xf0] }
 0x2f9   :  { %v7779_v35 = vld [vmem:[#allocation5 + $0x93c] sm:$0xf] }
 0x2fa   :  { %4575 = vmatpush.bf16.msrb.mxu1 %v7101_v48  ;;  %4617 = vmatpush.bf16.msra.mxu0 %v6977_v0  ;;  %v7783_v48 = vld [vmem:[#allocation5 + $0x9bc] sm:$0xf]  ;;  %v7120_v0 = vld [vmem:[#allocation5 + $0xd38] sm:$0xf] }
 0x2fb   :  { %4657 = vmatpush.bf16.msra.mxu3 %v6885_v27  ;;  %v7013_v19 = vor.u32 %v7783_v48, %v7010_v5  ;;  %v6994_v52 = vld [vmem:[#allocation5 + $0x978] sm:$0xf0]  ;;  %v7121_v4 = vor.u32 %v7813_v32, %v7120_v0 }
 0x2fc   :  { %4644 = vmatpush.bf16.msra.mxu2 %v6741_v40  ;;  %v6997_v45 = vor.u32 %v7779_v35, %v6994_v52  ;;  %v7775_v25 = vld [vmem:[#allocation5 + $0x8bc] sm:$0xf] }
 0x2fd   :  { %v6978_v27 = vld [vmem:[#allocation5 + $0x8f8] sm:$0xf0] }
 0x2fe   :  { %4576 = vmatpush.bf16.msrb.mxu1 %v7085_v29  ;;  %4618 = vmatpush.bf16.msra.mxu0 %v6961_v53  ;;  %v7105_v29 = vor.u32 %v7809_v49, %v7104_v7  ;;  %v6981_v30 = vor.u32 %v7775_v25, %v6978_v27  ;;  %v7805_v53 = vld [vmem:[#allocation5 + $0xc74] sm:$0xf0]  ;;  %v7831_v34 = vld [vmem:[#allocation5 + $0xfbc] sm:$0xf] }
 0x2ff   :  { %4658 = vmatpush.bf16.msra.mxu3 %v6869_v51  ;;  %v7827_v12 = vld [vmem:[#allocation5 + $0xf3c] sm:$0xf] }
 0x300   :  { %4645 = vmatpush.bf16.msra.mxu2 %v6725_v60  ;;  %v7186_v50 = vld [vmem:[#allocation5 + $0xf78] sm:$0xf0] }
 0x301   :  { %4577 = vmatmul.bf16.vlgmr.msrb.gmra.mxu1 %v8010_v15  ;;  %4619 = vmatmul.bf16.vlgmr.msra.gmra.mxu0 %v8008_v8  ;;  %v7189_v40 = vor.u32 %v7827_v12, %v7186_v50  ;;  %v7823_v46 = vld [vmem:[#allocation5 + $0xebc] sm:$0xf] }
 0x302   :  { %4625 = vmatpush.bf16.msra.mxu1 %v7201_v54  ;;  %4667 = vmatpush.bf16.msrb.mxu0 %v7077_v2  ;;  %v7771_v54 = vld [vmem:[#allocation5 + $0x83c] sm:$0xf] }
 0x303   :  { %4659 = vmatpush.bf16.msra.mxu3 %v6853_v6  ;;  %v6962_v2 = vld [vmem:[#allocation5 + $0x878] sm:$0xf0] }
 0x304   :  { %4646 = vmatpush.bf16.msra.mxu2 %v6709_v11  ;;  %v6965_v42 = vor.u32 %v7771_v54, %v6962_v2  ;;  %v7170_v51 = vld [vmem:[#allocation5 + $0xef8] sm:$0xf0] }
 0x305   :  { %v7173_v57 = vor.u32 %v7823_v46, %v7170_v51  ;;  %v7819_v44 = vld [vmem:[#allocation5 + $0xe3c] sm:$0xf]  ;;  %v7834_v51 = vld [vmem:[%s8541_s2 + $0x180] sm:$0xff] }
 0x306   :  { %4626 = vmatpush.bf16.msra.mxu1 %v7185_v47  ;;  %4668 = vmatpush.bf16.msrb.mxu0 %v7061_v41  ;;  %v7154_v47 = vld [vmem:[#allocation5 + $0xe78] sm:$0xf0] }
 0x307   :  { %4660 = vmatpush.bf16.msra.mxu3 %v6837_v10  ;;  %4647 = vmatmul.bf16.vlgmr.msra.gmra.mxu2 %v8014_v26  ;;  %v7202_v26 = vld [vmem:[#allocation5 + $0xff8] sm:$0xf0]  ;;  %v7157_v41 = vor.u32 %v7819_v44, %v7154_v47 }
 0x308   :  { %v7205_v43 = vor.u32 %v7831_v34, %v7202_v26  ;;  %v7815_v56 = vld [vmem:[#allocation5 + $0xdbc] sm:$0xf]  ;;  %v7835_v26 = vld [vmem:[%s8541_s2 + $0x188] sm:$0xff] }
 0x309   :  { %v7138_v14 = vld [vmem:[#allocation5 + $0xdf8] sm:$0xf0] }
 0x30a   :  { %4627 = vmatpush.bf16.msra.mxu1 %v7169_v61  ;;  %4669 = vmatpush.bf16.msrb.mxu0 %v7045_v38  ;;  %v7141_v55 = vor.u32 %v7815_v56, %v7138_v14  ;;  %v7811_v28 = vld [vmem:[#allocation5 + $0xd3c] sm:$0xf]  ;;  %v2473_v38 = vadd.f32 %v8298_v36, %v8300_v39 }
 0x30b   :  { %4661 = vmatmul.bf16.vlgmr.msra.gmra.mxu3 %v8016_v33  ;;  %v7089_v33 = vor.u32 %v7805_v53, %v7088_v21  ;;  %v7122_v59 = vld [vmem:[#allocation5 + $0xd78] sm:$0xf0] }
 0x30c   :  { %v7125_v60 = vor.u32 %v7811_v28, %v7122_v59  ;;  %v7807_v3 = vld [vmem:[#allocation5 + $0xcbc] sm:$0xf]  ;;  %v2487_v20 = vadd.f32 %v8302_v23, %v2473_v38  ;;  %v7848_v28 = vld [vmem:[%s8541_s2 + $0x1f0] sm:$0xff] }
 0x30d   :  { %v7106_v6 = vld [vmem:[#allocation5 + $0xcf8] sm:$0xf0] }
 0x30e   :  { %4628 = vmatpush.bf16.msra.mxu1 %v7153_v13  ;;  %4670 = vmatpush.bf16.msrb.mxu0 %v7029_v17  ;;  %v7109_v31 = vor.u32 %v7807_v3, %v7106_v6  ;;  %v7803_v58 = vld [vmem:[#allocation5 + $0xc3c] sm:$0xf]  ;;  %v7847_v6 = vld [vmem:[%s8541_s2 + $0x1e8] sm:$0xff] }
 0x30f   :  { %v7837_v49 = vld [vmem:[%s8541_s2 + $0x198] sm:$0xff] }
 0x310   :  { %v7849_v44 = vld [vmem:[%s8541_s2 + $0x1f8] sm:$0xff] }
 0x311   :  { %4899 = vmatpush.bf16.msrb.mxu3 %v7849_v44 }
 0x312   :  { %4629 = vmatpush.bf16.msra.mxu1 %v7137_v18  ;;  %4671 = vmatpush.bf16.msrb.mxu0 %v7013_v19  ;;  %v7841_v19 = vld [vmem:[%s8541_s2 + $0x1b8] sm:$0xff] }
 0x313   :  { %4885 = vmatpush.bf16.msrb.mxu2 %v7841_v19 }
 0x315   :  { %4900 = vmatpush.bf16.msrb.mxu3 %v7848_v28 }
 0x316   :  { %4630 = vmatpush.bf16.msra.mxu1 %v7121_v4  ;;  %4672 = vmatpush.bf16.msrb.mxu0 %v6997_v45  ;;  %v7839_v4 = vld [vmem:[%s8541_s2 + $0x1a8] sm:$0xff]  ;;  %v7838_v45 = vld [vmem:[%s8541_s2 + $0x1a0] sm:$0xff] }
 0x319   :  { %4901 = vmatpush.bf16.msrb.mxu3 %v7847_v6 }
 0x31a   :  { %4631 = vmatpush.bf16.msra.mxu1 %v7105_v29  ;;  %4673 = vmatpush.bf16.msrb.mxu0 %v6981_v30  ;;  %v7836_v30 = vld [vmem:[%s8541_s2 + $0x190] sm:$0xff] }
 0x31e   :  { %4632 = vmatpush.bf16.msra.mxu1 %v7089_v33  ;;  %4674 = vmatpush.bf16.msrb.mxu0 %v6965_v42 }
 0x321   :  { %4633 = vmatmul.bf16.vlgmr.msra.gmra.mxu1 %v8010_v15  ;;  %4675 = vmatmul.bf16.vlgmr.msrb.gmra.mxu0 %v8008_v8  ;;  %v7090_v8 = vld [vmem:[#allocation5 + $0xc78] sm:$0xf0] }
 0x322   :  { %4681 = vmatpush.bf16.msrb.mxu1 %v7205_v43  ;;  %v7093_v61 = vor.u32 %v7803_v58, %v7090_v8  ;;  %v7846_v8 = vld [vmem:[%s8541_s2 + $0x1e0] sm:$0xff] }
 0x323   :  { %4902 = vmatpush.bf16.msrb.mxu3 %v7846_v8 }
 0x326   :  { %4682 = vmatpush.bf16.msrb.mxu1 %v7189_v40 }
 0x328   :  { %v4480_v16 = vpop.f32.mrf.mxu2 }
 0x32a   :  { %4683 = vmatpush.bf16.msrb.mxu1 %v7173_v57 }
 0x32c   :  { %v4494_v17 = vpop.f32.mrf.mxu3 }
 0x32d   :  { %v4495_v21 = vadd.f32 %v4494_v17, %v4480_v16  ;;  %v7844_v17 = vld [vmem:[%s8541_s2 + $0x1d0] sm:$0xff] }
 0x32e   :  { %4684 = vmatpush.bf16.msrb.mxu1 %v7157_v41 }
 0x332   :  { %4685 = vmatpush.bf16.msrb.mxu1 %v7141_v55 }
 0x334   :  { %v4496_v48 = vpop.f32.mrf.mxu3 }
 0x336   :  { %4686 = vmatpush.bf16.msrb.mxu1 %v7125_v60 }
 0x33a   :  { %4687 = vmatpush.bf16.msrb.mxu1 %v7109_v31 }
 0x33e   :  { %4688 = vmatpush.bf16.msrb.mxu1 %v7093_v61  ;;  %v3682_v24 = vpop.f32.mrf.mxu0 }
 0x341   :  { %4689 = vmatmul.bf16.vlgmr.msrb.gmra.mxu1 %v8010_v15  ;;  %v4482_v15 = vpop.f32.mrf.mxu2 }
 0x342   :  { %v4497_v12 = vadd.f32 %v4496_v48, %v4482_v15 }
 0x346   :  { %v3684_v11 = vpop.f32.mrf.mxu0 }
 0x34b   :  { %v8453_v39 = vpop.f32.mrf.mxu2 }
 0x34c   :  { %v8455_v18 = vpop.f32.mrf.mxu3 }
 0x34e   :  { %v4508_v62 = vpop.f32.mrf.mxu0 }
 0x34f   :  { %v4509_v2 = vadd.f32 %v4508_v62, %v4495_v21 }
 0x353   :  { %v8465_v32 = vpop.f32.mrf.mxu2 }
 0x354   :  { %v8467_v35 = vpop.f32.mrf.mxu3 }
 0x356   :  { %v4510_v36 = vpop.f32.mrf.mxu0 }
 0x357   :  { %v4511_v41 = vadd.f32 %v4510_v36, %v4497_v12 }
 0x35e   :  { %v3696_v1 = vpop.f32.mrf.mxu1  ;;  %v8457_v0 = vpop.f32.mrf.mxu0 }
 0x35f   :  { %v3697_v9 = vadd.f32 %v3696_v1, %v3682_v24 }
 0x361   :  { %v8448_v37 = vadd.f32 %v3697_v9, %v2487_v20  ;;  %v7845_v20 = vld [vmem:[%s8541_s2 + $0x1d8] sm:$0xff] }
 0x362   :  { %4903 = vmatpush.bf16.msrb.mxu3 %v7845_v20 }
 0x366   :  { %v3698_v63 = vpop.f32.mrf.mxu1  ;;  %v8474_v7 = vpop.f32.mrf.mxu0  ;;  %4904 = vmatpush.bf16.msrb.mxu3 %v7844_v17 }
 0x367   :  { %v3699_v10 = vadd.f32 %v3698_v63, %v3684_v11  ;;  %v4551_v63 = vadd.f32 %v8455_v18, %v8453_v39  ;;  %v7843_v39 = vld [vmem:[%s8541_s2 + $0x1c8] sm:$0xff] }
 0x369   :  { %v8451_v13 = vadd.f32 %v3699_v10, %v8304_v22  ;;  %v7840_v22 = vld [vmem:[%s8541_s2 + $0x1b0] sm:$0xff] }
 0x36a   :  { %4886 = vmatpush.bf16.msrb.mxu2 %v7840_v22  ;;  %v4592_v25 = vpop.f32.mrf.mxu2  ;;  %4905 = vmatpush.bf16.msrb.mxu3 %v7843_v39 }
 0x36e   :  { %v4522_v5 = vpop.f32.mrf.mxu1  ;;  %4887 = vmatpush.bf16.msrb.mxu2 %v7839_v4 }
 0x36f   :  { %v4606_v27 = vpop.f32.mrf.mxu3  ;;  %v4523_v43 = vadd.f32 %v4522_v5, %v4509_v2  ;;  %v4565_v5 = vadd.f32 %v8457_v0, %v4551_v63  ;;  %v7842_v0 = vld [vmem:[%s8541_s2 + $0x1c0] sm:$0xff]  ;;  %s7979_s2 = smov [#allocation7]  }
 0x370   :  { %v4607_v54 = vadd.f32 %v4606_v27, %v4592_v25  ;;  %4906 = vmatpush.bf16.msrb.mxu3 %v7842_v0  ;;  %s4934_s9 = sshll.u32 %s7979_s2, 4  ;;  %s4935_s9 = int_to_ptr.vmem [resolvable:$true] %s4934_s9 }
 0x371   :  { %v4695_v47 = vmul.f32 %v4523_v43, %v4523_v43 }
 0x372   :  { %4888 = vmatpush.bf16.msrb.mxu2 %v7838_v45  ;;  %v4594_v33 = vpop.f32.mrf.mxu2  ;;  %v4553_v45 = vadd.f32 %v8467_v35, %v8465_v32 }
 0x376   :  { %v4524_v23 = vpop.f32.mrf.mxu1  ;;  %4889 = vmatpush.bf16.msrb.mxu2 %v7837_v49 }
 0x377   :  { %v4608_v42 = vpop.f32.mrf.mxu3  ;;  %v4525_v59 = vadd.f32 %v4524_v23, %v4511_v41 }
 0x378   :  { %v4609_v46 = vadd.f32 %v4608_v42, %v4594_v33 }
 0x379   :  { %v4697_v31 = vmul.f32 %v4525_v59, %v4525_v59 }
 0x37a   :  { %4890 = vmatpush.bf16.msrb.mxu2 %v7836_v30 }
 0x37e   :  { %v8469_v52 = vpop.f32.mrf.mxu1  ;;  %v4620_v53 = vpop.f32.mrf.mxu0  ;;  %4891 = vmatpush.bf16.msrb.mxu2 %v7835_v26 }
 0x37f   :  { %v4621_v34 = vadd.f32 %v4620_v53, %v4607_v54  ;;  %v4579_v4 = vadd.f32 %v8469_v52, %v4565_v5 }
 0x381   :  { %v4696_v2 = vmul.f32 %v4579_v4, %v4579_v4 }
 0x382   :  { %4892 = vmatpush.bf16.msrb.mxu2 %v7834_v51 }
 0x386   :  { %v8482_v29 = vpop.f32.mrf.mxu1  ;;  %v4622_v57 = vpop.f32.mrf.mxu0 }
 0x387   :  { %v4623_v55 = vadd.f32 %v4622_v57, %v4609_v46 }
 0x38a   :  { %v4648_v9 = vpop.f32.mrf.mxu2 }
 0x38e   :  { %v4662_v10 = vpop.f32.mrf.mxu3 }
 0x38f   :  { %v4663_v15 = vadd.f32 %v4662_v10, %v4648_v9 }
 0x392   :  { %v4650_v49 = vpop.f32.mrf.mxu2 }
 0x396   :  { %v4664_v21 = vpop.f32.mrf.mxu3 }
 0x397   :  { %v4665_v52 = vadd.f32 %v4664_v21, %v4650_v49 }
 0x39e   :  { %v4634_v50 = vpop.f32.mrf.mxu1  ;;  %v4676_v36 = vpop.f32.mrf.mxu0 }
 0x39f   :  { %v4635_v40 = vadd.f32 %v4634_v50, %v4621_v34  ;;  %v4677_v18 = vadd.f32 %v4676_v36, %v4663_v15  ;;  %v4567_v34 = vadd.f32 %v8474_v7, %v4553_v45 }
 0x3a1   :  { %v4699_v56 = vmul.f32 %v4635_v40, %v4635_v40  ;;  %v4581_v46 = vadd.f32 %v8482_v29, %v4567_v34 }
 0x3a3   :  { %v8496_v14 = vadd.f32 %v4699_v56, %v4695_v47  ;;  %v4698_v41 = vmul.f32 %v4581_v46, %v4581_v46 }
 0x3a5   :  { %7883 = vrsqrt.f32 %v8496_v14  ;;  %vm4714_vm8 = vcmp.eq.f32.partialorder %v8496_v14, inf  ;;  %v4717_v42 = vand.u32 2147483648, %v8496_v14  ;;  %vm4716_vm10 = vcmp.eq.f32.partialorder %v8496_v14, 0.0 }
 0x3a6   :  { %v4636_v60 = vpop.f32.mrf.mxu1  ;;  %v4678_v33 = vpop.f32.mrf.mxu0 }
 0x3a7   :  { %v4637_v3 = vadd.f32 %v4636_v60, %v4623_v55  ;;  %v4679_v51 = vadd.f32 %v4678_v33, %v4665_v52 }
 0x3a9   :  { %v4701_v58 = vmul.f32 %v4637_v3, %v4637_v3 }
 0x3ab   :  { %v7884_v61 = vpop.eup %7883  ;;  %v4705_v38 = vadd.f32 %v4701_v58, %v4697_v31 }
 0x3ac   :  { %v4708_v24 = vmul.f32 %v7884_v61, %v8496_v14 }
 0x3ad   :  { %7885 = vrsqrt.f32 %v4705_v38  ;;  %vm4738_vm9 = vcmp.eq.f32.partialorder %v4705_v38, inf  ;;  %v4741_v43 = vand.u32 2147483648, %v4705_v38  ;;  %vm4740_vm11 = vcmp.eq.f32.partialorder %v4705_v38, 0.0 }
 0x3ae   :  { %v4709_v1 = vmul.f32 %v7884_v61, %v4708_v24 }
 0x3b0   :  { %v4710_v11 = vmul.f32 0.5, %v4709_v1 }
 0x3b2   :  { %v4711_v16 = vsub.f32 1.5, %v4710_v11 }
 0x3b3   :  { %v7886_v62 = vpop.eup %7885 }
 0x3b4   :  { %v4732_v48 = vmul.f32 %v7886_v62, %v4705_v38  ;;  %v4712_v23 = vmul.f32 %v7884_v61, %v4711_v16 }
 0x3b6   :  { %v4733_v19 = vmul.f32 %v7886_v62, %v4732_v48  ;;  %v4713_v25 = vmul.f32 %v4712_v23, %v8496_v14 }
 0x3b8   :  { %v4734_v22 = vmul.f32 0.5, %v4733_v19  ;;  %v4715_v35 = vsel %vm4714_vm8, %v8496_v14, %v4713_v25 }
 0x3b9   :  { %v4718_v40 = vsel %vm4716_vm10, %v4717_v42, %v4715_v35 }
 0x3ba   :  { %v4735_v27 = vsub.f32 1.5, %v4734_v22 }
 0x3bc   :  { %v4736_v54 = vmul.f32 %v7886_v62, %v4735_v27 }
 0x3be   :  { %v4690_v30 = vpop.f32.mrf.mxu1  ;;  %v4737_v26 = vmul.f32 %v4736_v54, %v4705_v38 }
 0x3bf   :  { %v4691_v53 = vadd.f32 %v4690_v30, %v4677_v18 }
 0x3c0   :  { %v4739_v50 = vsel %vm4738_vm9, %v4705_v38, %v4737_v26 }
 0x3c1   :  { %v4700_v32 = vmul.f32 %v4691_v53, %v4691_v53  ;;  %v4742_v7 = vsel %vm4740_vm11, %v4741_v43, %v4739_v50 }
 0x3c2   :  { %v4755_v57 = vpack.c.bf16 %v4742_v7, %v4718_v40 }
 0x3c3   :  { %v4704_v12 = vadd.f32 %v4700_v32, %v4696_v2 }
 0x3c4   :  { %4893 = vmatmul.bf16.vlgmr.msrb.gmra.mxu2 %v4755_v57 }
 0x3c5   :  { %7887 = vrsqrt.f32 %v4704_v12  ;;  %vm4726_vm12 = vcmp.eq.f32.partialorder %v4704_v12, inf  ;;  %v4729_v9 = vand.u32 2147483648, %v4704_v12  ;;  %vm4728_vm14 = vcmp.eq.f32.partialorder %v4704_v12, 0.0 }
 0x3c6   :  { %v4692_v44 = vpop.f32.mrf.mxu1 }
 0x3c7   :  { %v4693_v47 = vadd.f32 %v4692_v44, %v4679_v51 }
 0x3c9   :  { %v4702_v56 = vmul.f32 %v4693_v47, %v4693_v47 }
 0x3cb   :  { %v7888_v55 = vpop.eup %7887  ;;  %v4706_v28 = vadd.f32 %v4702_v56, %v4698_v41 }
 0x3cc   :  { %v4720_v59 = vmul.f32 %v7888_v55, %v4704_v12 }
 0x3cd   :  { %7889 = vrsqrt.f32 %v4706_v28  ;;  %vm4750_vm13 = vcmp.eq.f32.partialorder %v4706_v28, inf  ;;  %v4753_v11 = vand.u32 2147483648, %v4706_v28  ;;  %vm4752_vm15 = vcmp.eq.f32.partialorder %v4706_v28, 0.0 }
 0x3ce   :  { %v4721_v60 = vmul.f32 %v7888_v55, %v4720_v59 }
 0x3d0   :  { %v4722_v14 = vmul.f32 0.5, %v4721_v60 }
 0x3d2   :  { %v4723_v3 = vsub.f32 1.5, %v4722_v14 }
 0x3d3   :  { %v7890_v6 = vpop.eup %7889 }
 0x3d4   :  { %v4744_v31 = vmul.f32 %v7890_v6, %v4706_v28  ;;  %v4724_v58 = vmul.f32 %v7888_v55, %v4723_v3 }
 0x3d6   :  { %v4745_v8 = vmul.f32 %v7890_v6, %v4744_v31  ;;  %v4725_v61 = vmul.f32 %v4724_v58, %v4704_v12 }
 0x3d8   :  { %v4746_v29 = vmul.f32 0.5, %v4745_v8  ;;  %v4727_v1 = vsel %vm4726_vm12, %v4704_v12, %v4725_v61 }
 0x3d9   :  { %v4730_v10 = vsel %vm4728_vm14, %v4729_v9, %v4727_v1 }
 0x3da   :  { %v4747_v38 = vsub.f32 1.5, %v4746_v29 }
 0x3dc   :  { %v4748_v24 = vmul.f32 %v7890_v6, %v4747_v38 }
 0x3de   :  { %v4749_v20 = vmul.f32 %v4748_v24, %v4706_v28 }
 0x3e0   :  { %v4751_v63 = vsel %vm4750_vm13, %v4706_v28, %v4749_v20 }
 0x3e1   :  { %v4754_v16 = vsel %vm4752_vm15, %v4753_v11, %v4751_v63 }
 0x3e2   :  { %v4756_v17 = vpack.c.bf16 %v4754_v16, %v4730_v10 }
 0x3e4   :  { %4907 = vmatmul.bf16.vlgmr.msrb.gmra.mxu3 %v4756_v17 }
 0x447   :  { %v4894_v62 = vpop.f32.mrf.mxu2 }
 0x44f   :  { %v4896_v23 = vpop.f32.mrf.mxu2 }
 0x467   :  { %v4908_v15 = vpop.f32.mrf.mxu3 }
 0x468   :  { %v4909_v48 = vadd.f32 %v4908_v15, %v4894_v62 }
 0x46a   :  { %v4913_v5 = vadd.f32 %v4909_v48, %v8448_v37 }
 0x46c   :  { %v4915_v36 = vmax.f32 %v4913_v5, 1e-05 }
 0x46e   :  { %7891 = vlog2.f32 %v4915_v36 }
 0x46f   :  { %v4910_v19 = vpop.f32.mrf.mxu3 }
 0x470   :  { %v4911_v39 = vadd.f32 %v4910_v19, %v4896_v23 }
 0x472   :  { %v4914_v18 = vadd.f32 %v4911_v39, %v8451_v13 }
 0x474   :  { %v7892_v22 = vpop.eup %7891  ;;  %v4916_v4 = vmax.f32 %v4914_v18, 1e-05 }
 0x475   :  { %v4918_v45 = vmul.f32 0.6931472, %v7892_v22 }
 0x476   :  { %7893 = vlog2.f32 %v4916_v4 }
 0x477   :  { %v4921_v49 = vmul.f32 0.4342945, %v4918_v45 }
 0x479   :  { %v4923_v25 = vmul.f32 0.2, %v4921_v49 }
 0x47b   :  { %v4925_v27 = vadd.f32 1.0, %v4923_v25 }
 0x47c   :  { %v7894_v0 = vpop.eup %7893 }
 0x47d   :  { %4928 = vst.msk [vmem:[#allocation7] sm:$0xff] %vm4927_vm0, %v4925_v27  ;;  %v4920_v21 = vmul.f32 0.6931472, %v7894_v0 }
 0x47f   :  { %v4922_v30 = vmul.f32 0.4342945, %v4920_v21 }
 0x481   :  { %v4924_v37 = vmul.f32 0.2, %v4922_v30 }
 0x483   :  { %v4926_v13 = vadd.f32 1.0, %v4924_v37 }
 0x485   :  { %4929 = vst.msk [vmem:[#allocation7 + $0x8] sm:$0xff] %vm4927_vm0, %v4926_v13 }
 0x486   :  { %4942 = dma.vmem_to_hbm [thread:$0]  %s4935_s9, 256, %s4937_s12, [#allocation4], %s7980_s13, %s7980_s13, %s7981_s14  }
 0x487   :  { %7971 = dma.done.wait [#allocation4], 256  }
 0x488   :  { %7972 = vsyncadd [#allocation4], 4294967040 }
 0x489   :  { %4947 = vsyncpa [#allocation3], 1 }
 0x48a   :  { %4948 = vsyncpa [#allocation6], 1 }
 0x48b   :  { %4949 = vsyncpa [#allocation4], 1 }

// kernel: tpu_custom_call.1
= control target key start
LH: loop header
LB: loop body
LE: loop exit
PB: predicated region body
PF: predicated region fallthrough
CT: control target
= control target key end

     0   :  { %8 = vsyncpa [#allocation3], 0  ;;  %s8539_s0 = inlined_call_operand.hbm [shape: bf16[16,512], index: 0, kind: input, shape index: {}]   ;;  %s8540_s1 = inlined_call_operand.hbm [shape: bf16[512,2048], index: 1, kind: input, shape index: {}]   ;;  %s8541_s2 = inlined_call_operand.vmem [shape: bf16[1024,32], index: 2, kind: input, shape index: {}]   ;;  %s8542_s3 = inlined_call_operand.hbm [shape: f32[16,32], index: 3, kind: output, shape index: {}]  }
   0x1   :  { %9 = vsyncpa [#allocation6], 0 }
   0x2   :  { %10 = vsyncpa [#allocation4], 0  ;;  %s15_s14 = sshll.u32 %s8539_s0, 4  ;;  %s7973_s15 = smov [#allocation2]   ;;  %s16_s14 = int_to_ptr.hbm [resolvable:$true] %s15_s14 }
   0x3   :  { %s17_s16 = sshll.u32 %s7973_s15, 4  ;;  %s28_s19 = sshll.u32 %s8540_s1, 4  ;;  %s18_s16 = int_to_ptr.vmem [resolvable:$true] %s17_s16  ;;  %s29_s19 = int_to_ptr.hbm [resolvable:$true] %s28_s19 }
   0x4   :  { %s7974_s20 = smov 256   ;;  %s7975_s21 = smov 16  }
   0x5   :  { %23 = dma.hbm_to_vmem [thread:$0]  %s16_s14, 512, %s18_s16, [#allocation3], %s7974_s20, %s7974_s20, %s7975_s21  }
   0x6   :  { %s7976_s22 = smov [#allocation5]   ;;  %s7977_s24 = smov 1024  }
   0x7   :  { %s30_s23 = sshll.u32 %s7976_s22, 4  ;;  %s7978_s25 = smov 64   ;;  %s31_s23 = int_to_ptr.vmem [resolvable:$true] %s30_s23 }
   0x8   :  { %36 = dma.hbm_to_vmem [thread:$0]  %s29_s19, 65536, %s31_s23, [#allocation6], %s7977_s24, %s7977_s24, %s7978_s25  }
   0x9   :  { %7967 = dma.done.wait [#allocation3], 512  }
   0xa   :  { %7968 = vsyncadd [#allocation3], 4294966784 }
   0xb   :  { %7969 = dma.done.wait [#allocation6], 65536  }
   0xc   :  { %7970 = vsyncadd [#allocation6], 4294901760  ;;  %v5080_v0 = vld [vmem:[#allocation5 + $0x380] sm:$0xf]  ;;  %s4936_s12 = sshll.u32 %s8542_s3, 4  ;;  %s7980_s13 = smov 128   ;;  %s4937_s12 = int_to_ptr.hbm [resolvable:$true] %s4936_s12 }
   0xd   :  { %v7304_v1 = vld [vmem:[#allocation5 + $0x3bc] sm:$0xf0]  ;;  %s7981_s14 = smov 8  }
   0xe   :  { %v5208_v2 = vld [vmem:[#allocation5 + $0x780] sm:$0xf]  ;;  %v5081_v3 = vor.u32 %v7304_v1, %v5080_v0 }
   0xf   :  { %v7336_v4 = vld [vmem:[#allocation5 + $0x7bc] sm:$0xf0] }
  0x10   :  { %v5336_v5 = vld [vmem:[#allocation5 + $0xb80] sm:$0xf]  ;;  %v5209_v7 = vor.u32 %v7336_v4, %v5208_v2  ;;  %839 = vmatpush.bf16.msra.mxu0 %v5081_v3 }
  0x11   :  { %v7368_v6 = vld [vmem:[#allocation5 + $0xbbc] sm:$0xf0] }
  0x12   :  { %v5337_v8 = vor.u32 %v7368_v6, %v5336_v5  ;;  %v5464_v9 = vld [vmem:[#allocation5 + $0xf80] sm:$0xf]  ;;  %853 = vmatpush.bf16.msra.mxu1 %v5209_v7 }
  0x13   :  { %v7400_v10 = vld [vmem:[#allocation5 + $0xfbc] sm:$0xf0] }
  0x14   :  { %v5064_v11 = vld [vmem:[#allocation5 + $0x300] sm:$0xf]  ;;  %v5465_v12 = vor.u32 %v7400_v10, %v5464_v9  ;;  %867 = vmatpush.bf16.msra.mxu2 %v5337_v8 }
  0x15   :  { %v7300_v13 = vld [vmem:[#allocation5 + $0x33c] sm:$0xf0] }
  0x16   :  { %v5192_v14 = vld [vmem:[#allocation5 + $0x700] sm:$0xf]  ;;  %v5065_v16 = vor.u32 %v7300_v13, %v5064_v11  ;;  %881 = vmatpush.bf16.msra.mxu3 %v5465_v12 }
  0x17   :  { %v7332_v15 = vld [vmem:[#allocation5 + $0x73c] sm:$0xf0] }
  0x18   :  { %v5193_v17 = vor.u32 %v7332_v15, %v5192_v14  ;;  %v5320_v18 = vld [vmem:[#allocation5 + $0xb00] sm:$0xf]  ;;  %840 = vmatpush.bf16.msra.mxu0 %v5065_v16 }
  0x19   :  { %v7364_v19 = vld [vmem:[#allocation5 + $0xb3c] sm:$0xf0] }
  0x1a   :  { %v5448_v20 = vld [vmem:[#allocation5 + $0xf00] sm:$0xf]  ;;  %v5321_v21 = vor.u32 %v7364_v19, %v5320_v18  ;;  %854 = vmatpush.bf16.msra.mxu1 %v5193_v17 }
  0x1b   :  { %v7396_v22 = vld [vmem:[#allocation5 + $0xf3c] sm:$0xf0] }
  0x1c   :  { %v5048_v23 = vld [vmem:[#allocation5 + $0x280] sm:$0xf]  ;;  %v5449_v25 = vor.u32 %v7396_v22, %v5448_v20  ;;  %868 = vmatpush.bf16.msra.mxu2 %v5321_v21 }
  0x1d   :  { %v7296_v24 = vld [vmem:[#allocation5 + $0x2bc] sm:$0xf0] }
  0x1e   :  { %v5176_v26 = vld [vmem:[#allocation5 + $0x680] sm:$0xf]  ;;  %v5049_v29 = vor.u32 %v7296_v24, %v5048_v23  ;;  %882 = vmatpush.bf16.msra.mxu3 %v5449_v25 }
  0x1f   :  { %v7328_v27 = vld [vmem:[#allocation5 + $0x6bc] sm:$0xf0] }
  0x20   :  { %v5304_v28 = vld [vmem:[#allocation5 + $0xa80] sm:$0xf]  ;;  %v5177_v33 = vor.u32 %v7328_v27, %v5176_v26  ;;  %841 = vmatpush.bf16.msra.mxu0 %v5049_v29  ;;  %v5082_v29 = vld [vmem:[#allocation5 + $0x3c0] sm:$0xf0] }
  0x21   :  { %v7360_v30 = vld [vmem:[#allocation5 + $0xabc] sm:$0xf0] }
  0x22   :  { %v5432_v31 = vld [vmem:[#allocation5 + $0xe80] sm:$0xf]  ;;  %v5305_v34 = vor.u32 %v7360_v30, %v5304_v28  ;;  %855 = vmatpush.bf16.msra.mxu1 %v5177_v33  ;;  %v7302_v28 = vld [vmem:[#allocation5 + $0x384] sm:$0xf] }
  0x23   :  { %v7392_v32 = vld [vmem:[#allocation5 + $0xebc] sm:$0xf0]  ;;  %v7334_v30 = vld [vmem:[#allocation5 + $0x784] sm:$0xf] }
  0x24   :  { %v5032_v35 = vld [vmem:[#allocation5 + $0x200] sm:$0xf]  ;;  %v5433_v38 = vor.u32 %v7392_v32, %v5432_v31  ;;  %869 = vmatpush.bf16.msra.mxu2 %v5305_v34  ;;  %v5210_v32 = vld [vmem:[#allocation5 + $0x7c0] sm:$0xf0] }
  0x25   :  { %v7292_v36 = vld [vmem:[#allocation5 + $0x23c] sm:$0xf0]  ;;  %v7366_v33 = vld [vmem:[#allocation5 + $0xb84] sm:$0xf] }
  0x26   :  { %v5160_v37 = vld [vmem:[#allocation5 + $0x600] sm:$0xf]  ;;  %v5033_v44 = vor.u32 %v7292_v36, %v5032_v35  ;;  %883 = vmatpush.bf16.msra.mxu3 %v5433_v38  ;;  %v5338_v34 = vld [vmem:[#allocation5 + $0xbc0] sm:$0xf0] }
  0x27   :  { %v7324_v39 = vld [vmem:[#allocation5 + $0x63c] sm:$0xf0]  ;;  %v5466_v38 = vld [vmem:[#allocation5 + $0xfc0] sm:$0xf0] }
  0x28   :  { %v5288_v40 = vld [vmem:[#allocation5 + $0xa00] sm:$0xf]  ;;  %v5161_v45 = vor.u32 %v7324_v39, %v5160_v37  ;;  %842 = vmatpush.bf16.msra.mxu0 %v5033_v44  ;;  %v7398_v37 = vld [vmem:[#allocation5 + $0xf84] sm:$0xf] }
  0x29   :  { %v7356_v41 = vld [vmem:[#allocation5 + $0xa3c] sm:$0xf0]  ;;  %v5066_v44 = vld [vmem:[#allocation5 + $0x340] sm:$0xf0] }
  0x2a   :  { %v5416_v42 = vld [vmem:[#allocation5 + $0xe00] sm:$0xf]  ;;  %v5289_v46 = vor.u32 %v7356_v41, %v5288_v40  ;;  %856 = vmatpush.bf16.msra.mxu1 %v5161_v45  ;;  %v5085_v40 = vor.u32 %v7302_v28, %v5082_v29  ;;  %v5213_v41 = vor.u32 %v7334_v30, %v5210_v32  ;;  %v7330_v45 = vld [vmem:[#allocation5 + $0x704] sm:$0xf]  ;;  %v4954_v28 = vld [vmem:[#allocation2 + $0x10] sm:$0xf0] }
  0x2b   :  { %v7388_v43 = vld [vmem:[#allocation5 + $0xe3c] sm:$0xf0]  ;;  %v5146_v30 = vld [vmem:[#allocation5 + $0x5c0] sm:$0xf0] }
  0x2c   :  { %v5016_v47 = vld [vmem:[#allocation5 + $0x180] sm:$0xf]  ;;  %v5417_v50 = vor.u32 %v7388_v43, %v5416_v42  ;;  %870 = vmatpush.bf16.msra.mxu2 %v5289_v46  ;;  %v5341_v42 = vor.u32 %v7366_v33, %v5338_v34  ;;  %v7298_v43 = vld [vmem:[#allocation5 + $0x304] sm:$0xf]  ;;  %v5469_v46 = vor.u32 %v7398_v37, %v5466_v38 }
  0x2d   :  { %v7288_v48 = vld [vmem:[#allocation5 + $0x1bc] sm:$0xf0]  ;;  %v5274_v32 = vld [vmem:[#allocation5 + $0x9c0] sm:$0xf0] }
  0x2e   :  { %v5144_v49 = vld [vmem:[#allocation5 + $0x580] sm:$0xf]  ;;  %v5017_v56 = vor.u32 %v7288_v48, %v5016_v47  ;;  %884 = vmatpush.bf16.msra.mxu3 %v5417_v50  ;;  %v5194_v47 = vld [vmem:[#allocation5 + $0x740] sm:$0xf0] }
  0x2f   :  { %v7320_v51 = vld [vmem:[#allocation5 + $0x5bc] sm:$0xf0]  ;;  %v7362_v48 = vld [vmem:[#allocation5 + $0xb04] sm:$0xf] }
  0x30   :  { %v5272_v52 = vld [vmem:[#allocation5 + $0x980] sm:$0xf]  ;;  %v5145_v57 = vor.u32 %v7320_v51, %v5144_v49  ;;  %843 = vmatpush.bf16.msra.mxu0 %v5017_v56  ;;  %v5322_v49 = vld [vmem:[#allocation5 + $0xb40] sm:$0xf0] }
  0x31   :  { %v7352_v53 = vld [vmem:[#allocation5 + $0x9bc] sm:$0xf0]  ;;  %v7394_v50 = vld [vmem:[#allocation5 + $0xf04] sm:$0xf] }
  0x32   :  { %v5400_v54 = vld [vmem:[#allocation5 + $0xd80] sm:$0xf]  ;;  %v5273_v58 = vor.u32 %v7352_v53, %v5272_v52  ;;  %857 = vmatpush.bf16.msra.mxu1 %v5145_v57  ;;  %v5450_v51 = vld [vmem:[#allocation5 + $0xf40] sm:$0xf0]  ;;  %v5069_v52 = vor.u32 %v7298_v43, %v5066_v44  ;;  %v5197_v53 = vor.u32 %v7330_v45, %v5194_v47 }
  0x33   :  { %v7384_v55 = vld [vmem:[#allocation5 + $0xdbc] sm:$0xf0]  ;;  %v5050_v56 = vld [vmem:[#allocation5 + $0x2c0] sm:$0xf0] }
  0x34   :  { %v5000_v59 = vld [vmem:[#allocation5 + $0x100] sm:$0xf]  ;;  %v5401_v62 = vor.u32 %v7384_v55, %v5400_v54  ;;  %871 = vmatpush.bf16.msra.mxu2 %v5273_v58  ;;  %v5325_v54 = vor.u32 %v7362_v48, %v5322_v49  ;;  %v7294_v55 = vld [vmem:[#allocation5 + $0x284] sm:$0xf]  ;;  %v5453_v58 = vor.u32 %v7394_v50, %v5450_v51 }
  0x35   :  { %v7284_v60 = vld [vmem:[#allocation5 + $0x13c] sm:$0xf0]  ;;  %v7326_v57 = vld [vmem:[#allocation5 + $0x684] sm:$0xf] }
  0x36   :  { %v5128_v61 = vld [vmem:[#allocation5 + $0x500] sm:$0xf]  ;;  %v5001_v4 = vor.u32 %v7284_v60, %v5000_v59  ;;  %885 = vmatpush.bf16.msra.mxu3 %v5401_v62  ;;  %v5178_v59 = vld [vmem:[#allocation5 + $0x6c0] sm:$0xf0] }
  0x37   :  { %v7316_v63 = vld [vmem:[#allocation5 + $0x53c] sm:$0xf0]  ;;  %v7358_v60 = vld [vmem:[#allocation5 + $0xa84] sm:$0xf] }
  0x38   :  { %v5256_v0 = vld [vmem:[#allocation5 + $0x900] sm:$0xf]  ;;  %v5129_v5 = vor.u32 %v7316_v63, %v5128_v61  ;;  %844 = vmatpush.bf16.msra.mxu0 %v5001_v4  ;;  %v5306_v61 = vld [vmem:[#allocation5 + $0xac0] sm:$0xf0]  ;;  %v7273_v4 = vld [vmem:[#allocation2 + $0x14] sm:$0xf0] }
  0x39   :  { %v7348_v1 = vld [vmem:[#allocation5 + $0x93c] sm:$0xf0]  ;;  %v7390_v62 = vld [vmem:[#allocation5 + $0xe84] sm:$0xf] }
  0x3a   :  { %v5384_v2 = vld [vmem:[#allocation5 + $0xd00] sm:$0xf]  ;;  %v5257_v6 = vor.u32 %v7348_v1, %v5256_v0  ;;  %858 = vmatpush.bf16.msra.mxu1 %v5129_v5  ;;  %v5434_v63 = vld [vmem:[#allocation5 + $0xec0] sm:$0xf0]  ;;  %v5053_v1 = vor.u32 %v7294_v55, %v5050_v56  ;;  %v5181_v5 = vor.u32 %v7326_v57, %v5178_v59 }
  0x3b   :  { %v7380_v3 = vld [vmem:[#allocation5 + $0xd3c] sm:$0xf0]  ;;  %v7290_v0 = vld [vmem:[#allocation5 + $0x204] sm:$0xf] }
  0x3c   :  { %v4984_v7 = vld [vmem:[#allocation5 + $0x80] sm:$0xf]  ;;  %v5385_v10 = vor.u32 %v7380_v3, %v5384_v2  ;;  %872 = vmatpush.bf16.msra.mxu2 %v5257_v6  ;;  %v5034_v2 = vld [vmem:[#allocation5 + $0x240] sm:$0xf0]  ;;  %v4960_v3 = vld [vmem:[#allocation2 + $0x8] sm:$0xf]  ;;  %v5309_v6 = vor.u32 %v7358_v60, %v5306_v61 }
  0x3d   :  { %v7280_v8 = vld [vmem:[#allocation5 + $0xbc] sm:$0xf0]  ;;  %v7382_v34 = vld [vmem:[#allocation5 + $0xd84] sm:$0xf] }
  0x3e   :  { %v5112_v9 = vld [vmem:[#allocation5 + $0x480] sm:$0xf]  ;;  %v4985_v16 = vor.u32 %v7280_v8, %v4984_v7  ;;  %886 = vmatpush.bf16.msra.mxu3 %v5385_v10  ;;  %v7322_v7 = vld [vmem:[#allocation5 + $0x604] sm:$0xf]  ;;  %v8008_v8 = vor.u32 %v7273_v4, %v4960_v3  ;;  %v4962_v10 = vld [vmem:[#allocation2 + $0x18] sm:$0xf0] }
  0x3f   :  { %v7312_v11 = vld [vmem:[#allocation5 + $0x4bc] sm:$0xf0]  ;;  %v5130_v43 = vld [vmem:[#allocation5 + $0x540] sm:$0xf0] }
  0x40   :  { %v5240_v12 = vld [vmem:[#allocation5 + $0x880] sm:$0xf]  ;;  %v5113_v19 = vor.u32 %v7312_v11, %v5112_v9  ;;  %845 = vmatpush.bf16.msra.mxu0 %v4985_v16  ;;  %v7271_v9 = vld [vmem:[#allocation2 + $0xc] sm:$0xf]  ;;  %v5437_v11 = vor.u32 %v7390_v62, %v5434_v63  ;;  %v7386_v16 = vld [vmem:[#allocation5 + $0xe04] sm:$0xf] }
  0x41   :  { %v7344_v13 = vld [vmem:[#allocation5 + $0x8bc] sm:$0xf0]  ;;  %v7346_v44 = vld [vmem:[#allocation5 + $0x904] sm:$0xf] }
  0x42   :  { %v5368_v14 = vld [vmem:[#allocation5 + $0xc80] sm:$0xf]  ;;  %v5241_v20 = vor.u32 %v7344_v13, %v5240_v12  ;;  %859 = vmatpush.bf16.msra.mxu1 %v5113_v19  ;;  %v5162_v12 = vld [vmem:[#allocation5 + $0x640] sm:$0xf0]  ;;  %v5037_v19 = vor.u32 %v7290_v0, %v5034_v2 }
  0x43   :  { %v7376_v15 = vld [vmem:[#allocation5 + $0xcbc] sm:$0xf0]  ;;  %v7354_v13 = vld [vmem:[#allocation5 + $0xa04] sm:$0xf] }
  0x44   :  { %v4968_v17 = vld [vmem:[#allocation5] sm:$0xf]  ;;  %v5369_v24 = vor.u32 %v7376_v15, %v5368_v14  ;;  %873 = vmatpush.bf16.msra.mxu2 %v5241_v20  ;;  %v5290_v14 = vld [vmem:[#allocation5 + $0xa40] sm:$0xf0]  ;;  %v8010_v15 = vor.u32 %v7271_v9, %v4962_v10  ;;  %v5088_v9 = vld [vmem:[#allocation5 + $0x388] sm:$0xf] }
  0x45   :  { %v7276_v18 = vld [vmem:[#allocation5 + $0x3c] sm:$0xf0]  ;;  %v5018_v20 = vld [vmem:[#allocation5 + $0x1c0] sm:$0xf0]  ;;  %v7305_v10 = vld [vmem:[#allocation5 + $0x3c4] sm:$0xf0] }
  0x46   :  { %v5096_v21 = vld [vmem:[#allocation5 + $0x400] sm:$0xf]  ;;  %v4969_v31 = vor.u32 %v7276_v18, %v4968_v17  ;;  %887 = vmatpush.bf16.msra.mxu3 %v5369_v24  ;;  %v5418_v17 = vld [vmem:[#allocation5 + $0xe40] sm:$0xf0]  ;;  %v5293_v24 = vor.u32 %v7354_v13, %v5290_v14  ;;  %v7337_v13 = vld [vmem:[#allocation5 + $0x7c4] sm:$0xf0] }
  0x47   :  { %v7308_v22 = vld [vmem:[#allocation5 + $0x43c] sm:$0xf0]  ;;  %v7286_v18 = vld [vmem:[#allocation5 + $0x184] sm:$0xf]  ;;  %v5421_v29 = vor.u32 %v7386_v16, %v5418_v17  ;;  %v5344_v14 = vld [vmem:[#allocation5 + $0xb88] sm:$0xf] }
  0x48   :  { %v5224_v23 = vld [vmem:[#allocation5 + $0x800] sm:$0xf]  ;;  %v5097_v35 = vor.u32 %v7308_v22, %v5096_v21  ;;  %846 = vmatpush.bf16.msra.mxu0 %v4969_v31  ;;  %v7272_v22 = vld [vmem:[#allocation2 + $0xc] sm:$0xf0]  ;;  %v7350_v31 = vld [vmem:[#allocation5 + $0x984] sm:$0xf] }
  0x49   :  { %v7340_v25 = vld [vmem:[#allocation5 + $0x83c] sm:$0xf0]  ;;  %v5277_v38 = vor.u32 %v7350_v31, %v5274_v32  ;;  %v5258_v45 = vld [vmem:[#allocation5 + $0x940] sm:$0xf0]  ;;  %v7369_v16 = vld [vmem:[#allocation5 + $0xbc4] sm:$0xf0] }
  0x4a   :  { %v5352_v26 = vld [vmem:[#allocation5 + $0xc00] sm:$0xf]  ;;  %v5225_v36 = vor.u32 %v7340_v25, %v5224_v23  ;;  %860 = vmatpush.bf16.msra.mxu1 %v5097_v35  ;;  %v5165_v23 = vor.u32 %v7322_v7, %v5162_v12  ;;  %v7318_v25 = vld [vmem:[#allocation5 + $0x584] sm:$0xf]  ;;  %v5261_v50 = vor.u32 %v7346_v44, %v5258_v45  ;;  %v5328_v31 = vld [vmem:[#allocation5 + $0xb08] sm:$0xf] }
  0x4b   :  { %v7372_v27 = vld [vmem:[#allocation5 + $0xc3c] sm:$0xf0]  ;;  %v5402_v35 = vld [vmem:[#allocation5 + $0xdc0] sm:$0xf0]  ;;  %v5149_v37 = vor.u32 %v7318_v25, %v5146_v30  ;;  %v5072_v25 = vld [vmem:[#allocation5 + $0x308] sm:$0xf] }
  0x4c   :  { %v5353_v39 = vor.u32 %v7372_v27, %v5352_v26  ;;  %874 = vmatpush.bf16.msra.mxu2 %v5225_v36  ;;  %895 = vmatpush.bf16.msrb.mxu0 %v5085_v40  ;;  %v4952_v21 = vld [vmem:[#allocation2] sm:$0xf]  ;;  %v7270_v27 = vld [vmem:[#allocation2 + $0x4] sm:$0xf]  ;;  %v5021_v36 = vor.u32 %v7286_v18, %v5018_v20  ;;  %v7401_v20 = vld [vmem:[#allocation5 + $0xfc4] sm:$0xf0] }
  0x4d   :  { %v8014_v26 = vor.u32 %v7272_v22, %v4952_v21  ;;  %v8016_v33 = vor.u32 %v7270_v27, %v4954_v28  ;;  %v5002_v40 = vld [vmem:[#allocation5 + $0x140] sm:$0xf0]  ;;  %v5089_v22 = vor.u32 %v7305_v10, %v5088_v9  ;;  %v7301_v27 = vld [vmem:[#allocation5 + $0x344] sm:$0xf0] }
  0x4e   :  { %888 = vmatpush.bf16.msra.mxu3 %v5353_v39  ;;  %909 = vmatpush.bf16.msrb.mxu1 %v5213_v41  ;;  %v7282_v39 = vld [vmem:[#allocation5 + $0x104] sm:$0xf]  ;;  %v5200_v28 = vld [vmem:[#allocation5 + $0x708] sm:$0xf] }
  0x4f   :  { %875 = vmatmul.bf16.vlgmr.msra.gmra.mxu2 %v8008_v8  ;;  %847 = vmatmul.bf16.vlgmr.msra.gmra.mxu0 %v8014_v26  ;;  %v7314_v41 = vld [vmem:[#allocation5 + $0x504] sm:$0xf]  ;;  %v5005_v48 = vor.u32 %v7282_v39, %v5002_v40  ;;  %v7333_v30 = vld [vmem:[#allocation5 + $0x744] sm:$0xf0] }
  0x50   :  { %923 = vmatpush.bf16.msrb.mxu2 %v5341_v42  ;;  %896 = vmatpush.bf16.msrb.mxu0 %v5069_v52  ;;  %v5405_v42 = vor.u32 %v7382_v34, %v5402_v35  ;;  %v5386_v47 = vld [vmem:[#allocation5 + $0xd40] sm:$0xf0]  ;;  %v5133_v49 = vor.u32 %v7314_v41, %v5130_v43  ;;  %v7365_v32 = vld [vmem:[#allocation5 + $0xb44] sm:$0xf0] }
  0x51   :  { %889 = vmatmul.bf16.vlgmr.msra.gmra.mxu3 %v8010_v15  ;;  %861 = vmatmul.bf16.vlgmr.msra.gmra.mxu1 %v8016_v33  ;;  %v7278_v51 = vld [vmem:[#allocation5 + $0x84] sm:$0xf]  ;;  %v5456_v34 = vld [vmem:[#allocation5 + $0xf08] sm:$0xf] }
  0x52   :  { %937 = vmatpush.bf16.msrb.mxu3 %v5469_v46  ;;  %910 = vmatpush.bf16.msrb.mxu1 %v5197_v53  ;;  %v7378_v46 = vld [vmem:[#allocation5 + $0xd04] sm:$0xf]  ;;  %v7397_v35 = vld [vmem:[#allocation5 + $0xf44] sm:$0xf0] }
  0x53   :  { %v4986_v52 = vld [vmem:[#allocation5 + $0xc0] sm:$0xf0]  ;;  %v5056_v39 = vld [vmem:[#allocation5 + $0x288] sm:$0xf] }
  0x54   :  { %924 = vmatpush.bf16.msrb.mxu2 %v5325_v54  ;;  %897 = vmatpush.bf16.msrb.mxu0 %v5053_v1  ;;  %v7310_v53 = vld [vmem:[#allocation5 + $0x484] sm:$0xf]  ;;  %v5389_v54 = vor.u32 %v7378_v46, %v5386_v47  ;;  %v4989_v60 = vor.u32 %v7278_v51, %v4986_v52  ;;  %v7297_v40 = vld [vmem:[#allocation5 + $0x2c4] sm:$0xf0] }
  0x55   :  { %v5114_v55 = vld [vmem:[#allocation5 + $0x4c0] sm:$0xf0]  ;;  %v5184_v41 = vld [vmem:[#allocation5 + $0x688] sm:$0xf] }
  0x56   :  { %938 = vmatpush.bf16.msrb.mxu3 %v5453_v58  ;;  %911 = vmatpush.bf16.msrb.mxu1 %v5181_v5  ;;  %v7342_v56 = vld [vmem:[#allocation5 + $0x884] sm:$0xf]  ;;  %v5117_v63 = vor.u32 %v7310_v53, %v5114_v55  ;;  %v7329_v43 = vld [vmem:[#allocation5 + $0x6c4] sm:$0xf0] }
  0x57   :  { %v5242_v57 = vld [vmem:[#allocation5 + $0x8c0] sm:$0xf0]  ;;  %v5312_v44 = vld [vmem:[#allocation5 + $0xa88] sm:$0xf] }
  0x58   :  { %925 = vmatpush.bf16.msrb.mxu2 %v5309_v6  ;;  %898 = vmatpush.bf16.msrb.mxu0 %v5037_v19  ;;  %v7374_v58 = vld [vmem:[#allocation5 + $0xc84] sm:$0xf]  ;;  %v5245_v0 = vor.u32 %v7342_v56, %v5242_v57  ;;  %v5472_v19 = vld [vmem:[#allocation5 + $0xf88] sm:$0xf] }
  0x59   :  { %v5370_v59 = vld [vmem:[#allocation5 + $0xcc0] sm:$0xf0]  ;;  %v7361_v45 = vld [vmem:[#allocation5 + $0xac4] sm:$0xf0] }
  0x5a   :  { %939 = vmatpush.bf16.msrb.mxu3 %v5437_v11  ;;  %912 = vmatpush.bf16.msrb.mxu1 %v5165_v23  ;;  %v7274_v61 = vld [vmem:[#allocation5 + $0x4] sm:$0xf]  ;;  %v5373_v4 = vor.u32 %v7374_v58, %v5370_v59  ;;  %v5216_v11 = vld [vmem:[#allocation5 + $0x788] sm:$0xf] }
  0x5b   :  { %v4970_v62 = vld [vmem:[#allocation5 + $0x40] sm:$0xf0]  ;;  %v5217_v23 = vor.u32 %v7337_v13, %v5216_v11  ;;  %v5440_v46 = vld [vmem:[#allocation5 + $0xe88] sm:$0xf] }
  0x5c   :  { %926 = vmatpush.bf16.msrb.mxu2 %v5293_v24  ;;  %899 = vmatpush.bf16.msrb.mxu0 %v5021_v36  ;;  %v7306_v1 = vld [vmem:[#allocation5 + $0x404] sm:$0xf]  ;;  %v4973_v12 = vor.u32 %v7274_v61, %v4970_v62  ;;  %v5345_v24 = vor.u32 %v7369_v16, %v5344_v14  ;;  %v5073_v36 = vor.u32 %v7301_v27, %v5072_v25  ;;  %v7393_v47 = vld [vmem:[#allocation5 + $0xec4] sm:$0xf0] }
  0x5d   :  { %v5098_v2 = vld [vmem:[#allocation5 + $0x440] sm:$0xf0]  ;;  %v5040_v51 = vld [vmem:[#allocation5 + $0x208] sm:$0xf] }
  0x5e   :  { %940 = vmatpush.bf16.msrb.mxu3 %v5421_v29  ;;  %913 = vmatpush.bf16.msrb.mxu1 %v5149_v37  ;;  %v7338_v3 = vld [vmem:[#allocation5 + $0x804] sm:$0xf]  ;;  %v5101_v17 = vor.u32 %v7306_v1, %v5098_v2  ;;  %v5473_v29 = vor.u32 %v7401_v20, %v5472_v19  ;;  %v5201_v37 = vor.u32 %v7333_v30, %v5200_v28  ;;  %v7293_v52 = vld [vmem:[#allocation5 + $0x244] sm:$0xf0] }
  0x5f   :  { %v5226_v5 = vld [vmem:[#allocation5 + $0x840] sm:$0xf0]  ;;  %v5168_v53 = vld [vmem:[#allocation5 + $0x608] sm:$0xf] }
  0x60   :  { %927 = vmatpush.bf16.msrb.mxu2 %v5277_v38  ;;  %900 = vmatpush.bf16.msrb.mxu0 %v5005_v48  ;;  %v7370_v6 = vld [vmem:[#allocation5 + $0xc04] sm:$0xf]  ;;  %v5229_v18 = vor.u32 %v7338_v3, %v5226_v5  ;;  %v5329_v38 = vor.u32 %v7365_v32, %v5328_v31  ;;  %v5057_v48 = vor.u32 %v7297_v40, %v5056_v39  ;;  %v7325_v55 = vld [vmem:[#allocation5 + $0x644] sm:$0xf0] }
  0x61   :  { %v5354_v7 = vld [vmem:[#allocation5 + $0xc40] sm:$0xf0]  ;;  %v5296_v56 = vld [vmem:[#allocation5 + $0xa08] sm:$0xf]  ;;  %v5169_v61 = vor.u32 %v7325_v55, %v5168_v53  ;;  %v7367_v53 = vld [vmem:[#allocation5 + $0xb8c] sm:$0xf] }
  0x62   :  { %941 = vmatpush.bf16.msrb.mxu3 %v5405_v42  ;;  %914 = vmatpush.bf16.msrb.mxu1 %v5133_v49  ;;  %v5357_v21 = vor.u32 %v7370_v6, %v5354_v7  ;;  %v5457_v42 = vor.u32 %v7397_v35, %v5456_v34  ;;  %v5185_v49 = vor.u32 %v7329_v43, %v5184_v41  ;;  %v7357_v57 = vld [vmem:[#allocation5 + $0xa44] sm:$0xf0] }
  0x63   :  { %v5424_v58 = vld [vmem:[#allocation5 + $0xe08] sm:$0xf]  ;;  %v5297_v62 = vor.u32 %v7357_v57, %v5296_v56  ;;  %v7399_v57 = vld [vmem:[#allocation5 + $0xf8c] sm:$0xf] }
  0x64   :  { %928 = vmatpush.bf16.msrb.mxu2 %v5261_v50  ;;  %901 = vmatpush.bf16.msrb.mxu0 %v4989_v60  ;;  %v5313_v50 = vor.u32 %v7361_v45, %v5312_v44  ;;  %v7389_v59 = vld [vmem:[#allocation5 + $0xe44] sm:$0xf0]  ;;  %v5041_v60 = vor.u32 %v7293_v52, %v5040_v51  ;;  %v5218_v52 = vld [vmem:[#allocation5 + $0x7c8] sm:$0xf0] }
  0x65   :  { %v5152_v1 = vld [vmem:[#allocation5 + $0x588] sm:$0xf]  ;;  %v5425_v2 = vor.u32 %v7389_v59, %v5424_v58  ;;  %v5474_v58 = vld [vmem:[#allocation5 + $0xfc8] sm:$0xf0] }
  0x66   :  { %942 = vmatpush.bf16.msrb.mxu3 %v5389_v54  ;;  %915 = vmatpush.bf16.msrb.mxu1 %v5117_v63  ;;  %v5441_v54 = vor.u32 %v7393_v47, %v5440_v46  ;;  %v5024_v63 = vld [vmem:[#allocation5 + $0x188] sm:$0xf] }
  0x67   :  { %v7321_v3 = vld [vmem:[#allocation5 + $0x5c4] sm:$0xf0] }
  0x68   :  { %929 = vmatpush.bf16.msrb.mxu2 %v5245_v0  ;;  %902 = vmatpush.bf16.msrb.mxu0 %v4973_v12  ;;  %v7289_v0 = vld [vmem:[#allocation5 + $0x1c4] sm:$0xf0]  ;;  %v5153_v10 = vor.u32 %v7321_v3, %v5152_v1  ;;  %v7331_v1 = vld [vmem:[#allocation5 + $0x70c] sm:$0xf] }
  0x69   :  { %v7353_v5 = vld [vmem:[#allocation5 + $0x9c4] sm:$0xf0]  ;;  %v5025_v9 = vor.u32 %v7289_v0, %v5024_v63  ;;  %v7299_v63 = vld [vmem:[#allocation5 + $0x30c] sm:$0xf] }
  0x6a   :  { %943 = vmatpush.bf16.msrb.mxu3 %v5373_v4  ;;  %916 = vmatpush.bf16.msrb.mxu1 %v5101_v17  ;;  %v5280_v4 = vld [vmem:[#allocation5 + $0x988] sm:$0xf]  ;;  %v5074_v0 = vld [vmem:[#allocation5 + $0x348] sm:$0xf0] }
  0x6b   :  { %903 = vmatmul.bf16.vlgmr.msrb.gmra.mxu0 %v8014_v26  ;;  %v5408_v6 = vld [vmem:[#allocation5 + $0xd88] sm:$0xf]  ;;  %v5281_v11 = vor.u32 %v7353_v5, %v5280_v4  ;;  %v5202_v3 = vld [vmem:[#allocation5 + $0x748] sm:$0xf0] }
  0x6c   :  { %930 = vmatpush.bf16.msrb.mxu2 %v5229_v18  ;;  %951 = vmatpush.bf16.msra.mxu0 %v5089_v22  ;;  %v7385_v7 = vld [vmem:[#allocation5 + $0xdc4] sm:$0xf0]  ;;  %v7363_v4 = vld [vmem:[#allocation5 + $0xb0c] sm:$0xf] }
  0x6d   :  { %917 = vmatmul.bf16.vlgmr.msrb.gmra.mxu1 %v8016_v33  ;;  %v5008_v12 = vld [vmem:[#allocation5 + $0x108] sm:$0xf]  ;;  %v5409_v16 = vor.u32 %v7385_v7, %v5408_v6  ;;  %v5330_v5 = vld [vmem:[#allocation5 + $0xb48] sm:$0xf0] }
  0x6e   :  { %944 = vmatpush.bf16.msrb.mxu3 %v5357_v21  ;;  %965 = vmatpush.bf16.msra.mxu1 %v5217_v23  ;;  %v7285_v13 = vld [vmem:[#allocation5 + $0x144] sm:$0xf0]  ;;  %v7395_v6 = vld [vmem:[#allocation5 + $0xf0c] sm:$0xf] }
  0x6f   :  { %931 = vmatmul.bf16.vlgmr.msrb.gmra.mxu2 %v8008_v8  ;;  %v5136_v14 = vld [vmem:[#allocation5 + $0x508] sm:$0xf]  ;;  %v5009_v22 = vor.u32 %v7285_v13, %v5008_v12  ;;  %v5458_v7 = vld [vmem:[#allocation5 + $0xf48] sm:$0xf0] }
  0x70   :  { %979 = vmatpush.bf16.msra.mxu2 %v5345_v24  ;;  %952 = vmatpush.bf16.msra.mxu0 %v5073_v36  ;;  %v7317_v17 = vld [vmem:[#allocation5 + $0x544] sm:$0xf0]  ;;  %v7295_v12 = vld [vmem:[#allocation5 + $0x28c] sm:$0xf] }
  0x71   :  { %945 = vmatmul.bf16.vlgmr.msrb.gmra.mxu3 %v8010_v15  ;;  %v5264_v18 = vld [vmem:[#allocation5 + $0x908] sm:$0xf]  ;;  %v5137_v23 = vor.u32 %v7317_v17, %v5136_v14  ;;  %v5058_v13 = vld [vmem:[#allocation5 + $0x2c8] sm:$0xf0] }
  0x72   :  { %993 = vmatpush.bf16.msra.mxu3 %v5473_v29  ;;  %966 = vmatpush.bf16.msra.mxu1 %v5201_v37  ;;  %v7349_v19 = vld [vmem:[#allocation5 + $0x944] sm:$0xf0]  ;;  %v7327_v14 = vld [vmem:[#allocation5 + $0x68c] sm:$0xf] }
  0x73   :  { %v5392_v20 = vld [vmem:[#allocation5 + $0xd08] sm:$0xf]  ;;  %v5265_v24 = vor.u32 %v7349_v19, %v5264_v18  ;;  %v5186_v17 = vld [vmem:[#allocation5 + $0x6c8] sm:$0xf0] }
  0x74   :  { %980 = vmatpush.bf16.msra.mxu2 %v5329_v38  ;;  %953 = vmatpush.bf16.msra.mxu0 %v5057_v48  ;;  %v7381_v21 = vld [vmem:[#allocation5 + $0xd44] sm:$0xf0]  ;;  %v7303_v48 = vld [vmem:[#allocation5 + $0x38c] sm:$0xf] }
  0x75   :  { %v4992_v25 = vld [vmem:[#allocation5 + $0x88] sm:$0xf]  ;;  %v5393_v29 = vor.u32 %v7381_v21, %v5392_v20  ;;  %v7359_v18 = vld [vmem:[#allocation5 + $0xa8c] sm:$0xf] }
  0x76   :  { %994 = vmatpush.bf16.msra.mxu3 %v5457_v42  ;;  %967 = vmatpush.bf16.msra.mxu1 %v5185_v49  ;;  %v7281_v27 = vld [vmem:[#allocation5 + $0xc4] sm:$0xf0]  ;;  %v5090_v49 = vld [vmem:[#allocation5 + $0x3c8] sm:$0xf0] }
  0x77   :  { %v5120_v28 = vld [vmem:[#allocation5 + $0x488] sm:$0xf]  ;;  %v4993_v36 = vor.u32 %v7281_v27, %v4992_v25  ;;  %v5314_v19 = vld [vmem:[#allocation5 + $0xac8] sm:$0xf0] }
  0x78   :  { %981 = vmatpush.bf16.msra.mxu2 %v5313_v50  ;;  %954 = vmatpush.bf16.msra.mxu0 %v5041_v60  ;;  %v7313_v30 = vld [vmem:[#allocation5 + $0x4c4] sm:$0xf0]  ;;  %v7335_v50 = vld [vmem:[#allocation5 + $0x78c] sm:$0xf]  ;;  %v5093_v60 = vor.u32 %v7303_v48, %v5090_v49 }
  0x79   :  { %v5248_v31 = vld [vmem:[#allocation5 + $0x888] sm:$0xf]  ;;  %v5121_v39 = vor.u32 %v7313_v30, %v5120_v28  ;;  %v7391_v20 = vld [vmem:[#allocation5 + $0xe8c] sm:$0xf] }
  0x7a   :  { %995 = vmatpush.bf16.msra.mxu3 %v5441_v54  ;;  %968 = vmatpush.bf16.msra.mxu1 %v5169_v61  ;;  %v7345_v32 = vld [vmem:[#allocation5 + $0x8c4] sm:$0xf0]  ;;  %v5346_v54 = vld [vmem:[#allocation5 + $0xbc8] sm:$0xf0]  ;;  %v5221_v61 = vor.u32 %v7335_v50, %v5218_v52 }
  0x7b   :  { %v5376_v34 = vld [vmem:[#allocation5 + $0xc88] sm:$0xf]  ;;  %v5249_v40 = vor.u32 %v7345_v32, %v5248_v31  ;;  %v5442_v21 = vld [vmem:[#allocation5 + $0xec8] sm:$0xf0] }
  0x7c   :  { %982 = vmatpush.bf16.msra.mxu2 %v5297_v62  ;;  %955 = vmatpush.bf16.msra.mxu0 %v5025_v9  ;;  %v7377_v35 = vld [vmem:[#allocation5 + $0xcc4] sm:$0xf0]  ;;  %v5349_v62 = vor.u32 %v7367_v53, %v5346_v54  ;;  %v5077_v9 = vor.u32 %v7299_v63, %v5074_v0  ;;  %v7291_v25 = vld [vmem:[#allocation5 + $0x20c] sm:$0xf] }
  0x7d   :  { %v4976_v37 = vld [vmem:[#allocation5 + $0x8] sm:$0xf]  ;;  %v5377_v44 = vor.u32 %v7377_v35, %v5376_v34  ;;  %v5042_v27 = vld [vmem:[#allocation5 + $0x248] sm:$0xf0] }
  0x7e   :  { %996 = vmatpush.bf16.msra.mxu3 %v5425_v2  ;;  %969 = vmatpush.bf16.msra.mxu1 %v5153_v10  ;;  %v7277_v38 = vld [vmem:[#allocation5 + $0x44] sm:$0xf0]  ;;  %v5477_v2 = vor.u32 %v7399_v57, %v5474_v58  ;;  %v5205_v10 = vor.u32 %v7331_v1, %v5202_v3  ;;  %v7323_v28 = vld [vmem:[#allocation5 + $0x60c] sm:$0xf] }
  0x7f   :  { %v5104_v41 = vld [vmem:[#allocation5 + $0x408] sm:$0xf]  ;;  %v4977_v51 = vor.u32 %v7277_v38, %v4976_v37  ;;  %v5170_v30 = vld [vmem:[#allocation5 + $0x648] sm:$0xf0] }
  0x80   :  { %983 = vmatpush.bf16.msra.mxu2 %v5281_v11  ;;  %956 = vmatpush.bf16.msra.mxu0 %v5009_v22  ;;  %v7309_v42 = vld [vmem:[#allocation5 + $0x444] sm:$0xf0]  ;;  %v5333_v11 = vor.u32 %v7363_v4, %v5330_v5  ;;  %v5061_v22 = vor.u32 %v7295_v12, %v5058_v13  ;;  %v7355_v31 = vld [vmem:[#allocation5 + $0xa0c] sm:$0xf]  ;;  %v5173_v37 = vor.u32 %v7323_v28, %v5170_v30  ;;  %v5848_v28 = vld [vmem:[#allocation5 + $0xb90] sm:$0xf] }
  0x81   :  { %v5232_v43 = vld [vmem:[#allocation5 + $0x808] sm:$0xf]  ;;  %v5105_v55 = vor.u32 %v7309_v42, %v5104_v41  ;;  %v5298_v32 = vld [vmem:[#allocation5 + $0xa48] sm:$0xf0] }
  0x82   :  { %997 = vmatpush.bf16.msra.mxu3 %v5409_v16  ;;  %970 = vmatpush.bf16.msra.mxu1 %v5137_v23  ;;  %v7341_v45 = vld [vmem:[#allocation5 + $0x844] sm:$0xf0]  ;;  %v5461_v16 = vor.u32 %v7395_v6, %v5458_v7  ;;  %v5189_v23 = vor.u32 %v7327_v14, %v5186_v17  ;;  %v7387_v34 = vld [vmem:[#allocation5 + $0xe0c] sm:$0xf]  ;;  %v5301_v38 = vor.u32 %v7355_v31, %v5298_v32  ;;  %v5976_v32 = vld [vmem:[#allocation5 + $0xf90] sm:$0xf] }
  0x83   :  { %v5360_v46 = vld [vmem:[#allocation5 + $0xc08] sm:$0xf]  ;;  %v5233_v56 = vor.u32 %v7341_v45, %v5232_v43  ;;  %v5426_v35 = vld [vmem:[#allocation5 + $0xe48] sm:$0xf0] }
  0x84   :  { %984 = vmatpush.bf16.msra.mxu2 %v5265_v24  ;;  %v7373_v47 = vld [vmem:[#allocation5 + $0xc44] sm:$0xf0]  ;;  %957 = vmatpush.bf16.msra.mxu0 %v4993_v36  ;;  %v5317_v24 = vor.u32 %v7359_v18, %v5314_v19  ;;  %v5045_v36 = vor.u32 %v7291_v25, %v5042_v27  ;;  %v7319_v41 = vld [vmem:[#allocation5 + $0x58c] sm:$0xf]  ;;  %v5429_v42 = vor.u32 %v7387_v34, %v5426_v35  ;;  %v7480_v27 = vld [vmem:[#allocation5 + $0x7cc] sm:$0xf0] }
  0x85   :  { %v5361_v59 = vor.u32 %v7373_v47, %v5360_v46  ;;  %v5154_v43 = vld [vmem:[#allocation5 + $0x5c8] sm:$0xf0]  ;;  %v7544_v34 = vld [vmem:[#allocation5 + $0xfcc] sm:$0xf0] }
  0x86   :  { %998 = vmatpush.bf16.msra.mxu3 %v5393_v29  ;;  %971 = vmatpush.bf16.msra.mxu1 %v5121_v39  ;;  %v5445_v29 = vor.u32 %v7391_v20, %v5442_v21  ;;  %v7287_v39 = vld [vmem:[#allocation5 + $0x18c] sm:$0xf]  ;;  %v5157_v49 = vor.u32 %v7319_v41, %v5154_v43  ;;  %v5704_v41 = vld [vmem:[#allocation5 + $0x710] sm:$0xf] }
  0x87   :  { %v5282_v45 = vld [vmem:[#allocation5 + $0x9c8] sm:$0xf0]  ;;  %v7476_v43 = vld [vmem:[#allocation5 + $0x74c] sm:$0xf0] }
  0x88   :  { %985 = vmatpush.bf16.msra.mxu2 %v5249_v40  ;;  %958 = vmatpush.bf16.msra.mxu0 %v4977_v51  ;;  %v5026_v40 = vld [vmem:[#allocation5 + $0x1c8] sm:$0xf0] }
  0x89   :  { %v7383_v46 = vld [vmem:[#allocation5 + $0xd8c] sm:$0xf]  ;;  %v5029_v48 = vor.u32 %v7287_v39, %v5026_v40  ;;  %v5576_v39 = vld [vmem:[#allocation5 + $0x310] sm:$0xf] }
  0x8a   :  { %999 = vmatpush.bf16.msra.mxu3 %v5377_v44  ;;  %972 = vmatpush.bf16.msra.mxu1 %v5105_v55  ;;  %v7351_v44 = vld [vmem:[#allocation5 + $0x98c] sm:$0xf]  ;;  %v7444_v40 = vld [vmem:[#allocation5 + $0x34c] sm:$0xf0] }
  0x8b   :  { %959 = vmatmul.bf16.vlgmr.msra.gmra.mxu0 %v8014_v26  ;;  %v5410_v47 = vld [vmem:[#allocation5 + $0xdc8] sm:$0xf0]  ;;  %v5285_v50 = vor.u32 %v7351_v44, %v5282_v45  ;;  %v5832_v44 = vld [vmem:[#allocation5 + $0xb10] sm:$0xf] }
  0x8c   :  { %986 = vmatpush.bf16.msra.mxu2 %v5233_v56  ;;  %1007 = vmatpush.bf16.msrb.mxu0 %v5093_v60  ;;  %v7283_v51 = vld [vmem:[#allocation5 + $0x10c] sm:$0xf]  ;;  %v5413_v54 = vor.u32 %v7383_v46, %v5410_v47  ;;  %v7508_v45 = vld [vmem:[#allocation5 + $0xb4c] sm:$0xf0] }
  0x8d   :  { %973 = vmatmul.bf16.vlgmr.msra.gmra.mxu1 %v8016_v33  ;;  %v5010_v52 = vld [vmem:[#allocation5 + $0x148] sm:$0xf0]  ;;  %v5960_v46 = vld [vmem:[#allocation5 + $0xf10] sm:$0xf] }
  0x8e   :  { %1000 = vmatpush.bf16.msra.mxu3 %v5361_v59  ;;  %1021 = vmatpush.bf16.msrb.mxu1 %v5221_v61  ;;  %v7315_v53 = vld [vmem:[#allocation5 + $0x50c] sm:$0xf]  ;;  %v5013_v60 = vor.u32 %v7283_v51, %v5010_v52  ;;  %v7540_v47 = vld [vmem:[#allocation5 + $0xf4c] sm:$0xf0] }
  0x8f   :  { %987 = vmatmul.bf16.vlgmr.msra.gmra.mxu2 %v8008_v8  ;;  %v5138_v55 = vld [vmem:[#allocation5 + $0x548] sm:$0xf0]  ;;  %v5560_v51 = vld [vmem:[#allocation5 + $0x290] sm:$0xf] }
  0x90   :  { %1035 = vmatpush.bf16.msrb.mxu2 %v5349_v62  ;;  %1008 = vmatpush.bf16.msrb.mxu0 %v5077_v9  ;;  %v7347_v56 = vld [vmem:[#allocation5 + $0x90c] sm:$0xf]  ;;  %v5141_v61 = vor.u32 %v7315_v53, %v5138_v55  ;;  %v7440_v52 = vld [vmem:[#allocation5 + $0x2cc] sm:$0xf0] }
  0x91   :  { %1001 = vmatmul.bf16.vlgmr.msra.gmra.mxu3 %v8010_v15  ;;  %v5266_v57 = vld [vmem:[#allocation5 + $0x948] sm:$0xf0]  ;;  %v5688_v53 = vld [vmem:[#allocation5 + $0x690] sm:$0xf] }
  0x92   :  { %1049 = vmatpush.bf16.msrb.mxu3 %v5477_v2  ;;  %1022 = vmatpush.bf16.msrb.mxu1 %v5205_v10  ;;  %v7379_v58 = vld [vmem:[#allocation5 + $0xd0c] sm:$0xf]  ;;  %v5269_v62 = vor.u32 %v7347_v56, %v5266_v57  ;;  %v7472_v55 = vld [vmem:[#allocation5 + $0x6cc] sm:$0xf0] }
  0x93   :  { %v5394_v59 = vld [vmem:[#allocation5 + $0xd48] sm:$0xf0]  ;;  %v5816_v56 = vld [vmem:[#allocation5 + $0xa90] sm:$0xf] }
  0x94   :  { %1036 = vmatpush.bf16.msrb.mxu2 %v5333_v11  ;;  %1009 = vmatpush.bf16.msrb.mxu0 %v5061_v22  ;;  %v7279_v63 = vld [vmem:[#allocation5 + $0x8c] sm:$0xf]  ;;  %v5397_v2 = vor.u32 %v7379_v58, %v5394_v59  ;;  %v5592_v22 = vld [vmem:[#allocation5 + $0x390] sm:$0xf] }
  0x95   :  { %v4994_v0 = vld [vmem:[#allocation5 + $0xc8] sm:$0xf0]  ;;  %v7504_v57 = vld [vmem:[#allocation5 + $0xacc] sm:$0xf0] }
  0x96   :  { %1050 = vmatpush.bf16.msrb.mxu3 %v5461_v16  ;;  %1023 = vmatpush.bf16.msrb.mxu1 %v5189_v23  ;;  %v7311_v1 = vld [vmem:[#allocation5 + $0x48c] sm:$0xf]  ;;  %v4997_v9 = vor.u32 %v7279_v63, %v4994_v0  ;;  %v7448_v23 = vld [vmem:[#allocation5 + $0x3cc] sm:$0xf0] }
  0x97   :  { %v5122_v3 = vld [vmem:[#allocation5 + $0x4c8] sm:$0xf0]  ;;  %v5944_v58 = vld [vmem:[#allocation5 + $0xe90] sm:$0xf] }
  0x98   :  { %1037 = vmatpush.bf16.msrb.mxu2 %v5317_v24  ;;  %1010 = vmatpush.bf16.msrb.mxu0 %v5045_v36  ;;  %v7343_v4 = vld [vmem:[#allocation5 + $0x88c] sm:$0xf]  ;;  %v5125_v12 = vor.u32 %v7311_v1, %v5122_v3  ;;  %v5720_v24 = vld [vmem:[#allocation5 + $0x790] sm:$0xf]  ;;  %v5593_v36 = vor.u32 %v7448_v23, %v5592_v22 }
  0x99   :  { %v5250_v5 = vld [vmem:[#allocation5 + $0x8c8] sm:$0xf0]  ;;  %v7536_v59 = vld [vmem:[#allocation5 + $0xecc] sm:$0xf0] }
  0x9a   :  { %1051 = vmatpush.bf16.msrb.mxu3 %v5445_v29  ;;  %1024 = vmatpush.bf16.msrb.mxu1 %v5173_v37  ;;  %v7375_v6 = vld [vmem:[#allocation5 + $0xc8c] sm:$0xf]  ;;  %v5253_v13 = vor.u32 %v7343_v4, %v5250_v5  ;;  %v7512_v29 = vld [vmem:[#allocation5 + $0xbcc] sm:$0xf0]  ;;  %v5721_v37 = vor.u32 %v7480_v27, %v5720_v24 }
  0x9b   :  { %v5378_v7 = vld [vmem:[#allocation5 + $0xcc8] sm:$0xf0]  ;;  %v5544_v63 = vld [vmem:[#allocation5 + $0x210] sm:$0xf] }
  0x9c   :  { %1038 = vmatpush.bf16.msrb.mxu2 %v5301_v38  ;;  %1011 = vmatpush.bf16.msrb.mxu0 %v5029_v48  ;;  %v7275_v10 = vld [vmem:[#allocation5 + $0xc] sm:$0xf]  ;;  %v5381_v18 = vor.u32 %v7375_v6, %v5378_v7  ;;  %v5849_v38 = vor.u32 %v7512_v29, %v5848_v28  ;;  %v5577_v48 = vor.u32 %v7444_v40, %v5576_v39  ;;  %v7436_v0 = vld [vmem:[#allocation5 + $0x24c] sm:$0xf0] }
  0x9d   :  { %v4978_v11 = vld [vmem:[#allocation5 + $0x48] sm:$0xf0]  ;;  %v5672_v1 = vld [vmem:[#allocation5 + $0x610] sm:$0xf] }
  0x9e   :  { %1052 = vmatpush.bf16.msrb.mxu3 %v5429_v42  ;;  %1025 = vmatpush.bf16.msrb.mxu1 %v5157_v49  ;;  %v7307_v14 = vld [vmem:[#allocation5 + $0x40c] sm:$0xf]  ;;  %v4981_v25 = vor.u32 %v7275_v10, %v4978_v11  ;;  %v5977_v42 = vor.u32 %v7544_v34, %v5976_v32  ;;  %v5705_v49 = vor.u32 %v7476_v43, %v5704_v41  ;;  %v7468_v3 = vld [vmem:[#allocation5 + $0x64c] sm:$0xf0] }
  0x9f   :  { %v5106_v16 = vld [vmem:[#allocation5 + $0x448] sm:$0xf0]  ;;  %v5800_v4 = vld [vmem:[#allocation5 + $0xa10] sm:$0xf]  ;;  %v5673_v10 = vor.u32 %v7468_v3, %v5672_v1  ;;  %v7510_v1 = vld [vmem:[#allocation5 + $0xb94] sm:$0xf] }
  0xa0   :  { %1039 = vmatpush.bf16.msrb.mxu2 %v5285_v50  ;;  %1012 = vmatpush.bf16.msrb.mxu0 %v5013_v60  ;;  %v7339_v17 = vld [vmem:[#allocation5 + $0x80c] sm:$0xf]  ;;  %v5109_v30 = vor.u32 %v7307_v14, %v5106_v16  ;;  %v5833_v50 = vor.u32 %v7508_v45, %v5832_v44  ;;  %v5561_v60 = vor.u32 %v7440_v52, %v5560_v51  ;;  %v7500_v5 = vld [vmem:[#allocation5 + $0xa4c] sm:$0xf0] }
  0xa1   :  { %v5234_v19 = vld [vmem:[#allocation5 + $0x848] sm:$0xf0]  ;;  %v5928_v6 = vld [vmem:[#allocation5 + $0xe10] sm:$0xf]  ;;  %v5801_v11 = vor.u32 %v7500_v5, %v5800_v4  ;;  %v7542_v5 = vld [vmem:[#allocation5 + $0xf94] sm:$0xf] }
  0xa2   :  { %1053 = vmatpush.bf16.msrb.mxu3 %v5413_v54  ;;  %1026 = vmatpush.bf16.msrb.mxu1 %v5141_v61  ;;  %v7371_v20 = vld [vmem:[#allocation5 + $0xc0c] sm:$0xf]  ;;  %v5237_v31 = vor.u32 %v7339_v17, %v5234_v19  ;;  %v5961_v54 = vor.u32 %v7540_v47, %v5960_v46  ;;  %v5689_v61 = vor.u32 %v7472_v55, %v5688_v53  ;;  %v7532_v7 = vld [vmem:[#allocation5 + $0xe4c] sm:$0xf0] }
  0xa3   :  { %v5362_v21 = vld [vmem:[#allocation5 + $0xc48] sm:$0xf0]  ;;  %v5656_v14 = vld [vmem:[#allocation5 + $0x590] sm:$0xf]  ;;  %v5929_v16 = vor.u32 %v7532_v7, %v5928_v6  ;;  %v5978_v6 = vld [vmem:[#allocation5 + $0xfd0] sm:$0xf0] }
  0xa4   :  { %1040 = vmatpush.bf16.msrb.mxu2 %v5269_v62  ;;  %1013 = vmatpush.bf16.msrb.mxu0 %v4997_v9  ;;  %v5365_v35 = vor.u32 %v7371_v20, %v5362_v21  ;;  %v5817_v62 = vor.u32 %v7504_v57, %v5816_v56  ;;  %v5545_v9 = vor.u32 %v7436_v0, %v5544_v63  ;;  %v7464_v17 = vld [vmem:[#allocation5 + $0x5cc] sm:$0xf0]  ;;  %v5722_v0 = vld [vmem:[#allocation5 + $0x7d0] sm:$0xf0] }
  0xa5   :  { %v7496_v19 = vld [vmem:[#allocation5 + $0x9cc] sm:$0xf0]  ;;  %v5657_v23 = vor.u32 %v7464_v17, %v5656_v14  ;;  %v7474_v14 = vld [vmem:[#allocation5 + $0x714] sm:$0xf] }
  0xa6   :  { %1054 = vmatpush.bf16.msrb.mxu3 %v5397_v2  ;;  %1027 = vmatpush.bf16.msrb.mxu1 %v5125_v12  ;;  %v5945_v2 = vor.u32 %v7536_v59, %v5944_v58  ;;  %v5528_v12 = vld [vmem:[#allocation5 + $0x190] sm:$0xf]  ;;  %v5706_v17 = vld [vmem:[#allocation5 + $0x750] sm:$0xf0] }
  0xa7   :  { %v5912_v20 = vld [vmem:[#allocation5 + $0xd90] sm:$0xf] }
  0xa8   :  { %1041 = vmatpush.bf16.msrb.mxu2 %v5253_v13  ;;  %1014 = vmatpush.bf16.msrb.mxu0 %v4981_v25  ;;  %v7432_v13 = vld [vmem:[#allocation5 + $0x1cc] sm:$0xf0] }
  0xa9   :  { %v7528_v21 = vld [vmem:[#allocation5 + $0xdcc] sm:$0xf0]  ;;  %v5529_v22 = vor.u32 %v7432_v13, %v5528_v12  ;;  %v7442_v12 = vld [vmem:[#allocation5 + $0x314] sm:$0xf] }
  0xaa   :  { %1055 = vmatpush.bf16.msrb.mxu3 %v5381_v18  ;;  %1028 = vmatpush.bf16.msrb.mxu1 %v5109_v30  ;;  %v5784_v18 = vld [vmem:[#allocation5 + $0x990] sm:$0xf]  ;;  %v5913_v29 = vor.u32 %v7528_v21, %v5912_v20  ;;  %v5578_v13 = vld [vmem:[#allocation5 + $0x350] sm:$0xf0] }
  0xab   :  { %1015 = vmatmul.bf16.vlgmr.msrb.gmra.mxu0 %v8014_v26  ;;  %v5785_v24 = vor.u32 %v7496_v19, %v5784_v18  ;;  %v5512_v25 = vld [vmem:[#allocation5 + $0x110] sm:$0xf]  ;;  %v7506_v18 = vld [vmem:[#allocation5 + $0xb14] sm:$0xf] }
  0xac   :  { %1042 = vmatpush.bf16.msrb.mxu2 %v5237_v31  ;;  %1925 = vmatpush.bf16.msra.mxu0 %v5593_v36  ;;  %v7428_v27 = vld [vmem:[#allocation5 + $0x14c] sm:$0xf0]  ;;  %v5834_v19 = vld [vmem:[#allocation5 + $0xb50] sm:$0xf0] }
  0xad   :  { %1029 = vmatmul.bf16.vlgmr.msrb.gmra.mxu1 %v8016_v33  ;;  %v5640_v28 = vld [vmem:[#allocation5 + $0x510] sm:$0xf]  ;;  %v5513_v36 = vor.u32 %v7428_v27, %v5512_v25  ;;  %v7538_v20 = vld [vmem:[#allocation5 + $0xf14] sm:$0xf] }
  0xae   :  { %1056 = vmatpush.bf16.msrb.mxu3 %v5365_v35  ;;  %1939 = vmatpush.bf16.msra.mxu1 %v5721_v37  ;;  %v7460_v30 = vld [vmem:[#allocation5 + $0x54c] sm:$0xf0]  ;;  %v5962_v21 = vld [vmem:[#allocation5 + $0xf50] sm:$0xf0] }
  0xaf   :  { %1043 = vmatmul.bf16.vlgmr.msrb.gmra.mxu2 %v8008_v8  ;;  %v5768_v31 = vld [vmem:[#allocation5 + $0x910] sm:$0xf]  ;;  %v5641_v37 = vor.u32 %v7460_v30, %v5640_v28  ;;  %v7438_v25 = vld [vmem:[#allocation5 + $0x294] sm:$0xf] }
  0xb0   :  { %1953 = vmatpush.bf16.msra.mxu2 %v5849_v38  ;;  %1926 = vmatpush.bf16.msra.mxu0 %v5577_v48  ;;  %v7492_v32 = vld [vmem:[#allocation5 + $0x94c] sm:$0xf0]  ;;  %v5562_v27 = vld [vmem:[#allocation5 + $0x2d0] sm:$0xf0] }
  0xb1   :  { %1057 = vmatmul.bf16.vlgmr.msrb.gmra.mxu3 %v8010_v15  ;;  %v5896_v34 = vld [vmem:[#allocation5 + $0xd10] sm:$0xf]  ;;  %v5769_v38 = vor.u32 %v7492_v32, %v5768_v31  ;;  %v7470_v28 = vld [vmem:[#allocation5 + $0x694] sm:$0xf] }
  0xb2   :  { %1967 = vmatpush.bf16.msra.mxu3 %v5977_v42  ;;  %1940 = vmatpush.bf16.msra.mxu1 %v5705_v49  ;;  %v7524_v35 = vld [vmem:[#allocation5 + $0xd4c] sm:$0xf0]  ;;  %v5690_v30 = vld [vmem:[#allocation5 + $0x6d0] sm:$0xf0] }
  0xb3   :  { %v5496_v39 = vld [vmem:[#allocation5 + $0x90] sm:$0xf]  ;;  %v5897_v42 = vor.u32 %v7524_v35, %v5896_v34  ;;  %v7502_v31 = vld [vmem:[#allocation5 + $0xa94] sm:$0xf] }
  0xb4   :  { %1954 = vmatpush.bf16.msra.mxu2 %v5833_v50  ;;  %1927 = vmatpush.bf16.msra.mxu0 %v5561_v60  ;;  %v7424_v40 = vld [vmem:[#allocation5 + $0xcc] sm:$0xf0]  ;;  %v7446_v60 = vld [vmem:[#allocation5 + $0x394] sm:$0xf] }
  0xb5   :  { %v5624_v41 = vld [vmem:[#allocation5 + $0x490] sm:$0xf]  ;;  %v5497_v48 = vor.u32 %v7424_v40, %v5496_v39  ;;  %v5818_v32 = vld [vmem:[#allocation5 + $0xad0] sm:$0xf0] }
  0xb6   :  { %1968 = vmatpush.bf16.msra.mxu3 %v5961_v54  ;;  %1941 = vmatpush.bf16.msra.mxu1 %v5689_v61  ;;  %v7456_v43 = vld [vmem:[#allocation5 + $0x4cc] sm:$0xf0]  ;;  %v5594_v61 = vld [vmem:[#allocation5 + $0x3d0] sm:$0xf0] }
  0xb7   :  { %v5752_v44 = vld [vmem:[#allocation5 + $0x890] sm:$0xf]  ;;  %v5625_v51 = vor.u32 %v7456_v43, %v5624_v41  ;;  %v7534_v34 = vld [vmem:[#allocation5 + $0xe94] sm:$0xf] }
  0xb8   :  { %1955 = vmatpush.bf16.msra.mxu2 %v5817_v62  ;;  %1928 = vmatpush.bf16.msra.mxu0 %v5545_v9  ;;  %v7488_v45 = vld [vmem:[#allocation5 + $0x8cc] sm:$0xf0]  ;;  %v7478_v62 = vld [vmem:[#allocation5 + $0x794] sm:$0xf]  ;;  %v5597_v9 = vor.u32 %v7446_v60, %v5594_v61 }
  0xb9   :  { %v5880_v46 = vld [vmem:[#allocation5 + $0xc90] sm:$0xf]  ;;  %v5753_v52 = vor.u32 %v7488_v45, %v5752_v44  ;;  %v5946_v35 = vld [vmem:[#allocation5 + $0xed0] sm:$0xf0] }
  0xba   :  { %1969 = vmatpush.bf16.msra.mxu3 %v5945_v2  ;;  %1942 = vmatpush.bf16.msra.mxu1 %v5673_v10  ;;  %v7520_v47 = vld [vmem:[#allocation5 + $0xccc] sm:$0xf0]  ;;  %v5850_v2 = vld [vmem:[#allocation5 + $0xbd0] sm:$0xf0]  ;;  %v5725_v10 = vor.u32 %v7478_v62, %v5722_v0 }
  0xbb   :  { %v5480_v49 = vld [vmem:[#allocation5 + $0x10] sm:$0xf]  ;;  %v5881_v56 = vor.u32 %v7520_v47, %v5880_v46  ;;  %v7434_v39 = vld [vmem:[#allocation5 + $0x214] sm:$0xf] }
  0xbc   :  { %1956 = vmatpush.bf16.msra.mxu2 %v5801_v11  ;;  %1929 = vmatpush.bf16.msra.mxu0 %v5529_v22  ;;  %v7420_v50 = vld [vmem:[#allocation5 + $0x4c] sm:$0xf0]  ;;  %v5853_v11 = vor.u32 %v7510_v1, %v5850_v2  ;;  %v5581_v22 = vor.u32 %v7442_v12, %v5578_v13  ;;  %v5546_v40 = vld [vmem:[#allocation5 + $0x250] sm:$0xf0] }
  0xbd   :  { %v5608_v53 = vld [vmem:[#allocation5 + $0x410] sm:$0xf]  ;;  %v5481_v63 = vor.u32 %v7420_v50, %v5480_v49  ;;  %v7466_v41 = vld [vmem:[#allocation5 + $0x614] sm:$0xf] }
  0xbe   :  { %1970 = vmatpush.bf16.msra.mxu3 %v5929_v16  ;;  %1943 = vmatpush.bf16.msra.mxu1 %v5657_v23  ;;  %v7452_v54 = vld [vmem:[#allocation5 + $0x44c] sm:$0xf0]  ;;  %v5981_v16 = vor.u32 %v7542_v5, %v5978_v6  ;;  %v5709_v23 = vor.u32 %v7474_v14, %v5706_v17  ;;  %v5674_v43 = vld [vmem:[#allocation5 + $0x650] sm:$0xf0] }
  0xbf   :  { %v5736_v55 = vld [vmem:[#allocation5 + $0x810] sm:$0xf]  ;;  %v5609_v3 = vor.u32 %v7452_v54, %v5608_v53  ;;  %v7498_v44 = vld [vmem:[#allocation5 + $0xa14] sm:$0xf]  ;;  %v5677_v49 = vor.u32 %v7466_v41, %v5674_v43  ;;  %v5856_v41 = vld [vmem:[#allocation5 + $0xb98] sm:$0xf] }
  0xc0   :  { %1957 = vmatpush.bf16.msra.mxu2 %v5785_v24  ;;  %1930 = vmatpush.bf16.msra.mxu0 %v5513_v36  ;;  %v7484_v57 = vld [vmem:[#allocation5 + $0x84c] sm:$0xf0]  ;;  %v5837_v24 = vor.u32 %v7506_v18, %v5834_v19  ;;  %v5565_v36 = vor.u32 %v7438_v25, %v5562_v27  ;;  %v5802_v45 = vld [vmem:[#allocation5 + $0xa50] sm:$0xf0] }
  0xc1   :  { %v5864_v58 = vld [vmem:[#allocation5 + $0xc10] sm:$0xf]  ;;  %v5737_v4 = vor.u32 %v7484_v57, %v5736_v55  ;;  %v7530_v46 = vld [vmem:[#allocation5 + $0xe14] sm:$0xf]  ;;  %v5805_v50 = vor.u32 %v7498_v44, %v5802_v45  ;;  %v5984_v45 = vld [vmem:[#allocation5 + $0xf98] sm:$0xf] }
  0xc2   :  { %1971 = vmatpush.bf16.msra.mxu3 %v5913_v29  ;;  %1944 = vmatpush.bf16.msra.mxu1 %v5641_v37  ;;  %v7516_v59 = vld [vmem:[#allocation5 + $0xc4c] sm:$0xf0]  ;;  %v5965_v29 = vor.u32 %v7538_v20, %v5962_v21  ;;  %v5693_v37 = vor.u32 %v7470_v28, %v5690_v30  ;;  %v5930_v47 = vld [vmem:[#allocation5 + $0xe50] sm:$0xf0] }
  0xc3   :  { %v5865_v7 = vor.u32 %v7516_v59, %v5864_v58  ;;  %v7462_v53 = vld [vmem:[#allocation5 + $0x594] sm:$0xf]  ;;  %v5933_v54 = vor.u32 %v7530_v46, %v5930_v47  ;;  %v7545_v46 = vld [vmem:[#allocation5 + $0xfd4] sm:$0xf0] }
  0xc4   :  { %1958 = vmatpush.bf16.msra.mxu2 %v5769_v38  ;;  %1931 = vmatpush.bf16.msra.mxu0 %v5497_v48  ;;  %v5821_v38 = vor.u32 %v7502_v31, %v5818_v32  ;;  %v5549_v48 = vor.u32 %v7434_v39, %v5546_v40  ;;  %v5658_v55 = vld [vmem:[#allocation5 + $0x5d0] sm:$0xf0]  ;;  %v7481_v40 = vld [vmem:[#allocation5 + $0x7d4] sm:$0xf0] }
  0xc5   :  { %v5786_v57 = vld [vmem:[#allocation5 + $0x9d0] sm:$0xf0]  ;;  %v5661_v61 = vor.u32 %v7462_v53, %v5658_v55  ;;  %v5712_v53 = vld [vmem:[#allocation5 + $0x718] sm:$0xf] }
  0xc6   :  { %1972 = vmatpush.bf16.msra.mxu3 %v5897_v42  ;;  %1945 = vmatpush.bf16.msra.mxu1 %v5625_v51  ;;  %v5949_v42 = vor.u32 %v7534_v34, %v5946_v35  ;;  %v7430_v51 = vld [vmem:[#allocation5 + $0x194] sm:$0xf]  ;;  %v7477_v55 = vld [vmem:[#allocation5 + $0x754] sm:$0xf0] }
  0xc7   :  { %v7526_v58 = vld [vmem:[#allocation5 + $0xd94] sm:$0xf] }
  0xc8   :  { %1959 = vmatpush.bf16.msra.mxu2 %v5753_v52  ;;  %1932 = vmatpush.bf16.msra.mxu0 %v5481_v63  ;;  %v5530_v52 = vld [vmem:[#allocation5 + $0x1d0] sm:$0xf0] }
  0xc9   :  { %v5914_v59 = vld [vmem:[#allocation5 + $0xdd0] sm:$0xf0]  ;;  %v5533_v60 = vor.u32 %v7430_v51, %v5530_v52  ;;  %v5584_v51 = vld [vmem:[#allocation5 + $0x318] sm:$0xf] }
  0xca   :  { %1973 = vmatpush.bf16.msra.mxu3 %v5881_v56  ;;  %1946 = vmatpush.bf16.msra.mxu1 %v5609_v3  ;;  %v7494_v56 = vld [vmem:[#allocation5 + $0x994] sm:$0xf]  ;;  %v5917_v2 = vor.u32 %v7526_v58, %v5914_v59  ;;  %v7445_v52 = vld [vmem:[#allocation5 + $0x354] sm:$0xf0] }
  0xcb   :  { %1933 = vmatmul.bf16.vlgmr.msra.gmra.mxu0 %v8014_v26  ;;  %v5789_v62 = vor.u32 %v7494_v56, %v5786_v57  ;;  %v7426_v63 = vld [vmem:[#allocation5 + $0x114] sm:$0xf]  ;;  %v5840_v56 = vld [vmem:[#allocation5 + $0xb18] sm:$0xf] }
  0xcc   :  { %1960 = vmatpush.bf16.msra.mxu2 %v5737_v4  ;;  %1981 = vmatpush.bf16.msrb.mxu0 %v5597_v9  ;;  %v5514_v0 = vld [vmem:[#allocation5 + $0x150] sm:$0xf0]  ;;  %v7509_v57 = vld [vmem:[#allocation5 + $0xb54] sm:$0xf0] }
  0xcd   :  { %1947 = vmatmul.bf16.vlgmr.msra.gmra.mxu1 %v8016_v33  ;;  %v7458_v1 = vld [vmem:[#allocation5 + $0x514] sm:$0xf]  ;;  %v5517_v9 = vor.u32 %v7426_v63, %v5514_v0  ;;  %v5968_v58 = vld [vmem:[#allocation5 + $0xf18] sm:$0xf]  ;;  %v5841_v63 = vor.u32 %v7509_v57, %v5840_v56 }
  0xce   :  { %1974 = vmatpush.bf16.msra.mxu3 %v5865_v7  ;;  %1995 = vmatpush.bf16.msrb.mxu1 %v5725_v10  ;;  %v5642_v3 = vld [vmem:[#allocation5 + $0x550] sm:$0xf0]  ;;  %v7541_v59 = vld [vmem:[#allocation5 + $0xf54] sm:$0xf0]  ;;  %v8038_v0 = vpop.f32.mrf.mxu1 }
  0xcf   :  { %1961 = vmatmul.bf16.vlgmr.msra.gmra.mxu2 %v8008_v8  ;;  %v7490_v4 = vld [vmem:[#allocation5 + $0x914] sm:$0xf]  ;;  %v5645_v10 = vor.u32 %v7458_v1, %v5642_v3  ;;  %v5568_v1 = vld [vmem:[#allocation5 + $0x298] sm:$0xf] }
  0xd0   :  { %2009 = vmatpush.bf16.msrb.mxu2 %v5853_v11  ;;  %1982 = vmatpush.bf16.msrb.mxu0 %v5581_v22  ;;  %v5770_v5 = vld [vmem:[#allocation5 + $0x950] sm:$0xf0]  ;;  %v5696_v3 = vld [vmem:[#allocation5 + $0x698] sm:$0xf] }
  0xd1   :  { %1975 = vmatmul.bf16.vlgmr.msra.gmra.mxu3 %v8010_v15  ;;  %v7522_v6 = vld [vmem:[#allocation5 + $0xd14] sm:$0xf]  ;;  %v5773_v11 = vor.u32 %v7490_v4, %v5770_v5  ;;  %v5969_v4 = vor.u32 %v7541_v59, %v5968_v58  ;;  %v7473_v5 = vld [vmem:[#allocation5 + $0x6d4] sm:$0xf0] }
  0xd2   :  { %2023 = vmatpush.bf16.msrb.mxu3 %v5981_v16  ;;  %1996 = vmatpush.bf16.msrb.mxu1 %v5709_v23  ;;  %v5898_v7 = vld [vmem:[#allocation5 + $0xd50] sm:$0xf0]  ;;  %v5504_v59 = vld [vmem:[#allocation5 + $0x98] sm:$0xf] }
  0xd3   :  { %v7422_v12 = vld [vmem:[#allocation5 + $0x94] sm:$0xf]  ;;  %v5901_v16 = vor.u32 %v7522_v6, %v5898_v7  ;;  %v5824_v6 = vld [vmem:[#allocation5 + $0xa98] sm:$0xf] }
  0xd4   :  { %2010 = vmatpush.bf16.msrb.mxu2 %v5837_v24  ;;  %1983 = vmatpush.bf16.msrb.mxu0 %v5565_v36  ;;  %v5498_v13 = vld [vmem:[#allocation5 + $0xd0] sm:$0xf0]  ;;  %v5600_v36 = vld [vmem:[#allocation5 + $0x398] sm:$0xf] }
  0xd5   :  { %v7454_v14 = vld [vmem:[#allocation5 + $0x494] sm:$0xf]  ;;  %v5501_v22 = vor.u32 %v7422_v12, %v5498_v13  ;;  %v7505_v7 = vld [vmem:[#allocation5 + $0xad4] sm:$0xf0]  ;;  %v8044_v12 = vpop.f32.mrf.mxu2  ;;  %v5697_v13 = vor.u32 %v7473_v5, %v5696_v3 }
  0xd6   :  { %2024 = vmatpush.bf16.msrb.mxu3 %v5965_v29  ;;  %1997 = vmatpush.bf16.msrb.mxu1 %v5693_v37  ;;  %v5626_v17 = vld [vmem:[#allocation5 + $0x4d0] sm:$0xf0]  ;;  %v7449_v37 = vld [vmem:[#allocation5 + $0x3d4] sm:$0xf0] }
  0xd7   :  { %v7486_v18 = vld [vmem:[#allocation5 + $0x894] sm:$0xf]  ;;  %v5629_v25 = vor.u32 %v7454_v14, %v5626_v17  ;;  %v5825_v14 = vor.u32 %v7505_v7, %v5824_v6  ;;  %v7437_v17 = vld [vmem:[#allocation5 + $0x254] sm:$0xf0] }
  0xd8   :  { %2011 = vmatpush.bf16.msrb.mxu2 %v5821_v38  ;;  %1984 = vmatpush.bf16.msrb.mxu0 %v5549_v48  ;;  %v5754_v19 = vld [vmem:[#allocation5 + $0x8d0] sm:$0xf0]  ;;  %v5728_v38 = vld [vmem:[#allocation5 + $0x798] sm:$0xf]  ;;  %v5601_v48 = vor.u32 %v7449_v37, %v5600_v36 }
  0xd9   :  { %v7518_v20 = vld [vmem:[#allocation5 + $0xc94] sm:$0xf]  ;;  %v5757_v27 = vor.u32 %v7486_v18, %v5754_v19  ;;  %v5680_v18 = vld [vmem:[#allocation5 + $0x618] sm:$0xf] }
  0xda   :  { %2025 = vmatpush.bf16.msrb.mxu3 %v5949_v42  ;;  %1998 = vmatpush.bf16.msrb.mxu1 %v5677_v49  ;;  %v5882_v21 = vld [vmem:[#allocation5 + $0xcd0] sm:$0xf0]  ;;  %v7513_v42 = vld [vmem:[#allocation5 + $0xbd4] sm:$0xf0]  ;;  %v5729_v49 = vor.u32 %v7481_v40, %v5728_v38 }
  0xdb   :  { %v7418_v23 = vld [vmem:[#allocation5 + $0x14] sm:$0xf]  ;;  %v5885_v31 = vor.u32 %v7518_v20, %v5882_v21  ;;  %v8046_v20 = vpop.f32.mrf.mxu3  ;;  %v7469_v21 = vld [vmem:[#allocation5 + $0x654] sm:$0xf0] }
  0xdc   :  { %2012 = vmatpush.bf16.msrb.mxu2 %v5805_v50  ;;  %1985 = vmatpush.bf16.msrb.mxu0 %v5533_v60  ;;  %v5482_v24 = vld [vmem:[#allocation5 + $0x50] sm:$0xf0]  ;;  %v5857_v50 = vor.u32 %v7513_v42, %v5856_v41  ;;  %v5585_v60 = vor.u32 %v7445_v52, %v5584_v51  ;;  %v7465_v36 = vld [vmem:[#allocation5 + $0x5d4] sm:$0xf0] }
  0xdd   :  { %v7450_v28 = vld [vmem:[#allocation5 + $0x414] sm:$0xf]  ;;  %v5485_v39 = vor.u32 %v7418_v23, %v5482_v24  ;;  %v7501_v23 = vld [vmem:[#allocation5 + $0xa54] sm:$0xf0]  ;;  %v8052_v52 = vpop.f32.mrf.mxu2 }
  0xde   :  { %2026 = vmatpush.bf16.msrb.mxu3 %v5933_v54  ;;  %1999 = vmatpush.bf16.msrb.mxu1 %v5661_v61  ;;  %v5610_v29 = vld [vmem:[#allocation5 + $0x450] sm:$0xf0]  ;;  %v5985_v54 = vor.u32 %v7545_v46, %v5984_v45  ;;  %v8036_v61 = vpop.f32.mrf.mxu0  ;;  %v5936_v24 = vld [vmem:[#allocation5 + $0xe18] sm:$0xf] }
  0xdf   :  { %v7482_v30 = vld [vmem:[#allocation5 + $0x814] sm:$0xf]  ;;  %v5613_v43 = vor.u32 %v7450_v28, %v5610_v29  ;;  %v5681_v28 = vor.u32 %v7469_v21, %v5680_v18  ;;  %v5792_v37 = vld [vmem:[#allocation5 + $0x998] sm:$0xf] }
  0xe0   :  { %2013 = vmatpush.bf16.msrb.mxu2 %v5789_v62  ;;  %1986 = vmatpush.bf16.msrb.mxu0 %v5517_v9  ;;  %v5738_v32 = vld [vmem:[#allocation5 + $0x850] sm:$0xf0]  ;;  %v5713_v62 = vor.u32 %v7477_v55, %v5712_v53  ;;  %v5952_v9 = vld [vmem:[#allocation5 + $0xe98] sm:$0xf] }
  0xe1   :  { %v7514_v34 = vld [vmem:[#allocation5 + $0xc14] sm:$0xf]  ;;  %v5741_v44 = vor.u32 %v7482_v30, %v5738_v32  ;;  %v5536_v30 = vld [vmem:[#allocation5 + $0x198] sm:$0xf] }
  0xe2   :  { %2027 = vmatpush.bf16.msrb.mxu3 %v5917_v2  ;;  %2000 = vmatpush.bf16.msrb.mxu1 %v5645_v10  ;;  %v5866_v35 = vld [vmem:[#allocation5 + $0xc50] sm:$0xf0]  ;;  %v7441_v2 = vld [vmem:[#allocation5 + $0x2d4] sm:$0xf0] }
  0xe3   :  { %v5869_v47 = vor.u32 %v7514_v34, %v5866_v35  ;;  %v7537_v10 = vld [vmem:[#allocation5 + $0xed4] sm:$0xf0]  ;;  %v8054_v55 = vpop.f32.mrf.mxu3 }
  0xe4   :  { %2014 = vmatpush.bf16.msrb.mxu2 %v5773_v11  ;;  %1987 = vmatpush.bf16.msrb.mxu0 %v5501_v22  ;;  %v5569_v11 = vor.u32 %v7441_v2, %v5568_v1  ;;  %v5953_v19 = vor.u32 %v7537_v10, %v5952_v9  ;;  %v5808_v22 = vld [vmem:[#allocation5 + $0xa18] sm:$0xf] }
  0xe5   :  { %v5809_v29 = vor.u32 %v7501_v23, %v5808_v22  ;;  %v5664_v32 = vld [vmem:[#allocation5 + $0x598] sm:$0xf] }
  0xe6   :  { %2028 = vmatpush.bf16.msrb.mxu3 %v5901_v16  ;;  %2001 = vmatpush.bf16.msrb.mxu1 %v5629_v25  ;;  %v5552_v16 = vld [vmem:[#allocation5 + $0x218] sm:$0xf]  ;;  %v8048_v35 = vpop.f32.mrf.mxu0 }
  0xe7   :  { %v7533_v25 = vld [vmem:[#allocation5 + $0xe54] sm:$0xf0] }
  0xe8   :  { %2015 = vmatpush.bf16.msrb.mxu2 %v5757_v27  ;;  %1988 = vmatpush.bf16.msrb.mxu0 %v5485_v39  ;;  %v5553_v27 = vor.u32 %v7437_v17, %v5552_v16  ;;  %v5937_v34 = vor.u32 %v7533_v25, %v5936_v24  ;;  %v7497_v38 = vld [vmem:[#allocation5 + $0x9d4] sm:$0xf0]  ;;  %v8050_v39 = vpop.f32.mrf.mxu1  ;;  %v7447_v24 = vld [vmem:[#allocation5 + $0x39c] sm:$0xf] }
  0xe9   :  { %v5920_v40 = vld [vmem:[#allocation5 + $0xd98] sm:$0xf]  ;;  %v5602_v25 = vld [vmem:[#allocation5 + $0x3d8] sm:$0xf0] }
  0xea   :  { %2029 = vmatpush.bf16.msrb.mxu3 %v5885_v31  ;;  %2002 = vmatpush.bf16.msrb.mxu1 %v5613_v43  ;;  %v7433_v31 = vld [vmem:[#allocation5 + $0x1d4] sm:$0xf0]  ;;  %v5665_v43 = vor.u32 %v7465_v36, %v5664_v32  ;;  %v5858_v32 = vld [vmem:[#allocation5 + $0xbd8] sm:$0xf0] }
  0xeb   :  { %1989 = vmatmul.bf16.vlgmr.msrb.gmra.mxu0 %v8014_v26  ;;  %v7529_v41 = vld [vmem:[#allocation5 + $0xdd4] sm:$0xf0]  ;;  %v5537_v42 = vor.u32 %v7433_v31, %v5536_v30  ;;  %v5730_v30 = vld [vmem:[#allocation5 + $0x7d8] sm:$0xf0] }
  0xec   :  { %2016 = vmatpush.bf16.msrb.mxu2 %v5741_v44  ;;  %2037 = vmatpush.bf16.msra.mxu0 %v5601_v48  ;;  %v5793_v44 = vor.u32 %v7497_v38, %v5792_v37  ;;  %v5520_v45 = vld [vmem:[#allocation5 + $0x118] sm:$0xf]  ;;  %v5921_v48 = vor.u32 %v7529_v41, %v5920_v40  ;;  %v7511_v31 = vld [vmem:[#allocation5 + $0xb9c] sm:$0xf] }
  0xed   :  { %2003 = vmatmul.bf16.vlgmr.msrb.gmra.mxu1 %v8016_v33  ;;  %v7429_v46 = vld [vmem:[#allocation5 + $0x154] sm:$0xf0]  ;;  %v7543_v38 = vld [vmem:[#allocation5 + $0xf9c] sm:$0xf] }
  0xee   :  { %2030 = vmatpush.bf16.msrb.mxu3 %v5869_v47  ;;  %2051 = vmatpush.bf16.msra.mxu1 %v5729_v49  ;;  %v5648_v47 = vld [vmem:[#allocation5 + $0x518] sm:$0xf]  ;;  %v5521_v56 = vor.u32 %v7429_v46, %v5520_v45  ;;  %v5986_v40 = vld [vmem:[#allocation5 + $0xfd8] sm:$0xf0] }
  0xef   :  { %2017 = vmatmul.bf16.vlgmr.msrb.gmra.mxu2 %v8008_v8  ;;  %v7461_v49 = vld [vmem:[#allocation5 + $0x554] sm:$0xf0]  ;;  %v7443_v45 = vld [vmem:[#allocation5 + $0x31c] sm:$0xf] }
  0xf0   :  { %2065 = vmatpush.bf16.msra.mxu2 %v5857_v50  ;;  %2038 = vmatpush.bf16.msra.mxu0 %v5585_v60  ;;  %v5776_v50 = vld [vmem:[#allocation5 + $0x918] sm:$0xf]  ;;  %v5649_v57 = vor.u32 %v7461_v49, %v5648_v47  ;;  %v8058_v7 = vpop.f32.mrf.mxu1  ;;  %v5586_v46 = vld [vmem:[#allocation5 + $0x358] sm:$0xf0] }
  0xf1   :  { %2031 = vmatmul.bf16.vlgmr.msrb.gmra.mxu3 %v8010_v15  ;;  %v7493_v51 = vld [vmem:[#allocation5 + $0x954] sm:$0xf0]  ;;  %v7475_v47 = vld [vmem:[#allocation5 + $0x71c] sm:$0xf] }
  0xf2   :  { %2079 = vmatpush.bf16.msra.mxu3 %v5985_v54  ;;  %2052 = vmatpush.bf16.msra.mxu1 %v5713_v62  ;;  %v5904_v53 = vld [vmem:[#allocation5 + $0xd18] sm:$0xf]  ;;  %v5777_v58 = vor.u32 %v7493_v51, %v5776_v50  ;;  %v5714_v49 = vld [vmem:[#allocation5 + $0x758] sm:$0xf0] }
  0xf3   :  { %v7525_v54 = vld [vmem:[#allocation5 + $0xd54] sm:$0xf0]  ;;  %v7507_v50 = vld [vmem:[#allocation5 + $0xb1c] sm:$0xf] }
  0xf4   :  { %2066 = vmatpush.bf16.msra.mxu2 %v5841_v63  ;;  %2039 = vmatpush.bf16.msra.mxu0 %v5569_v11  ;;  %v7425_v60 = vld [vmem:[#allocation5 + $0xd4] sm:$0xf0]  ;;  %v5905_v63 = vor.u32 %v7525_v54, %v5904_v53  ;;  %v5842_v51 = vld [vmem:[#allocation5 + $0xb58] sm:$0xf0] }
  0xf5   :  { %v5632_v62 = vld [vmem:[#allocation5 + $0x498] sm:$0xf]  ;;  %v5505_v9 = vor.u32 %v7425_v60, %v5504_v59  ;;  %v7539_v54 = vld [vmem:[#allocation5 + $0xf1c] sm:$0xf]  ;;  %v5717_v59 = vor.u32 %v7475_v47, %v5714_v49  ;;  %v5845_v60 = vor.u32 %v7507_v50, %v5842_v51 }
  0xf6   :  { %2080 = vmatpush.bf16.msra.mxu3 %v5969_v4  ;;  %2053 = vmatpush.bf16.msra.mxu1 %v5697_v13  ;;  %v7457_v1 = vld [vmem:[#allocation5 + $0x4d4] sm:$0xf0]  ;;  %v8056_v4 = vpop.f32.mrf.mxu0  ;;  %v7527_v47 = vld [vmem:[#allocation5 + $0xd9c] sm:$0xf] }
  0xf7   :  { %v5760_v2 = vld [vmem:[#allocation5 + $0x898] sm:$0xf]  ;;  %v5633_v13 = vor.u32 %v7457_v1, %v5632_v62  ;;  %v7439_v62 = vld [vmem:[#allocation5 + $0x29c] sm:$0xf] }
  0xf8   :  { %2067 = vmatpush.bf16.msra.mxu2 %v5825_v14  ;;  %2040 = vmatpush.bf16.msra.mxu0 %v5553_v27  ;;  %v7489_v3 = vld [vmem:[#allocation5 + $0x8d4] sm:$0xf0]  ;;  %v7479_v27 = vld [vmem:[#allocation5 + $0x79c] sm:$0xf] }
  0xf9   :  { %v5888_v5 = vld [vmem:[#allocation5 + $0xc98] sm:$0xf]  ;;  %v5761_v14 = vor.u32 %v7489_v3, %v5760_v2  ;;  %v7471_v1 = vld [vmem:[#allocation5 + $0x69c] sm:$0xf] }
  0xfa   :  { %2081 = vmatpush.bf16.msra.mxu3 %v5953_v19  ;;  %2054 = vmatpush.bf16.msra.mxu1 %v5681_v28  ;;  %v7521_v6 = vld [vmem:[#allocation5 + $0xcd4] sm:$0xf0]  ;;  %v8060_v28 = vpop.f32.mrf.mxu2  ;;  %v5698_v3 = vld [vmem:[#allocation5 + $0x6d8] sm:$0xf0] }
  0xfb   :  { %v5488_v10 = vld [vmem:[#allocation5 + $0x18] sm:$0xf]  ;;  %v5889_v19 = vor.u32 %v7521_v6, %v5888_v5  ;;  %v7503_v5 = vld [vmem:[#allocation5 + $0xa9c] sm:$0xf] }
  0xfc   :  { %2068 = vmatpush.bf16.msra.mxu2 %v5809_v29  ;;  %2041 = vmatpush.bf16.msra.mxu0 %v5537_v42  ;;  %v7421_v11 = vld [vmem:[#allocation5 + $0x54] sm:$0xf0]  ;;  %v5605_v42 = vor.u32 %v7447_v24, %v5602_v25  ;;  %v5826_v6 = vld [vmem:[#allocation5 + $0xad8] sm:$0xf0] }
  0xfd   :  { %v5616_v16 = vld [vmem:[#allocation5 + $0x418] sm:$0xf]  ;;  %v5489_v29 = vor.u32 %v7421_v11, %v5488_v10  ;;  %v5954_v10 = vld [vmem:[#allocation5 + $0xed8] sm:$0xf0] }
  0xfe   :  { %2082 = vmatpush.bf16.msra.mxu3 %v5937_v34  ;;  %2055 = vmatpush.bf16.msra.mxu1 %v5665_v43  ;;  %v7453_v17 = vld [vmem:[#allocation5 + $0x454] sm:$0xf0]  ;;  %v8062_v34 = vpop.f32.mrf.mxu3  ;;  %v5733_v43 = vor.u32 %v7479_v27, %v5730_v30  ;;  %v8064_v53 = vpop.f32.mrf.mxu0  ;;  %v5682_v24 = vld [vmem:[#allocation5 + $0x658] sm:$0xf0] }
  0xff   :  { %v5744_v18 = vld [vmem:[#allocation5 + $0x818] sm:$0xf]  ;;  %v5617_v36 = vor.u32 %v7453_v17, %v5616_v16  ;;  %v863_v16 = vadd.f32 %v8038_v0, %v8036_v61  ;;  %v5701_v17 = vor.u32 %v7471_v1, %v5698_v3  ;;  %v7499_v25 = vld [vmem:[#allocation5 + $0xa1c] sm:$0xf] }
 0x100   :  { %2069 = vmatpush.bf16.msra.mxu2 %v5793_v44  ;;  %2042 = vmatpush.bf16.msra.mxu0 %v5521_v56  ;;  %v7485_v21 = vld [vmem:[#allocation5 + $0x854] sm:$0xf0]  ;;  %v5861_v44 = vor.u32 %v7511_v31, %v5858_v32  ;;  %v5970_v56 = vld [vmem:[#allocation5 + $0xf58] sm:$0xf0] }
 0x101   :  { %v5872_v22 = vld [vmem:[#allocation5 + $0xc18] sm:$0xf]  ;;  %v5745_v37 = vor.u32 %v7485_v21, %v5744_v18  ;;  %v5973_v2 = vor.u32 %v7539_v54, %v5970_v56  ;;  %v5829_v18 = vor.u32 %v7503_v5, %v5826_v6  ;;  %v5554_v21 = vld [vmem:[#allocation5 + $0x258] sm:$0xf0] }
 0x102   :  { %2083 = vmatpush.bf16.msra.mxu3 %v5921_v48  ;;  %2056 = vmatpush.bf16.msra.mxu1 %v5649_v57  ;;  %v7517_v23 = vld [vmem:[#allocation5 + $0xc54] sm:$0xf0]  ;;  %v5989_v48 = vor.u32 %v7543_v38, %v5986_v40  ;;  %v8066_v57 = vpop.f32.mrf.mxu1  ;;  %v8071_v11 = vpop.f32.mrf.mxu2  ;;  %v5810_v27 = vld [vmem:[#allocation5 + $0xa58] sm:$0xf0] }
 0x103   :  { %v5873_v41 = vor.u32 %v7517_v23, %v5872_v22  ;;  %v7467_v22 = vld [vmem:[#allocation5 + $0x61c] sm:$0xf]  ;;  %v5813_v0 = vor.u32 %v7499_v25, %v5810_v27 }
 0x104   :  { %2070 = vmatpush.bf16.msra.mxu2 %v5777_v58  ;;  %2043 = vmatpush.bf16.msra.mxu0 %v5505_v9  ;;  %v5589_v58 = vor.u32 %v7443_v45, %v5586_v46  ;;  %v7535_v9 = vld [vmem:[#allocation5 + $0xe9c] sm:$0xf]  ;;  %v5685_v61 = vor.u32 %v7467_v22, %v5682_v24 }
 0x105   :  { %v5957_v23 = vor.u32 %v7535_v9, %v5954_v10  ;;  %v5938_v30 = vld [vmem:[#allocation5 + $0xe58] sm:$0xf0] }
 0x106   :  { %2084 = vmatpush.bf16.msra.mxu3 %v5905_v63  ;;  %2057 = vmatpush.bf16.msra.mxu1 %v5633_v13  ;;  %v5570_v63 = vld [vmem:[#allocation5 + $0x2d8] sm:$0xf0] }
 0x107   :  { %v5573_v13 = vor.u32 %v7439_v62, %v5570_v63  ;;  %v7431_v38 = vld [vmem:[#allocation5 + $0x19c] sm:$0xf] }
 0x108   :  { %2071 = vmatpush.bf16.msra.mxu2 %v5761_v14  ;;  %2044 = vmatpush.bf16.msra.mxu0 %v5489_v29  ;;  %v8074_v14 = vpop.f32.mrf.mxu3  ;;  %v7531_v29 = vld [vmem:[#allocation5 + $0xe1c] sm:$0xf]  ;;  %v960_v32 = vpop.f32.mrf.mxu0 }
 0x109   :  { %v5538_v40 = vld [vmem:[#allocation5 + $0x1d8] sm:$0xf0] }
 0x10a   :  { %2085 = vmatpush.bf16.msra.mxu3 %v5889_v19  ;;  %2058 = vmatpush.bf16.msra.mxu1 %v5617_v36  ;;  %v7435_v19 = vld [vmem:[#allocation5 + $0x21c] sm:$0xf]  ;;  %v877_v36 = vadd.f32 %v8044_v12, %v863_v16  ;;  %v5541_v49 = vor.u32 %v7431_v38, %v5538_v40 }
 0x10b   :  { %2045 = vmatmul.bf16.vlgmr.msra.gmra.mxu0 %v8014_v26  ;;  %v5557_v31 = vor.u32 %v7435_v19, %v5554_v21  ;;  %v7495_v45 = vld [vmem:[#allocation5 + $0x99c] sm:$0xf] }
 0x10c   :  { %2072 = vmatpush.bf16.msra.mxu2 %v5745_v37  ;;  %2093 = vmatpush.bf16.msrb.mxu0 %v5605_v42  ;;  %v974_v37 = vpop.f32.mrf.mxu1  ;;  %v5941_v42 = vor.u32 %v7531_v29, %v5938_v30  ;;  %v5794_v46 = vld [vmem:[#allocation5 + $0x9d8] sm:$0xf0]  ;;  %v891_v12 = vadd.f32 %v8046_v20, %v877_v36 }
 0x10d   :  { %2059 = vmatmul.bf16.vlgmr.msra.gmra.mxu1 %v8016_v33  ;;  %v5797_v51 = vor.u32 %v7495_v45, %v5794_v46  ;;  %v7427_v56 = vld [vmem:[#allocation5 + $0x11c] sm:$0xf] }
 0x10e   :  { %2086 = vmatpush.bf16.msra.mxu3 %v5873_v41  ;;  %2107 = vmatpush.bf16.msrb.mxu1 %v5733_v43  ;;  %v7463_v41 = vld [vmem:[#allocation5 + $0x59c] sm:$0xf]  ;;  %v975_v43 = vadd.f32 %v974_v37, %v960_v32  ;;  %v1063_v16 = vmul.f32 %v891_v12, %v891_v12 }
 0x10f   :  { %2073 = vmatmul.bf16.vlgmr.msra.gmra.mxu2 %v8008_v8  ;;  %v7491_v3 = vld [vmem:[#allocation5 + $0x91c] sm:$0xf] }
 0x110   :  { %2121 = vmatpush.bf16.msrb.mxu2 %v5861_v44  ;;  %2094 = vmatpush.bf16.msrb.mxu0 %v5589_v58  ;;  %v5666_v44 = vld [vmem:[#allocation5 + $0x5d8] sm:$0xf0] }
 0x111   :  { %2087 = vmatmul.bf16.vlgmr.msra.gmra.mxu3 %v8010_v15  ;;  %v5669_v50 = vor.u32 %v7463_v41, %v5666_v44  ;;  %v5522_v58 = vld [vmem:[#allocation5 + $0x158] sm:$0xf0] }
 0x112   :  { %2135 = vmatpush.bf16.msrb.mxu3 %v5989_v48  ;;  %2108 = vmatpush.bf16.msrb.mxu1 %v5717_v59  ;;  %v5922_v48 = vld [vmem:[#allocation5 + $0xdd8] sm:$0xf0]  ;;  %v988_v54 = vpop.f32.mrf.mxu2  ;;  %v5525_v10 = vor.u32 %v7427_v56, %v5522_v58 }
 0x113   :  { %v7459_v59 = vld [vmem:[#allocation5 + $0x51c] sm:$0xf]  ;;  %v5925_v62 = vor.u32 %v7527_v47, %v5922_v48  ;;  %v989_v63 = vadd.f32 %v988_v54, %v975_v43 }
 0x114   :  { %2122 = vmatpush.bf16.msrb.mxu2 %v5845_v60  ;;  %2095 = vmatpush.bf16.msrb.mxu0 %v5573_v13  ;;  %v865_v60 = vadd.f32 %v8050_v39, %v8048_v35  ;;  %v1002_v1 = vpop.f32.mrf.mxu3  ;;  %v5778_v5 = vld [vmem:[#allocation5 + $0x958] sm:$0xf0]  ;;  %v962_v13 = vpop.f32.mrf.mxu0 }
 0x115   :  { %v7523_v6 = vld [vmem:[#allocation5 + $0xd1c] sm:$0xf]  ;;  %v1003_v9 = vadd.f32 %v1002_v1, %v989_v63  ;;  %v976_v19 = vpop.f32.mrf.mxu1 }
 0x116   :  { %2136 = vmatpush.bf16.msrb.mxu3 %v5973_v2  ;;  %2109 = vmatpush.bf16.msrb.mxu1 %v5701_v17  ;;  %v5650_v2 = vld [vmem:[#allocation5 + $0x558] sm:$0xf0]  ;;  %v879_v22 = vadd.f32 %v8052_v52, %v865_v60  ;;  %v977_v25 = vadd.f32 %v976_v19, %v962_v13  ;;  %v919_v13 = vadd.f32 %v8058_v7, %v8056_v4 }
 0x117   :  { %v5906_v20 = vld [vmem:[#allocation5 + $0xd58] sm:$0xf0]  ;;  %v5653_v17 = vor.u32 %v7459_v59, %v5650_v2  ;;  %v7408_v2 = vld [vmem:[%s8541_s2 + $0x30] sm:$0xff] }
 0x118   :  { %2123 = vmatpush.bf16.msrb.mxu2 %v5829_v18  ;;  %2096 = vmatpush.bf16.msrb.mxu0 %v5557_v31  ;;  %v5781_v18 = vor.u32 %v7491_v3, %v5778_v5  ;;  %v7423_v35 = vld [vmem:[#allocation5 + $0x9c] sm:$0xf]  ;;  %v5909_v24 = vor.u32 %v7523_v6, %v5906_v20  ;;  %v7416_v3 = vld [vmem:[%s8541_s2 + $0x70] sm:$0xff]  ;;  %v7407_v6 = vld [vmem:[%s8541_s2 + $0x28] sm:$0xff] }
 0x119   :  { %v5506_v39 = vld [vmem:[#allocation5 + $0xd8] sm:$0xf0] }
 0x11a   :  { %2137 = vmatpush.bf16.msrb.mxu3 %v5957_v23  ;;  %2110 = vmatpush.bf16.msrb.mxu1 %v5685_v61  ;;  %v7455_v21 = vld [vmem:[#allocation5 + $0x49c] sm:$0xf]  ;;  %v1067_v23 = vmul.f32 %v1003_v9, %v1003_v9  ;;  %v5509_v61 = vor.u32 %v7423_v35, %v5506_v39  ;;  %v990_v38 = vpop.f32.mrf.mxu2  ;;  %v7415_v9 = vld [vmem:[%s8541_s2 + $0x68] sm:$0xff] }
 0x11b   :  { %v5634_v27 = vld [vmem:[#allocation5 + $0x4d8] sm:$0xf0]  ;;  %v991_v44 = vadd.f32 %v990_v38, %v977_v25 }
 0x11c   :  { %2124 = vmatpush.bf16.msrb.mxu2 %v5813_v0  ;;  %2097 = vmatpush.bf16.msrb.mxu0 %v5541_v49  ;;  %v7487_v29 = vld [vmem:[#allocation5 + $0x89c] sm:$0xf]  ;;  %v8083_v36 = vadd.f32 %v1067_v23, %v1063_v16  ;;  %v5637_v0 = vor.u32 %v7455_v21, %v5634_v27  ;;  %v1004_v45 = vpop.f32.mrf.mxu3  ;;  %v7414_v21 = vld [vmem:[%s8541_s2 + $0x60] sm:$0xff] }
 0x11d   :  { %v5762_v30 = vld [vmem:[#allocation5 + $0x8d8] sm:$0xf0] }
 0x11e   :  { %2138 = vmatpush.bf16.msrb.mxu3 %v5941_v42  ;;  %2111 = vmatpush.bf16.msrb.mxu1 %v5669_v50  ;;  %v7519_v31 = vld [vmem:[#allocation5 + $0xc9c] sm:$0xf]  ;;  %v5765_v37 = vor.u32 %v7487_v29, %v5762_v30  ;;  %v893_v42 = vadd.f32 %v8054_v55, %v879_v22  ;;  %7859 = vrsqrt.f32 %v8083_v36  ;;  %v1005_v50 = vadd.f32 %v1004_v45, %v991_v44  ;;  %v7403_v45 = vld [vmem:[%s8541_s2 + $0x8] sm:$0xff] }
 0x11f   :  { %v5890_v32 = vld [vmem:[#allocation5 + $0xcd8] sm:$0xf0]  ;;  %v933_v22 = vadd.f32 %v8060_v28, %v919_v13  ;;  %v921_v28 = vadd.f32 %v8066_v57, %v8064_v53  ;;  %vm1082_vm1 = vcmp.eq.f32.partialorder %v8083_v36, inf  ;;  %vm1084_vm3 = vcmp.eq.f32.partialorder %v8083_v36, 0.0 }
 0x120   :  { %2125 = vmatpush.bf16.msrb.mxu2 %v5797_v51  ;;  %2098 = vmatpush.bf16.msrb.mxu0 %v5525_v10  ;;  %v7419_v40 = vld [vmem:[#allocation5 + $0x1c] sm:$0xf]  ;;  %v5893_v43 = vor.u32 %v7519_v31, %v5890_v32  ;;  %v1065_v58 = vmul.f32 %v893_v42, %v893_v42  ;;  %v1069_v55 = vmul.f32 %v1005_v50, %v1005_v50 }
 0x121   :  { %v5490_v52 = vld [vmem:[#allocation5 + $0x58] sm:$0xf0]  ;;  %v947_v30 = vadd.f32 %v8062_v34, %v933_v22  ;;  %v7412_v34 = vld [vmem:[%s8541_s2 + $0x50] sm:$0xff]  ;;  %v935_v53 = vadd.f32 %v8071_v11, %v921_v28 }
 0x122   :  { %2139 = vmatpush.bf16.msrb.mxu3 %v5925_v62  ;;  %2112 = vmatpush.bf16.msrb.mxu1 %v5653_v17  ;;  %v7451_v41 = vld [vmem:[#allocation5 + $0x41c] sm:$0xf]  ;;  %v5493_v51 = vor.u32 %v7419_v40, %v5490_v52  ;;  %v8093_v1 = vadd.f32 %v1069_v55, %v1065_v58  ;;  %v7406_v17 = vld [vmem:[%s8541_s2 + $0x20] sm:$0xff] }
 0x123   :  { %v5618_v46 = vld [vmem:[#allocation5 + $0x458] sm:$0xf0]  ;;  %v949_v11 = vadd.f32 %v8074_v14, %v935_v53  ;;  %v7410_v14 = vld [vmem:[%s8541_s2 + $0x40] sm:$0xff] }
 0x124   :  { %2126 = vmatpush.bf16.msrb.mxu2 %v5781_v18  ;;  %v7483_v47 = vld [vmem:[#allocation5 + $0x81c] sm:$0xf]  ;;  %2099 = vmatpush.bf16.msrb.mxu0 %v5509_v61  ;;  %v5621_v54 = vor.u32 %v7451_v41, %v5618_v46  ;;  %v7860_v63 = vpop.eup %7859  ;;  %7861 = vrsqrt.f32 %v8093_v1  ;;  %v1064_v41 = vmul.f32 %v947_v30, %v947_v30  ;;  %vm1106_vm0 = vcmp.eq.f32.partialorder %v8093_v1, inf }
 0x125   :  { %v5746_v48 = vld [vmem:[#allocation5 + $0x858] sm:$0xf0]  ;;  %v1076_v5 = vmul.f32 %v7860_v63, %v8083_v36  ;;  %vm1108_vm2 = vcmp.eq.f32.partialorder %v8093_v1, 0.0  ;;  %v1066_v55 = vmul.f32 %v949_v11, %v949_v11 }
 0x126   :  { %2140 = vmatpush.bf16.msrb.mxu3 %v5909_v24  ;;  %v7515_v49 = vld [vmem:[#allocation5 + $0xc1c] sm:$0xf]  ;;  %2113 = vmatpush.bf16.msrb.mxu1 %v5637_v0  ;;  %v5749_v56 = vor.u32 %v7483_v47, %v5746_v48  ;;  %v7411_v48 = vld [vmem:[%s8541_s2 + $0x48] sm:$0xff] }
 0x127   :  { %v5874_v12 = vld [vmem:[#allocation5 + $0xc58] sm:$0xf0]  ;;  %v1077_v20 = vmul.f32 %v7860_v63, %v1076_v5 }
 0x128   :  { %2127 = vmatpush.bf16.msrb.mxu2 %v5765_v37  ;;  %v5877_v59 = vor.u32 %v7515_v49, %v5874_v12  ;;  %v7409_v60 = vld [vmem:[%s8541_s2 + $0x38] sm:$0xff]  ;;  %2100 = vmatpush.bf16.msrb.mxu0 %v5493_v51  ;;  %v1016_v18 = vpop.f32.mrf.mxu0  ;;  %v7404_v37 = vld [vmem:[%s8541_s2 + $0x10] sm:$0xff] }
 0x129   :  { %v7417_v62 = vld [vmem:[%s8541_s2 + $0x78] sm:$0xff]  ;;  %v1078_v35 = vmul.f32 0.5, %v1077_v20 }
 0x12a   :  { %2141 = vmatpush.bf16.msrb.mxu3 %v5893_v43  ;;  %2114 = vmatpush.bf16.msrb.mxu1 %v5621_v54  ;;  %v7862_v10 = vpop.eup %7861  ;;  %v1030_v19 = vpop.f32.mrf.mxu1  ;;  %v7405_v7 = vld [vmem:[%s8541_s2 + $0x18] sm:$0xff]  ;;  %v7402_v54 = vld [vmem:[%s8541_s2] sm:$0xff] }
 0x12b   :  { %2101 = vmatmul.bf16.vlgmr.msrb.gmra.mxu0 %v8014_v26  ;;  %v1100_v16 = vmul.f32 %v7862_v10, %v8093_v1  ;;  %v1031_v23 = vadd.f32 %v1030_v19, %v1016_v18  ;;  %v1079_v25 = vsub.f32 1.5, %v1078_v35  ;;  %v7413_v29 = vld [vmem:[%s8541_s2 + $0x58] sm:$0xff] }
 0x12c   :  { %2128 = vmatpush.bf16.msrb.mxu2 %v5749_v56  ;;  %v1109_v56 = vand.u32 2147483648, %v8093_v1 }
 0x12d   :  { %2115 = vmatmul.bf16.vlgmr.msrb.gmra.mxu1 %v8016_v33  ;;  %v1101_v39 = vmul.f32 %v7862_v10, %v1100_v16  ;;  %v1080_v52 = vmul.f32 %v7860_v63, %v1079_v25 }
 0x12e   :  { %2142 = vmatpush.bf16.msrb.mxu3 %v5877_v59 }
 0x12f   :  { %2129 = vmatmul.bf16.vlgmr.msrb.gmra.mxu2 %v8008_v8  ;;  %v1102_v4 = vmul.f32 0.5, %v1101_v39  ;;  %v1081_v47 = vmul.f32 %v1080_v52, %v8083_v36 }
 0x130   :  { %2463 = vmatpush.bf16.msra.mxu2 %v7409_v60  ;;  %v1018_v38 = vpop.f32.mrf.mxu0  ;;  %v1085_v60 = vand.u32 2147483648, %v8083_v36 }
 0x131   :  { %2143 = vmatmul.bf16.vlgmr.msrb.gmra.mxu3 %v8010_v15  ;;  %v1103_v27 = vsub.f32 1.5, %v1102_v4  ;;  %v1083_v58 = vsel %vm1082_vm1, %v8083_v36, %v1081_v47 }
 0x132   :  { %2477 = vmatpush.bf16.msra.mxu3 %v7417_v62  ;;  %v1044_v24 = vpop.f32.mrf.mxu2  ;;  %v1032_v40 = vpop.f32.mrf.mxu1 }
 0x133   :  { %v1045_v31 = vadd.f32 %v1044_v24, %v1031_v23  ;;  %v1104_v61 = vmul.f32 %v7862_v10, %v1103_v27  ;;  %v1033_v42 = vadd.f32 %v1032_v40, %v1018_v38  ;;  %v7552_v40 = vld [vmem:[%s8541_s2 + $0xb0] sm:$0xff] }
 0x134   :  { %2464 = vmatpush.bf16.msra.mxu2 %v7408_v2  ;;  %v1058_v32 = vpop.f32.mrf.mxu3 }
 0x135   :  { %v1059_v0 = vadd.f32 %v1058_v32, %v1045_v31  ;;  %v1105_v43 = vmul.f32 %v1104_v61, %v8093_v1  ;;  %v7553_v61 = vld [vmem:[%s8541_s2 + $0xb8] sm:$0xff] }
 0x136   :  { %2478 = vmatpush.bf16.msra.mxu3 %v7416_v3  ;;  %v1086_v3 = vsel %vm1084_vm3, %v1085_v60, %v1083_v58  ;;  %2339 = vmatpush.bf16.msra.mxu0 %v7553_v61  ;;  %v7656_v58 = vld [vmem:[#allocation5 + $0xbdc] sm:$0xf0] }
 0x137   :  { %v1068_v57 = vmul.f32 %v1059_v0, %v1059_v0  ;;  %v1107_v50 = vsel %vm1106_vm0, %v8093_v1, %v1105_v43  ;;  %v7560_v43 = vld [vmem:[%s8541_s2 + $0xf0] sm:$0xff] }
 0x138   :  { %2465 = vmatpush.bf16.msra.mxu2 %v7407_v6  ;;  %v1110_v62 = vsel %vm1108_vm2, %v1109_v56, %v1107_v50  ;;  %v6488_v56 = vld [vmem:[#allocation5 + $0xba0] sm:$0xf] }
 0x139   :  { %v1072_v44 = vadd.f32 %v1068_v57, %v1064_v41  ;;  %v1123_v5 = vpack.c.bf16 %v1110_v62, %v1086_v3  ;;  %v7561_v41 = vld [vmem:[%s8541_s2 + $0xf8] sm:$0xff] }
 0x13a   :  { %2479 = vmatpush.bf16.msra.mxu3 %v7415_v9  ;;  %v1046_v46 = vpop.f32.mrf.mxu2  ;;  %2340 = vmatpush.bf16.msra.mxu0 %v7552_v40 }
 0x13b   :  { %7863 = vrsqrt.f32 %v1072_v44  ;;  %v1047_v49 = vadd.f32 %v1046_v46, %v1033_v42  ;;  %vm1094_vm4 = vcmp.eq.f32.partialorder %v1072_v44, inf  ;;  %v1097_v22 = vand.u32 2147483648, %v1072_v44  ;;  %2353 = vmatpush.bf16.msra.mxu1 %v7561_v41  ;;  %v7550_v42 = vld [vmem:[%s8541_s2 + $0xa0] sm:$0xff]  ;;  %v7559_v46 = vld [vmem:[%s8541_s2 + $0xe8] sm:$0xff] }
 0x13c   :  { %2466 = vmatpush.bf16.msra.mxu2 %v7406_v17  ;;  %v1060_v12 = vpop.f32.mrf.mxu3  ;;  %vm1096_vm6 = vcmp.eq.f32.partialorder %v1072_v44, 0.0  ;;  %v6584_v41 = vld [vmem:[#allocation5 + $0xea0] sm:$0xf] }
 0x13d   :  { %v1061_v51 = vadd.f32 %v1060_v12, %v1047_v49  ;;  %v7548_v49 = vld [vmem:[%s8541_s2 + $0x90] sm:$0xff]  ;;  %v7558_v12 = vld [vmem:[%s8541_s2 + $0xe0] sm:$0xff] }
 0x13e   :  { %2480 = vmatpush.bf16.msra.mxu3 %v7414_v21 }
 0x13f   :  { %v1070_v59 = vmul.f32 %v1061_v51, %v1061_v51  ;;  %2354 = vmatpush.bf16.msra.mxu1 %v7560_v43  ;;  %v7547_v51 = vld [vmem:[%s8541_s2 + $0x88] sm:$0xff] }
 0x140   :  { %2467 = vmatpush.bf16.msra.mxu2 %v7405_v7 }
 0x141   :  { %v7864_v63 = vpop.eup %7863  ;;  %v1074_v2 = vadd.f32 %v1070_v59, %v1066_v55  ;;  %v6489_v55 = vor.u32 %v7656_v58, %v6488_v56  ;;  %v6440_v56 = vld [vmem:[#allocation5 + $0xa20] sm:$0xf] }
 0x142   :  { %2481 = vmatpush.bf16.msra.mxu3 %v7413_v29  ;;  %v1088_v6 = vmul.f32 %v7864_v63, %v1072_v44 }
 0x143   :  { %7865 = vrsqrt.f32 %v1074_v2  ;;  %vm1118_vm5 = vcmp.eq.f32.partialorder %v1074_v2, inf  ;;  %v1121_v23 = vand.u32 2147483648, %v1074_v2  ;;  %vm1120_vm7 = vcmp.eq.f32.partialorder %v1074_v2, 0.0  ;;  %2355 = vmatpush.bf16.msra.mxu1 %v7559_v46  ;;  %v7554_v46 = vld [vmem:[%s8541_s2 + $0xc0] sm:$0xff] }
 0x144   :  { %2468 = vmatpush.bf16.msra.mxu2 %v7404_v37  ;;  %v1089_v1 = vmul.f32 %v7864_v63, %v1088_v6  ;;  %v7556_v6 = vld [vmem:[%s8541_s2 + $0xd0] sm:$0xff] }
 0x146   :  { %2482 = vmatpush.bf16.msra.mxu3 %v7412_v34  ;;  %v1090_v20 = vmul.f32 0.5, %v1089_v1  ;;  %v7551_v34 = vld [vmem:[%s8541_s2 + $0xa8] sm:$0xff]  ;;  %v6232_v1 = vld [vmem:[#allocation5 + $0x3a0] sm:$0xf] }
 0x147   :  { %2341 = vmatpush.bf16.msra.mxu0 %v7551_v34  ;;  %2356 = vmatpush.bf16.msra.mxu1 %v7558_v12  ;;  %v7584_v12 = vld [vmem:[#allocation5 + $0x2dc] sm:$0xf0] }
 0x148   :  { %2469 = vmatpush.bf16.msra.mxu2 %v7403_v45  ;;  %v1091_v9 = vsub.f32 1.5, %v1090_v20  ;;  %v1934_v27 = vpop.f32.mrf.mxu0  ;;  %v7549_v45 = vld [vmem:[%s8541_s2 + $0x98] sm:$0xff] }
 0x149   :  { %v7866_v10 = vpop.eup %7865 }
 0x14a   :  { %2483 = vmatpush.bf16.msra.mxu3 %v7411_v48  ;;  %v1112_v13 = vmul.f32 %v7866_v10, %v1074_v2  ;;  %v1092_v16 = vmul.f32 %v7864_v63, %v1091_v9  ;;  %v1948_v29 = vpop.f32.mrf.mxu1  ;;  %v6616_v63 = vld [vmem:[#allocation5 + $0xfa0] sm:$0xf] }
 0x14b   :  { %2342 = vmatpush.bf16.msra.mxu0 %v7550_v42  ;;  %v1949_v50 = vadd.f32 %v1948_v29, %v1934_v27  ;;  %v7680_v42 = vld [vmem:[#allocation5 + $0xedc] sm:$0xf0] }
 0x14c   :  { %2470 = vmatpush.bf16.msra.mxu2 %v7402_v54  ;;  %v1113_v17 = vmul.f32 %v7866_v10, %v1112_v13  ;;  %v1093_v19 = vmul.f32 %v1092_v16, %v1072_v44  ;;  %v7557_v54 = vld [vmem:[%s8541_s2 + $0xd8] sm:$0xff]  ;;  %v7592_v13 = vld [vmem:[#allocation5 + $0x3dc] sm:$0xf0]  ;;  %v6585_v43 = vor.u32 %v7680_v42, %v6584_v41 }
 0x14d   :  { %2357 = vmatpush.bf16.msra.mxu1 %v7557_v54  ;;  %v6472_v16 = vld [vmem:[#allocation5 + $0xb20] sm:$0xf] }
 0x14e   :  { %2484 = vmatpush.bf16.msra.mxu3 %v7410_v14  ;;  %v1114_v18 = vmul.f32 0.5, %v1113_v17  ;;  %v1095_v39 = vsel %vm1094_vm4, %v1072_v44, %v1093_v19  ;;  %v7652_v17 = vld [vmem:[#allocation5 + $0xb5c] sm:$0xf0] }
 0x14f   :  { %2471 = vmatmul.bf16.vlgmr.msra.gmra.mxu2 %v1123_v5  ;;  %v1098_v7 = vsel %vm1096_vm6, %v1097_v22, %v1095_v39  ;;  %2343 = vmatpush.bf16.msra.mxu0 %v7549_v45  ;;  %v7546_v5 = vld [vmem:[%s8541_s2 + $0x80] sm:$0xff] }
 0x150   :  { %v1115_v35 = vsub.f32 1.5, %v1114_v18  ;;  %v1936_v31 = vpop.f32.mrf.mxu0  ;;  %3287 = vmatpush.bf16.msrb.mxu2 %v6489_v55  ;;  %v6600_v39 = vld [vmem:[#allocation5 + $0xf20] sm:$0xf] }
 0x151   :  { %2358 = vmatpush.bf16.msra.mxu1 %v7556_v6  ;;  %v7624_v54 = vld [vmem:[#allocation5 + $0x7dc] sm:$0xf0] }
 0x152   :  { %v1116_v36 = vmul.f32 %v7866_v10, %v1115_v35  ;;  %v1962_v30 = vpop.f32.mrf.mxu2  ;;  %v1950_v32 = vpop.f32.mrf.mxu1  ;;  %v6233_v35 = vor.u32 %v7592_v13, %v6232_v1  ;;  %v6184_v6 = vld [vmem:[#allocation5 + $0x220] sm:$0xf] }
 0x153   :  { %2344 = vmatpush.bf16.msra.mxu0 %v7548_v49  ;;  %v1963_v59 = vadd.f32 %v1962_v30, %v1949_v50  ;;  %v1951_v9 = vadd.f32 %v1950_v32, %v1936_v31  ;;  %v7648_v31 = vld [vmem:[#allocation5 + $0xadc] sm:$0xf0] }
 0x154   :  { %v1117_v21 = vmul.f32 %v1116_v36, %v1074_v2  ;;  %v1976_v28 = vpop.f32.mrf.mxu3  ;;  %v6473_v36 = vor.u32 %v7652_v17, %v6472_v16  ;;  %v6200_v49 = vld [vmem:[#allocation5 + $0x2a0] sm:$0xf] }
 0x155   :  { %v1977_v20 = vadd.f32 %v1976_v28, %v1963_v59  ;;  %v6456_v28 = vld [vmem:[#allocation5 + $0xaa0] sm:$0xf] }
 0x156   :  { %v1119_v4 = vsel %vm1118_vm5, %v1074_v2, %v1117_v21  ;;  %v7688_v2 = vld [vmem:[#allocation5 + $0xfdc] sm:$0xf0]  ;;  %3288 = vmatpush.bf16.msrb.mxu2 %v6473_v36  ;;  %v6457_v34 = vor.u32 %v7648_v31, %v6456_v28 }
 0x157   :  { %v1122_v24 = vsel %vm1120_vm7, %v1121_v23, %v1119_v4  ;;  %2345 = vmatpush.bf16.msra.mxu0 %v7547_v51  ;;  %v6617_v3 = vor.u32 %v7688_v2, %v6616_v63  ;;  %v7684_v21 = vld [vmem:[#allocation5 + $0xf5c] sm:$0xf0]  ;;  %v2149_v27 = vmul.f32 %v1977_v20, %v1977_v20 }
 0x158   :  { %v1124_v25 = vpack.c.bf16 %v1122_v24, %v1098_v7  ;;  %v6601_v22 = vor.u32 %v7684_v21, %v6600_v39  ;;  %v7555_v7 = vld [vmem:[%s8541_s2 + $0xc8] sm:$0xff]  ;;  %v6216_v24 = vld [vmem:[#allocation5 + $0x320] sm:$0xf] }
 0x159   :  { %3301 = vmatpush.bf16.msrb.mxu3 %v6617_v3  ;;  %2359 = vmatpush.bf16.msra.mxu1 %v7555_v7  ;;  %v6360_v51 = vld [vmem:[#allocation5 + $0x7a0] sm:$0xf] }
 0x15a   :  { %2485 = vmatmul.bf16.vlgmr.msra.gmra.mxu3 %v1124_v25  ;;  %v8165_v0 = vpop.f32.mrf.mxu2  ;;  %v7588_v25 = vld [vmem:[#allocation5 + $0x35c] sm:$0xf0]  ;;  %3289 = vmatpush.bf16.msrb.mxu2 %v6457_v34 }
 0x15b   :  { %2346 = vmatpush.bf16.msra.mxu0 %v7546_v5  ;;  %v6217_v30 = vor.u32 %v7588_v25, %v6216_v24  ;;  %v1965_v32 = vadd.f32 %v8165_v0, %v1951_v9  ;;  %v6201_v0 = vor.u32 %v7584_v12, %v6200_v49  ;;  %v7644_v59 = vld [vmem:[#allocation5 + $0xa5c] sm:$0xf0] }
 0x15c   :  { %v8167_v37 = vpop.f32.mrf.mxu3  ;;  %v6441_v63 = vor.u32 %v7644_v59, %v6440_v56  ;;  %v7676_v2 = vld [vmem:[#allocation5 + $0xe5c] sm:$0xf0] }
 0x15d   :  { %3302 = vmatpush.bf16.msrb.mxu3 %v6601_v22  ;;  %v1979_v58 = vadd.f32 %v8167_v37, %v1965_v32  ;;  %2360 = vmatpush.bf16.msra.mxu1 %v7554_v46  ;;  %v7580_v1 = vld [vmem:[#allocation5 + $0x25c] sm:$0xf0] }
 0x15e   :  { %v6344_v20 = vld [vmem:[#allocation5 + $0x720] sm:$0xf]  ;;  %3290 = vmatpush.bf16.msrb.mxu2 %v6441_v63  ;;  %v6185_v9 = vor.u32 %v7580_v1, %v6184_v6 }
 0x15f   :  { %3259 = vmatpush.bf16.msrb.mxu0 %v6233_v35  ;;  %v7620_v37 = vld [vmem:[#allocation5 + $0x75c] sm:$0xf0]  ;;  %v2151_v16 = vmul.f32 %v1979_v58, %v1979_v58 }
 0x160   :  { %v7640_v13 = vld [vmem:[#allocation5 + $0x9dc] sm:$0xf0] }
 0x161   :  { %3303 = vmatpush.bf16.msrb.mxu3 %v6585_v43  ;;  %v6552_v35 = vld [vmem:[#allocation5 + $0xda0] sm:$0xf] }
 0x162   :  { %v7672_v36 = vld [vmem:[#allocation5 + $0xddc] sm:$0xf0] }
 0x163   :  { %3260 = vmatpush.bf16.msrb.mxu0 %v6217_v30  ;;  %v6553_v39 = vor.u32 %v7672_v36, %v6552_v35  ;;  %v6328_v7 = vld [vmem:[#allocation5 + $0x6a0] sm:$0xf] }
 0x164   :  { %v7636_v30 = vld [vmem:[#allocation5 + $0x95c] sm:$0xf0] }
 0x165   :  { %v6536_v28 = vld [vmem:[#allocation5 + $0xd20] sm:$0xf] }
 0x166   :  { %v6152_v34 = vld [vmem:[#allocation5 + $0x120] sm:$0xf] }
 0x167   :  { %3261 = vmatpush.bf16.msrb.mxu0 %v6201_v0  ;;  %v7572_v41 = vld [vmem:[#allocation5 + $0x15c] sm:$0xf0] }
 0x168   :  { %v8169_v38 = vpop.f32.mrf.mxu0  ;;  %v6153_v43 = vor.u32 %v7572_v41, %v6152_v34  ;;  %v6312_v46 = vld [vmem:[#allocation5 + $0x620] sm:$0xf] }
 0x169   :  { %v7612_v49 = vld [vmem:[#allocation5 + $0x65c] sm:$0xf0] }
 0x16a   :  { %v8174_v52 = vpop.f32.mrf.mxu1  ;;  %v6392_v12 = vld [vmem:[#allocation5 + $0x8a0] sm:$0xf]  ;;  %v6313_v0 = vor.u32 %v7612_v49, %v6312_v46  ;;  %v7682_v46 = vld [vmem:[#allocation5 + $0xf24] sm:$0xf] }
 0x16b   :  { %3262 = vmatpush.bf16.msrb.mxu0 %v6185_v9  ;;  %v7664_v58 = vld [vmem:[#allocation5 + $0xcdc] sm:$0xf0]  ;;  %v2005_v59 = vadd.f32 %v8174_v52, %v8169_v38  ;;  %v6602_v49 = vld [vmem:[#allocation5 + $0xf60] sm:$0xf0] }
 0x16c   :  { %v6296_v63 = vld [vmem:[#allocation5 + $0x5a0] sm:$0xf] }
 0x16d   :  { %v6376_v6 = vld [vmem:[#allocation5 + $0x820] sm:$0xf] }
 0x16e   :  { %v7628_v1 = vld [vmem:[#allocation5 + $0x85c] sm:$0xf0] }
 0x170   :  { %v8192_v44 = vpop.f32.mrf.mxu0 }
 0x172   :  { %v8182_v53 = vpop.f32.mrf.mxu2  ;;  %v8200_v47 = vpop.f32.mrf.mxu1 }
 0x173   :  { %v2019_v35 = vadd.f32 %v8182_v53, %v2005_v59  ;;  %v2007_v34 = vadd.f32 %v8200_v47, %v8192_v44  ;;  %v7646_v47 = vld [vmem:[#allocation5 + $0xaa4] sm:$0xf] }
 0x174   :  { %v8184_v57 = vpop.f32.mrf.mxu3  ;;  %v7590_v59 = vld [vmem:[#allocation5 + $0x3a4] sm:$0xf] }
 0x17a   :  { %v8202_v48 = vpop.f32.mrf.mxu2 }
 0x17c   :  { %v8204_v11 = vpop.f32.mrf.mxu3 }
 0x188   :  { %v2046_v14 = vpop.f32.mrf.mxu0 }
 0x18a   :  { %v2060_v60 = vpop.f32.mrf.mxu1 }
 0x18b   :  { %v2061_v62 = vadd.f32 %v2060_v60, %v2046_v14  ;;  %v6568_v60 = vld [vmem:[#allocation5 + $0xe20] sm:$0xf] }
 0x18c   :  { %v6569_v5 = vor.u32 %v7676_v2, %v6568_v60  ;;  %v7608_v2 = vld [vmem:[#allocation5 + $0x5dc] sm:$0xf0] }
 0x18e   :  { %3304 = vmatpush.bf16.msrb.mxu3 %v6569_v5 }
 0x190   :  { %v2048_v4 = vpop.f32.mrf.mxu0 }
 0x192   :  { %v2074_v10 = vpop.f32.mrf.mxu2  ;;  %v2062_v29 = vpop.f32.mrf.mxu1  ;;  %3305 = vmatpush.bf16.msrb.mxu3 %v6553_v39 }
 0x193   :  { %v2075_v18 = vadd.f32 %v2074_v10, %v2061_v62  ;;  %v2063_v40 = vadd.f32 %v2062_v29, %v2048_v4  ;;  %v6361_v62 = vor.u32 %v7624_v54, %v6360_v51  ;;  %v6424_v10 = vld [vmem:[#allocation5 + $0x9a0] sm:$0xf] }
 0x194   :  { %v2088_v19 = vpop.f32.mrf.mxu3  ;;  %v7576_v4 = vld [vmem:[#allocation5 + $0x1dc] sm:$0xf0] }
 0x195   :  { %v2089_v23 = vadd.f32 %v2088_v19, %v2075_v18  ;;  %3273 = vmatpush.bf16.msrb.mxu1 %v6361_v62  ;;  %v6345_v18 = vor.u32 %v7620_v37, %v6344_v20  ;;  %v6425_v19 = vor.u32 %v7640_v13, %v6424_v10  ;;  %v6408_v29 = vld [vmem:[#allocation5 + $0x920] sm:$0xf]  ;;  %v7654_v20 = vld [vmem:[#allocation5 + $0xba4] sm:$0xf]  ;;  %v6297_v13 = vor.u32 %v7608_v2, %v6296_v63 }
 0x196   :  { %v7632_v51 = vld [vmem:[#allocation5 + $0x8dc] sm:$0xf0]  ;;  %v2021_v63 = vadd.f32 %v8202_v48, %v2007_v34 }
 0x197   :  { %v2153_v61 = vmul.f32 %v2089_v23, %v2089_v23  ;;  %v6168_v23 = vld [vmem:[#allocation5 + $0x1a0] sm:$0xf]  ;;  %3291 = vmatpush.bf16.msrb.mxu2 %v6425_v19  ;;  %v6393_v56 = vor.u32 %v7632_v51, %v6392_v12 }
 0x198   :  { %v6169_v25 = vor.u32 %v7576_v4, %v6168_v23  ;;  %v6520_v54 = vld [vmem:[#allocation5 + $0xca0] sm:$0xf]  ;;  %v7686_v23 = vld [vmem:[#allocation5 + $0xfa4] sm:$0xf] }
 0x199   :  { %v8228_v45 = vadd.f32 %v2153_v61, %v2149_v27  ;;  %3274 = vmatpush.bf16.msrb.mxu1 %v6345_v18  ;;  %v7616_v27 = vld [vmem:[#allocation5 + $0x6dc] sm:$0xf0]  ;;  %v6409_v61 = vor.u32 %v7636_v30, %v6408_v29  ;;  %v6521_v62 = vor.u32 %v7664_v58, %v6520_v54  ;;  %v6618_v4 = vld [vmem:[#allocation5 + $0xfe0] sm:$0xf0] }
 0x19a   :  { %v2076_v50 = vpop.f32.mrf.mxu2  ;;  %v6329_v32 = vor.u32 %v7616_v27, %v6328_v7  ;;  %3263 = vmatpush.bf16.msrb.mxu0 %v6169_v25  ;;  %v6504_v18 = vld [vmem:[#allocation5 + $0xc20] sm:$0xf] }
 0x19b   :  { %7867 = vrsqrt.f32 %v8228_v45  ;;  %v2077_v14 = vadd.f32 %v2076_v50, %v2063_v40  ;;  %v7668_v40 = vld [vmem:[#allocation5 + $0xd5c] sm:$0xf0]  ;;  %3292 = vmatpush.bf16.msrb.mxu2 %v6409_v61  ;;  %v6474_v61 = vld [vmem:[#allocation5 + $0xb60] sm:$0xf0]  ;;  %vm2168_vm8 = vcmp.eq.f32.partialorder %v8228_v45, inf  ;;  %vm2170_vm9 = vcmp.eq.f32.partialorder %v8228_v45, 0.0 }
 0x19c   :  { %v2090_v55 = vpop.f32.mrf.mxu3  ;;  %v6537_v42 = vor.u32 %v7668_v40, %v6536_v28  ;;  %v7660_v19 = vld [vmem:[#allocation5 + $0xc5c] sm:$0xf0]  ;;  %v2033_v40 = vadd.f32 %v8184_v57, %v2019_v35 }
 0x19d   :  { %v2091_v3 = vadd.f32 %v2090_v55, %v2077_v14  ;;  %3275 = vmatpush.bf16.msrb.mxu1 %v6329_v32  ;;  %v6136_v14 = vld [vmem:[#allocation5 + $0xa0] sm:$0xf]  ;;  %v6505_v39 = vor.u32 %v7660_v19, %v6504_v18  ;;  %v7650_v32 = vld [vmem:[#allocation5 + $0xb24] sm:$0xf] }
 0x19e   :  { %3306 = vmatpush.bf16.msrb.mxu3 %v6537_v42  ;;  %v7568_v55 = vld [vmem:[#allocation5 + $0xdc] sm:$0xf0]  ;;  %3264 = vmatpush.bf16.msrb.mxu0 %v6153_v43  ;;  %v6477_v43 = vor.u32 %v7650_v32, %v6474_v61  ;;  %v7638_v32 = vld [vmem:[#allocation5 + $0x9a4] sm:$0xf] }
 0x19f   :  { %v2155_v17 = vmul.f32 %v2091_v3, %v2091_v3  ;;  %v6137_v5 = vor.u32 %v7568_v55, %v6136_v14  ;;  %3293 = vmatpush.bf16.msrb.mxu2 %v6393_v56  ;;  %v6120_v25 = vld [vmem:[#allocation5 + $0x20] sm:$0xf]  ;;  %v6458_v56 = vld [vmem:[#allocation5 + $0xae0] sm:$0xf0]  ;;  %v2171_v55 = vand.u32 2147483648, %v8228_v45 }
 0x1a0   :  { %v7564_v27 = vld [vmem:[#allocation5 + $0x5c] sm:$0xf0]  ;;  %v6426_v61 = vld [vmem:[#allocation5 + $0x9e0] sm:$0xf0] }
 0x1a1   :  { %v7868_v21 = vpop.eup %7867  ;;  %v8235_v22 = vadd.f32 %v2155_v17, %v2151_v16  ;;  %3276 = vmatpush.bf16.msrb.mxu1 %v6313_v0  ;;  %v6377_v16 = vor.u32 %v7628_v1, %v6376_v6  ;;  %v6490_v17 = vld [vmem:[#allocation5 + $0xbe0] sm:$0xf0]  ;;  %v6280_v29 = vld [vmem:[#allocation5 + $0x520] sm:$0xf]  ;;  %v6605_v0 = vor.u32 %v7682_v46, %v6602_v49  ;;  %v6429_v34 = vor.u32 %v7638_v32, %v6426_v61  ;;  %v6608_v32 = vld [vmem:[#allocation5 + $0xf28] sm:$0xf] }
 0x1a2   :  { %v2162_v24 = vmul.f32 %v7868_v21, %v8228_v45  ;;  %3307 = vmatpush.bf16.msrb.mxu3 %v6521_v62  ;;  %v6493_v52 = vor.u32 %v7654_v20, %v6490_v17  ;;  %3265 = vmatpush.bf16.msrb.mxu0 %v6137_v5  ;;  %v7604_v28 = vld [vmem:[#allocation5 + $0x55c] sm:$0xf0]  ;;  %v2150_v62 = vmul.f32 %v2033_v40, %v2033_v40  ;;  %v6234_v6 = vld [vmem:[#allocation5 + $0x3e0] sm:$0xf0]  ;;  %v7685_v61 = vld [vmem:[#allocation5 + $0xf64] sm:$0xf0] }
 0x1a3   :  { %7869 = vrsqrt.f32 %v8235_v22  ;;  %3294 = vmatpush.bf16.msrb.mxu2 %v6377_v16  ;;  %v6281_v53 = vor.u32 %v7604_v28, %v6280_v29  ;;  %v6264_v51 = vld [vmem:[#allocation5 + $0x4a0] sm:$0xf]  ;;  %v7678_v1 = vld [vmem:[#allocation5 + $0xea4] sm:$0xf]  ;;  %vm2192_vm10 = vcmp.eq.f32.partialorder %v8235_v22, inf  ;;  %vm2194_vm11 = vcmp.eq.f32.partialorder %v8235_v22, 0.0 }
 0x1a4   :  { %v2163_v31 = vmul.f32 %v7868_v21, %v2162_v24  ;;  %v6621_v24 = vor.u32 %v7686_v23, %v6618_v4  ;;  %v7600_v54 = vld [vmem:[#allocation5 + $0x4dc] sm:$0xf0]  ;;  %v6586_v20 = vld [vmem:[#allocation5 + $0xee0] sm:$0xf0]  ;;  %v6237_v35 = vor.u32 %v7590_v59, %v6234_v6 }
 0x1a5   :  { %3277 = vmatpush.bf16.msrb.mxu1 %v6297_v13  ;;  %v6265_v44 = vor.u32 %v7600_v54, %v6264_v51  ;;  %v6248_v13 = vld [vmem:[#allocation5 + $0x420] sm:$0xf]  ;;  %v6442_v23 = vld [vmem:[#allocation5 + $0xa60] sm:$0xf0] }
 0x1a6   :  { %v2164_v50 = vmul.f32 0.5, %v2163_v31  ;;  %3308 = vmatpush.bf16.msrb.mxu3 %v6505_v39  ;;  %3295 = vmatmul.bf16.vlgmr.msrb.gmra.mxu2 %v8008_v8  ;;  %v7596_v16 = vld [vmem:[#allocation5 + $0x45c] sm:$0xf0]  ;;  %v7642_v39 = vld [vmem:[#allocation5 + $0xa24] sm:$0xf] }
 0x1a7   :  { %3343 = vmatpush.bf16.msra.mxu2 %v6493_v52  ;;  %v6202_v40 = vld [vmem:[#allocation5 + $0x2e0] sm:$0xf0] }
 0x1a8   :  { %v2165_v60 = vsub.f32 1.5, %v2164_v50  ;;  %v2102_v9 = vpop.f32.mrf.mxu0  ;;  %v7634_v49 = vld [vmem:[#allocation5 + $0x924] sm:$0xf] }
 0x1a9   :  { %v7870_v3 = vpop.eup %7869  ;;  %3278 = vmatpush.bf16.msrb.mxu1 %v6281_v53  ;;  %3309 = vmatmul.bf16.vlgmr.msrb.gmra.mxu3 %v8010_v15  ;;  %v7582_v53 = vld [vmem:[#allocation5 + $0x2a4] sm:$0xf] }
 0x1aa   :  { %v2116_v37 = vpop.f32.mrf.mxu1  ;;  %v2186_v10 = vmul.f32 %v7870_v3, %v8235_v22  ;;  %v2166_v38 = vmul.f32 %v7868_v21, %v2165_v60  ;;  %v6121_v21 = vor.u32 %v7564_v27, %v6120_v25  ;;  %3357 = vmatpush.bf16.msra.mxu3 %v6621_v24  ;;  %v6461_v60 = vor.u32 %v7646_v47, %v6458_v56  ;;  %v6218_v24 = vld [vmem:[#allocation5 + $0x360] sm:$0xf0] }
 0x1ab   :  { %v2117_v7 = vadd.f32 %v2116_v37, %v2102_v9  ;;  %3344 = vmatpush.bf16.msra.mxu2 %v6477_v43  ;;  %v2195_v37 = vand.u32 2147483648, %v8235_v22  ;;  %v7674_v25 = vld [vmem:[#allocation5 + $0xe24] sm:$0xf]  ;;  %v6205_v51 = vor.u32 %v7582_v53, %v6202_v40 }
 0x1ac   :  { %v2187_v36 = vmul.f32 %v7870_v3, %v2186_v10  ;;  %v2167_v31 = vmul.f32 %v2166_v38, %v8228_v45  ;;  %3266 = vmatpush.bf16.msrb.mxu0 %v6121_v21  ;;  %v6589_v10 = vor.u32 %v7678_v1, %v6586_v20  ;;  %v6249_v38 = vor.u32 %v7596_v16, %v6248_v13  ;;  %v6570_v27 = vld [vmem:[#allocation5 + $0xe60] sm:$0xf0] }
 0x1ad   :  { %3279 = vmatpush.bf16.msrb.mxu1 %v6265_v44  ;;  %v6573_v21 = vor.u32 %v7674_v25, %v6570_v27  ;;  %v7578_v54 = vld [vmem:[#allocation5 + $0x224] sm:$0xf] }
 0x1ae   :  { %v2188_v30 = vmul.f32 0.5, %v2187_v36  ;;  %v2169_v14 = vsel %vm2168_vm8, %v8228_v45, %v2167_v31  ;;  %3358 = vmatpush.bf16.msra.mxu3 %v6605_v0  ;;  %v7586_v36 = vld [vmem:[#allocation5 + $0x324] sm:$0xf]  ;;  %v6445_v45 = vor.u32 %v7642_v39, %v6442_v23 }
 0x1af   :  { %v2172_v17 = vsel %vm2170_vm9, %v2171_v55, %v2169_v14  ;;  %3345 = vmatpush.bf16.msra.mxu2 %v6461_v60  ;;  %v6221_v31 = vor.u32 %v7586_v36, %v6218_v24  ;;  %v6186_v47 = vld [vmem:[#allocation5 + $0x260] sm:$0xf0]  ;;  %v7689_v24 = vld [vmem:[#allocation5 + $0xfe4] sm:$0xf0] }
 0x1b0   :  { %v2189_v42 = vsub.f32 1.5, %v2188_v30  ;;  %v2104_v2 = vpop.f32.mrf.mxu0  ;;  %v7666_v56 = vld [vmem:[#allocation5 + $0xd24] sm:$0xf]  ;;  %v6189_v60 = vor.u32 %v7578_v54, %v6186_v47 }
 0x1b1   :  { %3280 = vmatpush.bf16.msrb.mxu1 %v6249_v38  ;;  %v7574_v55 = vld [vmem:[#allocation5 + $0x1a4] sm:$0xf]  ;;  %v7657_v38 = vld [vmem:[#allocation5 + $0xbe4] sm:$0xf0] }
 0x1b2   :  { %v2130_v41 = vpop.f32.mrf.mxu2  ;;  %v2190_v57 = vmul.f32 %v7870_v3, %v2189_v42  ;;  %v2118_v5 = vpop.f32.mrf.mxu1  ;;  %3359 = vmatpush.bf16.msra.mxu3 %v6589_v10  ;;  %v6554_v42 = vld [vmem:[#allocation5 + $0xde0] sm:$0xf0] }
 0x1b3   :  { %v2131_v12 = vadd.f32 %v2130_v41, %v2117_v7  ;;  %v2119_v18 = vadd.f32 %v2118_v5, %v2104_v2  ;;  %3346 = vmatpush.bf16.msra.mxu2 %v6445_v45  ;;  %v7670_v41 = vld [vmem:[#allocation5 + $0xda4] sm:$0xf] }
 0x1b4   :  { %v2144_v50 = vpop.f32.mrf.mxu3  ;;  %v2191_v3 = vmul.f32 %v2190_v57, %v8235_v22  ;;  %v6557_v46 = vor.u32 %v7670_v41, %v6554_v42  ;;  %v6394_v2 = vld [vmem:[#allocation5 + $0x8e0] sm:$0xf0]  ;;  %v6609_v41 = vor.u32 %v7685_v61, %v6608_v32  ;;  %v7669_v32 = vld [vmem:[#allocation5 + $0xd64] sm:$0xf0] }
 0x1b5   :  { %v2145_v58 = vadd.f32 %v2144_v50, %v2131_v12  ;;  %v6410_v12 = vld [vmem:[#allocation5 + $0x960] sm:$0xf0] }
 0x1b6   :  { %v2193_v48 = vsel %vm2192_vm10, %v8235_v22, %v2191_v3  ;;  %v2035_v22 = vadd.f32 %v8204_v11, %v2021_v63  ;;  %3360 = vmatpush.bf16.msra.mxu3 %v6573_v21  ;;  %v6413_v57 = vor.u32 %v7634_v49, %v6410_v12  ;;  %v7630_v63 = vld [vmem:[#allocation5 + $0x8a4] sm:$0xf]  ;;  %v6240_v12 = vld [vmem:[#allocation5 + $0x3a8] sm:$0xf] }
 0x1b7   :  { %v2154_v9 = vmul.f32 %v2145_v58, %v2145_v58  ;;  %v2196_v19 = vsel %vm2194_vm11, %v2195_v37, %v2193_v48  ;;  %3347 = vmatpush.bf16.msra.mxu2 %v6429_v34  ;;  %v6538_v58 = vld [vmem:[#allocation5 + $0xd60] sm:$0xf0]  ;;  %v6397_v3 = vor.u32 %v7630_v63, %v6394_v2  ;;  %v6496_v48 = vld [vmem:[#allocation5 + $0xba8] sm:$0xf] }
 0x1b8   :  { %v2209_v7 = vpack.c.bf16 %v2196_v19, %v2172_v17  ;;  %v2152_v11 = vmul.f32 %v2035_v22, %v2035_v22  ;;  %v6541_v59 = vor.u32 %v7666_v56, %v6538_v58  ;;  %v7662_v6 = vld [vmem:[#allocation5 + $0xca4] sm:$0xf]  ;;  %v6497_v36 = vor.u32 %v7657_v38, %v6496_v48 }
 0x1b9   :  { %v8261_v52 = vadd.f32 %v2154_v9, %v2150_v62  ;;  %v6170_v62 = vld [vmem:[#allocation5 + $0x1e0] sm:$0xf0] }
 0x1ba   :  { %v2132_v4 = vpop.f32.mrf.mxu2  ;;  %2347 = vmatmul.bf16.vlgmr.msra.gmra.mxu0 %v2209_v7  ;;  %3361 = vmatpush.bf16.msra.mxu3 %v6557_v46  ;;  %v6522_v1 = vld [vmem:[#allocation5 + $0xce0] sm:$0xf0]  ;;  %v6173_v16 = vor.u32 %v7574_v55, %v6170_v62  ;;  %v6624_v7 = vld [vmem:[#allocation5 + $0xfa8] sm:$0xf] }
 0x1bb   :  { %7871 = vrsqrt.f32 %v8261_v52  ;;  %v2133_v29 = vadd.f32 %v2132_v4, %v2119_v18  ;;  %3315 = vmatpush.bf16.msra.mxu0 %v6237_v35  ;;  %3348 = vmatpush.bf16.msra.mxu2 %v6413_v57  ;;  %v6525_v20 = vor.u32 %v7662_v6, %v6522_v1  ;;  %v7570_v37 = vld [vmem:[#allocation5 + $0x124] sm:$0xf]  ;;  %v6625_v27 = vor.u32 %v7689_v24, %v6624_v7  ;;  %v6592_v57 = vld [vmem:[#allocation5 + $0xea8] sm:$0xf] }
 0x1bc   :  { %v2146_v30 = vpop.f32.mrf.mxu3  ;;  %v7626_v10 = vld [vmem:[#allocation5 + $0x824] sm:$0xf]  ;;  %vm2180_vm12 = vcmp.eq.f32.partialorder %v8261_v52, inf  ;;  %vm2182_vm13 = vcmp.eq.f32.partialorder %v8261_v52, 0.0  ;;  %v2183_v56 = vand.u32 2147483648, %v8261_v52 }
 0x1bd   :  { %v2147_v28 = vadd.f32 %v2146_v30, %v2133_v29  ;;  %v6378_v17 = vld [vmem:[#allocation5 + $0x860] sm:$0xf0]  ;;  %v6480_v30 = vld [vmem:[#allocation5 + $0xb28] sm:$0xf] }
 0x1be   :  { %3362 = vmatpush.bf16.msra.mxu3 %v6541_v59  ;;  %v6154_v19 = vld [vmem:[#allocation5 + $0x160] sm:$0xf0]  ;;  %v6381_v35 = vor.u32 %v7626_v10, %v6378_v17  ;;  %v7645_v6 = vld [vmem:[#allocation5 + $0xa64] sm:$0xf0] }
 0x1bf   :  { %v2156_v43 = vmul.f32 %v2147_v28, %v2147_v28  ;;  %3316 = vmatpush.bf16.msra.mxu0 %v6221_v31  ;;  %3349 = vmatpush.bf16.msra.mxu2 %v6397_v3  ;;  %v7658_v39 = vld [vmem:[#allocation5 + $0xc24] sm:$0xf]  ;;  %v6157_v22 = vor.u32 %v7570_v37, %v6154_v19  ;;  %v7653_v31 = vld [vmem:[#allocation5 + $0xb64] sm:$0xf0] }
 0x1c0   :  { %v6506_v23 = vld [vmem:[#allocation5 + $0xc60] sm:$0xf0]  ;;  %v6481_v53 = vor.u32 %v7653_v31, %v6480_v30  ;;  %v6448_v3 = vld [vmem:[#allocation5 + $0xa28] sm:$0xf] }
 0x1c1   :  { %v7872_v50 = vpop.eup %7871  ;;  %v8265_v0 = vadd.f32 %v2156_v43, %v2152_v11  ;;  %v6509_v4 = vor.u32 %v7658_v39, %v6506_v23  ;;  %v7566_v29 = vld [vmem:[#allocation5 + $0xa4] sm:$0xf]  ;;  %v6464_v43 = vld [vmem:[#allocation5 + $0xaa8] sm:$0xf]  ;;  %v6449_v10 = vor.u32 %v7645_v6, %v6448_v3 }
 0x1c2   :  { %v2174_v44 = vmul.f32 %v7872_v50, %v8261_v52  ;;  %3363 = vmatpush.bf16.msra.mxu3 %v6525_v20  ;;  %v6138_v28 = vld [vmem:[#allocation5 + $0xe0] sm:$0xf0]  ;;  %v7589_v37 = vld [vmem:[#allocation5 + $0x364] sm:$0xf0] }
 0x1c3   :  { %7873 = vrsqrt.f32 %v8265_v0  ;;  %3317 = vmatpush.bf16.msra.mxu0 %v6205_v51  ;;  %3350 = vmatpush.bf16.msra.mxu2 %v6381_v35  ;;  %v6141_v42 = vor.u32 %v7566_v29, %v6138_v28  ;;  %v7562_v11 = vld [vmem:[#allocation5 + $0x24] sm:$0xf]  ;;  %v7593_v51 = vld [vmem:[#allocation5 + $0x3e4] sm:$0xf0]  ;;  %vm2204_vm14 = vcmp.eq.f32.partialorder %v8265_v0, inf  ;;  %vm2206_vm15 = vcmp.eq.f32.partialorder %v8265_v0, 0.0 }
 0x1c4   :  { %v2175_v14 = vmul.f32 %v7872_v50, %v2174_v44  ;;  %v6122_v49 = vld [vmem:[#allocation5 + $0x60] sm:$0xf0]  ;;  %v7681_v44 = vld [vmem:[#allocation5 + $0xee4] sm:$0xf0]  ;;  %v6241_v2 = vor.u32 %v7593_v51, %v6240_v12 }
 0x1c5   :  { %v6362_v55 = vld [vmem:[#allocation5 + $0x7e0] sm:$0xf0]  ;;  %v6593_v59 = vor.u32 %v7681_v44, %v6592_v57  ;;  %v6125_v62 = vor.u32 %v7562_v11, %v6122_v49  ;;  %v7641_v19 = vld [vmem:[#allocation5 + $0x9e4] sm:$0xf0] }
 0x1c6   :  { %v2176_v5 = vmul.f32 0.5, %v2175_v14  ;;  %3364 = vmatpush.bf16.msra.mxu3 %v6509_v4  ;;  %3351 = vmatmul.bf16.vlgmr.msra.gmra.mxu2 %v8008_v8  ;;  %v7622_v14 = vld [vmem:[#allocation5 + $0x7a4] sm:$0xf]  ;;  %v7585_v39 = vld [vmem:[#allocation5 + $0x2e4] sm:$0xf0] }
 0x1c7   :  { %3318 = vmatpush.bf16.msra.mxu0 %v6189_v60  ;;  %3399 = vmatpush.bf16.msrb.mxu2 %v6497_v36  ;;  %v2207_v60 = vand.u32 2147483648, %v8265_v0  ;;  %v7618_v48 = vld [vmem:[#allocation5 + $0x724] sm:$0xf]  ;;  %v6208_v36 = vld [vmem:[#allocation5 + $0x2a8] sm:$0xf] }
 0x1c8   :  { %v2177_v9 = vsub.f32 1.5, %v2176_v5  ;;  %v6224_v5 = vld [vmem:[#allocation5 + $0x328] sm:$0xf]  ;;  %v6346_v38 = vld [vmem:[#allocation5 + $0x760] sm:$0xf0]  ;;  %v6209_v29 = vor.u32 %v7585_v39, %v6208_v36 }
 0x1c9   :  { %v7874_v13 = vpop.eup %7873  ;;  %3365 = vmatmul.bf16.vlgmr.msra.gmra.mxu3 %v8010_v15  ;;  %v6225_v35 = vor.u32 %v7589_v37, %v6224_v5  ;;  %v6560_v4 = vld [vmem:[#allocation5 + $0xda8] sm:$0xf]  ;;  %v7614_v24 = vld [vmem:[#allocation5 + $0x6a4] sm:$0xf]  ;;  %v6626_v37 = vld [vmem:[#allocation5 + $0xfe8] sm:$0xf0] }
 0x1ca   :  { %v2198_v18 = vmul.f32 %v7874_v13, %v8265_v0  ;;  %v2178_v45 = vmul.f32 %v7872_v50, %v2177_v9  ;;  %3267 = vmatmul.bf16.vlgmr.msrb.gmra.mxu0 %v8014_v26  ;;  %3413 = vmatpush.bf16.msrb.mxu3 %v6625_v27  ;;  %v7649_v50 = vld [vmem:[#allocation5 + $0xae4] sm:$0xf0]  ;;  %v6365_v9 = vor.u32 %v7622_v14, %v6362_v55  ;;  %v7610_v61 = vld [vmem:[#allocation5 + $0x624] sm:$0xf]  ;;  %v7683_v36 = vld [vmem:[#allocation5 + $0xf2c] sm:$0xf] }
 0x1cb   :  { %3319 = vmatpush.bf16.msra.mxu0 %v6173_v16  ;;  %3400 = vmatpush.bf16.msrb.mxu2 %v6481_v53  ;;  %v6465_v54 = vor.u32 %v7649_v50, %v6464_v43  ;;  %v7677_v16 = vld [vmem:[#allocation5 + $0xe64] sm:$0xf0]  ;;  %v6298_v57 = vld [vmem:[#allocation5 + $0x5e0] sm:$0xf0] }
 0x1cc   :  { %v2199_v25 = vmul.f32 %v7874_v13, %v2198_v18  ;;  %v2179_v40 = vmul.f32 %v2178_v45, %v8261_v52  ;;  %v7673_v7 = vld [vmem:[#allocation5 + $0xde4] sm:$0xf0]  ;;  %v6330_v45 = vld [vmem:[#allocation5 + $0x6e0] sm:$0xf0] }
 0x1cd   :  { %v6416_v27 = vld [vmem:[#allocation5 + $0x928] sm:$0xf]  ;;  %v6282_v6 = vld [vmem:[#allocation5 + $0x560] sm:$0xf0] }
 0x1ce   :  { %v2200_v21 = vmul.f32 0.5, %v2199_v25  ;;  %3414 = vmatpush.bf16.msrb.mxu3 %v6609_v41  ;;  %v2181_v47 = vsel %vm2180_vm12, %v8261_v52, %v2179_v40  ;;  %v6349_v52 = vor.u32 %v7618_v48, %v6346_v38  ;;  %v6561_v25 = vor.u32 %v7673_v7, %v6560_v4  ;;  %v6192_v30 = vld [vmem:[#allocation5 + $0x228] sm:$0xf]  ;;  %v6314_v40 = vld [vmem:[#allocation5 + $0x660] sm:$0xf0] }
 0x1cf   :  { %3320 = vmatpush.bf16.msra.mxu0 %v6157_v22  ;;  %3401 = vmatpush.bf16.msrb.mxu2 %v6465_v54  ;;  %v2184_v1 = vsel %vm2182_vm13, %v2183_v56, %v2181_v47  ;;  %v7637_v22 = vld [vmem:[#allocation5 + $0x964] sm:$0xf0]  ;;  %v7606_v54 = vld [vmem:[#allocation5 + $0x5a4] sm:$0xf] }
 0x1d0   :  { %v2201_v34 = vsub.f32 1.5, %v2200_v21  ;;  %v6333_v21 = vor.u32 %v7614_v24, %v6330_v45  ;;  %v7581_v28 = vld [vmem:[#allocation5 + $0x264] sm:$0xf0]  ;;  %v6417_v31 = vor.u32 %v7637_v22, %v6416_v27  ;;  %v6250_v4 = vld [vmem:[#allocation5 + $0x460] sm:$0xf0] }
 0x1d1   :  { %v6544_v53 = vld [vmem:[#allocation5 + $0xd28] sm:$0xf]  ;;  %v6193_v11 = vor.u32 %v7581_v28, %v6192_v30  ;;  %v7647_v45 = vld [vmem:[#allocation5 + $0xaac] sm:$0xf] }
 0x1d2   :  { %v2202_v46 = vmul.f32 %v7874_v13, %v2201_v34  ;;  %3415 = vmatpush.bf16.msrb.mxu3 %v6593_v59  ;;  %v6576_v13 = vld [vmem:[#allocation5 + $0xe28] sm:$0xf]  ;;  %v6545_v34 = vor.u32 %v7669_v32, %v6544_v53  ;;  %v7655_v59 = vld [vmem:[#allocation5 + $0xbac] sm:$0xf] }
 0x1d3   :  { %3321 = vmatpush.bf16.msra.mxu0 %v6141_v42  ;;  %v6577_v18 = vor.u32 %v7677_v16, %v6576_v13  ;;  %3402 = vmatpush.bf16.msrb.mxu2 %v6449_v10  ;;  %v6400_v41 = vld [vmem:[#allocation5 + $0x8a8] sm:$0xf]  ;;  %v7598_v13 = vld [vmem:[#allocation5 + $0x4a4] sm:$0xf]  ;;  %v7591_v22 = vld [vmem:[#allocation5 + $0x3ac] sm:$0xf] }
 0x1d4   :  { %v2203_v58 = vmul.f32 %v2202_v46, %v8265_v0  ;;  %v7633_v42 = vld [vmem:[#allocation5 + $0x8e4] sm:$0xf0]  ;;  %v6317_v46 = vor.u32 %v7610_v61, %v6314_v40  ;;  %v6242_v30 = vld [vmem:[#allocation5 + $0x3e8] sm:$0xf0] }
 0x1d5   :  { %v6176_v43 = vld [vmem:[#allocation5 + $0x1a8] sm:$0xf]  ;;  %v6401_v12 = vor.u32 %v7633_v42, %v6400_v41  ;;  %v7679_v28 = vld [vmem:[#allocation5 + $0xeac] sm:$0xf]  ;;  %v6245_v41 = vor.u32 %v7591_v22, %v6242_v30 }
 0x1d6   :  { %v2205_v63 = vsel %vm2204_vm14, %v8265_v0, %v2203_v58  ;;  %v6432_v0 = vld [vmem:[#allocation5 + $0x9a8] sm:$0xf]  ;;  %3416 = vmatpush.bf16.msrb.mxu3 %v6577_v18  ;;  %v7602_v58 = vld [vmem:[#allocation5 + $0x524] sm:$0xf]  ;;  %v7587_v42 = vld [vmem:[#allocation5 + $0x32c] sm:$0xf] }
 0x1d7   :  { %v2208_v20 = vsel %vm2206_vm15, %v2207_v60, %v2205_v63  ;;  %3322 = vmatpush.bf16.msra.mxu0 %v6125_v62  ;;  %v6433_v23 = vor.u32 %v7641_v19, %v6432_v0  ;;  %v7577_v49 = vld [vmem:[#allocation5 + $0x1e4] sm:$0xf0]  ;;  %v6498_v60 = vld [vmem:[#allocation5 + $0xbe8] sm:$0xf0]  ;;  %v6301_v62 = vor.u32 %v7606_v54, %v6298_v57  ;;  %v6285_v48 = vor.u32 %v7602_v58, %v6282_v6  ;;  %v6266_v19 = vld [vmem:[#allocation5 + $0x4e0] sm:$0xf0] }
 0x1d8   :  { %v2210_v17 = vpack.c.bf16 %v2208_v20, %v2184_v1  ;;  %v6528_v50 = vld [vmem:[#allocation5 + $0xca8] sm:$0xf]  ;;  %v6177_v14 = vor.u32 %v7577_v49, %v6176_v43  ;;  %v6501_v1 = vor.u32 %v7655_v59, %v6498_v60  ;;  %v6482_v0 = vld [vmem:[#allocation5 + $0xb68] sm:$0xf0] }
 0x1d9   :  { %3403 = vmatpush.bf16.msrb.mxu2 %v6433_v23  ;;  %v7665_v51 = vld [vmem:[#allocation5 + $0xce4] sm:$0xf0]  ;;  %v7594_v23 = vld [vmem:[#allocation5 + $0x424] sm:$0xf]  ;;  %v6450_v43 = vld [vmem:[#allocation5 + $0xa68] sm:$0xf0] }
 0x1da   :  { %2361 = vmatmul.bf16.vlgmr.msra.gmra.mxu1 %v2210_v17  ;;  %3323 = vmatmul.bf16.vlgmr.msra.gmra.mxu0 %v8014_v26  ;;  %v6529_v44 = vor.u32 %v7665_v51, %v6528_v50  ;;  %v6384_v47 = vld [vmem:[#allocation5 + $0x828] sm:$0xf]  ;;  %v7651_v17 = vld [vmem:[#allocation5 + $0xb2c] sm:$0xf] }
 0x1db   :  { %3371 = vmatpush.bf16.msrb.mxu0 %v6241_v2  ;;  %3329 = vmatpush.bf16.msra.mxu1 %v6365_v9  ;;  %v7629_v56 = vld [vmem:[#allocation5 + $0x864] sm:$0xf0]  ;;  %v7687_v9 = vld [vmem:[#allocation5 + $0xfac] sm:$0xf] }
 0x1dc   :  { %3417 = vmatpush.bf16.msrb.mxu3 %v6561_v25  ;;  %v6160_v55 = vld [vmem:[#allocation5 + $0x128] sm:$0xf]  ;;  %v6385_v2 = vor.u32 %v7629_v56, %v6384_v47  ;;  %v6629_v10 = vor.u32 %v7687_v9, %v6626_v37  ;;  %v6269_v25 = vor.u32 %v7598_v13, %v6266_v19  ;;  %v6226_v49 = vld [vmem:[#allocation5 + $0x368] sm:$0xf0] }
 0x1dd   :  { %3404 = vmatpush.bf16.msrb.mxu2 %v6417_v31  ;;  %v7573_v63 = vld [vmem:[#allocation5 + $0x164] sm:$0xf0]  ;;  %v6594_v31 = vld [vmem:[#allocation5 + $0xee8] sm:$0xf0]  ;;  %v6229_v47 = vor.u32 %v7587_v42, %v6226_v49 }
 0x1de   :  { %v6512_v5 = vld [vmem:[#allocation5 + $0xc28] sm:$0xf]  ;;  %v6161_v16 = vor.u32 %v7573_v63, %v6160_v55  ;;  %v6597_v61 = vor.u32 %v7679_v28, %v6594_v31  ;;  %v7675_v50 = vld [vmem:[#allocation5 + $0xe2c] sm:$0xf] }
 0x1df   :  { %3372 = vmatpush.bf16.msrb.mxu0 %v6225_v35  ;;  %3330 = vmatpush.bf16.msra.mxu1 %v6349_v52  ;;  %v7661_v3 = vld [vmem:[#allocation5 + $0xc64] sm:$0xf0]  ;;  %v6485_v35 = vor.u32 %v7651_v17, %v6482_v0  ;;  %v6610_v52 = vld [vmem:[#allocation5 + $0xf68] sm:$0xf0] }
 0x1e0   :  { %3418 = vmatpush.bf16.msrb.mxu3 %v6545_v34  ;;  %v6513_v20 = vor.u32 %v7661_v3, %v6512_v5  ;;  %v6144_v38 = vld [vmem:[#allocation5 + $0xa8] sm:$0xf]  ;;  %v6613_v39 = vor.u32 %v7683_v36, %v6610_v52  ;;  %v6253_v34 = vor.u32 %v7594_v23, %v6250_v4  ;;  %v6578_v51 = vld [vmem:[#allocation5 + $0xe68] sm:$0xf0] }
 0x1e1   :  { %3405 = vmatpush.bf16.msrb.mxu2 %v6401_v12  ;;  %v7569_v18 = vld [vmem:[#allocation5 + $0xe4] sm:$0xf0]  ;;  %v7583_v56 = vld [vmem:[#allocation5 + $0x2ac] sm:$0xf] }
 0x1e2   :  { %v6145_v7 = vor.u32 %v7569_v18, %v6144_v38  ;;  %v6128_v24 = vld [vmem:[#allocation5 + $0x28] sm:$0xf]  ;;  %v7639_v58 = vld [vmem:[#allocation5 + $0x9ac] sm:$0xf] }
 0x1e3   :  { %3373 = vmatpush.bf16.msrb.mxu0 %v6209_v29  ;;  %3331 = vmatpush.bf16.msra.mxu1 %v6333_v21  ;;  %v7565_v27 = vld [vmem:[#allocation5 + $0x64] sm:$0xf0]  ;;  %v6466_v29 = vld [vmem:[#allocation5 + $0xae8] sm:$0xf0] }
 0x1e4   :  { %3419 = vmatpush.bf16.msrb.mxu3 %v6529_v44  ;;  %v6469_v21 = vor.u32 %v7647_v45, %v6466_v29  ;;  %v6368_v53 = vld [vmem:[#allocation5 + $0x7a8] sm:$0xf]  ;;  %v6129_v40 = vor.u32 %v7565_v27, %v6128_v24  ;;  %v6581_v44 = vor.u32 %v7675_v50, %v6578_v51  ;;  %v6210_v59 = vld [vmem:[#allocation5 + $0x2e8] sm:$0xf0] }
 0x1e5   :  { %3406 = vmatpush.bf16.msrb.mxu2 %v6385_v2  ;;  %v7625_v32 = vld [vmem:[#allocation5 + $0x7e4] sm:$0xf0]  ;;  %v6562_v63 = vld [vmem:[#allocation5 + $0xde8] sm:$0xf0] }
 0x1e6   :  { %v6352_v54 = vld [vmem:[#allocation5 + $0x728] sm:$0xf]  ;;  %v7635_v6 = vld [vmem:[#allocation5 + $0x92c] sm:$0xf] }
 0x1e7   :  { %3374 = vmatpush.bf16.msrb.mxu0 %v6193_v11  ;;  %3332 = vmatpush.bf16.msra.mxu1 %v6317_v46  ;;  %v7643_v11 = vld [vmem:[#allocation5 + $0xa2c] sm:$0xf]  ;;  %v6369_v46 = vor.u32 %v7625_v32, %v6368_v53  ;;  %v7621_v57 = vld [vmem:[#allocation5 + $0x764] sm:$0xf0] }
 0x1e8   :  { %3420 = vmatpush.bf16.msrb.mxu3 %v6513_v20  ;;  %3407 = vmatmul.bf16.vlgmr.msrb.gmra.mxu2 %v8008_v8  ;;  %v6453_v12 = vor.u32 %v7643_v11, %v6450_v43  ;;  %v6353_v55 = vor.u32 %v7621_v57, %v6352_v54  ;;  %v6336_v2 = vld [vmem:[#allocation5 + $0x6a8] sm:$0xf]  ;;  %v6213_v20 = vor.u32 %v7583_v56, %v6210_v59  ;;  %v7579_v9 = vld [vmem:[#allocation5 + $0x22c] sm:$0xf] }
 0x1e9   :  { %3455 = vmatpush.bf16.msra.mxu2 %v6501_v1  ;;  %v7617_v5 = vld [vmem:[#allocation5 + $0x6e4] sm:$0xf0]  ;;  %v6418_v1 = vld [vmem:[#allocation5 + $0x968] sm:$0xf0] }
 0x1ea   :  { %3281 = vmatmul.bf16.vlgmr.msrb.gmra.mxu1 %v8016_v33  ;;  %v6337_v37 = vor.u32 %v7617_v5, %v6336_v2  ;;  %v6421_v13 = vor.u32 %v7635_v6, %v6418_v1  ;;  %v6546_v17 = vld [vmem:[#allocation5 + $0xd68] sm:$0xf0]  ;;  %v7613_v38 = vld [vmem:[#allocation5 + $0x664] sm:$0xf0] }
 0x1eb   :  { %3375 = vmatpush.bf16.msrb.mxu0 %v6177_v14  ;;  %3333 = vmatpush.bf16.msra.mxu1 %v6301_v62  ;;  %v6434_v14 = vld [vmem:[#allocation5 + $0x9e8] sm:$0xf0]  ;;  %v6304_v24 = vld [vmem:[#allocation5 + $0x5a8] sm:$0xf] }
 0x1ec   :  { %3469 = vmatpush.bf16.msra.mxu3 %v6629_v10  ;;  %v6437_v60 = vor.u32 %v7639_v58, %v6434_v14  ;;  %v7671_v62 = vld [vmem:[#allocation5 + $0xdac] sm:$0xf]  ;;  %v7609_v45 = vld [vmem:[#allocation5 + $0x5e4] sm:$0xf0] }
 0x1ed   :  { %3421 = vmatmul.bf16.vlgmr.msrb.gmra.mxu3 %v8010_v15  ;;  %3456 = vmatpush.bf16.msra.mxu2 %v6485_v35  ;;  %v6565_v3 = vor.u32 %v7671_v62, %v6562_v63  ;;  %v6194_v10 = vld [vmem:[#allocation5 + $0x268] sm:$0xf0]  ;;  %v7601_v49 = vld [vmem:[#allocation5 + $0x4e4] sm:$0xf0] }
 0x1ee   :  { %v7631_v0 = vld [vmem:[#allocation5 + $0x8ac] sm:$0xf]  ;;  %v6197_v35 = vor.u32 %v7579_v9, %v6194_v10  ;;  %v6256_v57 = vld [vmem:[#allocation5 + $0x428] sm:$0xf] }
 0x1ef   :  { %3376 = vmatpush.bf16.msrb.mxu0 %v6161_v16  ;;  %3334 = vmatpush.bf16.msra.mxu1 %v6285_v48  ;;  %v7667_v16 = vld [vmem:[#allocation5 + $0xd2c] sm:$0xf]  ;;  %v6320_v48 = vld [vmem:[#allocation5 + $0x628] sm:$0xf] }
 0x1f0   :  { %3470 = vmatpush.bf16.msra.mxu3 %v6613_v39  ;;  %v6549_v18 = vor.u32 %v7667_v16, %v6546_v17  ;;  %v6402_v19 = vld [vmem:[#allocation5 + $0x8e8] sm:$0xf0]  ;;  %v6321_v52 = vor.u32 %v7613_v38, %v6320_v48 }
 0x1f1   :  { %3457 = vmatpush.bf16.msra.mxu2 %v6469_v21  ;;  %v7575_v36 = vld [vmem:[#allocation5 + $0x1ac] sm:$0xf]  ;;  %v6405_v23 = vor.u32 %v7631_v0, %v6402_v19  ;;  %v6305_v21 = vor.u32 %v7609_v45, %v6304_v24 }
 0x1f2   :  { %v6178_v39 = vld [vmem:[#allocation5 + $0x1e8] sm:$0xf0] }
 0x1f3   :  { %3377 = vmatpush.bf16.msrb.mxu0 %v6145_v7  ;;  %3335 = vmatpush.bf16.msra.mxu1 %v6269_v25  ;;  %v7663_v4 = vld [vmem:[#allocation5 + $0xcac] sm:$0xf]  ;;  %v6181_v29 = vor.u32 %v7575_v36, %v6178_v39  ;;  %v8298_v36 = vpop.f32.mrf.mxu2 }
 0x1f4   :  { %3471 = vmatpush.bf16.msra.mxu3 %v6597_v61  ;;  %v6530_v7 = vld [vmem:[#allocation5 + $0xce8] sm:$0xf0]  ;;  %v6288_v61 = vld [vmem:[#allocation5 + $0x528] sm:$0xf] }
 0x1f5   :  { %3458 = vmatpush.bf16.msra.mxu2 %v6453_v12  ;;  %v6533_v25 = vor.u32 %v7663_v4, %v6530_v7  ;;  %v7627_v27 = vld [vmem:[#allocation5 + $0x82c] sm:$0xf] }
 0x1f6   :  { %v6386_v22 = vld [vmem:[#allocation5 + $0x868] sm:$0xf0] }
 0x1f7   :  { %3378 = vmatpush.bf16.msrb.mxu0 %v6129_v40  ;;  %3336 = vmatpush.bf16.msra.mxu1 %v6253_v34  ;;  %v7571_v30 = vld [vmem:[#allocation5 + $0x12c] sm:$0xf]  ;;  %v6389_v31 = vor.u32 %v7627_v27, %v6386_v22  ;;  %v7605_v40 = vld [vmem:[#allocation5 + $0x564] sm:$0xf0] }
 0x1f8   :  { %3472 = vmatpush.bf16.msra.mxu3 %v6581_v44  ;;  %v6162_v28 = vld [vmem:[#allocation5 + $0x168] sm:$0xf0]  ;;  %v6289_v42 = vor.u32 %v7605_v40, %v6288_v61  ;;  %v7597_v44 = vld [vmem:[#allocation5 + $0x464] sm:$0xf0] }
 0x1f9   :  { %3459 = vmatpush.bf16.msra.mxu2 %v6437_v60  ;;  %v7659_v53 = vld [vmem:[#allocation5 + $0xc2c] sm:$0xf]  ;;  %v6257_v14 = vor.u32 %v7597_v44, %v6256_v57  ;;  %v7692_v44 = vld [vmem:[%s8541_s2 + $0x110] sm:$0xff] }
 0x1fa   :  { %3379 = vmatmul.bf16.vlgmr.msrb.gmra.mxu0 %v8014_v26  ;;  %3337 = vmatmul.bf16.vlgmr.msra.gmra.mxu1 %v8016_v33  ;;  %v6514_v32 = vld [vmem:[#allocation5 + $0xc68] sm:$0xf0] }
 0x1fb   :  { %3427 = vmatpush.bf16.msra.mxu0 %v6245_v41  ;;  %3385 = vmatpush.bf16.msrb.mxu1 %v6369_v46  ;;  %v6517_v34 = vor.u32 %v7659_v53, %v6514_v32  ;;  %v6165_v41 = vor.u32 %v7571_v30, %v6162_v28  ;;  %v7567_v11 = vld [vmem:[#allocation5 + $0xac] sm:$0xf]  ;;  %v6272_v46 = vld [vmem:[#allocation5 + $0x4a8] sm:$0xf]  ;;  %v2474_v45 = vpop.f32.mrf.mxu2  ;;  %v7697_v53 = vld [vmem:[%s8541_s2 + $0x138] sm:$0xff] }
 0x1fc   :  { %3473 = vmatpush.bf16.msra.mxu3 %v6565_v3  ;;  %v6146_v43 = vld [vmem:[#allocation5 + $0xe8] sm:$0xf0]  ;;  %v6273_v50 = vor.u32 %v7601_v49, %v6272_v46 }
 0x1fd   :  { %3460 = vmatpush.bf16.msra.mxu2 %v6421_v13  ;;  %v6149_v12 = vor.u32 %v7567_v11, %v6146_v43  ;;  %v7563_v51 = vld [vmem:[#allocation5 + $0x2c] sm:$0xf]  ;;  %v7705_v43 = vld [vmem:[%s8541_s2 + $0x178] sm:$0xff] }
 0x1fe   :  { %v6130_v54 = vld [vmem:[#allocation5 + $0x68] sm:$0xf0] }
 0x1ff   :  { %3428 = vmatpush.bf16.msra.mxu0 %v6229_v47  ;;  %3386 = vmatpush.bf16.msrb.mxu1 %v6353_v55  ;;  %v7623_v47 = vld [vmem:[#allocation5 + $0x7ac] sm:$0xf]  ;;  %v6133_v58 = vor.u32 %v7563_v51, %v6130_v54  ;;  %v7693_v51 = vld [vmem:[%s8541_s2 + $0x118] sm:$0xff] }
 0x200   :  { %3474 = vmatpush.bf16.msra.mxu3 %v6549_v18  ;;  %v6370_v56 = vld [vmem:[#allocation5 + $0x7e8] sm:$0xf0] }
 0x201   :  { %3461 = vmatpush.bf16.msra.mxu2 %v6405_v23  ;;  %v6373_v55 = vor.u32 %v7623_v47, %v6370_v56  ;;  %v7619_v59 = vld [vmem:[#allocation5 + $0x72c] sm:$0xf]  ;;  %v8302_v23 = vpop.f32.mrf.mxu3  ;;  %v6808_v47 = vld [vmem:[#allocation5 + $0x3b0] sm:$0xf] }
 0x202   :  { %v6354_v60 = vld [vmem:[#allocation5 + $0x768] sm:$0xf0] }
 0x203   :  { %3429 = vmatpush.bf16.msra.mxu0 %v6213_v20  ;;  %3387 = vmatpush.bf16.msrb.mxu1 %v6337_v37  ;;  %v6357_v62 = vor.u32 %v7619_v59, %v6354_v60  ;;  %v7615_v63 = vld [vmem:[#allocation5 + $0x6ac] sm:$0xf] }
 0x204   :  { %3475 = vmatpush.bf16.msra.mxu3 %v6533_v25  ;;  %v6338_v2 = vld [vmem:[#allocation5 + $0x6e8] sm:$0xf0] }
 0x205   :  { %3462 = vmatpush.bf16.msra.mxu2 %v6389_v31  ;;  %v6341_v5 = vor.u32 %v7615_v63, %v6338_v2  ;;  %v7611_v3 = vld [vmem:[#allocation5 + $0x62c] sm:$0xf]  ;;  %v6792_v63 = vld [vmem:[#allocation5 + $0x330] sm:$0xf] }
 0x206   :  { %v6322_v6 = vld [vmem:[#allocation5 + $0x668] sm:$0xf0] }
 0x207   :  { %3430 = vmatpush.bf16.msra.mxu0 %v6197_v35  ;;  %3388 = vmatpush.bf16.msrb.mxu1 %v6321_v52  ;;  %v6325_v1 = vor.u32 %v7611_v3, %v6322_v6  ;;  %v7607_v20 = vld [vmem:[#allocation5 + $0x5ac] sm:$0xf]  ;;  %v7732_v3 = vld [vmem:[#allocation5 + $0x36c] sm:$0xf0] }
 0x208   :  { %3476 = vmatpush.bf16.msra.mxu3 %v6517_v34  ;;  %3463 = vmatmul.bf16.vlgmr.msra.gmra.mxu2 %v8008_v8  ;;  %v6306_v9 = vld [vmem:[#allocation5 + $0x5e8] sm:$0xf0]  ;;  %v7696_v34 = vld [vmem:[%s8541_s2 + $0x130] sm:$0xff] }
 0x209   :  { %v6309_v37 = vor.u32 %v7607_v20, %v6306_v9  ;;  %v7603_v10 = vld [vmem:[#allocation5 + $0x52c] sm:$0xf]  ;;  %v2488_v27 = vpop.f32.mrf.mxu3  ;;  %v6920_v6 = vld [vmem:[#allocation5 + $0x730] sm:$0xf]  ;;  %v6793_v9 = vor.u32 %v7732_v3, %v6792_v63 }
 0x20a   :  { %v6290_v13 = vld [vmem:[#allocation5 + $0x568] sm:$0xf0] }
 0x20b   :  { %3431 = vmatpush.bf16.msra.mxu0 %v6181_v29  ;;  %3389 = vmatpush.bf16.msrb.mxu1 %v6305_v21  ;;  %v6293_v16 = vor.u32 %v7603_v10, %v6290_v13  ;;  %v7599_v17 = vld [vmem:[#allocation5 + $0x4ac] sm:$0xf]  ;;  %v7701_v13 = vld [vmem:[%s8541_s2 + $0x158] sm:$0xff] }
 0x20c   :  { %3477 = vmatmul.bf16.vlgmr.msra.gmra.mxu3 %v8010_v15  ;;  %v6274_v48 = vld [vmem:[#allocation5 + $0x4e8] sm:$0xf0] }
 0x20d   :  { %v6277_v38 = vor.u32 %v7599_v17, %v6274_v48  ;;  %v7595_v18 = vld [vmem:[#allocation5 + $0x42c] sm:$0xf]  ;;  %v7690_v17 = vld [vmem:[%s8541_s2 + $0x100] sm:$0xff]  ;;  %v6776_v48 = vld [vmem:[#allocation5 + $0x2b0] sm:$0xf] }
 0x20e   :  { %v6258_v0 = vld [vmem:[#allocation5 + $0x468] sm:$0xf0] }
 0x20f   :  { %3432 = vmatpush.bf16.msra.mxu0 %v6165_v41  ;;  %3390 = vmatpush.bf16.msrb.mxu1 %v6289_v42  ;;  %v6261_v19 = vor.u32 %v7595_v18, %v6258_v0  ;;  %v7695_v42 = vld [vmem:[%s8541_s2 + $0x128] sm:$0xff] }
 0x210   :  { %v7703_v57 = vld [vmem:[%s8541_s2 + $0x168] sm:$0xff] }
 0x211   :  { %v7691_v20 = vld [vmem:[%s8541_s2 + $0x108] sm:$0xff] }
 0x213   :  { %3433 = vmatpush.bf16.msra.mxu0 %v6149_v12  ;;  %3391 = vmatpush.bf16.msrb.mxu1 %v6273_v50  ;;  %v7694_v12 = vld [vmem:[%s8541_s2 + $0x120] sm:$0xff]  ;;  %v7704_v50 = vld [vmem:[%s8541_s2 + $0x170] sm:$0xff] }
 0x217   :  { %3434 = vmatpush.bf16.msra.mxu0 %v6133_v58  ;;  %3392 = vmatpush.bf16.msrb.mxu1 %v6257_v14  ;;  %v7736_v58 = vld [vmem:[#allocation5 + $0x3ec] sm:$0xf0] }
 0x218   :  { %v6936_v14 = vld [vmem:[#allocation5 + $0x7b0] sm:$0xf]  ;;  %v6809_v59 = vor.u32 %v7736_v58, %v6808_v47 }
 0x21a   :  { %3435 = vmatmul.bf16.vlgmr.msra.gmra.mxu0 %v8014_v26  ;;  %3393 = vmatmul.bf16.vlgmr.msrb.gmra.mxu1 %v8016_v33 }
 0x21b   :  { %3441 = vmatpush.bf16.msra.mxu1 %v6373_v55  ;;  %3673 = vmatpush.bf16.msrb.mxu0 %v7697_v53  ;;  %v7768_v55 = vld [vmem:[#allocation5 + $0x7ec] sm:$0xf0] }
 0x21c   :  { %v6937_v60 = vor.u32 %v7768_v55, %v6936_v14  ;;  %4471 = vmatpush.bf16.msrb.mxu2 %v6809_v59  ;;  %v7724_v53 = vld [vmem:[#allocation5 + $0x26c] sm:$0xf0]  ;;  %v7699_v14 = vld [vmem:[%s8541_s2 + $0x148] sm:$0xff] }
 0x21d   :  { %v7720_v59 = vld [vmem:[#allocation5 + $0x1ec] sm:$0xf0] }
 0x21e   :  { %4485 = vmatpush.bf16.msrb.mxu3 %v6937_v60  ;;  %v6872_v60 = vld [vmem:[#allocation5 + $0x5b0] sm:$0xf] }
 0x21f   :  { %3442 = vmatpush.bf16.msra.mxu1 %v6357_v62  ;;  %3674 = vmatpush.bf16.msrb.mxu0 %v7696_v34  ;;  %v7702_v62 = vld [vmem:[%s8541_s2 + $0x160] sm:$0xff]  ;;  %v6888_v34 = vld [vmem:[#allocation5 + $0x630] sm:$0xf] }
 0x220   :  { %4472 = vmatpush.bf16.msrb.mxu2 %v6793_v9 }
 0x223   :  { %3443 = vmatpush.bf16.msra.mxu1 %v6341_v5  ;;  %3675 = vmatpush.bf16.msrb.mxu0 %v7695_v42 }
 0x227   :  { %3444 = vmatpush.bf16.msra.mxu1 %v6325_v1  ;;  %3676 = vmatpush.bf16.msrb.mxu0 %v7694_v12  ;;  %v7764_v1 = vld [vmem:[#allocation5 + $0x76c] sm:$0xf0] }
 0x228   :  { %v7756_v12 = vld [vmem:[#allocation5 + $0x66c] sm:$0xf0] }
 0x229   :  { %v3296_v30 = vpop.f32.mrf.mxu2  ;;  %v6889_v47 = vor.u32 %v7756_v12, %v6888_v34  ;;  %v7828_v34 = vld [vmem:[#allocation5 + $0xf6c] sm:$0xf0] }
 0x22a   :  { %v7712_v12 = vld [vmem:[#allocation5 + $0xec] sm:$0xf0] }
 0x22b   :  { %3445 = vmatpush.bf16.msra.mxu1 %v6309_v37  ;;  %3677 = vmatpush.bf16.msrb.mxu0 %v7693_v51  ;;  %v6921_v37 = vor.u32 %v7764_v1, %v6920_v6  ;;  %v7796_v51 = vld [vmem:[#allocation5 + $0xb6c] sm:$0xf0] }
 0x22c   :  { %v8306_v28 = vpop.f32.mrf.mxu3  ;;  %v7752_v6 = vld [vmem:[#allocation5 + $0x5ec] sm:$0xf0] }
 0x22d   :  { %4486 = vmatpush.bf16.msrb.mxu3 %v6921_v37  ;;  %v6873_v9 = vor.u32 %v7752_v6, %v6872_v60  ;;  %v6696_v60 = vld [vmem:[#allocation5 + $0x30] sm:$0xf] }
 0x22e   :  { %v7708_v6 = vld [vmem:[#allocation5 + $0x6c] sm:$0xf0] }
 0x22f   :  { %3446 = vmatpush.bf16.msra.mxu1 %v6293_v16  ;;  %3678 = vmatpush.bf16.msrb.mxu0 %v7692_v44 }
 0x231   :  { %v8313_v32 = vpop.f32.mrf.mxu2 }
 0x233   :  { %3447 = vmatpush.bf16.msra.mxu1 %v6277_v38  ;;  %3679 = vmatpush.bf16.msrb.mxu0 %v7691_v20  ;;  %v7728_v38 = vld [vmem:[#allocation5 + $0x2ec] sm:$0xf0] }
 0x234   :  { %v8317_v40 = vpop.f32.mrf.mxu3 }
 0x237   :  { %3448 = vmatpush.bf16.msra.mxu1 %v6261_v19  ;;  %v2348_v35 = vpop.f32.mrf.mxu0  ;;  %v6777_v19 = vor.u32 %v7728_v38, %v6776_v48  ;;  %3680 = vmatpush.bf16.msrb.mxu0 %v7690_v17  ;;  %v7192_v17 = vld [vmem:[#allocation5 + $0xfb0] sm:$0xf] }
 0x238   :  { %v7832_v48 = vld [vmem:[#allocation5 + $0xfec] sm:$0xf0] }
 0x239   :  { %4473 = vmatpush.bf16.msrb.mxu2 %v6777_v19 }
 0x23a   :  { %3449 = vmatmul.bf16.vlgmr.msra.gmra.mxu1 %v8016_v33 }
 0x23b   :  { %3687 = vmatpush.bf16.msrb.mxu1 %v7705_v43 }
 0x23f   :  { %v2350_v4 = vpop.f32.mrf.mxu0  ;;  %3688 = vmatpush.bf16.msrb.mxu1 %v7704_v50  ;;  %v7048_v50 = vld [vmem:[#allocation5 + $0xb30] sm:$0xf] }
 0x240   :  { %v7049_v58 = vor.u32 %v7796_v51, %v7048_v50  ;;  %v6840_v50 = vld [vmem:[#allocation5 + $0x4b0] sm:$0xf] }
 0x243   :  { %3689 = vmatpush.bf16.msrb.mxu1 %v7703_v57 }
 0x247   :  { %v3268_v29 = vpop.f32.mrf.mxu0  ;;  %3690 = vmatpush.bf16.msrb.mxu1 %v7702_v62 }
 0x249   :  { %v8327_v11 = vpop.f32.mrf.mxu2 }
 0x24b   :  { %3691 = vmatpush.bf16.msrb.mxu1 %v7701_v13 }
 0x24c   :  { %v8334_v49 = vpop.f32.mrf.mxu3 }
 0x24f   :  { %v8308_v31 = vpop.f32.mrf.mxu0 }
 0x251   :  { %v8353_v56 = vpop.f32.mrf.mxu2 }
 0x254   :  { %v8360_v5 = vpop.f32.mrf.mxu3 }
 0x257   :  { %v2362_v52 = vpop.f32.mrf.mxu1  ;;  %v8322_v41 = vpop.f32.mrf.mxu0 }
 0x258   :  { %v8300_v39 = vadd.f32 %v2362_v52, %v2348_v35  ;;  %v6904_v35 = vld [vmem:[#allocation5 + $0x6b0] sm:$0xf] }
 0x259   :  { %v7760_v52 = vld [vmem:[#allocation5 + $0x6ec] sm:$0xf0] }
 0x25f   :  { %v2364_v7 = vpop.f32.mrf.mxu1  ;;  %v8345_v54 = vpop.f32.mrf.mxu0 }
 0x260   :  { %v2365_v24 = vadd.f32 %v2364_v7, %v2350_v4  ;;  %v7064_v4 = vld [vmem:[#allocation5 + $0xbb0] sm:$0xf]  ;;  %v6905_v7 = vor.u32 %v7760_v52, %v6904_v35 }
 0x261   :  { %v7716_v35 = vld [vmem:[#allocation5 + $0x16c] sm:$0xf0] }
 0x262   :  { %v2475_v25 = vadd.f32 %v2474_v45, %v2365_v24  ;;  %v7800_v24 = vld [vmem:[#allocation5 + $0xbec] sm:$0xf0]  ;;  %4487 = vmatpush.bf16.msrb.mxu3 %v6905_v7 }
 0x263   :  { %v7700_v45 = vld [vmem:[%s8541_s2 + $0x150] sm:$0xff] }
 0x264   :  { %v8304_v22 = vadd.f32 %v2488_v27, %v2475_v25  ;;  %3692 = vmatpush.bf16.msrb.mxu1 %v7700_v45  ;;  %v6856_v52 = vld [vmem:[#allocation5 + $0x530] sm:$0xf] }
 0x265   :  { %v7016_v45 = vld [vmem:[#allocation5 + $0xa30] sm:$0xf] }
 0x266   :  { %4488 = vmatpush.bf16.msrb.mxu3 %v6889_v47  ;;  %v7000_v47 = vld [vmem:[#allocation5 + $0x9b0] sm:$0xf] }
 0x267   :  { %v3282_v21 = vpop.f32.mrf.mxu1 }
 0x268   :  { %v3283_v10 = vadd.f32 %v3282_v21, %v3268_v29  ;;  %v7065_v29 = vor.u32 %v7800_v24, %v7064_v4  ;;  %3693 = vmatpush.bf16.msrb.mxu1 %v7699_v14  ;;  %v7748_v24 = vld [vmem:[#allocation5 + $0x56c] sm:$0xf0] }
 0x26a   :  { %v3297_v18 = vadd.f32 %v3296_v30, %v3283_v10  ;;  %v6760_v30 = vld [vmem:[#allocation5 + $0x230] sm:$0xf]  ;;  %4499 = vmatpush.bf16.msra.mxu0 %v7065_v29  ;;  %v7698_v10 = vld [vmem:[%s8541_s2 + $0x140] sm:$0xff]  ;;  %4489 = vmatpush.bf16.msrb.mxu3 %v6873_v9 }
 0x26b   :  { %v3408_v0 = vpop.f32.mrf.mxu2  ;;  %v6761_v43 = vor.u32 %v7724_v53, %v6760_v30  ;;  %v7788_v29 = vld [vmem:[#allocation5 + $0xa6c] sm:$0xf0] }
 0x26c   :  { %v3311_v42 = vadd.f32 %v8306_v28, %v3297_v18  ;;  %v6744_v28 = vld [vmem:[#allocation5 + $0x1b0] sm:$0xf]  ;;  %3694 = vmatpush.bf16.msrb.mxu1 %v7698_v10  ;;  %v7017_v53 = vor.u32 %v7788_v29, %v7016_v45  ;;  %v6794_v29 = vld [vmem:[#allocation5 + $0x370] sm:$0xf0] }
 0x26d   :  { %4474 = vmatpush.bf16.msrb.mxu2 %v6761_v43  ;;  %v6745_v3 = vor.u32 %v7720_v59, %v6744_v28  ;;  %v6712_v43 = vld [vmem:[#allocation5 + $0xb0] sm:$0xf] }
 0x26e   :  { %v3483_v62 = vmul.f32 %v3311_v42, %v3311_v42  ;;  %4500 = vmatpush.bf16.msra.mxu0 %v7049_v58  ;;  %v7784_v58 = vld [vmem:[#allocation5 + $0x9ec] sm:$0xf0] }
 0x26f   :  { %v8315_v61 = vpop.f32.mrf.mxu1  ;;  %v7160_v28 = vld [vmem:[#allocation5 + $0xeb0] sm:$0xf] }
 0x270   :  { %v3422_v27 = vpop.f32.mrf.mxu3  ;;  %v3285_v57 = vadd.f32 %v8315_v61, %v8308_v31  ;;  %v7032_v31 = vld [vmem:[#allocation5 + $0xab0] sm:$0xf] }
 0x271   :  { %v7792_v61 = vld [vmem:[#allocation5 + $0xaec] sm:$0xf0]  ;;  %4475 = vmatpush.bf16.msrb.mxu2 %v6745_v3 }
 0x272   :  { %v3299_v1 = vadd.f32 %v8313_v32, %v3285_v57  ;;  %v7033_v37 = vor.u32 %v7792_v61, %v7032_v31  ;;  %v6728_v32 = vld [vmem:[#allocation5 + $0x130] sm:$0xf]  ;;  %v6713_v57 = vor.u32 %v7712_v12, %v6712_v43 }
 0x273   :  { %v7824_v59 = vld [vmem:[#allocation5 + $0xeec] sm:$0xf0] }
 0x274   :  { %4501 = vmatpush.bf16.msra.mxu0 %v7033_v37  ;;  %v3313_v4 = vadd.f32 %v8317_v40, %v3299_v1  ;;  %v7161_v3 = vor.u32 %v7824_v59, %v7160_v28  ;;  %v6824_v31 = vld [vmem:[#allocation5 + $0x430] sm:$0xf] }
 0x275   :  { %v7740_v61 = vld [vmem:[#allocation5 + $0x46c] sm:$0xf0] }
 0x276   :  { %v3485_v40 = vmul.f32 %v3313_v4, %v3313_v4  ;;  %v6825_v9 = vor.u32 %v7740_v61, %v6824_v31  ;;  %v6984_v37 = vld [vmem:[#allocation5 + $0x930] sm:$0xf] }
 0x277   :  { %v8332_v46 = vpop.f32.mrf.mxu1  ;;  %v3380_v16 = vpop.f32.mrf.mxu0  ;;  %v7780_v10 = vld [vmem:[#allocation5 + $0x96c] sm:$0xf0] }
 0x278   :  { %v3424_v19 = vpop.f32.mrf.mxu3  ;;  %4502 = vmatpush.bf16.msra.mxu0 %v7017_v53  ;;  %v6968_v4 = vld [vmem:[#allocation5 + $0x8b0] sm:$0xf]  ;;  %v7762_v53 = vld [vmem:[#allocation5 + $0x734] sm:$0xf] }
 0x279   :  { %v7812_v31 = vld [vmem:[#allocation5 + $0xd6c] sm:$0xf0] }
 0x27f   :  { %v8358_v2 = vpop.f32.mrf.mxu1  ;;  %v3382_v63 = vpop.f32.mrf.mxu0 }
 0x297   :  { %v3394_v25 = vpop.f32.mrf.mxu1  ;;  %v3436_v28 = vpop.f32.mrf.mxu0 }
 0x298   :  { %v3395_v21 = vadd.f32 %v3394_v25, %v3380_v16  ;;  %v3410_v16 = vpop.f32.mrf.mxu2  ;;  %v6729_v25 = vor.u32 %v7716_v35, %v6728_v32  ;;  %v7144_v32 = vld [vmem:[#allocation5 + $0xe30] sm:$0xf] }
 0x29a   :  { %v3409_v44 = vadd.f32 %v3408_v0, %v3395_v21  ;;  %v7193_v0 = vor.u32 %v7832_v48, %v7192_v17  ;;  %v7176_v21 = vld [vmem:[#allocation5 + $0xf30] sm:$0xf]  ;;  %4476 = vmatpush.bf16.msrb.mxu2 %v6729_v25  ;;  %v6985_v48 = vor.u32 %v7780_v10, %v6984_v37 }
 0x29b   :  { %v7177_v42 = vor.u32 %v7828_v34, %v7176_v21  ;;  %v6922_v34 = vld [vmem:[#allocation5 + $0x770] sm:$0xf0] }
 0x29c   :  { %v3423_v55 = vadd.f32 %v3422_v27, %v3409_v44  ;;  %4513 = vmatpush.bf16.msra.mxu1 %v7193_v0  ;;  %v6857_v27 = vor.u32 %v7748_v24, %v6856_v52  ;;  %v7744_v44 = vld [vmem:[#allocation5 + $0x4ec] sm:$0xf0]  ;;  %v7766_v0 = vld [vmem:[#allocation5 + $0x7b4] sm:$0xf]  ;;  %v3339_v24 = vadd.f32 %v8332_v46, %v8322_v41  ;;  %v6925_v12 = vor.u32 %v7762_v53, %v6922_v34 }
 0x29d   :  { %v6841_v14 = vor.u32 %v7744_v44, %v6840_v50  ;;  %v7820_v52 = vld [vmem:[#allocation5 + $0xe6c] sm:$0xf0]  ;;  %v6778_v44 = vld [vmem:[#allocation5 + $0x2f0] sm:$0xf0] }
 0x29e   :  { %v3487_v20 = vmul.f32 %v3423_v55, %v3423_v55  ;;  %4490 = vmatpush.bf16.msrb.mxu3 %v6857_v27  ;;  %v7001_v55 = vor.u32 %v7784_v58, %v7000_v47  ;;  %4477 = vmatpush.bf16.msrb.mxu2 %v6713_v57  ;;  %v7145_v25 = vor.u32 %v7820_v52, %v7144_v32  ;;  %v7730_v27 = vld [vmem:[#allocation5 + $0x334] sm:$0xf]  ;;  %v7816_v50 = vld [vmem:[#allocation5 + $0xdec] sm:$0xf0]  ;;  %v3478_v32 = vpop.f32.mrf.mxu3 }
 0x29f   :  { %v3396_v13 = vpop.f32.mrf.mxu1  ;;  %v7726_v57 = vld [vmem:[#allocation5 + $0x2b4] sm:$0xf]  ;;  %v3353_v47 = vadd.f32 %v8327_v11, %v3339_v24 }
 0x2a0   :  { %v8384_v38 = vadd.f32 %v3487_v20, %v3483_v62  ;;  %v3397_v18 = vadd.f32 %v3396_v13, %v3382_v63  ;;  %4514 = vmatpush.bf16.msra.mxu1 %v7177_v42  ;;  %v6697_v20 = vor.u32 %v7708_v6, %v6696_v60  ;;  %v7734_v13 = vld [vmem:[#allocation5 + $0x3b4] sm:$0xf]  ;;  %4503 = vmatpush.bf16.msra.mxu0 %v7001_v55  ;;  %v7128_v42 = vld [vmem:[#allocation5 + $0xdb0] sm:$0xf]  ;;  %v3464_v37 = vpop.f32.mrf.mxu2 }
 0x2a1   :  { %v7129_v46 = vor.u32 %v7816_v50, %v7128_v42  ;;  %v6906_v55 = vld [vmem:[#allocation5 + $0x6f0] sm:$0xf0]  ;;  %v7112_v6 = vld [vmem:[#allocation5 + $0xd30] sm:$0xf] }
 0x2a2   :  { %7875 = vrsqrt.f32 %v8384_v38  ;;  %v3411_v7 = vadd.f32 %v3410_v16, %v3397_v18  ;;  %4491 = vmatpush.bf16.msrb.mxu3 %v6841_v14  ;;  %v6810_v16 = vld [vmem:[#allocation5 + $0x3f0] sm:$0xf0]  ;;  %4478 = vmatpush.bf16.msrb.mxu2 %v6697_v20  ;;  %v7113_v10 = vor.u32 %v7812_v31, %v7112_v6  ;;  %vm3502_vm0 = vcmp.eq.f32.partialorder %v8384_v38, inf }
 0x2a3   :  { %v6813_v18 = vor.u32 %v7734_v13, %v6810_v16  ;;  %v7758_v14 = vld [vmem:[#allocation5 + $0x6b4] sm:$0xf]  ;;  %vm3504_vm1 = vcmp.eq.f32.partialorder %v8384_v38, 0.0 }
 0x2a4   :  { %v3425_v30 = vadd.f32 %v3424_v19, %v3411_v7  ;;  %4515 = vmatpush.bf16.msra.mxu1 %v7161_v3  ;;  %v6938_v19 = vld [vmem:[#allocation5 + $0x7f0] sm:$0xf0]  ;;  %v7776_v7 = vld [vmem:[#allocation5 + $0x8ec] sm:$0xf0]  ;;  %4504 = vmatpush.bf16.msra.mxu0 %v6985_v48  ;;  %v6781_v3 = vor.u32 %v7726_v57, %v6778_v44  ;;  %v3438_v44 = vpop.f32.mrf.mxu0 }
 0x2a5   :  { %v6941_v35 = vor.u32 %v7766_v0, %v6938_v19  ;;  %v6969_v21 = vor.u32 %v7776_v7, %v6968_v4  ;;  %4479 = vmatmul.bf16.vlgmr.msrb.gmra.mxu2 %v8014_v26  ;;  %v7722_v20 = vld [vmem:[#allocation5 + $0x234] sm:$0xf]  ;;  %v7808_v0 = vld [vmem:[#allocation5 + $0xcec] sm:$0xf0]  ;;  %v3341_v19 = vadd.f32 %v8358_v2, %v8345_v54 }
 0x2a6   :  { %v3489_v51 = vmul.f32 %v3425_v30, %v3425_v30  ;;  %4492 = vmatpush.bf16.msrb.mxu3 %v6825_v9  ;;  %4527 = vmatpush.bf16.msra.mxu2 %v6813_v18  ;;  %v6797_v30 = vor.u32 %v7730_v27, %v6794_v29  ;;  %v6762_v9 = vld [vmem:[#allocation5 + $0x270] sm:$0xf0]  ;;  %v7096_v18 = vld [vmem:[#allocation5 + $0xcb0] sm:$0xf] }
 0x2a7   :  { %v7754_v13 = vld [vmem:[#allocation5 + $0x634] sm:$0xf]  ;;  %v6765_v52 = vor.u32 %v7722_v20, %v6762_v9  ;;  %v3355_v34 = vadd.f32 %v8353_v56, %v3341_v19 }
 0x2a8   :  { %v7876_v62 = vpop.eup %7875  ;;  %v8388_v63 = vadd.f32 %v3489_v51, %v3485_v40  ;;  %4516 = vmatpush.bf16.msra.mxu1 %v7145_v25  ;;  %v6952_v40 = vld [vmem:[#allocation5 + $0x830] sm:$0xf]  ;;  %4505 = vmatpush.bf16.msra.mxu0 %v6969_v21  ;;  %v6890_v16 = vld [vmem:[#allocation5 + $0x670] sm:$0xf0]  ;;  %v7097_v25 = vor.u32 %v7808_v0, %v7096_v18 }
 0x2a9   :  { %v3496_v1 = vmul.f32 %v7876_v62, %v8384_v38  ;;  %v7772_v51 = vld [vmem:[#allocation5 + $0x86c] sm:$0xf0]  ;;  %4493 = vmatmul.bf16.vlgmr.msrb.gmra.mxu3 %v8016_v33  ;;  %v7718_v4 = vld [vmem:[#allocation5 + $0x1b4] sm:$0xf] }
 0x2aa   :  { %7877 = vrsqrt.f32 %v8388_v63  ;;  %4541 = vmatpush.bf16.msra.mxu3 %v6941_v35  ;;  %4528 = vmatpush.bf16.msra.mxu2 %v6797_v30  ;;  %v6953_v60 = vor.u32 %v7772_v51, %v6952_v40  ;;  %v6746_v7 = vld [vmem:[#allocation5 + $0x1f0] sm:$0xf0]  ;;  %v7080_v21 = vld [vmem:[#allocation5 + $0xc30] sm:$0xf]  ;;  %vm3526_vm2 = vcmp.eq.f32.partialorder %v8388_v63, inf  ;;  %v3529_v56 = vand.u32 2147483648, %v8388_v63 }
 0x2ab   :  { %v3497_v17 = vmul.f32 %v7876_v62, %v3496_v1  ;;  %v6909_v1 = vor.u32 %v7758_v14, %v6906_v55  ;;  %v7750_v27 = vld [vmem:[#allocation5 + $0x5b4] sm:$0xf]  ;;  %v7804_v30 = vld [vmem:[#allocation5 + $0xc6c] sm:$0xf0]  ;;  %vm3528_vm3 = vcmp.eq.f32.partialorder %v8388_v63, 0.0 }
 0x2ac   :  { %4517 = vmatpush.bf16.msra.mxu1 %v7129_v46  ;;  %4506 = vmatpush.bf16.msra.mxu0 %v6953_v60  ;;  %v6874_v29 = vld [vmem:[#allocation5 + $0x5f0] sm:$0xf0]  ;;  %v7081_v57 = vor.u32 %v7804_v30, %v7080_v21 }
 0x2ad   :  { %v3498_v45 = vmul.f32 0.5, %v3497_v17  ;;  %v3367_v17 = vadd.f32 %v8334_v49, %v3353_v47  ;;  %v6893_v49 = vor.u32 %v7754_v13, %v6890_v16  ;;  %v7798_v46 = vld [vmem:[#allocation5 + $0xbb4] sm:$0xf] }
 0x2ae   :  { %4542 = vmatpush.bf16.msra.mxu3 %v6925_v12  ;;  %4529 = vmatpush.bf16.msra.mxu2 %v6781_v3  ;;  %v6877_v12 = vor.u32 %v7750_v27, %v6874_v29  ;;  %v7066_v51 = vld [vmem:[#allocation5 + $0xbf0] sm:$0xf0] }
 0x2af   :  { %v3499_v43 = vsub.f32 1.5, %v3498_v45  ;;  %v3484_v53 = vmul.f32 %v3367_v17, %v3367_v17  ;;  %v7069_v3 = vor.u32 %v7798_v46, %v7066_v51  ;;  %v7714_v6 = vld [vmem:[#allocation5 + $0x134] sm:$0xf] }
 0x2b0   :  { %v7878_v41 = vpop.eup %7877  ;;  %4518 = vmatpush.bf16.msra.mxu1 %v7113_v10  ;;  %v6730_v31 = vld [vmem:[#allocation5 + $0x170] sm:$0xf0] }
 0x2b1   :  { %v3520_v58 = vmul.f32 %v7878_v41, %v8388_v63  ;;  %v3500_v59 = vmul.f32 %v7876_v62, %v3499_v43  ;;  %v6749_v43 = vor.u32 %v7718_v4, %v6746_v7  ;;  %v7794_v9 = vld [vmem:[#allocation5 + $0xb34] sm:$0xf]  ;;  %v6733_v10 = vor.u32 %v7714_v6, %v6730_v31 }
 0x2b2   :  { %4543 = vmatpush.bf16.msra.mxu3 %v6909_v1  ;;  %4530 = vmatpush.bf16.msra.mxu2 %v6765_v52  ;;  %v7790_v19 = vld [vmem:[#allocation5 + $0xab4] sm:$0xf] }
 0x2b3   :  { %v3521_v61 = vmul.f32 %v7878_v41, %v3520_v58  ;;  %v3501_v35 = vmul.f32 %v3500_v59, %v8384_v38  ;;  %v6842_v52 = vld [vmem:[#allocation5 + $0x4f0] sm:$0xf0] }
 0x2b4   :  { %4519 = vmatpush.bf16.msra.mxu1 %v7097_v25  ;;  %v7706_v25 = vld [vmem:[#allocation5 + $0x34] sm:$0xf] }
 0x2b5   :  { %v3522_v48 = vmul.f32 0.5, %v3521_v61  ;;  %v3503_v42 = vsel %vm3502_vm0, %v8384_v38, %v3501_v35  ;;  %v7746_v61 = vld [vmem:[#allocation5 + $0x534] sm:$0xf]  ;;  %vm4927_vm0 = vcmask 261120  }
 0x2b6   :  { %4544 = vmatpush.bf16.msra.mxu3 %v6893_v49  ;;  %4531 = vmatpush.bf16.msra.mxu2 %v6749_v43  ;;  %v6698_v27 = vld [vmem:[#allocation5 + $0x70] sm:$0xf0]  ;;  %v7737_v43 = vld [vmem:[#allocation5 + $0x3f4] sm:$0xf0] }
 0x2b7   :  { %v3450_v11 = vpop.f32.mrf.mxu1  ;;  %v3523_v45 = vsub.f32 1.5, %v3522_v48  ;;  %v6714_v48 = vld [vmem:[#allocation5 + $0xf0] sm:$0xf0] }
 0x2b8   :  { %v3451_v62 = vadd.f32 %v3450_v11, %v3436_v28  ;;  %v3466_v28 = vpop.f32.mrf.mxu2  ;;  %4520 = vmatpush.bf16.msra.mxu1 %v7081_v57  ;;  %v6858_v11 = vld [vmem:[#allocation5 + $0x570] sm:$0xf0] }
 0x2b9   :  { %v3524_v2 = vmul.f32 %v7878_v41, %v3523_v45  ;;  %v3505_v41 = vand.u32 2147483648, %v8384_v38  ;;  %v3369_v38 = vadd.f32 %v8360_v5, %v3355_v34  ;;  %v6861_v13 = vor.u32 %v7746_v61, %v6858_v11  ;;  %v7742_v5 = vld [vmem:[#allocation5 + $0x4b4] sm:$0xf] }
 0x2ba   :  { %v3465_v24 = vadd.f32 %v3464_v37, %v3451_v62  ;;  %v7050_v37 = vld [vmem:[#allocation5 + $0xb70] sm:$0xf0]  ;;  %4545 = vmatpush.bf16.msra.mxu3 %v6877_v12  ;;  %4532 = vmatpush.bf16.msra.mxu2 %v6733_v10  ;;  %v6845_v4 = vor.u32 %v7742_v5, %v6842_v52  ;;  %v6944_v12 = vld [vmem:[#allocation5 + $0x7b8] sm:$0xf] }
 0x2bb   :  { %v3525_v40 = vmul.f32 %v3524_v2, %v8388_v63  ;;  %v3506_v59 = vsel %vm3504_vm1, %v3505_v41, %v3503_v42  ;;  %v7053_v17 = vor.u32 %v7794_v9, %v7050_v37  ;;  %v7710_v62 = vld [vmem:[#allocation5 + $0xb4] sm:$0xf]  ;;  %v3486_v18 = vmul.f32 %v3369_v38, %v3369_v38  ;;  %v6816_v42 = vld [vmem:[#allocation5 + $0x3b8] sm:$0xf] }
 0x2bc   :  { %v3479_v54 = vadd.f32 %v3478_v32, %v3465_v24  ;;  %v7034_v32 = vld [vmem:[#allocation5 + $0xaf0] sm:$0xf0]  ;;  %v6717_v35 = vor.u32 %v7710_v62, %v6714_v48  ;;  %v6701_v2 = vor.u32 %v7706_v25, %v6698_v27  ;;  %v6817_v51 = vor.u32 %v7737_v43, %v6816_v42  ;;  %v6800_v41 = vld [vmem:[#allocation5 + $0x338] sm:$0xf] }
 0x2bd   :  { %v3527_v55 = vsel %vm3526_vm2, %v8388_v63, %v3525_v40  ;;  %v3480_v63 = vpop.f32.mrf.mxu3  ;;  %v7037_v45 = vor.u32 %v7790_v19, %v7034_v32  ;;  %v7738_v29 = vld [vmem:[#allocation5 + $0x434] sm:$0xf]  ;;  %v6912_v9 = vld [vmem:[#allocation5 + $0x6b8] sm:$0xf] }
 0x2be   :  { %v3488_v50 = vmul.f32 %v3479_v54, %v3479_v54  ;;  %v3530_v60 = vsel %vm3528_vm3, %v3529_v56, %v3527_v55  ;;  %4546 = vmatpush.bf16.msra.mxu3 %v6861_v13  ;;  %4533 = vmatpush.bf16.msra.mxu2 %v6717_v35  ;;  %v7786_v21 = vld [vmem:[#allocation5 + $0xa34] sm:$0xf]  ;;  %v6928_v55 = vld [vmem:[#allocation5 + $0x738] sm:$0xf] }
 0x2bf   :  { %v3452_v47 = vpop.f32.mrf.mxu1  ;;  %v3543_v20 = vpack.c.bf16 %v3530_v60, %v3506_v59  ;;  %v7018_v30 = vld [vmem:[#allocation5 + $0xa70] sm:$0xf0]  ;;  %v7765_v60 = vld [vmem:[#allocation5 + $0x774] sm:$0xf0] }
 0x2c0   :  { %v8410_v58 = vadd.f32 %v3488_v50, %v3484_v53  ;;  %v3453_v14 = vadd.f32 %v3452_v47, %v3438_v44  ;;  %v6826_v53 = vld [vmem:[#allocation5 + $0x470] sm:$0xf0]  ;;  %v7769_v50 = vld [vmem:[#allocation5 + $0x7f4] sm:$0xf0]  ;;  %v7021_v46 = vor.u32 %v7786_v21, %v7018_v30  ;;  %v6929_v38 = vor.u32 %v7765_v60, %v6928_v55 }
 0x2c1   :  { %3681 = vmatmul.bf16.vlgmr.msrb.gmra.mxu0 %v3543_v20  ;;  %v6829_v34 = vor.u32 %v7738_v29, %v6826_v53  ;;  %v6945_v57 = vor.u32 %v7769_v50, %v6944_v12  ;;  %v7782_v44 = vld [vmem:[#allocation5 + $0x9b4] sm:$0xf]  ;;  %v7729_v20 = vld [vmem:[#allocation5 + $0x2f4] sm:$0xf0] }
 0x2c2   :  { %7879 = vrsqrt.f32 %v8410_v58  ;;  %v3467_v1 = vadd.f32 %v3466_v28, %v3453_v14  ;;  %4555 = vmatpush.bf16.msrb.mxu0 %v7069_v3  ;;  %4547 = vmatpush.bf16.msra.mxu3 %v6845_v4  ;;  %v7002_v47 = vld [vmem:[#allocation5 + $0x9f0] sm:$0xf0]  ;;  %v7733_v14 = vld [vmem:[#allocation5 + $0x374] sm:$0xf0]  ;;  %vm3514_vm4 = vcmp.eq.f32.partialorder %v8410_v58, inf  ;;  %v3517_v50 = vand.u32 2147483648, %v8410_v58 }
 0x2c3   :  { %4534 = vmatpush.bf16.msra.mxu2 %v6701_v2  ;;  %v6801_v59 = vor.u32 %v7733_v14, %v6800_v41  ;;  %v7005_v6 = vor.u32 %v7782_v44, %v7002_v47  ;;  %v7778_v31 = vld [vmem:[#allocation5 + $0x934] sm:$0xf]  ;;  %v7761_v10 = vld [vmem:[#allocation5 + $0x6f4] sm:$0xf0]  ;;  %vm3516_vm6 = vcmp.eq.f32.partialorder %v8410_v58, 0.0 }
 0x2c4   :  { %v3481_v16 = vadd.f32 %v3480_v63, %v3467_v1  ;;  %v6986_v61 = vld [vmem:[#allocation5 + $0x970] sm:$0xf0]  ;;  %v6784_v1 = vld [vmem:[#allocation5 + $0x2b8] sm:$0xf]  ;;  %v6913_v13 = vor.u32 %v7761_v10, %v6912_v9 }
 0x2c5   :  { %v6785_v63 = vor.u32 %v7729_v20, %v6784_v1  ;;  %v7774_v62 = vld [vmem:[#allocation5 + $0x8b4] sm:$0xf]  ;;  %v6768_v5 = vld [vmem:[#allocation5 + $0x238] sm:$0xf] }
 0x2c6   :  { %v3490_v0 = vmul.f32 %v3481_v16, %v3481_v16  ;;  %4556 = vmatpush.bf16.msrb.mxu0 %v7053_v17  ;;  %4548 = vmatpush.bf16.msra.mxu3 %v6829_v34  ;;  %v6989_v17 = vor.u32 %v7778_v31, %v6986_v61  ;;  %v6970_v48 = vld [vmem:[#allocation5 + $0x8f0] sm:$0xf0]  ;;  %v7757_v52 = vld [vmem:[#allocation5 + $0x674] sm:$0xf0] }
 0x2c7   :  { %4583 = vmatpush.bf16.msrb.mxu2 %v6817_v51  ;;  %v6973_v25 = vor.u32 %v7774_v62, %v6970_v48  ;;  %v7770_v27 = vld [vmem:[#allocation5 + $0x834] sm:$0xf]  ;;  %v6752_v21 = vld [vmem:[#allocation5 + $0x1b8] sm:$0xf] }
 0x2c8   :  { %v7880_v7 = vpop.eup %7879  ;;  %v8416_v24 = vadd.f32 %v3490_v0, %v3486_v18  ;;  %4535 = vmatmul.bf16.vlgmr.msra.gmra.mxu2 %v8014_v26  ;;  %v7725_v18 = vld [vmem:[#allocation5 + $0x274] sm:$0xf0]  ;;  %v6954_v29 = vld [vmem:[#allocation5 + $0x870] sm:$0xf0] }
 0x2c9   :  { %v3508_v49 = vmul.f32 %v7880_v7, %v8410_v58  ;;  %4549 = vmatmul.bf16.vlgmr.msra.gmra.mxu3 %v8016_v33  ;;  %v6896_v0 = vld [vmem:[#allocation5 + $0x638] sm:$0xf]  ;;  %v6769_v35 = vor.u32 %v7725_v18, %v6768_v5  ;;  %v7178_v44 = vld [vmem:[#allocation5 + $0xf70] sm:$0xf0]  ;;  %v6957_v47 = vor.u32 %v7770_v27, %v6954_v29  ;;  %v6818_v27 = vld [vmem:[#allocation5 + $0x3f8] sm:$0xf0] }
 0x2ca   :  { %7881 = vrsqrt.f32 %v8416_v24  ;;  %4557 = vmatpush.bf16.msrb.mxu0 %v7037_v45  ;;  %4597 = vmatpush.bf16.msrb.mxu3 %v6945_v57  ;;  %v6897_v4 = vor.u32 %v7757_v52, %v6896_v0  ;;  %v7830_v45 = vld [vmem:[#allocation5 + $0xfb4] sm:$0xf]  ;;  %v7721_v30 = vld [vmem:[#allocation5 + $0x1f4] sm:$0xf0]  ;;  %vm3538_vm5 = vcmp.eq.f32.partialorder %v8416_v24, inf  ;;  %vm3540_vm7 = vcmp.eq.f32.partialorder %v8416_v24, 0.0 }
 0x2cb   :  { %v3509_v54 = vmul.f32 %v7880_v7, %v3508_v49  ;;  %4584 = vmatpush.bf16.msrb.mxu2 %v6801_v59  ;;  %v7194_v49 = vld [vmem:[#allocation5 + $0xff0] sm:$0xf0]  ;;  %v6880_v53 = vld [vmem:[#allocation5 + $0x5b8] sm:$0xf]  ;;  %v6753_v43 = vor.u32 %v7721_v30, %v6752_v21  ;;  %v7767_v29 = vld [vmem:[#allocation5 + $0x7bc] sm:$0xf] }
 0x2cc   :  { %v7072_v34 = vld [vmem:[#allocation5 + $0xbb8] sm:$0xf]  ;;  %v7826_v57 = vld [vmem:[#allocation5 + $0xf34] sm:$0xf]  ;;  %v7197_v14 = vor.u32 %v7830_v45, %v7194_v49 }
 0x2cd   :  { %v3510_v40 = vmul.f32 0.5, %v3509_v54  ;;  %v7801_v42 = vld [vmem:[#allocation5 + $0xbf4] sm:$0xf0]  ;;  %v7162_v1 = vld [vmem:[#allocation5 + $0xef0] sm:$0xf0]  ;;  %v7181_v20 = vor.u32 %v7826_v57, %v7178_v44 }
 0x2ce   :  { %4558 = vmatpush.bf16.msrb.mxu0 %v7021_v46  ;;  %4598 = vmatpush.bf16.msrb.mxu3 %v6929_v38  ;;  %v7753_v12 = vld [vmem:[#allocation5 + $0x5f4] sm:$0xf0]  ;;  %v7073_v55 = vor.u32 %v7801_v42, %v7072_v34  ;;  %v7818_v48 = vld [vmem:[#allocation5 + $0xe34] sm:$0xf]  ;;  %v6930_v57 = vld [vmem:[#allocation5 + $0x778] sm:$0xf0] }
 0x2cf   :  { %v3511_v56 = vsub.f32 1.5, %v3510_v40  ;;  %4585 = vmatpush.bf16.msrb.mxu2 %v6785_v63  ;;  %v3541_v40 = vand.u32 2147483648, %v8416_v24  ;;  %v6881_v46 = vor.u32 %v7753_v12, %v6880_v53  ;;  %v7717_v59 = vld [vmem:[#allocation5 + $0x174] sm:$0xf0]  ;;  %v7146_v5 = vld [vmem:[#allocation5 + $0xe70] sm:$0xf0] }
 0x2d0   :  { %v7882_v28 = vpop.eup %7881  ;;  %v6864_v60 = vld [vmem:[#allocation5 + $0x538] sm:$0xf]  ;;  %v7814_v21 = vld [vmem:[#allocation5 + $0xdb4] sm:$0xf]  ;;  %v6946_v53 = vld [vmem:[#allocation5 + $0x7f8] sm:$0xf0] }
 0x2d1   :  { %v3532_v3 = vmul.f32 %v7882_v28, %v8416_v24  ;;  %v3512_v37 = vmul.f32 %v7880_v7, %v3511_v56  ;;  %4507 = vmatmul.bf16.vlgmr.msra.gmra.mxu0 %v8008_v8  ;;  %v7797_v31 = vld [vmem:[#allocation5 + $0xb74] sm:$0xf0]  ;;  %v6949_v12 = vor.u32 %v7767_v29, %v6946_v53  ;;  %v7810_v44 = vld [vmem:[#allocation5 + $0xd34] sm:$0xf] }
 0x2d2   :  { %4559 = vmatpush.bf16.msrb.mxu0 %v7005_v6  ;;  %4599 = vmatpush.bf16.msrb.mxu3 %v6913_v13  ;;  %v7056_v6 = vld [vmem:[#allocation5 + $0xb38] sm:$0xf] }
 0x2d3   :  { %v3533_v11 = vmul.f32 %v7882_v28, %v3532_v3  ;;  %v3513_v19 = vmul.f32 %v3512_v37, %v8410_v58  ;;  %4586 = vmatpush.bf16.msrb.mxu2 %v6769_v35  ;;  %v7749_v61 = vld [vmem:[#allocation5 + $0x574] sm:$0xf0]  ;;  %v7057_v9 = vor.u32 %v7797_v31, %v7056_v6  ;;  %v6914_v31 = vld [vmem:[#allocation5 + $0x6f8] sm:$0xf0] }
 0x2d4   :  { %v6865_v38 = vor.u32 %v7749_v61, %v6864_v60  ;;  %v6720_v37 = vld [vmem:[#allocation5 + $0xb8] sm:$0xf]  ;;  %v6786_v60 = vld [vmem:[#allocation5 + $0x2f8] sm:$0xf0] }
 0x2d5   :  { %v3534_v16 = vmul.f32 0.5, %v3533_v11  ;;  %v3515_v54 = vsel %vm3514_vm4, %v8410_v58, %v3513_v19  ;;  %v7713_v11 = vld [vmem:[#allocation5 + $0xf4] sm:$0xf0] }
 0x2d6   :  { %4560 = vmatpush.bf16.msrb.mxu0 %v6989_v17  ;;  %4600 = vmatpush.bf16.msrb.mxu3 %v6897_v4  ;;  %v3518_v41 = vsel %vm3516_vm6, %v3517_v50, %v3515_v54  ;;  %v6848_v63 = vld [vmem:[#allocation5 + $0x4b8] sm:$0xf]  ;;  %v7149_v54 = vor.u32 %v7818_v48, %v7146_v5  ;;  %v7731_v50 = vld [vmem:[#allocation5 + $0x33c] sm:$0xf] }
 0x2d7   :  { %v3535_v32 = vsub.f32 1.5, %v3534_v16  ;;  %4587 = vmatpush.bf16.msrb.mxu2 %v6753_v43  ;;  %v7040_v10 = vld [vmem:[#allocation5 + $0xab8] sm:$0xf]  ;;  %v6721_v16 = vor.u32 %v7713_v11, %v6720_v37  ;;  %v7723_v37 = vld [vmem:[#allocation5 + $0x23c] sm:$0xf] }
 0x2d8   :  { %v7793_v13 = vld [vmem:[#allocation5 + $0xaf4] sm:$0xf0]  ;;  %v6770_v11 = vld [vmem:[#allocation5 + $0x278] sm:$0xf0] }
 0x2d9   :  { %v3536_v7 = vmul.f32 %v7882_v28, %v3535_v32  ;;  %v6736_v28 = vld [vmem:[#allocation5 + $0x138] sm:$0xf]  ;;  %v7041_v0 = vor.u32 %v7793_v13, %v7040_v10  ;;  %v6773_v10 = vor.u32 %v7723_v37, %v6770_v11  ;;  %v6898_v13 = vld [vmem:[#allocation5 + $0x678] sm:$0xf0] }
 0x2da   :  { %4561 = vmatpush.bf16.msrb.mxu0 %v6973_v25  ;;  %4601 = vmatpush.bf16.msrb.mxu3 %v6881_v46  ;;  %v6737_v58 = vor.u32 %v7717_v59, %v6736_v28  ;;  %v7745_v17 = vld [vmem:[#allocation5 + $0x4f4] sm:$0xf0]  ;;  %v7735_v25 = vld [vmem:[#allocation5 + $0x3bc] sm:$0xf] }
 0x2db   :  { %v3537_v2 = vmul.f32 %v3536_v7, %v8416_v24  ;;  %v6849_v62 = vor.u32 %v7745_v17, %v6848_v63  ;;  %v6704_v19 = vld [vmem:[#allocation5 + $0x38] sm:$0xf]  ;;  %v6821_v30 = vor.u32 %v7735_v25, %v6818_v27  ;;  %v7763_v46 = vld [vmem:[#allocation5 + $0x73c] sm:$0xf]  ;;  %v7082_v17 = vld [vmem:[#allocation5 + $0xc70] sm:$0xf0] }
 0x2dc   :  { %4588 = vmatpush.bf16.msrb.mxu2 %v6737_v58  ;;  %v7709_v32 = vld [vmem:[#allocation5 + $0x74] sm:$0xf0]  ;;  %v7727_v59 = vld [vmem:[#allocation5 + $0x2bc] sm:$0xf]  ;;  %v7806_v58 = vld [vmem:[#allocation5 + $0xcb4] sm:$0xf] }
 0x2dd   :  { %v3539_v51 = vsel %vm3538_vm5, %v8416_v24, %v3537_v2  ;;  %v7822_v24 = vld [vmem:[#allocation5 + $0xeb4] sm:$0xf]  ;;  %v6832_v35 = vld [vmem:[#allocation5 + $0x438] sm:$0xf]  ;;  %v6705_v7 = vor.u32 %v7709_v32, %v6704_v19  ;;  %v6789_v6 = vor.u32 %v7727_v59, %v6786_v60  ;;  %v7755_v63 = vld [vmem:[#allocation5 + $0x63c] sm:$0xf] }
 0x2de   :  { %v3542_v56 = vsel %vm3540_vm7, %v3541_v40, %v3539_v51  ;;  %4562 = vmatpush.bf16.msrb.mxu0 %v6957_v47  ;;  %4602 = vmatpush.bf16.msrb.mxu3 %v6865_v38  ;;  %v7165_v18 = vor.u32 %v7822_v24, %v7162_v1  ;;  %v7024_v52 = vld [vmem:[#allocation5 + $0xa38] sm:$0xf]  ;;  %v7130_v2 = vld [vmem:[#allocation5 + $0xdf0] sm:$0xf0]  ;;  %v6802_v40 = vld [vmem:[#allocation5 + $0x378] sm:$0xf0]  ;;  %v6933_v47 = vor.u32 %v7763_v46, %v6930_v57 }
 0x2df   :  { %v3544_v3 = vpack.c.bf16 %v3542_v56, %v3518_v41  ;;  %v7789_v4 = vld [vmem:[#allocation5 + $0xa74] sm:$0xf0]  ;;  %v6805_v51 = vor.u32 %v7731_v50, %v6802_v40  ;;  %v7133_v41 = vor.u32 %v7814_v21, %v7130_v2  ;;  %v7114_v56 = vld [vmem:[#allocation5 + $0xd70] sm:$0xf0]  ;;  %v6882_v25 = vld [vmem:[#allocation5 + $0x5f8] sm:$0xf0] }
 0x2e0   :  { %4589 = vmatpush.bf16.msrb.mxu2 %v6721_v16  ;;  %v7741_v45 = vld [vmem:[#allocation5 + $0x474] sm:$0xf0]  ;;  %v7025_v34 = vor.u32 %v7789_v4, %v7024_v52  ;;  %v7117_v38 = vor.u32 %v7810_v44, %v7114_v56  ;;  %v7098_v24 = vld [vmem:[#allocation5 + $0xcf0] sm:$0xf0]  ;;  %v6754_v52 = vld [vmem:[#allocation5 + $0x1f8] sm:$0xf0] }
 0x2e1   :  { %3695 = vmatmul.bf16.vlgmr.msrb.gmra.mxu1 %v3544_v3  ;;  %4563 = vmatmul.bf16.vlgmr.msrb.gmra.mxu0 %v8008_v8  ;;  %v6833_v49 = vor.u32 %v7741_v45, %v6832_v35  ;;  %v7008_v42 = vld [vmem:[#allocation5 + $0x9b8] sm:$0xf]  ;;  %v7759_v3 = vld [vmem:[#allocation5 + $0x6bc] sm:$0xf]  ;;  %v7802_v16 = vld [vmem:[#allocation5 + $0xc34] sm:$0xf]  ;;  %v7101_v48 = vor.u32 %v7806_v58, %v7098_v24 }
 0x2e2   :  { %4569 = vmatpush.bf16.msrb.mxu1 %v7197_v14  ;;  %4611 = vmatpush.bf16.msra.mxu0 %v7073_v55  ;;  %v7785_v43 = vld [vmem:[#allocation5 + $0x9f4] sm:$0xf0]  ;;  %v6917_v61 = vor.u32 %v7759_v3, %v6914_v31  ;;  %v7719_v35 = vld [vmem:[#allocation5 + $0x1bc] sm:$0xf]  ;;  %v7085_v29 = vor.u32 %v7802_v16, %v7082_v17 }
 0x2e3   :  { %4603 = vmatpush.bf16.msrb.mxu3 %v6849_v62  ;;  %v7009_v14 = vor.u32 %v7785_v43, %v7008_v42  ;;  %v6992_v55 = vld [vmem:[#allocation5 + $0x938] sm:$0xf]  ;;  %v6901_v62 = vor.u32 %v7755_v63, %v6898_v13  ;;  %v7751_v4 = vld [vmem:[#allocation5 + $0x5bc] sm:$0xf] }
 0x2e4   :  { %4590 = vmatpush.bf16.msrb.mxu2 %v6705_v7  ;;  %v7781_v28 = vld [vmem:[#allocation5 + $0x974] sm:$0xf0]  ;;  %v7799_v7 = vld [vmem:[#allocation5 + $0xbbc] sm:$0xf]  ;;  %v6885_v27 = vor.u32 %v7751_v4, %v6882_v25 }
 0x2e5   :  { %v6993_v1 = vor.u32 %v7781_v28, %v6992_v55  ;;  %v7200_v5 = vld [vmem:[#allocation5 + $0xfb8] sm:$0xf]  ;;  %v7074_v45 = vld [vmem:[#allocation5 + $0xbf8] sm:$0xf0] }
 0x2e6   :  { %4570 = vmatpush.bf16.msrb.mxu1 %v7181_v20  ;;  %4612 = vmatpush.bf16.msra.mxu0 %v7057_v9  ;;  %v6976_v20 = vld [vmem:[#allocation5 + $0x8b8] sm:$0xf]  ;;  %v7077_v2 = vor.u32 %v7799_v7, %v7074_v45  ;;  %v6738_v42 = vld [vmem:[#allocation5 + $0x178] sm:$0xf0] }
 0x2e7   :  { %4604 = vmatpush.bf16.msrb.mxu3 %v6833_v49  ;;  %4591 = vmatmul.bf16.vlgmr.msrb.gmra.mxu2 %v8014_v26  ;;  %v7777_v9 = vld [vmem:[#allocation5 + $0x8f4] sm:$0xf0]  ;;  %v6757_v49 = vor.u32 %v7719_v35, %v6754_v52  ;;  %v7747_v43 = vld [vmem:[#allocation5 + $0x53c] sm:$0xf] }
 0x2e8   :  { %4639 = vmatpush.bf16.msra.mxu2 %v6821_v30  ;;  %v6960_v19 = vld [vmem:[#allocation5 + $0x838] sm:$0xf]  ;;  %v7058_v50 = vld [vmem:[#allocation5 + $0xb78] sm:$0xf0] }
 0x2e9   :  { %v7773_v32 = vld [vmem:[#allocation5 + $0x874] sm:$0xf0]  ;;  %v6866_v46 = vld [vmem:[#allocation5 + $0x578] sm:$0xf0] }
 0x2ea   :  { %4571 = vmatpush.bf16.msrb.mxu1 %v7165_v18  ;;  %4613 = vmatpush.bf16.msra.mxu0 %v7041_v0  ;;  %v7833_v18 = vld [vmem:[#allocation5 + $0xff4] sm:$0xf0]  ;;  %v6977_v0 = vor.u32 %v7777_v9, %v6976_v20  ;;  %v6961_v53 = vor.u32 %v7773_v32, %v6960_v19  ;;  %v7711_v56 = vld [vmem:[#allocation5 + $0xbc] sm:$0xf] }
 0x2eb   :  { %4653 = vmatpush.bf16.msra.mxu3 %v6949_v12  ;;  %v7184_v21 = vld [vmem:[#allocation5 + $0xf38] sm:$0xf]  ;;  %v7795_v12 = vld [vmem:[#allocation5 + $0xb3c] sm:$0xf] }
 0x2ec   :  { %4605 = vmatmul.bf16.vlgmr.msrb.gmra.mxu3 %v8016_v33  ;;  %4640 = vmatpush.bf16.msra.mxu2 %v6805_v51  ;;  %v7829_v30 = vld [vmem:[#allocation5 + $0xf74] sm:$0xf0]  ;;  %v6869_v51 = vor.u32 %v7747_v43, %v6866_v46  ;;  %v7743_v55 = vld [vmem:[#allocation5 + $0x4bc] sm:$0xf] }
 0x2ed   :  { %v7168_v57 = vld [vmem:[#allocation5 + $0xeb8] sm:$0xf]  ;;  %v7791_v28 = vld [vmem:[#allocation5 + $0xabc] sm:$0xf] }
 0x2ee   :  { %4572 = vmatpush.bf16.msrb.mxu1 %v7149_v54  ;;  %4614 = vmatpush.bf16.msra.mxu0 %v7025_v34  ;;  %v7201_v54 = vor.u32 %v7833_v18, %v7200_v5  ;;  %v7715_v34 = vld [vmem:[#allocation5 + $0x13c] sm:$0xf]  ;;  %v7825_v44 = vld [vmem:[#allocation5 + $0xef4] sm:$0xf0] }
 0x2ef   :  { %4654 = vmatpush.bf16.msra.mxu3 %v6933_v47  ;;  %v6741_v40 = vor.u32 %v7715_v34, %v6738_v42  ;;  %v7185_v47 = vor.u32 %v7829_v30, %v7184_v21  ;;  %v7042_v59 = vld [vmem:[#allocation5 + $0xaf8] sm:$0xf0]  ;;  %v7152_v31 = vld [vmem:[#allocation5 + $0xe38] sm:$0xf] }
 0x2f0   :  { %4641 = vmatpush.bf16.msra.mxu2 %v6789_v6  ;;  %v6850_v3 = vld [vmem:[#allocation5 + $0x4f8] sm:$0xf0]  ;;  %v7821_v58 = vld [vmem:[#allocation5 + $0xe74] sm:$0xf0] }
 0x2f1   :  { %4521 = vmatmul.bf16.vlgmr.msra.gmra.mxu1 %v8010_v15  ;;  %v6853_v6 = vor.u32 %v7743_v55, %v6850_v3  ;;  %v7707_v24 = vld [vmem:[#allocation5 + $0x3c] sm:$0xf]  ;;  %v7153_v13 = vor.u32 %v7821_v58, %v7152_v31  ;;  %v7136_v16 = vld [vmem:[#allocation5 + $0xdb8] sm:$0xf] }
 0x2f2   :  { %4573 = vmatpush.bf16.msrb.mxu1 %v7133_v41  ;;  %4615 = vmatpush.bf16.msra.mxu0 %v7009_v14  ;;  %v7061_v41 = vor.u32 %v7795_v12, %v7058_v50  ;;  %v6722_v14 = vld [vmem:[#allocation5 + $0xf8] sm:$0xf0]  ;;  %v7813_v32 = vld [vmem:[#allocation5 + $0xd74] sm:$0xf0] }
 0x2f3   :  { %4655 = vmatpush.bf16.msra.mxu3 %v6917_v61  ;;  %v6725_v60 = vor.u32 %v7711_v56, %v6722_v14  ;;  %v7169_v61 = vor.u32 %v7825_v44, %v7168_v57  ;;  %v7739_v20 = vld [vmem:[#allocation5 + $0x43c] sm:$0xf]  ;;  %v7104_v7 = vld [vmem:[#allocation5 + $0xcb8] sm:$0xf] }
 0x2f4   :  { %4642 = vmatpush.bf16.msra.mxu2 %v6773_v10  ;;  %v7787_v9 = vld [vmem:[#allocation5 + $0xa3c] sm:$0xf]  ;;  %v7088_v21 = vld [vmem:[#allocation5 + $0xc38] sm:$0xf] }
 0x2f5   :  { %v7026_v37 = vld [vmem:[#allocation5 + $0xa78] sm:$0xf0] }
 0x2f6   :  { %4574 = vmatpush.bf16.msrb.mxu1 %v7117_v38  ;;  %4616 = vmatpush.bf16.msra.mxu0 %v6993_v1  ;;  %v7045_v38 = vor.u32 %v7791_v28, %v7042_v59  ;;  %v6706_v1 = vld [vmem:[#allocation5 + $0x78] sm:$0xf0]  ;;  %v7029_v17 = vor.u32 %v7787_v9, %v7026_v37 }
 0x2f7   :  { %4656 = vmatpush.bf16.msra.mxu3 %v6901_v62  ;;  %v6709_v11 = vor.u32 %v7707_v24, %v6706_v1  ;;  %v6834_v63 = vld [vmem:[#allocation5 + $0x478] sm:$0xf0]  ;;  %v7817_v62 = vld [vmem:[#allocation5 + $0xdf4] sm:$0xf0] }
 0x2f8   :  { %4643 = vmatpush.bf16.msra.mxu2 %v6757_v49  ;;  %v6837_v10 = vor.u32 %v7739_v20, %v6834_v63  ;;  %v7010_v5 = vld [vmem:[#allocation5 + $0x9f8] sm:$0xf0]  ;;  %v7137_v18 = vor.u32 %v7817_v62, %v7136_v16  ;;  %v7809_v49 = vld [vmem:[#allocation5 + $0xcf4] sm:$0xf0] }
 0x2f9   :  { %v7779_v35 = vld [vmem:[#allocation5 + $0x93c] sm:$0xf] }
 0x2fa   :  { %4575 = vmatpush.bf16.msrb.mxu1 %v7101_v48  ;;  %4617 = vmatpush.bf16.msra.mxu0 %v6977_v0  ;;  %v7783_v48 = vld [vmem:[#allocation5 + $0x9bc] sm:$0xf]  ;;  %v7120_v0 = vld [vmem:[#allocation5 + $0xd38] sm:$0xf] }
 0x2fb   :  { %4657 = vmatpush.bf16.msra.mxu3 %v6885_v27  ;;  %v7013_v19 = vor.u32 %v7783_v48, %v7010_v5  ;;  %v6994_v52 = vld [vmem:[#allocation5 + $0x978] sm:$0xf0]  ;;  %v7121_v4 = vor.u32 %v7813_v32, %v7120_v0 }
 0x2fc   :  { %4644 = vmatpush.bf16.msra.mxu2 %v6741_v40  ;;  %v6997_v45 = vor.u32 %v7779_v35, %v6994_v52  ;;  %v7775_v25 = vld [vmem:[#allocation5 + $0x8bc] sm:$0xf] }
 0x2fd   :  { %v6978_v27 = vld [vmem:[#allocation5 + $0x8f8] sm:$0xf0] }
 0x2fe   :  { %4576 = vmatpush.bf16.msrb.mxu1 %v7085_v29  ;;  %4618 = vmatpush.bf16.msra.mxu0 %v6961_v53  ;;  %v7105_v29 = vor.u32 %v7809_v49, %v7104_v7  ;;  %v6981_v30 = vor.u32 %v7775_v25, %v6978_v27  ;;  %v7805_v53 = vld [vmem:[#allocation5 + $0xc74] sm:$0xf0]  ;;  %v7831_v34 = vld [vmem:[#allocation5 + $0xfbc] sm:$0xf] }
 0x2ff   :  { %4658 = vmatpush.bf16.msra.mxu3 %v6869_v51  ;;  %v7827_v12 = vld [vmem:[#allocation5 + $0xf3c] sm:$0xf] }
 0x300   :  { %4645 = vmatpush.bf16.msra.mxu2 %v6725_v60  ;;  %v7186_v50 = vld [vmem:[#allocation5 + $0xf78] sm:$0xf0] }
 0x301   :  { %4577 = vmatmul.bf16.vlgmr.msrb.gmra.mxu1 %v8010_v15  ;;  %4619 = vmatmul.bf16.vlgmr.msra.gmra.mxu0 %v8008_v8  ;;  %v7189_v40 = vor.u32 %v7827_v12, %v7186_v50  ;;  %v7823_v46 = vld [vmem:[#allocation5 + $0xebc] sm:$0xf] }
 0x302   :  { %4625 = vmatpush.bf16.msra.mxu1 %v7201_v54  ;;  %4667 = vmatpush.bf16.msrb.mxu0 %v7077_v2  ;;  %v7771_v54 = vld [vmem:[#allocation5 + $0x83c] sm:$0xf] }
 0x303   :  { %4659 = vmatpush.bf16.msra.mxu3 %v6853_v6  ;;  %v6962_v2 = vld [vmem:[#allocation5 + $0x878] sm:$0xf0] }
 0x304   :  { %4646 = vmatpush.bf16.msra.mxu2 %v6709_v11  ;;  %v6965_v42 = vor.u32 %v7771_v54, %v6962_v2  ;;  %v7170_v51 = vld [vmem:[#allocation5 + $0xef8] sm:$0xf0] }
 0x305   :  { %v7173_v57 = vor.u32 %v7823_v46, %v7170_v51  ;;  %v7819_v44 = vld [vmem:[#allocation5 + $0xe3c] sm:$0xf]  ;;  %v7834_v51 = vld [vmem:[%s8541_s2 + $0x180] sm:$0xff] }
 0x306   :  { %4626 = vmatpush.bf16.msra.mxu1 %v7185_v47  ;;  %4668 = vmatpush.bf16.msrb.mxu0 %v7061_v41  ;;  %v7154_v47 = vld [vmem:[#allocation5 + $0xe78] sm:$0xf0] }
 0x307   :  { %4660 = vmatpush.bf16.msra.mxu3 %v6837_v10  ;;  %4647 = vmatmul.bf16.vlgmr.msra.gmra.mxu2 %v8014_v26  ;;  %v7202_v26 = vld [vmem:[#allocation5 + $0xff8] sm:$0xf0]  ;;  %v7157_v41 = vor.u32 %v7819_v44, %v7154_v47 }
 0x308   :  { %v7205_v43 = vor.u32 %v7831_v34, %v7202_v26  ;;  %v7815_v56 = vld [vmem:[#allocation5 + $0xdbc] sm:$0xf]  ;;  %v7835_v26 = vld [vmem:[%s8541_s2 + $0x188] sm:$0xff] }
 0x309   :  { %v7138_v14 = vld [vmem:[#allocation5 + $0xdf8] sm:$0xf0] }
 0x30a   :  { %4627 = vmatpush.bf16.msra.mxu1 %v7169_v61  ;;  %4669 = vmatpush.bf16.msrb.mxu0 %v7045_v38  ;;  %v7141_v55 = vor.u32 %v7815_v56, %v7138_v14  ;;  %v7811_v28 = vld [vmem:[#allocation5 + $0xd3c] sm:$0xf]  ;;  %v2473_v38 = vadd.f32 %v8298_v36, %v8300_v39 }
 0x30b   :  { %4661 = vmatmul.bf16.vlgmr.msra.gmra.mxu3 %v8016_v33  ;;  %v7089_v33 = vor.u32 %v7805_v53, %v7088_v21  ;;  %v7122_v59 = vld [vmem:[#allocation5 + $0xd78] sm:$0xf0] }
 0x30c   :  { %v7125_v60 = vor.u32 %v7811_v28, %v7122_v59  ;;  %v7807_v3 = vld [vmem:[#allocation5 + $0xcbc] sm:$0xf]  ;;  %v2487_v20 = vadd.f32 %v8302_v23, %v2473_v38  ;;  %v7848_v28 = vld [vmem:[%s8541_s2 + $0x1f0] sm:$0xff] }
 0x30d   :  { %v7106_v6 = vld [vmem:[#allocation5 + $0xcf8] sm:$0xf0] }
 0x30e   :  { %4628 = vmatpush.bf16.msra.mxu1 %v7153_v13  ;;  %4670 = vmatpush.bf16.msrb.mxu0 %v7029_v17  ;;  %v7109_v31 = vor.u32 %v7807_v3, %v7106_v6  ;;  %v7803_v58 = vld [vmem:[#allocation5 + $0xc3c] sm:$0xf]  ;;  %v7847_v6 = vld [vmem:[%s8541_s2 + $0x1e8] sm:$0xff] }
 0x30f   :  { %v7837_v49 = vld [vmem:[%s8541_s2 + $0x198] sm:$0xff] }
 0x310   :  { %v7849_v44 = vld [vmem:[%s8541_s2 + $0x1f8] sm:$0xff] }
 0x311   :  { %4899 = vmatpush.bf16.msrb.mxu3 %v7849_v44 }
 0x312   :  { %4629 = vmatpush.bf16.msra.mxu1 %v7137_v18  ;;  %4671 = vmatpush.bf16.msrb.mxu0 %v7013_v19  ;;  %v7841_v19 = vld [vmem:[%s8541_s2 + $0x1b8] sm:$0xff] }
 0x313   :  { %4885 = vmatpush.bf16.msrb.mxu2 %v7841_v19 }
 0x315   :  { %4900 = vmatpush.bf16.msrb.mxu3 %v7848_v28 }
 0x316   :  { %4630 = vmatpush.bf16.msra.mxu1 %v7121_v4  ;;  %4672 = vmatpush.bf16.msrb.mxu0 %v6997_v45  ;;  %v7839_v4 = vld [vmem:[%s8541_s2 + $0x1a8] sm:$0xff]  ;;  %v7838_v45 = vld [vmem:[%s8541_s2 + $0x1a0] sm:$0xff] }
 0x319   :  { %4901 = vmatpush.bf16.msrb.mxu3 %v7847_v6 }
 0x31a   :  { %4631 = vmatpush.bf16.msra.mxu1 %v7105_v29  ;;  %4673 = vmatpush.bf16.msrb.mxu0 %v6981_v30  ;;  %v7836_v30 = vld [vmem:[%s8541_s2 + $0x190] sm:$0xff] }
 0x31e   :  { %4632 = vmatpush.bf16.msra.mxu1 %v7089_v33  ;;  %4674 = vmatpush.bf16.msrb.mxu0 %v6965_v42 }
 0x321   :  { %4633 = vmatmul.bf16.vlgmr.msra.gmra.mxu1 %v8010_v15  ;;  %4675 = vmatmul.bf16.vlgmr.msrb.gmra.mxu0 %v8008_v8  ;;  %v7090_v8 = vld [vmem:[#allocation5 + $0xc78] sm:$0xf0] }
 0x322   :  { %4681 = vmatpush.bf16.msrb.mxu1 %v7205_v43  ;;  %v7093_v61 = vor.u32 %v7803_v58, %v7090_v8  ;;  %v7846_v8 = vld [vmem:[%s8541_s2 + $0x1e0] sm:$0xff] }
 0x323   :  { %4902 = vmatpush.bf16.msrb.mxu3 %v7846_v8 }
 0x326   :  { %4682 = vmatpush.bf16.msrb.mxu1 %v7189_v40 }
 0x328   :  { %v4480_v16 = vpop.f32.mrf.mxu2 }
 0x32a   :  { %4683 = vmatpush.bf16.msrb.mxu1 %v7173_v57 }
 0x32c   :  { %v4494_v17 = vpop.f32.mrf.mxu3 }
 0x32d   :  { %v4495_v21 = vadd.f32 %v4494_v17, %v4480_v16  ;;  %v7844_v17 = vld [vmem:[%s8541_s2 + $0x1d0] sm:$0xff] }
 0x32e   :  { %4684 = vmatpush.bf16.msrb.mxu1 %v7157_v41 }
 0x332   :  { %4685 = vmatpush.bf16.msrb.mxu1 %v7141_v55 }
 0x334   :  { %v4496_v48 = vpop.f32.mrf.mxu3 }
 0x336   :  { %4686 = vmatpush.bf16.msrb.mxu1 %v7125_v60 }
 0x33a   :  { %4687 = vmatpush.bf16.msrb.mxu1 %v7109_v31 }
 0x33e   :  { %4688 = vmatpush.bf16.msrb.mxu1 %v7093_v61  ;;  %v3682_v24 = vpop.f32.mrf.mxu0 }
 0x341   :  { %4689 = vmatmul.bf16.vlgmr.msrb.gmra.mxu1 %v8010_v15  ;;  %v4482_v15 = vpop.f32.mrf.mxu2 }
 0x342   :  { %v4497_v12 = vadd.f32 %v4496_v48, %v4482_v15 }
 0x346   :  { %v3684_v11 = vpop.f32.mrf.mxu0 }
 0x34b   :  { %v8453_v39 = vpop.f32.mrf.mxu2 }
 0x34c   :  { %v8455_v18 = vpop.f32.mrf.mxu3 }
 0x34e   :  { %v4508_v62 = vpop.f32.mrf.mxu0 }
 0x34f   :  { %v4509_v2 = vadd.f32 %v4508_v62, %v4495_v21 }
 0x353   :  { %v8465_v32 = vpop.f32.mrf.mxu2 }
 0x354   :  { %v8467_v35 = vpop.f32.mrf.mxu3 }
 0x356   :  { %v4510_v36 = vpop.f32.mrf.mxu0 }
 0x357   :  { %v4511_v41 = vadd.f32 %v4510_v36, %v4497_v12 }
 0x35e   :  { %v3696_v1 = vpop.f32.mrf.mxu1  ;;  %v8457_v0 = vpop.f32.mrf.mxu0 }
 0x35f   :  { %v3697_v9 = vadd.f32 %v3696_v1, %v3682_v24 }
 0x361   :  { %v8448_v37 = vadd.f32 %v3697_v9, %v2487_v20  ;;  %v7845_v20 = vld [vmem:[%s8541_s2 + $0x1d8] sm:$0xff] }
 0x362   :  { %4903 = vmatpush.bf16.msrb.mxu3 %v7845_v20 }
 0x366   :  { %v3698_v63 = vpop.f32.mrf.mxu1  ;;  %v8474_v7 = vpop.f32.mrf.mxu0  ;;  %4904 = vmatpush.bf16.msrb.mxu3 %v7844_v17 }
 0x367   :  { %v3699_v10 = vadd.f32 %v3698_v63, %v3684_v11  ;;  %v4551_v63 = vadd.f32 %v8455_v18, %v8453_v39  ;;  %v7843_v39 = vld [vmem:[%s8541_s2 + $0x1c8] sm:$0xff] }
 0x369   :  { %v8451_v13 = vadd.f32 %v3699_v10, %v8304_v22  ;;  %v7840_v22 = vld [vmem:[%s8541_s2 + $0x1b0] sm:$0xff] }
 0x36a   :  { %4886 = vmatpush.bf16.msrb.mxu2 %v7840_v22  ;;  %v4592_v25 = vpop.f32.mrf.mxu2  ;;  %4905 = vmatpush.bf16.msrb.mxu3 %v7843_v39 }
 0x36e   :  { %v4522_v5 = vpop.f32.mrf.mxu1  ;;  %4887 = vmatpush.bf16.msrb.mxu2 %v7839_v4 }
 0x36f   :  { %v4606_v27 = vpop.f32.mrf.mxu3  ;;  %v4523_v43 = vadd.f32 %v4522_v5, %v4509_v2  ;;  %v4565_v5 = vadd.f32 %v8457_v0, %v4551_v63  ;;  %v7842_v0 = vld [vmem:[%s8541_s2 + $0x1c0] sm:$0xff]  ;;  %s7979_s2 = smov [#allocation7]  }
 0x370   :  { %v4607_v54 = vadd.f32 %v4606_v27, %v4592_v25  ;;  %4906 = vmatpush.bf16.msrb.mxu3 %v7842_v0  ;;  %s4934_s9 = sshll.u32 %s7979_s2, 4  ;;  %s4935_s9 = int_to_ptr.vmem [resolvable:$true] %s4934_s9 }
 0x371   :  { %v4695_v47 = vmul.f32 %v4523_v43, %v4523_v43 }
 0x372   :  { %4888 = vmatpush.bf16.msrb.mxu2 %v7838_v45  ;;  %v4594_v33 = vpop.f32.mrf.mxu2  ;;  %v4553_v45 = vadd.f32 %v8467_v35, %v8465_v32 }
 0x376   :  { %v4524_v23 = vpop.f32.mrf.mxu1  ;;  %4889 = vmatpush.bf16.msrb.mxu2 %v7837_v49 }
 0x377   :  { %v4608_v42 = vpop.f32.mrf.mxu3  ;;  %v4525_v59 = vadd.f32 %v4524_v23, %v4511_v41 }
 0x378   :  { %v4609_v46 = vadd.f32 %v4608_v42, %v4594_v33 }
 0x379   :  { %v4697_v31 = vmul.f32 %v4525_v59, %v4525_v59 }
 0x37a   :  { %4890 = vmatpush.bf16.msrb.mxu2 %v7836_v30 }
 0x37e   :  { %v8469_v52 = vpop.f32.mrf.mxu1  ;;  %v4620_v53 = vpop.f32.mrf.mxu0  ;;  %4891 = vmatpush.bf16.msrb.mxu2 %v7835_v26 }
 0x37f   :  { %v4621_v34 = vadd.f32 %v4620_v53, %v4607_v54  ;;  %v4579_v4 = vadd.f32 %v8469_v52, %v4565_v5 }
 0x381   :  { %v4696_v2 = vmul.f32 %v4579_v4, %v4579_v4 }
 0x382   :  { %4892 = vmatpush.bf16.msrb.mxu2 %v7834_v51 }
 0x386   :  { %v8482_v29 = vpop.f32.mrf.mxu1  ;;  %v4622_v57 = vpop.f32.mrf.mxu0 }
 0x387   :  { %v4623_v55 = vadd.f32 %v4622_v57, %v4609_v46 }
 0x38a   :  { %v4648_v9 = vpop.f32.mrf.mxu2 }
 0x38e   :  { %v4662_v10 = vpop.f32.mrf.mxu3 }
 0x38f   :  { %v4663_v15 = vadd.f32 %v4662_v10, %v4648_v9 }
 0x392   :  { %v4650_v49 = vpop.f32.mrf.mxu2 }
 0x396   :  { %v4664_v21 = vpop.f32.mrf.mxu3 }
 0x397   :  { %v4665_v52 = vadd.f32 %v4664_v21, %v4650_v49 }
 0x39e   :  { %v4634_v50 = vpop.f32.mrf.mxu1  ;;  %v4676_v36 = vpop.f32.mrf.mxu0 }
 0x39f   :  { %v4635_v40 = vadd.f32 %v4634_v50, %v4621_v34  ;;  %v4677_v18 = vadd.f32 %v4676_v36, %v4663_v15  ;;  %v4567_v34 = vadd.f32 %v8474_v7, %v4553_v45 }
 0x3a1   :  { %v4699_v56 = vmul.f32 %v4635_v40, %v4635_v40  ;;  %v4581_v46 = vadd.f32 %v8482_v29, %v4567_v34 }
 0x3a3   :  { %v8496_v14 = vadd.f32 %v4699_v56, %v4695_v47  ;;  %v4698_v41 = vmul.f32 %v4581_v46, %v4581_v46 }
 0x3a5   :  { %7883 = vrsqrt.f32 %v8496_v14  ;;  %vm4714_vm8 = vcmp.eq.f32.partialorder %v8496_v14, inf  ;;  %v4717_v42 = vand.u32 2147483648, %v8496_v14  ;;  %vm4716_vm10 = vcmp.eq.f32.partialorder %v8496_v14, 0.0 }
 0x3a6   :  { %v4636_v60 = vpop.f32.mrf.mxu1  ;;  %v4678_v33 = vpop.f32.mrf.mxu0 }
 0x3a7   :  { %v4637_v3 = vadd.f32 %v4636_v60, %v4623_v55  ;;  %v4679_v51 = vadd.f32 %v4678_v33, %v4665_v52 }
 0x3a9   :  { %v4701_v58 = vmul.f32 %v4637_v3, %v4637_v3 }
 0x3ab   :  { %v7884_v61 = vpop.eup %7883  ;;  %v4705_v38 = vadd.f32 %v4701_v58, %v4697_v31 }
 0x3ac   :  { %v4708_v24 = vmul.f32 %v7884_v61, %v8496_v14 }
 0x3ad   :  { %7885 = vrsqrt.f32 %v4705_v38  ;;  %vm4738_vm9 = vcmp.eq.f32.partialorder %v4705_v38, inf  ;;  %v4741_v43 = vand.u32 2147483648, %v4705_v38  ;;  %vm4740_vm11 = vcmp.eq.f32.partialorder %v4705_v38, 0.0 }
 0x3ae   :  { %v4709_v1 = vmul.f32 %v7884_v61, %v4708_v24 }
 0x3b0   :  { %v4710_v11 = vmul.f32 0.5, %v4709_v1 }
 0x3b2   :  { %v4711_v16 = vsub.f32 1.5, %v4710_v11 }
 0x3b3   :  { %v7886_v62 = vpop.eup %7885 }
 0x3b4   :  { %v4732_v48 = vmul.f32 %v7886_v62, %v4705_v38  ;;  %v4712_v23 = vmul.f32 %v7884_v61, %v4711_v16 }
 0x3b6   :  { %v4733_v19 = vmul.f32 %v7886_v62, %v4732_v48  ;;  %v4713_v25 = vmul.f32 %v4712_v23, %v8496_v14 }
 0x3b8   :  { %v4734_v22 = vmul.f32 0.5, %v4733_v19  ;;  %v4715_v35 = vsel %vm4714_vm8, %v8496_v14, %v4713_v25 }
 0x3b9   :  { %v4718_v40 = vsel %vm4716_vm10, %v4717_v42, %v4715_v35 }
 0x3ba   :  { %v4735_v27 = vsub.f32 1.5, %v4734_v22 }
 0x3bc   :  { %v4736_v54 = vmul.f32 %v7886_v62, %v4735_v27 }
 0x3be   :  { %v4690_v30 = vpop.f32.mrf.mxu1  ;;  %v4737_v26 = vmul.f32 %v4736_v54, %v4705_v38 }
 0x3bf   :  { %v4691_v53 = vadd.f32 %v4690_v30, %v4677_v18 }
 0x3c0   :  { %v4739_v50 = vsel %vm4738_vm9, %v4705_v38, %v4737_v26 }
 0x3c1   :  { %v4700_v32 = vmul.f32 %v4691_v53, %v4691_v53  ;;  %v4742_v7 = vsel %vm4740_vm11, %v4741_v43, %v4739_v50 }
 0x3c2   :  { %v4755_v57 = vpack.c.bf16 %v4742_v7, %v4718_v40 }
 0x3c3   :  { %v4704_v12 = vadd.f32 %v4700_v32, %v4696_v2 }
 0x3c4   :  { %4893 = vmatmul.bf16.vlgmr.msrb.gmra.mxu2 %v4755_v57 }
 0x3c5   :  { %7887 = vrsqrt.f32 %v4704_v12  ;;  %vm4726_vm12 = vcmp.eq.f32.partialorder %v4704_v12, inf  ;;  %v4729_v9 = vand.u32 2147483648, %v4704_v12  ;;  %vm4728_vm14 = vcmp.eq.f32.partialorder %v4704_v12, 0.0 }
 0x3c6   :  { %v4692_v44 = vpop.f32.mrf.mxu1 }
 0x3c7   :  { %v4693_v47 = vadd.f32 %v4692_v44, %v4679_v51 }
 0x3c9   :  { %v4702_v56 = vmul.f32 %v4693_v47, %v4693_v47 }
 0x3cb   :  { %v7888_v55 = vpop.eup %7887  ;;  %v4706_v28 = vadd.f32 %v4702_v56, %v4698_v41 }
 0x3cc   :  { %v4720_v59 = vmul.f32 %v7888_v55, %v4704_v12 }
 0x3cd   :  { %7889 = vrsqrt.f32 %v4706_v28  ;;  %vm4750_vm13 = vcmp.eq.f32.partialorder %v4706_v28, inf  ;;  %v4753_v11 = vand.u32 2147483648, %v4706_v28  ;;  %vm4752_vm15 = vcmp.eq.f32.partialorder %v4706_v28, 0.0 }
 0x3ce   :  { %v4721_v60 = vmul.f32 %v7888_v55, %v4720_v59 }
 0x3d0   :  { %v4722_v14 = vmul.f32 0.5, %v4721_v60 }
 0x3d2   :  { %v4723_v3 = vsub.f32 1.5, %v4722_v14 }
 0x3d3   :  { %v7890_v6 = vpop.eup %7889 }
 0x3d4   :  { %v4744_v31 = vmul.f32 %v7890_v6, %v4706_v28  ;;  %v4724_v58 = vmul.f32 %v7888_v55, %v4723_v3 }
 0x3d6   :  { %v4745_v8 = vmul.f32 %v7890_v6, %v4744_v31  ;;  %v4725_v61 = vmul.f32 %v4724_v58, %v4704_v12 }
 0x3d8   :  { %v4746_v29 = vmul.f32 0.5, %v4745_v8  ;;  %v4727_v1 = vsel %vm4726_vm12, %v4704_v12, %v4725_v61 }
 0x3d9   :  { %v4730_v10 = vsel %vm4728_vm14, %v4729_v9, %v4727_v1 }
 0x3da   :  { %v4747_v38 = vsub.f32 1.5, %v4746_v29 }
 0x3dc   :  { %v4748_v24 = vmul.f32 %v7890_v6, %v4747_v38 }
 0x3de   :  { %v4749_v20 = vmul.f32 %v4748_v24, %v4706_v28 }
 0x3e0   :  { %v4751_v63 = vsel %vm4750_vm13, %v4706_v28, %v4749_v20 }
 0x3e1   :  { %v4754_v16 = vsel %vm4752_vm15, %v4753_v11, %v4751_v63 }
 0x3e2   :  { %v4756_v17 = vpack.c.bf16 %v4754_v16, %v4730_v10 }
 0x3e4   :  { %4907 = vmatmul.bf16.vlgmr.msrb.gmra.mxu3 %v4756_v17 }
 0x447   :  { %v4894_v62 = vpop.f32.mrf.mxu2 }
 0x44f   :  { %v4896_v23 = vpop.f32.mrf.mxu2 }
 0x467   :  { %v4908_v15 = vpop.f32.mrf.mxu3 }
 0x468   :  { %v4909_v48 = vadd.f32 %v4908_v15, %v4894_v62 }
 0x46a   :  { %v4913_v5 = vadd.f32 %v4909_v48, %v8448_v37 }
 0x46c   :  { %v4915_v36 = vmax.f32 %v4913_v5, 1e-05 }
 0x46e   :  { %7891 = vlog2.f32 %v4915_v36 }
 0x46f   :  { %v4910_v19 = vpop.f32.mrf.mxu3 }
 0x470   :  { %v4911_v39 = vadd.f32 %v4910_v19, %v4896_v23 }
 0x472   :  { %v4914_v18 = vadd.f32 %v4911_v39, %v8451_v13 }
 0x474   :  { %v7892_v22 = vpop.eup %7891  ;;  %v4916_v4 = vmax.f32 %v4914_v18, 1e-05 }
 0x475   :  { %v4918_v45 = vmul.f32 0.6931472, %v7892_v22 }
 0x476   :  { %7893 = vlog2.f32 %v4916_v4 }
 0x477   :  { %v4921_v49 = vmul.f32 0.4342945, %v4918_v45 }
 0x479   :  { %v4923_v25 = vmul.f32 0.2, %v4921_v49 }
 0x47b   :  { %v4925_v27 = vadd.f32 1.0, %v4923_v25 }
 0x47c   :  { %v7894_v0 = vpop.eup %7893 }
 0x47d   :  { %4928 = vst.msk [vmem:[#allocation7] sm:$0xff] %vm4927_vm0, %v4925_v27  ;;  %v4920_v21 = vmul.f32 0.6931472, %v7894_v0 }
 0x47f   :  { %v4922_v30 = vmul.f32 0.4342945, %v4920_v21 }
 0x481   :  { %v4924_v37 = vmul.f32 0.2, %v4922_v30 }
 0x483   :  { %v4926_v13 = vadd.f32 1.0, %v4924_v37 }
 0x485   :  { %4929 = vst.msk [vmem:[#allocation7 + $0x8] sm:$0xff] %vm4927_vm0, %v4926_v13 }
 0x486   :  { %4942 = dma.vmem_to_hbm [thread:$0]  %s4935_s9, 256, %s4937_s12, [#allocation4], %s7980_s13, %s7980_s13, %s7981_s14  }
 0x487   :  { %7971 = dma.done.wait [#allocation4], 256  }
 0x488   :  { %7972 = vsyncadd [#allocation4], 4294967040 }
 0x489   :  { %4947 = vsyncpa [#allocation3], 1 }
 0x48a   :  { %4948 = vsyncpa [#allocation6], 1 }
 0x48b   :  { %4949 = vsyncpa [#allocation4], 1 }

</bundles_post_ra>
